<compile_context>
chip_gen: v5e
topology: v5e:2x2
jax: 0.10.0
libtpu: 0.0.40
codegen_flags: <defaults>
</compile_context>

<pallas_src>
import functools
import math

import jax
import jax.numpy as jnp
from jax.experimental import pallas as pl
from jax.experimental.pallas import tpu as pltpu


# ------------------------- helpers -------------------------

def _pick_tile(dim, target, granule):
    """Largest divisor of `dim` that is a multiple of `granule` and <= target.

    Falls back to the full dimension (always a legal Pallas block size), so we
    never emit a non-(8,128)-aligned partial block.
    """
    t = min(target, dim)
    t -= t % granule
    while t >= granule:
        if dim % t == 0:
            return t
        t -= granule
    return dim


def _mosaic_params(dimension_semantics, vmem_est_bytes):
    # Tie the scoped-VMEM request to the actual tile footprint; v7x has only
    # 64 MiB per TensorCore, so clamp to [32 MiB default, 64 MiB].
    limit = min(64 * 1024 * 1024,
                max(32 * 1024 * 1024, int(2 * vmem_est_bytes)))
    return pltpu.CompilerParams(dimension_semantics=dimension_semantics,
                                vmem_limit_bytes=limit)


# ------------------------- tiled linear (bias fused) -------------------------

def _linear_kernel(x_ref, w_ref, b_ref, o_ref, acc_ref):
    # One (tm, tn) output tile; K axis (grid dim 2) accumulated in f32 VMEM.
    @pl.when(pl.program_id(2) == 0)
    def _init():
        acc_ref[...] = jnp.zeros_like(acc_ref)

    acc_ref[...] += jnp.dot(x_ref[...], w_ref[...],
                            preferred_element_type=jnp.float32)

    @pl.when(pl.program_id(2) == pl.num_programs(2) - 1)
    def _finalize():
        o_ref[...] = (acc_ref[...] + b_ref[...].astype(jnp.float32)
                      ).astype(o_ref.dtype)


def linear(x, w, b, *, out_dtype=None, tm=256, tn=256, tk=512):
    """y = x @ w + b, with w stored as (Cin, Cout) (PyTorch weight.T).

    x/w in bf16 (MXU inputs), bias in f32, accumulation in f32.
    """
    M, K = x.shape
    K2, N = w.shape
    assert K == K2
    out_dtype = out_dtype or x.dtype

    tm = _pick_tile(M, tm, 8)
    tn = _pick_tile(N, tn, 128)
    tk = _pick_tile(K, tk, 128)
    grid = (M // tm, N // tn, K // tk)

    bpe = lambda d: jnp.dtype(d).itemsize
    vmem_est = (2 * (tm * tk * bpe(x.dtype) + tk * tn * bpe(w.dtype)
                     + tn * 4 + tm * tn * bpe(out_dtype))
                + tm * tn * 4)

    return pl.pallas_call(
        _linear_kernel,
        out_shape=jax.ShapeDtypeStruct((M, N), out_dtype),
        grid_spec=pltpu.PrefetchScalarGridSpec(
            num_scalar_prefetch=0,
            grid=grid,
            in_specs=[
                pl.BlockSpec((tm, tk), lambda i, j, k: (i, k)),
                pl.BlockSpec((tk, tn), lambda i, j, k: (k, j)),
                pl.BlockSpec((1, tn), lambda i, j, k: (0, j)),
            ],
            out_specs=pl.BlockSpec((tm, tn), lambda i, j, k: (i, j)),
            scratch_shapes=[pltpu.VMEM((tm, tn), jnp.float32)],
        ),
        compiler_params=_mosaic_params(
            ("parallel", "parallel", "arbitrary"), vmem_est),
    )(x, w, b.reshape(1, N))


# ------------------------- flash attention (heads batched) -------------------------

def _flash_attn_kernel(q_ref, k_ref, v_ref, o_ref, m_sc, l_sc, acc_sc,
                       *, num_heads, head_dim, heads_aligned):
    # Blocks: q_ref (1, tq, C), k_ref/v_ref (1, tk, C), o_ref (1, tq, C).
    # Channel layout inside C is head-major: c = h * Dh + d.  The softmax
    # scale is already folded into the q columns of w1/b1.
    ki = pl.program_id(2)
    nh, dh = num_heads, head_dim

    @pl.when(ki == 0)
    def _init():
        m_sc[...] = jnp.full(m_sc.shape, -jnp.inf, dtype=m_sc.dtype)
        l_sc[...] = jnp.zeros_like(l_sc)
        acc_sc[...] = jnp.zeros_like(acc_sc)

    if heads_aligned:
        # Dh % 128 == 0: per-head lane-aligned slices read straight off the
        # Refs (no (tq, C) materialization -> no vreg spills), one full-size
        # MXU matmul pair per head.
        for h in range(nh):
            qh = q_ref[0, :, h * dh:(h + 1) * dh]            # (tq, Dh) bf16
            kh = k_ref[0, :, h * dh:(h + 1) * dh]            # (tk, Dh) bf16
            vh = v_ref[0, :, h * dh:(h + 1) * dh]            # (tk, Dh) bf16

            # QK^T: contract the minor Dh axes directly (no explicit k.T).
            s = jax.lax.dot_general(
                qh, kh, (((1,), (1,)), ((), ())),
                preferred_element_type=jnp.float32)           # (tq, tk) f32

            m_prev = m_sc[h]                                  # (tq, 1)
            m_new = jnp.maximum(m_prev, s.max(axis=-1, keepdims=True))
            alpha = jnp.exp(m_prev - m_new)                   # (tq, 1)
            p = jnp.exp(s - m_new)                            # (tq, tk) f32

            l_sc[h] = alpha * l_sc[h] + p.sum(axis=-1, keepdims=True)
            acc_sc[h] = alpha * acc_sc[h] + jax.lax.dot_general(
                p.astype(vh.dtype), vh, (((1,), (0,)), ((), ())),
                preferred_element_type=jnp.float32)           # (tq, Dh) f32
            m_sc[h] = m_new
    else:
        # Dh not lane-aligned (e.g. Dh = 64): avoid masked sub-lane slices by
        # batching all heads through one dot_general pair (head = batch dim).
        tq = q_ref.shape[1]
        tk = k_ref.shape[1]
        q3 = q_ref[0].reshape(tq, nh, dh)
        k3 = k_ref[0].reshape(tk, nh, dh)
        v3 = v_ref[0].reshape(tk, nh, dh)

        s = jax.lax.dot_general(
            q3, k3, (((2,), (2,)), ((1,), (1,))),
            preferred_element_type=jnp.float32)               # (nh, tq, tk)

        m_prev = m_sc[...]                                    # (nh, tq, 1)
        m_new = jnp.maximum(m_prev, s.max(axis=-1, keepdims=True))
        alpha = jnp.exp(m_prev - m_new)
        p = jnp.exp(s - m_new)

        l_sc[...] = alpha * l_sc[...] + p.sum(axis=-1, keepdims=True)
        acc_sc[...] = alpha * acc_sc[...] + jax.lax.dot_general(
            p.astype(v3.dtype), v3, (((2,), (0,)), ((0,), (1,))),
            preferred_element_type=jnp.float32)               # (nh, tq, Dh)
        m_sc[...] = m_new

    @pl.when(ki == pl.num_programs(2) - 1)
    def _finalize():
        if heads_aligned:
            for h in range(nh):
                inv_l = pl.reciprocal(l_sc[h], approx=True)   # EUP, ~free
                o_ref[0, :, h * dh:(h + 1) * dh] = (
                    acc_sc[h] * inv_l).astype(o_ref.dtype)
        else:
            inv_l = pl.reciprocal(l_sc[...], approx=True)     # (nh, tq, 1)
            out = acc_sc[...] * inv_l                         # (nh, tq, Dh)
            tq = out.shape[1]
            o_ref[0] = jnp.transpose(out, (1, 0, 2)).reshape(
                tq, nh * dh).astype(o_ref.dtype)


def flash_attention(qkv, num_heads, *, tq=256, tk=256, out_dtype=None):
    """Non-causal softmax(q k^T) v over a packed qkv tensor.

    qkv: (B, L, 3C), columns laid out as [q | k | v], each head-major
    (c = h*Dh + d); the softmax scale is pre-folded into the q columns.
    q/k/v blocks are selected purely via BlockSpec index_maps (same array
    passed three times) — no HBM slicing/copies.
    Output: (B, L, C) with the same head-major channel layout (lane dense).
    """
    B, L, C3 = qkv.shape
    C = C3 // 3
    dh = C // num_heads
    out_dtype = out_dtype or qkv.dtype

    tq = _pick_tile(L, tq, 8)
    tk = _pick_tile(L, tk, 8)
    heads_aligned = (dh % 128 == 0)

    bpe = lambda d: jnp.dtype(d).itemsize
    vmem_est = (2 * ((tq + 2 * tk) * C * bpe(qkv.dtype)
                     + tq * C * bpe(out_dtype))
                + num_heads * tq * (dh + 2) * 4)

    kernel = functools.partial(_flash_attn_kernel, num_heads=num_heads,
                               head_dim=dh, heads_aligned=heads_aligned)
    return pl.pallas_call(
        kernel,
        out_shape=jax.ShapeDtypeStruct((B, L, C), out_dtype),
        grid_spec=pltpu.PrefetchScalarGridSpec(
            num_scalar_prefetch=0,
            grid=(B, L // tq, L // tk),                  # kv reduction last
            in_specs=[
                pl.BlockSpec((1, tq, C), lambda b, qi, ki: (b, qi, 0)),  # q
                pl.BlockSpec((1, tk, C), lambda b, qi, ki: (b, ki, 1)),  # k
                pl.BlockSpec((1, tk, C), lambda b, qi, ki: (b, ki, 2)),  # v
            ],
            out_specs=pl.BlockSpec((1, tq, C), lambda b, qi, ki: (b, qi, 0)),
            scratch_shapes=[
                pltpu.VMEM((num_heads, tq, 1), jnp.float32),   # running max
                pltpu.VMEM((num_heads, tq, 1), jnp.float32),   # running sum
                pltpu.VMEM((num_heads, tq, dh), jnp.float32),  # accumulator
            ],
        ),
        compiler_params=_mosaic_params(
            ("parallel", "parallel", "arbitrary"), vmem_est),
    )(qkv, qkv, qkv)


# ------------------------- parameters -------------------------

def init_params(key, C):
    """nn.Linear-style init; weights stored transposed: (Cin, Cout)."""
    k1, k2, k3, k4 = jax.random.split(key, 4)
    bound = 1.0 / math.sqrt(C)
    w1 = jax.random.uniform(k1, (C, 3 * C), jnp.float32, -bound, bound)
    b1 = jax.random.uniform(k2, (3 * C,), jnp.float32, -bound, bound)
    w2 = jax.random.uniform(k3, (C, C), jnp.float32, -bound, bound)
    b2 = jax.random.uniform(k4, (C,), jnp.float32, -bound, bound)
    return {"w1": w1, "b1": b1, "w2": w2, "b2": b2}


def prepare_params(params, num_heads):
    """One-time weight re-layout + scale folding + bf16 cast (outside jit).

    * proj1 columns j = d*(nh*3) + h*3 + kk  ->  j' = kk*C + h*dh + d so the
      kernel sees [q | k | v] blocks, head-major (folds the PyTorch
      'b L (C H K) -> K b H L C' rearrange into the weights).
    * The 1/sqrt(dh) softmax scale is folded into the q columns of w1/b1.
    * proj2 rows c = d*nh + h -> c' = h*dh + d (folds the
      'b H (h w) C -> b h w (C H)' rearrange into the weights).
    """
    C = params["w2"].shape[0]
    nh = num_heads
    dh = C // nh
    scale = 1.0 / math.sqrt(dh)

    w1 = jnp.transpose(params["w1"].reshape(C, dh, nh, 3),
                       (0, 3, 2, 1)).reshape(C, 3 * C)
    b1 = jnp.transpose(params["b1"].reshape(dh, nh, 3),
                       (2, 1, 0)).reshape(3 * C)
    col_scale = jnp.concatenate([jnp.full((C,), scale, jnp.float32),
                                 jnp.ones((2 * C,), jnp.float32)])
    w1 = w1 * col_scale[None, :]
    b1 = b1 * col_scale

    w2 = jnp.transpose(params["w2"].reshape(dh, nh, C),
                       (1, 0, 2)).reshape(C, C)
    b2 = params["b2"]

    cdt = jnp.bfloat16
    return {"w1": w1.astype(cdt), "b1": b1.astype(jnp.float32),
            "w2": w2.astype(cdt), "b2": b2.astype(jnp.float32)}


# ------------------------- module forward -------------------------

def attention_forward(x, prep, num_heads):
    # TODO(synk): attention-weight dropout (dropout_prob > 0) not implemented; eval / p=0 semantics.
    B, C, H, W = x.shape
    assert C % num_heads == 0
    L = H * W
    cdt = jnp.bfloat16

    # 'b c h w -> (b h w) c' token-major, lane-dense channels.
    x_tok = jnp.transpose(x, (0, 2, 3, 1)).reshape(B * L, C).astype(cdt)

    # proj1 (fused qkv, softmax scale pre-folded), output packed & lane-dense.
    qkv = linear(x_tok, prep["w1"], prep["b1"], out_dtype=cdt)   # (B*L, 3C)
    qkv = qkv.reshape(B, L, 3 * C)                               # free reshape

    # flash attention over all heads, output (B, L, C) head-major channels.
    o = flash_attention(qkv, num_heads, out_dtype=cdt)
    o = o.reshape(B * L, C)                                      # free reshape

    # proj2
    y = linear(o, prep["w2"], prep["b2"], out_dtype=jnp.float32)  # (B*L, C)

    # '(b h w) c -> b c h w'
    return jnp.transpose(y.reshape(B, H, W, C), (0, 3, 1, 2))


# ------------------------- reference (pure JAX, f32, PyTorch layout) -------------------------

def attention_ref(x, params, num_heads):
    B, C, H, W = x.shape
    L = H * W
    dh = C // num_heads
    x_tok = jnp.transpose(x, (0, 2, 3, 1)).reshape(B, L, C)
    qkv = x_tok @ params["w1"] + params["b1"]
    # 'b L (C H K) -> K b H L C'   (head_dim slowest, head, qkv fastest)
    qkv = qkv.reshape(B, L, dh, num_heads, 3)
    qkv = jnp.transpose(qkv, (4, 0, 3, 1, 2))
    q, k, v = qkv[0], qkv[1], qkv[2]
    s = jnp.einsum("bhld,bhmd->bhlm", q, k) / math.sqrt(dh)
    p = jax.nn.softmax(s, axis=-1)
    o = jnp.einsum("bhlm,bhmd->bhld", p, v)
    # 'b H (h w) C -> b h w (C H)'  (head_dim slowest, head fastest)
    o = jnp.transpose(o, (0, 2, 3, 1)).reshape(B, L, dh * num_heads)
    y = o @ params["w2"] + params["b2"]
    return jnp.transpose(y.reshape(B, H, W, C), (0, 3, 1, 2))


# ------------------------- main -------------------------

if __name__ == "__main__":
    # TPU-friendly shapes: C=256 channels, 2 heads (head_dim=128),
    # 16x16 spatial -> L=256 tokens, batch 2.
    B, C, H, W = 2, 256, 16, 16
    num_heads = 2
    dropout_prob = 0.0   # dropout disabled (eval semantics)

    key = jax.random.PRNGKey(0)
    kx, kp = jax.random.split(key)
    x = jax.random.normal(kx, (B, C, H, W), jnp.float32)
    params = init_params(kp, C)

    # One-time weight re-layout / scale fold / bf16 cast (outside the jit).
    prep = prepare_params(params, num_heads)

    fwd = jax.jit(functools.partial(attention_forward, num_heads=num_heads))
    out = jax.block_until_ready(fwd(x, prep))

    ref = attention_ref(x, params, num_heads)
    assert out.shape == (B, C, H, W)
    assert out.dtype == jnp.float32
    max_err = float(jnp.max(jnp.abs(out - ref)))
    assert jnp.allclose(out, ref, atol=2e-2, rtol=2e-2), f"max err {max_err}"

    print("KERNEL_OK")
</pallas_src>

<mosaic_0001>
module attributes {stable_mosaic.version = 11 : i64} {
  func.func @_linear_kernel(%arg0: i32, %arg1: i32, %arg2: i32, %arg3: memref<256x256xbf16, #tpu.memory_space<vmem>>, %arg4: memref<256x256xbf16, #tpu.memory_space<vmem>>, %arg5: memref<1x256xf32, #tpu.memory_space<vmem>>, %arg6: memref<256x256xbf16, #tpu.memory_space<vmem>>, %arg7: memref<256x256xf32, #tpu.memory_space<vmem>>) attributes {dimension_semantics = [#tpu.dimension_semantics<parallel>, #tpu.dimension_semantics<parallel>, #tpu.dimension_semantics<arbitrary>], iteration_bounds = array<i64: 2, 3, 1>, scalar_prefetch = 0 : i64, scratch_operands = 1 : i64, tpu.core_type = #tpu.core_type<tc>, window_params = [{transform_indices = @transform_0, window_bounds = array<i64: 256, 256>}, {transform_indices = @transform_1, window_bounds = array<i64: 256, 256>}, {transform_indices = @transform_2, window_bounds = array<i64: 1, 256>}, {transform_indices = @transform_3, window_bounds = array<i64: 256, 256>}]} {
    %c0_i32 = arith.constant 0 : i32
    %0 = arith.cmpi eq, %arg2, %c0_i32 : i32
    %1 = arith.extui %0 : i1 to i32
    %c0_i32_0 = arith.constant 0 : i32
    %2 = arith.cmpi ne, %1, %c0_i32_0 : i32
    scf.if %2 {
      %cst_10 = arith.constant 0.000000e+00 : f32
      %12 = vector.broadcast %cst_10 : f32 to vector<256x256xf32>
      %c0_11 = arith.constant 0 : index
      %c0_12 = arith.constant 0 : index
      %13 = vector.load %arg7[%c0_11, %c0_12] : memref<256x256xf32, #tpu.memory_space<vmem>>, vector<256x256xf32>
      tpu.vector_store %arg7[%c0_11, %c0_12], %12 {strides = array<i32>} : memref<256x256xf32, #tpu.memory_space<vmem>>, vector<256x256xf32>,
    } else {
    }
    %c0 = arith.constant 0 : index
    %c0_1 = arith.constant 0 : index
    %3 = vector.load %arg7[%c0, %c0_1] : memref<256x256xf32, #tpu.memory_space<vmem>>, vector<256x256xf32>
    %c0_2 = arith.constant 0 : index
    %c0_3 = arith.constant 0 : index
    %4 = vector.load %arg3[%c0_2, %c0_3] : memref<256x256xbf16, #tpu.memory_space<vmem>>, vector<256x256xbf16>
    %c0_4 = arith.constant 0 : index
    %c0_5 = arith.constant 0 : index
    %5 = vector.load %arg4[%c0_4, %c0_5] : memref<256x256xbf16, #tpu.memory_space<vmem>>, vector<256x256xbf16>
    %cst = arith.constant dense<0.000000e+00> : vector<256x256xf32>
    %6 = tpu.matmul %4, %5, %cst {dimension_numbers = #tpu.dot_dimension_numbers<[1], [0], [0], [1], [0, 0, 1, 1], [], []>} : vector<256x256xbf16>, vector<256x256xbf16>, vector<256x256xf32> -> vector<256x256xf32>
    %7 = arith.addf %3, %6 : vector<256x256xf32>
    %c0_6 = arith.constant 0 : index
    %c0_7 = arith.constant 0 : index
    %8 = vector.load %arg7[%c0_6, %c0_7] : memref<256x256xf32, #tpu.memory_space<vmem>>, vector<256x256xf32>
    tpu.vector_store %arg7[%c0_6, %c0_7], %7 {strides = array<i32>} : memref<256x256xf32, #tpu.memory_space<vmem>>, vector<256x256xf32>,
    %c0_i32_8 = arith.constant 0 : i32
    %9 = arith.cmpi eq, %arg2, %c0_i32_8 : i32
    %10 = arith.extui %9 : i1 to i32
    %c0_i32_9 = arith.constant 0 : i32
    %11 = arith.cmpi ne, %10, %c0_i32_9 : i32
    scf.if %11 {
      %c0_10 = arith.constant 0 : index
      %c0_11 = arith.constant 0 : index
      %12 = vector.load %arg7[%c0_10, %c0_11] : memref<256x256xf32, #tpu.memory_space<vmem>>, vector<256x256xf32>
      %c0_12 = arith.constant 0 : index
      %c0_13 = arith.constant 0 : index
      %13 = vector.load %arg5[%c0_12, %c0_13] : memref<1x256xf32, #tpu.memory_space<vmem>>, vector<1x256xf32>
      %14 = vector.broadcast %13 : vector<1x256xf32> to vector<256x256xf32>
      %15 = arith.addf %12, %14 : vector<256x256xf32>
      %16 = arith.truncf %15 : vector<256x256xf32> to vector<256x256xbf16>
      %c0_14 = arith.constant 0 : index
      %c0_15 = arith.constant 0 : index
      %17 = vector.load %arg6[%c0_14, %c0_15] : memref<256x256xbf16, #tpu.memory_space<vmem>>, vector<256x256xbf16>
      tpu.vector_store %arg6[%c0_14, %c0_15], %16 {strides = array<i32>} : memref<256x256xbf16, #tpu.memory_space<vmem>>, vector<256x256xbf16>,
    } else {
    }
    return
  }
  func.func @transform_0(%arg0: i32, %arg1: i32, %arg2: i32) -> (i32, i32) {
    %c0_i32 = arith.constant 0 : i32
    return %arg0, %arg2 : i32, i32
  }
  func.func @transform_1(%arg0: i32, %arg1: i32, %arg2: i32) -> (i32, i32) {
    %c0_i32 = arith.constant 0 : i32
    return %arg2, %arg1 : i32, i32
  }
  func.func @transform_2(%arg0: i32, %arg1: i32, %arg2: i32) -> (i32, i32) {
    %c0_i32 = arith.constant 0 : i32
    %c0_i32_0 = arith.constant 0 : i32
    return %c0_i32, %arg1 : i32, i32
  }
  func.func @transform_3(%arg0: i32, %arg1: i32, %arg2: i32) -> (i32, i32) {
    %c0_i32 = arith.constant 0 : i32
    return %arg0, %arg1 : i32, i32
  }
}

module attributes {stable_mosaic.version = 11 : i64} {
  func.func @_flash_attn_kernel(%arg0: i32, %arg1: i32, %arg2: i32, %arg3: memref<1x256x256xbf16, #tpu.memory_space<vmem>>, %arg4: memref<1x256x256xbf16, #tpu.memory_space<vmem>>, %arg5: memref<1x256x256xbf16, #tpu.memory_space<vmem>>, %arg6: memref<1x256x256xbf16, #tpu.memory_space<vmem>>, %arg7: memref<2x256x1xf32, #tpu.memory_space<vmem>>, %arg8: memref<2x256x1xf32, #tpu.memory_space<vmem>>, %arg9: memref<2x256x128xf32, #tpu.memory_space<vmem>>) attributes {dimension_semantics = [#tpu.dimension_semantics<parallel>, #tpu.dimension_semantics<parallel>, #tpu.dimension_semantics<arbitrary>], iteration_bounds = array<i64: 2, 1, 1>, scalar_prefetch = 0 : i64, scratch_operands = 3 : i64, tpu.core_type = #tpu.core_type<tc>, window_params = [{transform_indices = @transform_0, window_bounds = array<i64: 1, 256, 256>}, {transform_indices = @transform_1, window_bounds = array<i64: 1, 256, 256>}, {transform_indices = @transform_2, window_bounds = array<i64: 1, 256, 256>}, {transform_indices = @transform_3, window_bounds = array<i64: 1, 256, 256>}]} {
    %c0_i32 = arith.constant 0 : i32
    %0 = arith.cmpi eq, %arg2, %c0_i32 : i32
    %1 = arith.extui %0 : i1 to i32
    %c0_i32_0 = arith.constant 0 : i32
    %2 = arith.cmpi ne, %1, %c0_i32_0 : i32
    scf.if %2 {
      %cst_61 = arith.constant 0xFF800000 : f32
      %84 = vector.broadcast %cst_61 : f32 to vector<2x256x1xf32>
      %c0_62 = arith.constant 0 : index
      %c0_63 = arith.constant 0 : index
      %c0_64 = arith.constant 0 : index
      %85 = vector.load %arg7[%c0_62, %c0_63, %c0_64] : memref<2x256x1xf32, #tpu.memory_space<vmem>>, vector<2x256x1xf32>
      tpu.vector_store %arg7[%c0_62, %c0_63, %c0_64], %84 {strides = array<i32>} : memref<2x256x1xf32, #tpu.memory_space<vmem>>, vector<2x256x1xf32>,
      %cst_65 = arith.constant 0.000000e+00 : f32
      %86 = vector.broadcast %cst_65 : f32 to vector<2x256x1xf32>
      %c0_66 = arith.constant 0 : index
      %c0_67 = arith.constant 0 : index
      %c0_68 = arith.constant 0 : index
      %87 = vector.load %arg8[%c0_66, %c0_67, %c0_68] : memref<2x256x1xf32, #tpu.memory_space<vmem>>, vector<2x256x1xf32>
      tpu.vector_store %arg8[%c0_66, %c0_67, %c0_68], %86 {strides = array<i32>} : memref<2x256x1xf32, #tpu.memory_space<vmem>>, vector<2x256x1xf32>,
      %cst_69 = arith.constant 0.000000e+00 : f32
      %88 = vector.broadcast %cst_69 : f32 to vector<2x256x128xf32>
      %c0_70 = arith.constant 0 : index
      %c0_71 = arith.constant 0 : index
      %c0_72 = arith.constant 0 : index
      %89 = vector.load %arg9[%c0_70, %c0_71, %c0_72] : memref<2x256x128xf32, #tpu.memory_space<vmem>>, vector<2x256x128xf32>
      tpu.vector_store %arg9[%c0_70, %c0_71, %c0_72], %88 {strides = array<i32>} : memref<2x256x128xf32, #tpu.memory_space<vmem>>, vector<2x256x128xf32>,
    } else {
    }
    %c0 = arith.constant 0 : index
    %c0_1 = arith.constant 0 : index
    %c0_2 = arith.constant 0 : index
    %3 = vector.load %arg3[%c0, %c0_1, %c0_2] : memref<1x256x256xbf16, #tpu.memory_space<vmem>>, vector<1x256x128xbf16>
    %4 = vector.shape_cast %3 : vector<1x256x128xbf16> to vector<256x128xbf16>
    %c0_3 = arith.constant 0 : index
    %c0_4 = arith.constant 0 : index
    %c0_5 = arith.constant 0 : index
    %5 = vector.load %arg4[%c0_3, %c0_4, %c0_5] : memref<1x256x256xbf16, #tpu.memory_space<vmem>>, vector<1x256x128xbf16>
    %6 = vector.shape_cast %5 : vector<1x256x128xbf16> to vector<256x128xbf16>
    %c0_6 = arith.constant 0 : index
    %c0_7 = arith.constant 0 : index
    %c0_8 = arith.constant 0 : index
    %7 = vector.load %arg5[%c0_6, %c0_7, %c0_8] : memref<1x256x256xbf16, #tpu.memory_space<vmem>>, vector<1x256x128xbf16>
    %8 = vector.shape_cast %7 : vector<1x256x128xbf16> to vector<256x128xbf16>
    %cst = arith.constant dense<0.000000e+00> : vector<256x256xf32>
    %9 = tpu.matmul %4, %6, %cst {dimension_numbers = #tpu.dot_dimension_numbers<[1], [1], [0], [0], [0, 0, 1, 0], [], []>} : vector<256x128xbf16>, vector<256x128xbf16>, vector<256x256xf32> -> vector<256x256xf32>
    %c0_9 = arith.constant 0 : index
    %c0_10 = arith.constant 0 : index
    %c0_11 = arith.constant 0 : index
    %10 = vector.load %arg7[%c0_9, %c0_10, %c0_11] : memref<2x256x1xf32, #tpu.memory_space<vmem>>, vector<1x256x1xf32>
    %11 = vector.shape_cast %10 : vector<1x256x1xf32> to vector<256x1xf32>
    %cst_12 = arith.constant dense<0xFF800000> : vector<256xf32>
    %12 = vector.multi_reduction <maximumf>, %9, %cst_12 [1] : vector<256x256xf32> to vector<256xf32>
    %13 = vector.shape_cast %12 : vector<256xf32> to vector<256x1xf32>
    %14 = arith.maximumf %11, %13 : vector<256x1xf32>
    %15 = arith.subf %11, %14 : vector<256x1xf32>
    %16 = math.exp %15 : vector<256x1xf32>
    %17 = vector.broadcast %14 : vector<256x1xf32> to vector<256x256xf32>
    %18 = arith.subf %9, %17 : vector<256x256xf32>
    %19 = math.exp %18 : vector<256x256xf32>
    %c0_13 = arith.constant 0 : index
    %c0_14 = arith.constant 0 : index
    %c0_15 = arith.constant 0 : index
    %20 = vector.load %arg8[%c0_13, %c0_14, %c0_15] : memref<2x256x1xf32, #tpu.memory_space<vmem>>, vector<1x256x1xf32>
    %21 = vector.shape_cast %20 : vector<1x256x1xf32> to vector<256x1xf32>
    %22 = arith.mulf %16, %21 : vector<256x1xf32>
    %cst_16 = arith.constant dense<0.000000e+00> : vector<256xf32>
    %23 = vector.multi_reduction <add>, %19, %cst_16 [1] : vector<256x256xf32> to vector<256xf32>
    %24 = vector.shape_cast %23 : vector<256xf32> to vector<256x1xf32>
    %25 = arith.addf %22, %24 : vector<256x1xf32>
    %c0_17 = arith.constant 0 : index
    %c0_18 = arith.constant 0 : index
    %c0_19 = arith.constant 0 : index
    %26 = vector.load %arg8[%c0_17, %c0_18, %c0_19] : memref<2x256x1xf32, #tpu.memory_space<vmem>>, vector<1x256x1xf32>
    %27 = vector.shape_cast %26 : vector<1x256x1xf32> to vector<256x1xf32>
    %28 = vector.shape_cast %25 : vector<256x1xf32> to vector<1x256x1xf32>
    tpu.vector_store %arg8[%c0_17, %c0_18, %c0_19], %28 {strides = array<i32>} : memref<2x256x1xf32, #tpu.memory_space<vmem>>, vector<1x256x1xf32>,
    %c0_20 = arith.constant 0 : index
    %c0_21 = arith.constant 0 : index
    %c0_22 = arith.constant 0 : index
    %29 = vector.load %arg9[%c0_20, %c0_21, %c0_22] : memref<2x256x128xf32, #tpu.memory_space<vmem>>, vector<1x256x128xf32>
    %30 = vector.shape_cast %29 : vector<1x256x128xf32> to vector<256x128xf32>
    %31 = vector.broadcast %16 : vector<256x1xf32> to vector<256x128xf32>
    %32 = arith.mulf %31, %30 : vector<256x128xf32>
    %33 = arith.truncf %19 : vector<256x256xf32> to vector<256x256xbf16>
    %cst_23 = arith.constant dense<0.000000e+00> : vector<256x128xf32>
    %34 = tpu.matmul %33, %8, %cst_23 {dimension_numbers = #tpu.dot_dimension_numbers<[1], [0], [0], [1], [0, 0, 1, 1], [], []>} : vector<256x256xbf16>, vector<256x128xbf16>, vector<256x128xf32> -> vector<256x128xf32>
    %35 = arith.addf %32, %34 : vector<256x128xf32>
    %c0_24 = arith.constant 0 : index
    %c0_25 = arith.constant 0 : index
    %c0_26 = arith.constant 0 : index
    %36 = vector.load %arg9[%c0_24, %c0_25, %c0_26] : memref<2x256x128xf32, #tpu.memory_space<vmem>>, vector<1x256x128xf32>
    %37 = vector.shape_cast %36 : vector<1x256x128xf32> to vector<256x128xf32>
    %38 = vector.shape_cast %35 : vector<256x128xf32> to vector<1x256x128xf32>
    tpu.vector_store %arg9[%c0_24, %c0_25, %c0_26], %38 {strides = array<i32>} : memref<2x256x128xf32, #tpu.memory_space<vmem>>, vector<1x256x128xf32>,
    %c0_27 = arith.constant 0 : index
    %c0_28 = arith.constant 0 : index
    %c0_29 = arith.constant 0 : index
    %39 = vector.load %arg7[%c0_27, %c0_28, %c0_29] : memref<2x256x1xf32, #tpu.memory_space<vmem>>, vector<1x256x1xf32>
    %40 = vector.shape_cast %39 : vector<1x256x1xf32> to vector<256x1xf32>
    %41 = vector.shape_cast %14 : vector<256x1xf32> to vector<1x256x1xf32>
    tpu.vector_store %arg7[%c0_27, %c0_28, %c0_29], %41 {strides = array<i32>} : memref<2x256x1xf32, #tpu.memory_space<vmem>>, vector<1x256x1xf32>,
    %c0_30 = arith.constant 0 : index
    %c0_31 = arith.constant 0 : index
    %c128 = arith.constant 128 : index
    %42 = vector.load %arg3[%c0_30, %c0_31, %c128] : memref<1x256x256xbf16, #tpu.memory_space<vmem>>, vector<1x256x128xbf16>
    %43 = vector.shape_cast %42 : vector<1x256x128xbf16> to vector<256x128xbf16>
    %c0_32 = arith.constant 0 : index
    %c0_33 = arith.constant 0 : index
    %c128_34 = arith.constant 128 : index
    %44 = vector.load %arg4[%c0_32, %c0_33, %c128_34] : memref<1x256x256xbf16, #tpu.memory_space<vmem>>, vector<1x256x128xbf16>
    %45 = vector.shape_cast %44 : vector<1x256x128xbf16> to vector<256x128xbf16>
    %c0_35 = arith.constant 0 : index
    %c0_36 = arith.constant 0 : index
    %c128_37 = arith.constant 128 : index
    %46 = vector.load %arg5[%c0_35, %c0_36, %c128_37] : memref<1x256x256xbf16, #tpu.memory_space<vmem>>, vector<1x256x128xbf16>
    %47 = vector.shape_cast %46 : vector<1x256x128xbf16> to vector<256x128xbf16>
    %cst_38 = arith.constant dense<0.000000e+00> : vector<256x256xf32>
    %48 = tpu.matmul %43, %45, %cst_38 {dimension_numbers = #tpu.dot_dimension_numbers<[1], [1], [0], [0], [0, 0, 1, 0], [], []>} : vector<256x128xbf16>, vector<256x128xbf16>, vector<256x256xf32> -> vector<256x256xf32>
    %c1 = arith.constant 1 : index
    %c0_39 = arith.constant 0 : index
    %c0_40 = arith.constant 0 : index
    %49 = vector.load %arg7[%c1, %c0_39, %c0_40] : memref<2x256x1xf32, #tpu.memory_space<vmem>>, vector<1x256x1xf32>
    %50 = vector.shape_cast %49 : vector<1x256x1xf32> to vector<256x1xf32>
    %cst_41 = arith.constant dense<0xFF800000> : vector<256xf32>
    %51 = vector.multi_reduction <maximumf>, %48, %cst_41 [1] : vector<256x256xf32> to vector<256xf32>
    %52 = vector.shape_cast %51 : vector<256xf32> to vector<256x1xf32>
    %53 = arith.maximumf %50, %52 : vector<256x1xf32>
    %54 = arith.subf %50, %53 : vector<256x1xf32>
    %55 = math.exp %54 : vector<256x1xf32>
    %56 = vector.broadcast %53 : vector<256x1xf32> to vector<256x256xf32>
    %57 = arith.subf %48, %56 : vector<256x256xf32>
    %58 = math.exp %57 : vector<256x256xf32>
    %c1_42 = arith.constant 1 : index
    %c0_43 = arith.constant 0 : index
    %c0_44 = arith.constant 0 : index
    %59 = vector.load %arg8[%c1_42, %c0_43, %c0_44] : memref<2x256x1xf32, #tpu.memory_space<vmem>>, vector<1x256x1xf32>
    %60 = vector.shape_cast %59 : vector<1x256x1xf32> to vector<256x1xf32>
    %61 = arith.mulf %55, %60 : vector<256x1xf32>
    %cst_45 = arith.constant dense<0.000000e+00> : vector<256xf32>
    %62 = vector.multi_reduction <add>, %58, %cst_45 [1] : vector<256x256xf32> to vector<256xf32>
    %63 = vector.shape_cast %62 : vector<256xf32> to vector<256x1xf32>
    %64 = arith.addf %61, %63 : vector<256x1xf32>
    %c1_46 = arith.constant 1 : index
    %c0_47 = arith.constant 0 : index
    %c0_48 = arith.constant 0 : index
    %65 = vector.load %arg8[%c1_46, %c0_47, %c0_48] : memref<2x256x1xf32, #tpu.memory_space<vmem>>, vector<1x256x1xf32>
    %66 = vector.shape_cast %65 : vector<1x256x1xf32> to vector<256x1xf32>
    %67 = vector.shape_cast %64 : vector<256x1xf32> to vector<1x256x1xf32>
    tpu.vector_store %arg8[%c1_46, %c0_47, %c0_48], %67 {strides = array<i32>} : memref<2x256x1xf32, #tpu.memory_space<vmem>>, vector<1x256x1xf32>,
    %c1_49 = arith.constant 1 : index
    %c0_50 = arith.constant 0 : index
    %c0_51 = arith.constant 0 : index
    %68 = vector.load %arg9[%c1_49, %c0_50, %c0_51] : memref<2x256x128xf32, #tpu.memory_space<vmem>>, vector<1x256x128xf32>
    %69 = vector.shape_cast %68 : vector<1x256x128xf32> to vector<256x128xf32>
    %70 = vector.broadcast %55 : vector<256x1xf32> to vector<256x128xf32>
    %71 = arith.mulf %70, %69 : vector<256x128xf32>
    %72 = arith.truncf %58 : vector<256x256xf32> to vector<256x256xbf16>
    %cst_52 = arith.constant dense<0.000000e+00> : vector<256x128xf32>
    %73 = tpu.matmul %72, %47, %cst_52 {dimension_numbers = #tpu.dot_dimension_numbers<[1], [0], [0], [1], [0, 0, 1, 1], [], []>} : vector<256x256xbf16>, vector<256x128xbf16>, vector<256x128xf32> -> vector<256x128xf32>
    %74 = arith.addf %71, %73 : vector<256x128xf32>
    %c1_53 = arith.constant 1 : index
    %c0_54 = arith.constant 0 : index
    %c0_55 = arith.constant 0 : index
    %75 = vector.load %arg9[%c1_53, %c0_54, %c0_55] : memref<2x256x128xf32, #tpu.memory_space<vmem>>, vector<1x256x128xf32>
    %76 = vector.shape_cast %75 : vector<1x256x128xf32> to vector<256x128xf32>
    %77 = vector.shape_cast %74 : vector<256x128xf32> to vector<1x256x128xf32>
    tpu.vector_store %arg9[%c1_53, %c0_54, %c0_55], %77 {strides = array<i32>} : memref<2x256x128xf32, #tpu.memory_space<vmem>>, vector<1x256x128xf32>,
    %c1_56 = arith.constant 1 : index
    %c0_57 = arith.constant 0 : index
    %c0_58 = arith.constant 0 : index
    %78 = vector.load %arg7[%c1_56, %c0_57, %c0_58] : memref<2x256x1xf32, #tpu.memory_space<vmem>>, vector<1x256x1xf32>
    %79 = vector.shape_cast %78 : vector<1x256x1xf32> to vector<256x1xf32>
    %80 = vector.shape_cast %53 : vector<256x1xf32> to vector<1x256x1xf32>
    tpu.vector_store %arg7[%c1_56, %c0_57, %c0_58], %80 {strides = array<i32>} : memref<2x256x1xf32, #tpu.memory_space<vmem>>, vector<1x256x1xf32>,
    %c0_i32_59 = arith.constant 0 : i32
    %81 = arith.cmpi eq, %arg2, %c0_i32_59 : i32
    %82 = arith.extui %81 : i1 to i32
    %c0_i32_60 = arith.constant 0 : i32
    %83 = arith.cmpi ne, %82, %c0_i32_60 : i32
    scf.if %83 {
      %c0_61 = arith.constant 0 : index
      %c0_62 = arith.constant 0 : index
      %c0_63 = arith.constant 0 : index
      %84 = vector.load %arg8[%c0_61, %c0_62, %c0_63] : memref<2x256x1xf32, #tpu.memory_space<vmem>>, vector<1x256x1xf32>
      %85 = vector.shape_cast %84 : vector<1x256x1xf32> to vector<256x1xf32>
      %86 = tpu.reciprocal %85 {approx = true} : vector<256x1xf32> -> vector<256x1xf32>
      %c0_64 = arith.constant 0 : index
      %c0_65 = arith.constant 0 : index
      %c0_66 = arith.constant 0 : index
      %87 = vector.load %arg9[%c0_64, %c0_65, %c0_66] : memref<2x256x128xf32, #tpu.memory_space<vmem>>, vector<1x256x128xf32>
      %88 = vector.shape_cast %87 : vector<1x256x128xf32> to vector<256x128xf32>
      %89 = vector.broadcast %86 : vector<256x1xf32> to vector<256x128xf32>
      %90 = arith.mulf %88, %89 : vector<256x128xf32>
      %91 = arith.truncf %90 : vector<256x128xf32> to vector<256x128xbf16>
      %c0_67 = arith.constant 0 : index
      %c0_68 = arith.constant 0 : index
      %c0_69 = arith.constant 0 : index
      %92 = vector.load %arg6[%c0_67, %c0_68, %c0_69] : memref<1x256x256xbf16, #tpu.memory_space<vmem>>, vector<1x256x128xbf16>
      %93 = vector.shape_cast %92 : vector<1x256x128xbf16> to vector<256x128xbf16>
      %94 = vector.shape_cast %91 : vector<256x128xbf16> to vector<1x256x128xbf16>
      tpu.vector_store %arg6[%c0_67, %c0_68, %c0_69], %94 {strides = array<i32>} : memref<1x256x256xbf16, #tpu.memory_space<vmem>>, vector<1x256x128xbf16>,
      %c1_70 = arith.constant 1 : index
      %c0_71 = arith.constant 0 : index
      %c0_72 = arith.constant 0 : index
      %95 = vector.load %arg8[%c1_70, %c0_71, %c0_72] : memref<2x256x1xf32, #tpu.memory_space<vmem>>, vector<1x256x1xf32>
      %96 = vector.shape_cast %95 : vector<1x256x1xf32> to vector<256x1xf32>
      %97 = tpu.reciprocal %96 {approx = true} : vector<256x1xf32> -> vector<256x1xf32>
      %c1_73 = arith.constant 1 : index
      %c0_74 = arith.constant 0 : index
      %c0_75 = arith.constant 0 : index
      %98 = vector.load %arg9[%c1_73, %c0_74, %c0_75] : memref<2x256x128xf32, #tpu.memory_space<vmem>>, vector<1x256x128xf32>
      %99 = vector.shape_cast %98 : vector<1x256x128xf32> to vector<256x128xf32>
      %100 = vector.broadcast %97 : vector<256x1xf32> to vector<256x128xf32>
      %101 = arith.mulf %99, %100 : vector<256x128xf32>
      %102 = arith.truncf %101 : vector<256x128xf32> to vector<256x128xbf16>
      %c0_76 = arith.constant 0 : index
      %c0_77 = arith.constant 0 : index
      %c128_78 = arith.constant 128 : index
      %103 = vector.load %arg6[%c0_76, %c0_77, %c128_78] : memref<1x256x256xbf16, #tpu.memory_space<vmem>>, vector<1x256x128xbf16>
      %104 = vector.shape_cast %103 : vector<1x256x128xbf16> to vector<256x128xbf16>
      %105 = vector.shape_cast %102 : vector<256x128xbf16> to vector<1x256x128xbf16>
      tpu.vector_store %arg6[%c0_76, %c0_77, %c128_78], %105 {strides = array<i32>} : memref<1x256x256xbf16, #tpu.memory_space<vmem>>, vector<1x256x128xbf16>,
    } else {
    }
    return
  }
  func.func @transform_0(%arg0: i32, %arg1: i32, %arg2: i32) -> (i32, i32, i32) {
    %c0_i32 = arith.constant 0 : i32
    %c0_i32_0 = arith.constant 0 : i32
    return %arg0, %arg1, %c0_i32 : i32, i32, i32
  }
  func.func @transform_1(%arg0: i32, %arg1: i32, %arg2: i32) -> (i32, i32, i32) {
    %c1_i32 = arith.constant 1 : i32
    %c0_i32 = arith.constant 0 : i32
    return %arg0, %arg2, %c1_i32 : i32, i32, i32
  }
  func.func @transform_2(%arg0: i32, %arg1: i32, %arg2: i32) -> (i32, i32, i32) {
    %c2_i32 = arith.constant 2 : i32
    %c0_i32 = arith.constant 0 : i32
    return %arg0, %arg2, %c2_i32 : i32, i32, i32
  }
  func.func @transform_3(%arg0: i32, %arg1: i32, %arg2: i32) -> (i32, i32, i32) {
    %c0_i32 = arith.constant 0 : i32
    %c0_i32_0 = arith.constant 0 : i32
    return %arg0, %arg1, %c0_i32 : i32, i32, i32
  }
}

module attributes {stable_mosaic.version = 11 : i64} {
  func.func @_linear_kernel(%arg0: i32, %arg1: i32, %arg2: i32, %arg3: memref<256x256xbf16, #tpu.memory_space<vmem>>, %arg4: memref<256x256xbf16, #tpu.memory_space<vmem>>, %arg5: memref<1x256xf32, #tpu.memory_space<vmem>>, %arg6: memref<256x256xf32, #tpu.memory_space<vmem>>, %arg7: memref<256x256xf32, #tpu.memory_space<vmem>>) attributes {dimension_semantics = [#tpu.dimension_semantics<parallel>, #tpu.dimension_semantics<parallel>, #tpu.dimension_semantics<arbitrary>], iteration_bounds = array<i64: 2, 1, 1>, scalar_prefetch = 0 : i64, scratch_operands = 1 : i64, tpu.core_type = #tpu.core_type<tc>, window_params = [{transform_indices = @transform_0, window_bounds = array<i64: 256, 256>}, {transform_indices = @transform_1, window_bounds = array<i64: 256, 256>}, {transform_indices = @transform_2, window_bounds = array<i64: 1, 256>}, {transform_indices = @transform_3, window_bounds = array<i64: 256, 256>}]} {
    %c0_i32 = arith.constant 0 : i32
    %0 = arith.cmpi eq, %arg2, %c0_i32 : i32
    %1 = arith.extui %0 : i1 to i32
    %c0_i32_0 = arith.constant 0 : i32
    %2 = arith.cmpi ne, %1, %c0_i32_0 : i32
    scf.if %2 {
      %cst_10 = arith.constant 0.000000e+00 : f32
      %12 = vector.broadcast %cst_10 : f32 to vector<256x256xf32>
      %c0_11 = arith.constant 0 : index
      %c0_12 = arith.constant 0 : index
      %13 = vector.load %arg7[%c0_11, %c0_12] : memref<256x256xf32, #tpu.memory_space<vmem>>, vector<256x256xf32>
      tpu.vector_store %arg7[%c0_11, %c0_12], %12 {strides = array<i32>} : memref<256x256xf32, #tpu.memory_space<vmem>>, vector<256x256xf32>,
    } else {
    }
    %c0 = arith.constant 0 : index
    %c0_1 = arith.constant 0 : index
    %3 = vector.load %arg7[%c0, %c0_1] : memref<256x256xf32, #tpu.memory_space<vmem>>, vector<256x256xf32>
    %c0_2 = arith.constant 0 : index
    %c0_3 = arith.constant 0 : index
    %4 = vector.load %arg3[%c0_2, %c0_3] : memref<256x256xbf16, #tpu.memory_space<vmem>>, vector<256x256xbf16>
    %c0_4 = arith.constant 0 : index
    %c0_5 = arith.constant 0 : index
    %5 = vector.load %arg4[%c0_4, %c0_5] : memref<256x256xbf16, #tpu.memory_space<vmem>>, vector<256x256xbf16>
    %cst = arith.constant dense<0.000000e+00> : vector<256x256xf32>
    %6 = tpu.matmul %4, %5, %cst {dimension_numbers = #tpu.dot_dimension_numbers<[1], [0], [0], [1], [0, 0, 1, 1], [], []>} : vector<256x256xbf16>, vector<256x256xbf16>, vector<256x256xf32> -> vector<256x256xf32>
    %7 = arith.addf %3, %6 : vector<256x256xf32>
    %c0_6 = arith.constant 0 : index
    %c0_7 = arith.constant 0 : index
    %8 = vector.load %arg7[%c0_6, %c0_7] : memref<256x256xf32, #tpu.memory_space<vmem>>, vector<256x256xf32>
    tpu.vector_store %arg7[%c0_6, %c0_7], %7 {strides = array<i32>} : memref<256x256xf32, #tpu.memory_space<vmem>>, vector<256x256xf32>,
    %c0_i32_8 = arith.constant 0 : i32
    %9 = arith.cmpi eq, %arg2, %c0_i32_8 : i32
    %10 = arith.extui %9 : i1 to i32
    %c0_i32_9 = arith.constant 0 : i32
    %11 = arith.cmpi ne, %10, %c0_i32_9 : i32
    scf.if %11 {
      %c0_10 = arith.constant 0 : index
      %c0_11 = arith.constant 0 : index
      %12 = vector.load %arg7[%c0_10, %c0_11] : memref<256x256xf32, #tpu.memory_space<vmem>>, vector<256x256xf32>
      %c0_12 = arith.constant 0 : index
      %c0_13 = arith.constant 0 : index
      %13 = vector.load %arg5[%c0_12, %c0_13] : memref<1x256xf32, #tpu.memory_space<vmem>>, vector<1x256xf32>
      %14 = vector.broadcast %13 : vector<1x256xf32> to vector<256x256xf32>
      %15 = arith.addf %12, %14 : vector<256x256xf32>
      %c0_14 = arith.constant 0 : index
      %c0_15 = arith.constant 0 : index
      %16 = vector.load %arg6[%c0_14, %c0_15] : memref<256x256xf32, #tpu.memory_space<vmem>>, vector<256x256xf32>
      tpu.vector_store %arg6[%c0_14, %c0_15], %15 {strides = array<i32>} : memref<256x256xf32, #tpu.memory_space<vmem>>, vector<256x256xf32>,
    } else {
    }
    return
  }
  func.func @transform_0(%arg0: i32, %arg1: i32, %arg2: i32) -> (i32, i32) {
    %c0_i32 = arith.constant 0 : i32
    return %arg0, %arg2 : i32, i32
  }
  func.func @transform_1(%arg0: i32, %arg1: i32, %arg2: i32) -> (i32, i32) {
    %c0_i32 = arith.constant 0 : i32
    return %arg2, %arg1 : i32, i32
  }
  func.func @transform_2(%arg0: i32, %arg1: i32, %arg2: i32) -> (i32, i32) {
    %c0_i32 = arith.constant 0 : i32
    %c0_i32_0 = arith.constant 0 : i32
    return %c0_i32, %arg1 : i32, i32
  }
  func.func @transform_3(%arg0: i32, %arg1: i32, %arg2: i32) -> (i32, i32) {
    %c0_i32 = arith.constant 0 : i32
    return %arg0, %arg1 : i32, i32
  }
}

</mosaic_0001>

<bundles_post_ra>
// kernel: attention_forward.3
= control target key start
LH: loop header
LB: loop body
LE: loop exit
PB: predicated region body
PF: predicated region fallthrough
CT: control target
= control target key end

     0   :  { %s2398_s12 = smov 0   ;;  %s2400_s13 = smov 0   ;;  %s2906_s0 = inlined_call_operand.vmem [shape: bf16[512,256], index: 0, kind: input, shape index: {}]   ;;  %s2907_s1 = inlined_call_operand.vmem [shape: bf16[256,768], index: 1, kind: input, shape index: {}]   ;;  %s2908_s2 = inlined_call_operand.vmem [shape: f32[1,768], index: 2, kind: input, shape index: {}]   ;;  %s2909_s3 = inlined_call_operand.vmem [shape: bf16[512,768], index: 3, kind: output, shape index: {}]  }
   0x1   :  { %s2402_s14 = smov 0   ;;  %s2404_s15 = smov 0  }
   0x2   :  { %s2406_s16 = smov 0   ;;  %s2408_s17 = smov 0  }
   0x3   :  { %s2410_s18 = smov 0   ;;  %s2412_s19 = smov 0  }
   0x4   :  { %s2414_s20 = smov 0  }
   0x5 LB: > { %s1890_s21 = sadd.s32 4294967295, %s2376_s20   ;;  %s28_s22 = sadd.s32 1, %s2368_s18  ;;  %s2376_s20 = sphi %s2414_s20, %s13_s20   ;;  %s2372_s19 = sphi %s2412_s19, %s2919_s19   ;;  %s2368_s18 = sphi %s2410_s18, %s2918_s18   ;;  %s2364_s17 = sphi %s2408_s17, %s2917_s17   ;;  %s2360_s16 = sphi %s2406_s16, %s2916_s16   ;;  %s2356_s15 = sphi %s2404_s15, %s2915_s15   ;;  %s2352_s14 = sphi %s2402_s14, %s2914_s14   ;;  %s2348_s13 = sphi %s2400_s13, %s2913_s13   ;;  %s2344_s12 = sphi %s2398_s12, %s2912_s12  }
   0x6   : > { %p30_p0 = scmp.ge.s32.totalorder %s28_s22, 3  ;;  %s32_s23 = sadd.s32 1, %s2372_s19 }
   0x7   : > { %s69_s24 = sadd.s32 1, %s2356_s15  ;;  %p76_p1 = scmp.ne.s32.totalorder %s2356_s15, %s2352_s14 }
   0x8   : > { %s2921_s22 = smov (%p30_p0, %s28_s22), 0  ;;  %s2923_s23 = smov (!%p30_p0, %s32_s23), %s2372_s19 }
   0x9   : > { %s65_s25 = ssub.s32 %s2368_s18, %s2921_s22  ;;  %p77_p2 = scmp.eq.s32.totalorder %s2376_s20, 0 }
   0xa   : > { %p34_p3 = scmp.ge.s32.totalorder %s2923_s23, 2  ;;  %p67_p4 = scmp.eq.s32.totalorder %s65_s25, 0 }
   0xb   : > { %p78_p5 = por %p77_p2, %p76_p1  ;;  %s123_s26 = sadd.s32 1, %s2348_s13 }
   0xc   : > { %s2925_s23 = smov (%p34_p3, %s2923_s23), 0  ;;  %p133_p6 = scmp.ne.s32.totalorder %s2348_s13, %s2344_s12 }
   0xd   : > { %s2459_s27 = scalar_select %p67_p4, %s2356_s15, %s69_s24  }
   0xe   : > { %s118_s28 = ssub.s32 %s2372_s19, %s2925_s23  ;;  %p134_p7 = scmp.eq.s32.totalorder %s1890_s21, 5 }
   0xf   : > { %s120_s29 = sor.u32 %s118_s28, %s65_s25  ;;  %p1893_p10 = scmp.ge.s32.totalorder %s2376_s20, 6 }
  0x10   : > { %p121_p8 = scmp.eq.s32.totalorder %s120_s29, 0  ;;  %p2465_p9 = por %p134_p7, %p133_p6 }
  0x11   : > { %156 = sbr.rel (%p1893_p10) target bundleno = 58 (0x3a), region = 16 }
  0x12   : > { %s2470_s4 = scalar_select %p121_p8, %s2348_s13, %s123_s26  }
  0x16   : > { %174 = sbr.rel (!%p78_p5) target bundleno = 58 (0x3a), region = 24  ;;  %s176_s5 = sand.u32 (%p78_p5), 1, %s2356_s15  }
  0x17   : > { %s2167_s6 = sshll.u32 (%p78_p5), %s2368_s18, 3  ;;  %s1894_s7 = sshll.u32 (%p78_p5), %s176_s5, 8 }
  0x18   : > { %s2478_s10 = scalar_lea.vmem (%p78_p5), %s2907_s1, %s2167_s6  ;;  %s2483_s11 = scalar_lea.vmem (%p78_p5), [#allocation3], %s1894_s7 }
  0x19   : > { %v275_v0 = vld [vmem:[%s2478_s10] sm:$0xff] (%p78_p5)  ;;  %v277_v1 = vld [vmem:[%s2478_s10 + $0x18] sm:$0xff] (%p78_p5)  ;;  %v279_v2 = vld [vmem:[%s2478_s10 + $0x30] sm:$0xff] (%p78_p5) }
  0x1a   : > { %276 = vst [vmem:[%s2483_s11] sm:$0xff] (%p78_p5), %v275_v0  ;;  %v281_v3 = vld [vmem:[%s2478_s10 + $0x48] sm:$0xff] (%p78_p5)  ;;  %v283_v4 = vld [vmem:[%s2478_s10 + $0x60] sm:$0xff] (%p78_p5)  ;;  %v285_v5 = vld [vmem:[%s2478_s10 + $0x78] sm:$0xff] (%p78_p5) }
  0x1b   : > { %278 = vst [vmem:[%s2483_s11 + $0x8] sm:$0xff] %v277_v1  ;;  %v287_v6 = vld [vmem:[%s2478_s10 + $0x90] sm:$0xff]  ;;  %v289_v7 = vld [vmem:[%s2478_s10 + $0xa8] sm:$0xff]  ;;  %v291_v8 = vld [vmem:[%s2478_s10 + $0xc0] sm:$0xff] }
  0x1c   : > { %280 = vst [vmem:[%s2483_s11 + $0x10] sm:$0xff] %v279_v2  ;;  %v293_v9 = vld [vmem:[%s2478_s10 + $0xd8] sm:$0xff]  ;;  %v295_v10 = vld [vmem:[%s2478_s10 + $0xf0] sm:$0xff]  ;;  %v297_v11 = vld [vmem:[%s2478_s10 + $0x108] sm:$0xff] }
  0x1d   : > { %282 = vst [vmem:[%s2483_s11 + $0x18] sm:$0xff] %v281_v3  ;;  %v299_v12 = vld [vmem:[%s2478_s10 + $0x120] sm:$0xff]  ;;  %v301_v13 = vld [vmem:[%s2478_s10 + $0x138] sm:$0xff]  ;;  %v303_v14 = vld [vmem:[%s2478_s10 + $0x150] sm:$0xff] }
  0x1e   : > { %284 = vst [vmem:[%s2483_s11 + $0x20] sm:$0xff] %v283_v4  ;;  %v305_v15 = vld [vmem:[%s2478_s10 + $0x168] sm:$0xff]  ;;  %v307_v16 = vld [vmem:[%s2478_s10 + $0x180] sm:$0xff]  ;;  %v309_v17 = vld [vmem:[%s2478_s10 + $0x198] sm:$0xff] }
  0x1f   : > { %286 = vst [vmem:[%s2483_s11 + $0x28] sm:$0xff] %v285_v5  ;;  %v311_v18 = vld [vmem:[%s2478_s10 + $0x1b0] sm:$0xff]  ;;  %v313_v19 = vld [vmem:[%s2478_s10 + $0x1c8] sm:$0xff]  ;;  %v315_v20 = vld [vmem:[%s2478_s10 + $0x1e0] sm:$0xff] }
  0x20   : > { %288 = vst [vmem:[%s2483_s11 + $0x30] sm:$0xff] %v287_v6  ;;  %v317_v21 = vld [vmem:[%s2478_s10 + $0x1f8] sm:$0xff]  ;;  %v319_v22 = vld [vmem:[%s2478_s10 + $0x210] sm:$0xff]  ;;  %v321_v23 = vld [vmem:[%s2478_s10 + $0x228] sm:$0xff] }
  0x21   : > { %290 = vst [vmem:[%s2483_s11 + $0x38] sm:$0xff] %v289_v7  ;;  %v323_v24 = vld [vmem:[%s2478_s10 + $0x240] sm:$0xff]  ;;  %v325_v25 = vld [vmem:[%s2478_s10 + $0x258] sm:$0xff]  ;;  %v327_v26 = vld [vmem:[%s2478_s10 + $0x270] sm:$0xff] }
  0x22   : > { %292 = vst [vmem:[%s2483_s11 + $0x40] sm:$0xff] %v291_v8  ;;  %v329_v27 = vld [vmem:[%s2478_s10 + $0x288] sm:$0xff]  ;;  %v331_v28 = vld [vmem:[%s2478_s10 + $0x2a0] sm:$0xff]  ;;  %v333_v29 = vld [vmem:[%s2478_s10 + $0x2b8] sm:$0xff] }
  0x23   : > { %294 = vst [vmem:[%s2483_s11 + $0x48] sm:$0xff] %v293_v9  ;;  %v335_v30 = vld [vmem:[%s2478_s10 + $0x2d0] sm:$0xff]  ;;  %v337_v31 = vld [vmem:[%s2478_s10 + $0x2e8] sm:$0xff] }
  0x24   : > { %296 = vst [vmem:[%s2483_s11 + $0x50] sm:$0xff] %v295_v10 }
  0x25   : > { %298 = vst [vmem:[%s2483_s11 + $0x58] sm:$0xff] %v297_v11 }
  0x26   : > { %300 = vst [vmem:[%s2483_s11 + $0x60] sm:$0xff] %v299_v12 }
  0x27   : > { %302 = vst [vmem:[%s2483_s11 + $0x68] sm:$0xff] %v301_v13 }
  0x28   : > { %304 = vst [vmem:[%s2483_s11 + $0x70] sm:$0xff] %v303_v14 }
  0x29   : > { %306 = vst [vmem:[%s2483_s11 + $0x78] sm:$0xff] %v305_v15 }
  0x2a   : > { %308 = vst [vmem:[%s2483_s11 + $0x80] sm:$0xff] %v307_v16 }
  0x2b   : > { %310 = vst [vmem:[%s2483_s11 + $0x88] sm:$0xff] %v309_v17 }
  0x2c   : > { %312 = vst [vmem:[%s2483_s11 + $0x90] sm:$0xff] %v311_v18 }
  0x2d   : > { %314 = vst [vmem:[%s2483_s11 + $0x98] sm:$0xff] %v313_v19 }
  0x2e   : > { %316 = vst [vmem:[%s2483_s11 + $0xa0] sm:$0xff] %v315_v20 }
  0x2f   : > { %318 = vst [vmem:[%s2483_s11 + $0xa8] sm:$0xff] %v317_v21 }
  0x30   : > { %320 = vst [vmem:[%s2483_s11 + $0xb0] sm:$0xff] %v319_v22 }
  0x31   : > { %322 = vst [vmem:[%s2483_s11 + $0xb8] sm:$0xff] %v321_v23 }
  0x32   : > { %324 = vst [vmem:[%s2483_s11 + $0xc0] sm:$0xff] %v323_v24 }
  0x33   : > { %326 = vst [vmem:[%s2483_s11 + $0xc8] sm:$0xff] %v325_v25 }
  0x34   : > { %328 = vst [vmem:[%s2483_s11 + $0xd0] sm:$0xff] %v327_v26 }
  0x35   : > { %330 = vst [vmem:[%s2483_s11 + $0xd8] sm:$0xff] %v329_v27 }
  0x36   : > { %332 = vst [vmem:[%s2483_s11 + $0xe0] sm:$0xff] %v331_v28 }
  0x37   : > { %334 = vst [vmem:[%s2483_s11 + $0xe8] sm:$0xff] %v333_v29 }
  0x38   : > { %336 = vst [vmem:[%s2483_s11 + $0xf0] sm:$0xff] %v335_v30 }
  0x39   : > { %338 = vst [vmem:[%s2483_s11 + $0xf8] sm:$0xff] %v337_v31 }
  0x3a PF: > { %p1897_p11 = scmp.ge.s32.totalorder %s2376_s20, 1  ;;  %p351_p12 = scmp.lt.s32.totalorder %s2376_s20, 7 }
  0x3c   : > { %p352_p13 = pnand %p1897_p11, %p351_p12 }
  0x3d   : > { %s358_s21 = sand.u32 (!%p352_p13), 1, %s2352_s14   ;;  %s1900_s14 = sshll.u32 (!%p352_p13), %s2364_s17, 5 }
  0x3e   : > { %355 = sbr.rel (%p352_p13) target bundleno = 498 (0x1f2), region = 66  ;;  %s1898_s24 = sshll.u32 (!%p352_p13), %s358_s21, 8 }
  0x3f   : > { %s2549_s25 = scalar_lea.vmem (!%p352_p13), [#allocation3], %s1898_s24  ;;  %p2594_p0 = scmp.lt.s32.totalorder (!%p352_p13), %s1900_s14, 63 }
  0x40   : > { %s2664_s7 = sshll.u32 (!%p352_p13), %s2360_s16, 1  ;;  %s391_s16 = sand.u32 (!%p352_p13), 1, %s2344_s12  }
  0x41   : > { %p409_p1 = scmp.lt.s32.totalorder (!%p352_p13), %s2664_s7, 5  ;;  %s1899_s21 = sshll.u32 (!%p352_p13), %s391_s16, 8 }
  0x42   : > { %s2686_s24 = scalar_lea.vmem (!%p352_p13), [#allocation4], %s1899_s21 }
  0x43   : > { %v2090_v32 = vld [vmem:[%s2549_s25 + $0x70] sm:$0xf]  ;;  %v2216_v33 = vld [vmem:[%s2549_s25 + $0x74] sm:$0xf0]  ;;  %v2215_v37 = vld [vmem:[%s2549_s25 + $0x74] sm:$0xf] }
  0x44   : > { %v2154_v34 = vld [vmem:[%s2549_s25 + $0xf0] sm:$0xf]  ;;  %v2091_v35 = vor.u32 %v2216_v33, %v2090_v32  ;;  %v2232_v36 = vld [vmem:[%s2549_s25 + $0xf4] sm:$0xf0]  ;;  %v2092_v38 = vld [vmem:[%s2549_s25 + $0x78] sm:$0xf0] }
  0x45   : > { %v2155_v39 = vor.u32 %v2232_v36, %v2154_v34  ;;  %v2095_v40 = vor.u32 %v2215_v37, %v2092_v38  ;;  %v2231_v41 = vld [vmem:[%s2549_s25 + $0xf4] sm:$0xf]  ;;  %v2156_v42 = vld [vmem:[%s2549_s25 + $0xf8] sm:$0xf0]  ;;  %v2082_v43 = vld [vmem:[%s2549_s25 + $0x60] sm:$0xf] }
  0x46   : > { %931 = vmatpush.bf16.msra.mxu0 %v2091_v35  ;;  %v2159_v44 = vor.u32 %v2231_v41, %v2156_v42  ;;  %v2214_v45 = vld [vmem:[%s2549_s25 + $0x64] sm:$0xf0]  ;;  %v2146_v46 = vld [vmem:[%s2549_s25 + $0xe0] sm:$0xf]  ;;  %v2213_v50 = vld [vmem:[%s2549_s25 + $0x64] sm:$0xf] }
  0x47   : > { %v2230_v47 = vld [vmem:[%s2549_s25 + $0xe4] sm:$0xf0]  ;;  %1020 = vmatpush.bf16.msra.mxu1 %v2155_v39  ;;  %1109 = vmatpush.bf16.msra.mxu2 %v2095_v40  ;;  %v2083_v48 = vor.u32 %v2214_v45, %v2082_v43  ;;  %v2084_v51 = vld [vmem:[%s2549_s25 + $0x68] sm:$0xf0]  ;;  %v2229_v52 = vld [vmem:[%s2549_s25 + $0xe4] sm:$0xf] }
  0x48   : > { %v2147_v49 = vor.u32 %v2230_v47, %v2146_v46  ;;  %1198 = vmatpush.bf16.msra.mxu3 %v2159_v44  ;;  %v2087_v53 = vor.u32 %v2213_v50, %v2084_v51  ;;  %v2148_v54 = vld [vmem:[%s2549_s25 + $0xe8] sm:$0xf0]  ;;  %v2074_v55 = vld [vmem:[%s2549_s25 + $0x50] sm:$0xf]  ;;  %v2212_v56 = vld [vmem:[%s2549_s25 + $0x54] sm:$0xf0] }
  0x49   : > { %v2151_v57 = vor.u32 %v2229_v52, %v2148_v54  ;;  %v2138_v58 = vld [vmem:[%s2549_s25 + $0xd0] sm:$0xf]  ;;  %v2228_v59 = vld [vmem:[%s2549_s25 + $0xd4] sm:$0xf0]  ;;  %v2211_v60 = vld [vmem:[%s2549_s25 + $0x54] sm:$0xf]  ;;  %v2075_v61 = vor.u32 %v2212_v56, %v2074_v55 }
  0x4a   : > { %932 = vmatpush.bf16.msra.mxu0 %v2083_v48  ;;  %v2076_v62 = vld [vmem:[%s2549_s25 + $0x58] sm:$0xf0]  ;;  %v2227_v63 = vld [vmem:[%s2549_s25 + $0xd4] sm:$0xf]  ;;  %v2139_v1 = vor.u32 %v2228_v59, %v2138_v58  ;;  %v2066_v3 = vld [vmem:[%s2549_s25 + $0x40] sm:$0xf] }
  0x4b   : > { %v2140_v0 = vld [vmem:[%s2549_s25 + $0xd8] sm:$0xf0]  ;;  %1021 = vmatpush.bf16.msra.mxu1 %v2147_v49  ;;  %1110 = vmatpush.bf16.msra.mxu2 %v2087_v53  ;;  %v2079_v2 = vor.u32 %v2211_v60, %v2076_v62  ;;  %v2210_v4 = vld [vmem:[%s2549_s25 + $0x44] sm:$0xf0]  ;;  %v2130_v5 = vld [vmem:[%s2549_s25 + $0xc0] sm:$0xf] }
  0x4c   : > { %1199 = vmatpush.bf16.msra.mxu3 %v2151_v57  ;;  %v2143_v6 = vor.u32 %v2227_v63, %v2140_v0  ;;  %v2226_v7 = vld [vmem:[%s2549_s25 + $0xc4] sm:$0xf0]  ;;  %v2209_v8 = vld [vmem:[%s2549_s25 + $0x44] sm:$0xf]  ;;  %v2068_v9 = vld [vmem:[%s2549_s25 + $0x48] sm:$0xf0]  ;;  %v2067_v12 = vor.u32 %v2210_v4, %v2066_v3 }
  0x4d   : > { %v2225_v10 = vld [vmem:[%s2549_s25 + $0xc4] sm:$0xf]  ;;  %v2132_v11 = vld [vmem:[%s2549_s25 + $0xc8] sm:$0xf0]  ;;  %v2131_v13 = vor.u32 %v2226_v7, %v2130_v5  ;;  %v2071_v14 = vor.u32 %v2209_v8, %v2068_v9  ;;  %v2058_v15 = vld [vmem:[%s2549_s25 + $0x30] sm:$0xf] }
  0x4e   : > { %933 = vmatpush.bf16.msra.mxu0 %v2075_v61  ;;  %v2208_v16 = vld [vmem:[%s2549_s25 + $0x34] sm:$0xf0]  ;;  %v2122_v17 = vld [vmem:[%s2549_s25 + $0xb0] sm:$0xf]  ;;  %v2135_v18 = vor.u32 %v2225_v10, %v2132_v11  ;;  %v2207_v20 = vld [vmem:[%s2549_s25 + $0x34] sm:$0xf] }
  0x4f   : > { %1022 = vmatpush.bf16.msra.mxu1 %v2139_v1  ;;  %1111 = vmatpush.bf16.msra.mxu2 %v2079_v2  ;;  %v2224_v19 = vld [vmem:[%s2549_s25 + $0xb4] sm:$0xf0]  ;;  %v2060_v21 = vld [vmem:[%s2549_s25 + $0x38] sm:$0xf0]  ;;  %v2223_v22 = vld [vmem:[%s2549_s25 + $0xb4] sm:$0xf]  ;;  %v2059_v24 = vor.u32 %v2208_v16, %v2058_v15 }
  0x50   : > { %1200 = vmatpush.bf16.msra.mxu3 %v2143_v6  ;;  %v2124_v23 = vld [vmem:[%s2549_s25 + $0xb8] sm:$0xf0]  ;;  %v2123_v25 = vor.u32 %v2224_v19, %v2122_v17  ;;  %v2063_v26 = vor.u32 %v2207_v20, %v2060_v21  ;;  %v2050_v27 = vld [vmem:[%s2549_s25 + $0x20] sm:$0xf]  ;;  %v2206_v28 = vld [vmem:[%s2549_s25 + $0x24] sm:$0xf0] }
  0x51   : > { %v2114_v29 = vld [vmem:[%s2549_s25 + $0xa0] sm:$0xf]  ;;  %v2127_v30 = vor.u32 %v2223_v22, %v2124_v23  ;;  %v2222_v31 = vld [vmem:[%s2549_s25 + $0xa4] sm:$0xf0]  ;;  %v2205_v32 = vld [vmem:[%s2549_s25 + $0x24] sm:$0xf]  ;;  %v2051_v36 = vor.u32 %v2206_v28, %v2050_v27 }
  0x52   : > { %934 = vmatpush.bf16.msra.mxu0 %v2067_v12  ;;  %v2052_v33 = vld [vmem:[%s2549_s25 + $0x28] sm:$0xf0]  ;;  %v2221_v34 = vld [vmem:[%s2549_s25 + $0xa4] sm:$0xf]  ;;  %v2042_v37 = vld [vmem:[%s2549_s25 + $0x10] sm:$0xf]  ;;  %v2115_v38 = vor.u32 %v2222_v31, %v2114_v29 }
  0x53   : > { %1023 = vmatpush.bf16.msra.mxu1 %v2131_v13  ;;  %1112 = vmatpush.bf16.msra.mxu2 %v2071_v14  ;;  %v2116_v35 = vld [vmem:[%s2549_s25 + $0xa8] sm:$0xf0]  ;;  %v2055_v39 = vor.u32 %v2205_v32, %v2052_v33  ;;  %v2204_v40 = vld [vmem:[%s2549_s25 + $0x14] sm:$0xf0]  ;;  %v2106_v41 = vld [vmem:[%s2549_s25 + $0x90] sm:$0xf] }
  0x54   : > { %1201 = vmatpush.bf16.msra.mxu3 %v2135_v18  ;;  %v2220_v42 = vld [vmem:[%s2549_s25 + $0x94] sm:$0xf0]  ;;  %v2119_v43 = vor.u32 %v2221_v34, %v2116_v35  ;;  %v2203_v44 = vld [vmem:[%s2549_s25 + $0x14] sm:$0xf]  ;;  %v2044_v45 = vld [vmem:[%s2549_s25 + $0x18] sm:$0xf0]  ;;  %v2043_v48 = vor.u32 %v2204_v40, %v2042_v37 }
  0x55   : > { %s2927_s14 = smov (!%p2594_p0, %s1900_s14), 63  ;;  %v2219_v46 = vld [vmem:[%s2549_s25 + $0x94] sm:$0xf]  ;;  %v2108_v47 = vld [vmem:[%s2549_s25 + $0x98] sm:$0xf0]  ;;  %v2107_v49 = vor.u32 %v2220_v42, %v2106_v41  ;;  %v2047_v50 = vor.u32 %v2203_v44, %v2044_v45  ;;  %s2233_s12 = smul.u32 (%p2465_p9), 192, %s2364_s17 }
  0x56   : > { %935 = vmatpush.bf16.msra.mxu0 %v2059_v24  ;;  %s2168_s28 = sshll.u32 %s2927_s14, 3  ;;  %v2034_v51 = vld [vmem:[%s2549_s25] sm:$0xf]  ;;  %v2202_v52 = vld [vmem:[%s2549_s25 + $0x4] sm:$0xf0]  ;;  %v2111_v54 = vor.u32 %v2219_v46, %v2108_v47 }
  0x57   : > { %1024 = vmatpush.bf16.msra.mxu1 %v2123_v25  ;;  %1113 = vmatpush.bf16.msra.mxu2 %v2063_v26  ;;  %v2098_v53 = vld [vmem:[%s2549_s25 + $0x80] sm:$0xf]  ;;  %s2624_s6 = scalar_lea.vmem %s2906_s0, %s2168_s28  ;;  %v2218_v55 = vld [vmem:[%s2549_s25 + $0x84] sm:$0xf0]  ;;  %v2201_v56 = vld [vmem:[%s2549_s25 + $0x4] sm:$0xf]  ;;  %v2035_v60 = vor.u32 %v2202_v52, %v2034_v51 }
  0x58   : > { %1202 = vmatpush.bf16.msra.mxu3 %v2127_v30  ;;  %v2036_v57 = vld [vmem:[%s2549_s25 + $0x8] sm:$0xf0]  ;;  %v2217_v58 = vld [vmem:[%s2549_s25 + $0x84] sm:$0xf]  ;;  %v1906_v61 = vld [vmem:[%s2624_s6] sm:$0xf]  ;;  %v2099_v63 = vor.u32 %v2218_v55, %v2098_v53 }
  0x59   : > { %v2100_v59 = vld [vmem:[%s2549_s25 + $0x88] sm:$0xf0]  ;;  %v2170_v62 = vld [vmem:[%s2624_s6 + $0x4] sm:$0xf0]  ;;  %v2039_v0 = vor.u32 %v2201_v56, %v2036_v57  ;;  %v2169_v1 = vld [vmem:[%s2624_s6 + $0x4] sm:$0xf]  ;;  %s1626_s25 = sadd.s32 (%p2465_p9), %s2233_s12, %s2664_s7 }
  0x5a   : > { %936 = vmatpush.bf16.msra.mxu0 %v2051_v36  ;;  %v1908_v2 = vld [vmem:[%s2624_s6 + $0x8] sm:$0xf0]  ;;  %v2103_v3 = vor.u32 %v2217_v58, %v2100_v59  ;;  %v1907_v4 = vor.u32 %v2170_v62, %v1906_v61  ;;  %v1914_v6 = vld [vmem:[%s2624_s6 + $0x10] sm:$0xf]  ;;  %v2172_v7 = vld [vmem:[%s2624_s6 + $0x14] sm:$0xf0] }
  0x5b   : > { %1025 = vmatpush.bf16.msra.mxu1 %v2115_v38  ;;  %1114 = vmatpush.bf16.msra.mxu2 %v2055_v39  ;;  %v1911_v5 = vor.u32 %v2169_v1, %v1908_v2  ;;  %v2171_v8 = vld [vmem:[%s2624_s6 + $0x14] sm:$0xf]  ;;  %v1916_v9 = vld [vmem:[%s2624_s6 + $0x18] sm:$0xf0]  ;;  %v1915_v10 = vor.u32 %v2172_v7, %v1914_v6  ;;  %v1922_v12 = vld [vmem:[%s2624_s6 + $0x20] sm:$0xf] }
  0x5c   : > { %1203 = vmatpush.bf16.msra.mxu3 %v2119_v43  ;;  %v1919_v11 = vor.u32 %v2171_v8, %v1916_v9  ;;  %v2174_v13 = vld [vmem:[%s2624_s6 + $0x24] sm:$0xf0]  ;;  %v2173_v14 = vld [vmem:[%s2624_s6 + $0x24] sm:$0xf]  ;;  %v1924_v15 = vld [vmem:[%s2624_s6 + $0x28] sm:$0xf0] }
  0x5d   : > { %v1923_v16 = vor.u32 %v2174_v13, %v1922_v12  ;;  %v1927_v17 = vor.u32 %v2173_v14, %v1924_v15  ;;  %v1930_v18 = vld [vmem:[%s2624_s6 + $0x30] sm:$0xf]  ;;  %v2176_v19 = vld [vmem:[%s2624_s6 + $0x34] sm:$0xf0]  ;;  %v2175_v20 = vld [vmem:[%s2624_s6 + $0x34] sm:$0xf] }
  0x5e   : > { %937 = vmatpush.bf16.msra.mxu0 %v2043_v48  ;;  %v1932_v21 = vld [vmem:[%s2624_s6 + $0x38] sm:$0xf0]  ;;  %v1931_v22 = vor.u32 %v2176_v19, %v1930_v18  ;;  %v1938_v24 = vld [vmem:[%s2624_s6 + $0x40] sm:$0xf]  ;;  %v2178_v25 = vld [vmem:[%s2624_s6 + $0x44] sm:$0xf0] }
  0x5f   : > { %1026 = vmatpush.bf16.msra.mxu1 %v2107_v49  ;;  %1115 = vmatpush.bf16.msra.mxu2 %v2047_v50  ;;  %v1935_v23 = vor.u32 %v2175_v20, %v1932_v21  ;;  %v2177_v26 = vld [vmem:[%s2624_s6 + $0x44] sm:$0xf]  ;;  %v1940_v27 = vld [vmem:[%s2624_s6 + $0x48] sm:$0xf0]  ;;  %v1939_v28 = vor.u32 %v2178_v25, %v1938_v24  ;;  %v1946_v30 = vld [vmem:[%s2624_s6 + $0x50] sm:$0xf] }
  0x60   : > { %1204 = vmatpush.bf16.msra.mxu3 %v2111_v54  ;;  %v1943_v29 = vor.u32 %v2177_v26, %v1940_v27  ;;  %v2180_v31 = vld [vmem:[%s2624_s6 + $0x54] sm:$0xf0]  ;;  %v2179_v32 = vld [vmem:[%s2624_s6 + $0x54] sm:$0xf]  ;;  %v1948_v33 = vld [vmem:[%s2624_s6 + $0x58] sm:$0xf0] }
  0x61   : > { %v1947_v34 = vor.u32 %v2180_v31, %v1946_v30  ;;  %v1951_v35 = vor.u32 %v2179_v32, %v1948_v33  ;;  %v1954_v36 = vld [vmem:[%s2624_s6 + $0x60] sm:$0xf]  ;;  %v2182_v37 = vld [vmem:[%s2624_s6 + $0x64] sm:$0xf0]  ;;  %v2181_v38 = vld [vmem:[%s2624_s6 + $0x64] sm:$0xf] }
  0x62   : > { %938 = vmatpush.bf16.msra.mxu0 %v2035_v60  ;;  %v1956_v39 = vld [vmem:[%s2624_s6 + $0x68] sm:$0xf0]  ;;  %v1955_v40 = vor.u32 %v2182_v37, %v1954_v36  ;;  %v1962_v42 = vld [vmem:[%s2624_s6 + $0x70] sm:$0xf]  ;;  %v2184_v43 = vld [vmem:[%s2624_s6 + $0x74] sm:$0xf0] }
  0x63   : > { %1027 = vmatpush.bf16.msra.mxu1 %v2099_v63  ;;  %1116 = vmatpush.bf16.msra.mxu2 %v2039_v0  ;;  %v1959_v41 = vor.u32 %v2181_v38, %v1956_v39  ;;  %v2183_v44 = vld [vmem:[%s2624_s6 + $0x74] sm:$0xf]  ;;  %v1964_v45 = vld [vmem:[%s2624_s6 + $0x78] sm:$0xf0]  ;;  %v1963_v46 = vor.u32 %v2184_v43, %v1962_v42  ;;  %s410_s8 = scalar_select %p409_p1, %s2664_s7, 5 }
  0x64   : > { %1205 = vmatpush.bf16.msra.mxu3 %v2103_v3  ;;  %v1967_v47 = vor.u32 %v2183_v44, %v1964_v45  ;;  %v1970_v48 = vld [vmem:[%s2624_s6 + $0x80] sm:$0xf]  ;;  %v2186_v49 = vld [vmem:[%s2624_s6 + $0x84] sm:$0xf0]  ;;  %v2185_v50 = vld [vmem:[%s2624_s6 + $0x84] sm:$0xf] }
  0x65   : > { %939 = vmatmul.bf16.vlgmr.msra.gmra.mxu0 %v1907_v4  ;;  %v1972_v51 = vld [vmem:[%s2624_s6 + $0x88] sm:$0xf0]  ;;  %s411_s11 = scalar_lea.vmem %s2908_s2, %s410_s8  ;;  %v1971_v52 = vor.u32 %v2186_v49, %v1970_v48  ;;  %v1978_v3 = vld [vmem:[%s2624_s6 + $0x90] sm:$0xf]  ;;  %v2187_v6 = vld [vmem:[%s2624_s6 + $0x94] sm:$0xf] }
  0x66   : > { %1028 = vmatmul.bf16.vlgmr.msra.gmra.mxu1 %v1911_v5  ;;  %1117 = vmatmul.bf16.vlgmr.msra.gmra.mxu2 %v1907_v4  ;;  %v1975_v54 = vor.u32 %v2185_v50, %v1972_v51  ;;  %v1482_v56 = vld [vmem:[%s411_s11] sm:$0x3]  ;;  %v2188_v4 = vld [vmem:[%s2624_s6 + $0x94] sm:$0xf0]  ;;  %v1980_v7 = vld [vmem:[%s2624_s6 + $0x98] sm:$0xf0] }
  0x67   : > { %1206 = vmatmul.bf16.vlgmr.msra.gmra.mxu3 %v1911_v5  ;;  %v2675_v58 = vperm.slane %v1482_v56, 0  ;;  %v2678_v60 = vperm.slane %v1482_v56, 1  ;;  %v1983_v13 = vor.u32 %v2187_v6, %v1980_v7  ;;  %v1986_v27 = vld [vmem:[%s2624_s6 + $0xa0] sm:$0xf]  ;;  %v2189_v30 = vld [vmem:[%s2624_s6 + $0xa4] sm:$0xf] }
  0x68   : > { %v1988_v31 = vld [vmem:[%s2624_s6 + $0xa8] sm:$0xf0]  ;;  %v1994_v51 = vld [vmem:[%s2624_s6 + $0xb0] sm:$0xf]  ;;  %s2164_s14 = sshll.u32 (%p2465_p9), %s1626_s25, 2 }
  0x69   : > { %v1991_v37 = vor.u32 %v2189_v30, %v1988_v31  ;;  %s2815_s30 = scalar_lea.vmem (%p2465_p9), %s2909_s3, %s2164_s14 }
  0x75   : > { %944 = vmatmul.bf16.gmra.mxu0 %v1915_v10 }
  0x76   : > { %1033 = vmatmul.bf16.gmra.mxu1 %v1919_v11  ;;  %1122 = vmatmul.bf16.gmra.mxu2 %v1915_v10  ;;  %v1979_v10 = vor.u32 %v2188_v4, %v1978_v3 }
  0x77   : > { %1211 = vmatmul.bf16.gmra.mxu3 %v1919_v11 }
  0x85   : > { %949 = vmatmul.bf16.gmra.mxu0 %v1923_v16 }
  0x86   : > { %1038 = vmatmul.bf16.gmra.mxu1 %v1927_v17  ;;  %1127 = vmatmul.bf16.gmra.mxu2 %v1923_v16 }
  0x87   : > { %1216 = vmatmul.bf16.gmra.mxu3 %v1927_v17 }
  0x95   : > { %954 = vmatmul.bf16.gmra.mxu0 %v1931_v22 }
  0x96   : > { %1043 = vmatmul.bf16.gmra.mxu1 %v1935_v23  ;;  %1132 = vmatmul.bf16.gmra.mxu2 %v1931_v22 }
  0x97   : > { %1221 = vmatmul.bf16.gmra.mxu3 %v1935_v23 }
  0xa5   : > { %959 = vmatmul.bf16.gmra.mxu0 %v1939_v28 }
  0xa6   : > { %1048 = vmatmul.bf16.gmra.mxu1 %v1943_v29  ;;  %1137 = vmatmul.bf16.gmra.mxu2 %v1939_v28  ;;  %v2190_v28 = vld [vmem:[%s2624_s6 + $0xa4] sm:$0xf0] }
  0xa7   : > { %1226 = vmatmul.bf16.gmra.mxu3 %v1943_v29 }
  0xb5   : > { %964 = vmatmul.bf16.gmra.mxu0 %v1947_v34 }
  0xb6   : > { %1053 = vmatmul.bf16.gmra.mxu1 %v1951_v35  ;;  %1142 = vmatmul.bf16.gmra.mxu2 %v1947_v34  ;;  %v1987_v34 = vor.u32 %v2190_v28, %v1986_v27 }
  0xb7   : > { %1231 = vmatmul.bf16.gmra.mxu3 %v1951_v35 }
  0xc5   : > { %969 = vmatmul.bf16.gmra.mxu0 %v1955_v40 }
  0xc6   : > { %1058 = vmatmul.bf16.gmra.mxu1 %v1959_v41  ;;  %1147 = vmatmul.bf16.gmra.mxu2 %v1955_v40 }
  0xc7   : > { %1236 = vmatmul.bf16.gmra.mxu3 %v1959_v41 }
  0xd5   : > { %974 = vmatmul.bf16.gmra.mxu0 %v1963_v46 }
  0xd6   : > { %1063 = vmatmul.bf16.gmra.mxu1 %v1967_v47  ;;  %1152 = vmatmul.bf16.gmra.mxu2 %v1963_v46 }
  0xd7   : > { %1241 = vmatmul.bf16.gmra.mxu3 %v1967_v47 }
  0xe2   : > { %v940_v53 = vpop.f32.mrf.mxu0 }
  0xe3   : > { %v1029_v55 = vpop.f32.mrf.mxu1 }
  0xe4   : > { %v1030_v57 = vadd.f32 %v1029_v55, %v940_v53  ;;  %v1996_v55 = vld [vmem:[%s2624_s6 + $0xb8] sm:$0xf0] }
  0xe5   : > { %979 = vmatmul.bf16.gmra.mxu0 %v1971_v52 }
  0xe6   : > { %1068 = vmatmul.bf16.gmra.mxu1 %v1975_v54  ;;  %1157 = vmatmul.bf16.gmra.mxu2 %v1971_v52  ;;  %v1488_v63 = vadd.f32 %v2675_v58, %v1030_v57  ;;  %v2192_v52 = vld [vmem:[%s2624_s6 + $0xb4] sm:$0xf0] }
  0xe7   : > { %1246 = vmatmul.bf16.gmra.mxu3 %v1975_v54  ;;  %v2191_v54 = vld [vmem:[%s2624_s6 + $0xb4] sm:$0xf] }
  0xe9   : > { %v1118_v59 = vpop.f32.mrf.mxu2 }
  0xea   : > { %v1207_v61 = vpop.f32.mrf.mxu3  ;;  %v942_v62 = vpop.f32.mrf.mxu0 }
  0xeb   : > { %v1208_v0 = vadd.f32 %v1207_v61, %v1118_v59  ;;  %v1031_v1 = vpop.f32.mrf.mxu1  ;;  %v1995_v59 = vor.u32 %v2192_v52, %v1994_v51 }
  0xec   : > { %v1032_v8 = vadd.f32 %v1031_v1, %v942_v62 }
  0xed   : > { %v1489_v2 = vadd.f32 %v2678_v60, %v1208_v0 }
  0xee   : > { %v1490_v16 = vadd.f32 %v2675_v58, %v1032_v8 }
  0xef   : > { %v1552_v5 = vpack.c.bf16 %v1489_v2, %v1488_v63  ;;  %v1999_v63 = vor.u32 %v2191_v54, %v1996_v55 }
  0xf1   : > { %1584 = vst [vmem:[%s2686_s24] sm:$0xff] %v1552_v5  ;;  %v1120_v9 = vpop.f32.mrf.mxu2 }
  0xf2   : > { %v1209_v11 = vpop.f32.mrf.mxu3  ;;  %v945_v12 = vpop.f32.mrf.mxu0 }
  0xf3   : > { %v1210_v14 = vadd.f32 %v1209_v11, %v1120_v9  ;;  %v1034_v15 = vpop.f32.mrf.mxu1 }
  0xf4   : > { %v1035_v19 = vadd.f32 %v1034_v15, %v945_v12 }
  0xf5   : > { %v1491_v17 = vadd.f32 %v2678_v60, %v1210_v14  ;;  %984 = vmatmul.bf16.gmra.mxu0 %v1979_v10  ;;  %v2194_v14 = vld [vmem:[%s2624_s6 + $0xc4] sm:$0xf0] }
  0xf6   : > { %1073 = vmatmul.bf16.gmra.mxu1 %v1983_v13  ;;  %1162 = vmatmul.bf16.gmra.mxu2 %v1979_v10  ;;  %v1492_v23 = vadd.f32 %v2675_v58, %v1035_v19 }
  0xf7   : > { %v1553_v18 = vpack.c.bf16 %v1491_v17, %v1490_v16  ;;  %1251 = vmatmul.bf16.gmra.mxu3 %v1983_v13  ;;  %v2002_v13 = vld [vmem:[%s2624_s6 + $0xc0] sm:$0xf]  ;;  %v2193_v16 = vld [vmem:[%s2624_s6 + $0xc4] sm:$0xf]  ;;  %v2004_v17 = vld [vmem:[%s2624_s6 + $0xc8] sm:$0xf0] }
  0xf9   : > { %1585 = vst [vmem:[%s2686_s24 + $0x8] sm:$0xff] %v1553_v18  ;;  %v1123_v20 = vpop.f32.mrf.mxu2 }
  0xfa   : > { %v1212_v21 = vpop.f32.mrf.mxu3  ;;  %v947_v22 = vpop.f32.mrf.mxu0 }
  0xfb   : > { %v1213_v24 = vadd.f32 %v1212_v21, %v1123_v20  ;;  %v1036_v25 = vpop.f32.mrf.mxu1  ;;  %v2003_v20 = vor.u32 %v2194_v14, %v2002_v13 }
  0xfc   : > { %v1037_v32 = vadd.f32 %v1036_v25, %v947_v22 }
  0xfd   : > { %v1493_v26 = vadd.f32 %v2678_v60, %v1213_v24 }
  0xfe   : > { %v1494_v40 = vadd.f32 %v2675_v58, %v1037_v32 }
  0xff   : > { %v1554_v29 = vpack.c.bf16 %v1493_v26, %v1492_v23  ;;  %v2007_v23 = vor.u32 %v2193_v16, %v2004_v17 }
 0x101   : > { %1586 = vst [vmem:[%s2686_s24 + $0x10] sm:$0xff] %v1554_v29  ;;  %v1125_v33 = vpop.f32.mrf.mxu2 }
 0x102   : > { %v1214_v35 = vpop.f32.mrf.mxu3  ;;  %v950_v36 = vpop.f32.mrf.mxu0 }
 0x103   : > { %v1215_v38 = vadd.f32 %v1214_v35, %v1125_v33  ;;  %v1039_v39 = vpop.f32.mrf.mxu1 }
 0x104   : > { %v1040_v43 = vadd.f32 %v1039_v39, %v950_v36 }
 0x105   : > { %v1495_v41 = vadd.f32 %v2678_v60, %v1215_v38  ;;  %989 = vmatmul.bf16.gmra.mxu0 %v1987_v34  ;;  %v2196_v38 = vld [vmem:[%s2624_s6 + $0xd4] sm:$0xf0] }
 0x106   : > { %1078 = vmatmul.bf16.gmra.mxu1 %v1991_v37  ;;  %1167 = vmatmul.bf16.gmra.mxu2 %v1987_v34  ;;  %v1496_v47 = vadd.f32 %v2675_v58, %v1040_v43 }
 0x107   : > { %v1555_v42 = vpack.c.bf16 %v1495_v41, %v1494_v40  ;;  %1256 = vmatmul.bf16.gmra.mxu3 %v1991_v37  ;;  %v2010_v37 = vld [vmem:[%s2624_s6 + $0xd0] sm:$0xf]  ;;  %v2195_v40 = vld [vmem:[%s2624_s6 + $0xd4] sm:$0xf]  ;;  %v2012_v41 = vld [vmem:[%s2624_s6 + $0xd8] sm:$0xf0] }
 0x109   : > { %1587 = vst [vmem:[%s2686_s24 + $0x18] sm:$0xff] %v1555_v42  ;;  %v1128_v44 = vpop.f32.mrf.mxu2 }
 0x10a   : > { %v1217_v45 = vpop.f32.mrf.mxu3  ;;  %v952_v46 = vpop.f32.mrf.mxu0 }
 0x10b   : > { %v1218_v48 = vadd.f32 %v1217_v45, %v1128_v44  ;;  %v1041_v49 = vpop.f32.mrf.mxu1  ;;  %v2011_v44 = vor.u32 %v2196_v38, %v2010_v37 }
 0x10c   : > { %v1042_v56 = vadd.f32 %v1041_v49, %v952_v46 }
 0x10d   : > { %v1497_v50 = vadd.f32 %v2678_v60, %v1218_v48 }
 0x10e   : > { %v1498_v2 = vadd.f32 %v2675_v58, %v1042_v56 }
 0x10f   : > { %v1556_v53 = vpack.c.bf16 %v1497_v50, %v1496_v47  ;;  %v2015_v47 = vor.u32 %v2195_v40, %v2012_v41 }
 0x111   : > { %1588 = vst [vmem:[%s2686_s24 + $0x20] sm:$0xff] %v1556_v53  ;;  %v1130_v57 = vpop.f32.mrf.mxu2 }
 0x112   : > { %v1219_v61 = vpop.f32.mrf.mxu3  ;;  %v955_v62 = vpop.f32.mrf.mxu0 }
 0x113   : > { %v1220_v0 = vadd.f32 %v1219_v61, %v1130_v57  ;;  %v1044_v1 = vpop.f32.mrf.mxu1 }
 0x114   : > { %v1045_v5 = vadd.f32 %v1044_v1, %v955_v62 }
 0x115   : > { %v1499_v3 = vadd.f32 %v2678_v60, %v1220_v0  ;;  %994 = vmatmul.bf16.gmra.mxu0 %v1995_v59  ;;  %v2198_v0 = vld [vmem:[%s2624_s6 + $0xe4] sm:$0xf0] }
 0x116   : > { %1083 = vmatmul.bf16.gmra.mxu1 %v1999_v63  ;;  %1172 = vmatmul.bf16.gmra.mxu2 %v1995_v59  ;;  %v1500_v9 = vadd.f32 %v2675_v58, %v1045_v5 }
 0x117   : > { %v1557_v4 = vpack.c.bf16 %v1499_v3, %v1498_v2  ;;  %1261 = vmatmul.bf16.gmra.mxu3 %v1999_v63  ;;  %v2018_v63 = vld [vmem:[%s2624_s6 + $0xe0] sm:$0xf]  ;;  %v2197_v2 = vld [vmem:[%s2624_s6 + $0xe4] sm:$0xf]  ;;  %v2020_v3 = vld [vmem:[%s2624_s6 + $0xe8] sm:$0xf0] }
 0x119   : > { %1589 = vst [vmem:[%s2686_s24 + $0x28] sm:$0xff] %v1557_v4  ;;  %v1133_v6 = vpop.f32.mrf.mxu2 }
 0x11a   : > { %v1222_v7 = vpop.f32.mrf.mxu3  ;;  %v957_v8 = vpop.f32.mrf.mxu0 }
 0x11b   : > { %v1223_v10 = vadd.f32 %v1222_v7, %v1133_v6  ;;  %v1046_v11 = vpop.f32.mrf.mxu1  ;;  %v2019_v6 = vor.u32 %v2198_v0, %v2018_v63 }
 0x11c   : > { %v1047_v18 = vadd.f32 %v1046_v11, %v957_v8 }
 0x11d   : > { %v1501_v12 = vadd.f32 %v2678_v60, %v1223_v10 }
 0x11e   : > { %v1502_v26 = vadd.f32 %v2675_v58, %v1047_v18 }
 0x11f   : > { %v1558_v15 = vpack.c.bf16 %v1501_v12, %v1500_v9  ;;  %v2023_v9 = vor.u32 %v2197_v2, %v2020_v3 }
 0x121   : > { %1590 = vst [vmem:[%s2686_s24 + $0x30] sm:$0xff] %v1558_v15  ;;  %v1135_v19 = vpop.f32.mrf.mxu2 }
 0x122   : > { %v1224_v21 = vpop.f32.mrf.mxu3  ;;  %v960_v22 = vpop.f32.mrf.mxu0 }
 0x123   : > { %v1225_v24 = vadd.f32 %v1224_v21, %v1135_v19  ;;  %v1049_v25 = vpop.f32.mrf.mxu1 }
 0x124   : > { %v1050_v29 = vadd.f32 %v1049_v25, %v960_v22 }
 0x125   : > { %v1503_v27 = vadd.f32 %v2678_v60, %v1225_v24  ;;  %999 = vmatmul.bf16.gmra.mxu0 %v2003_v20  ;;  %v2200_v24 = vld [vmem:[%s2624_s6 + $0xf4] sm:$0xf0] }
 0x126   : > { %1088 = vmatmul.bf16.gmra.mxu1 %v2007_v23  ;;  %1177 = vmatmul.bf16.gmra.mxu2 %v2003_v20  ;;  %v1504_v33 = vadd.f32 %v2675_v58, %v1050_v29 }
 0x127   : > { %v1559_v28 = vpack.c.bf16 %v1503_v27, %v1502_v26  ;;  %1266 = vmatmul.bf16.gmra.mxu3 %v2007_v23  ;;  %v2026_v23 = vld [vmem:[%s2624_s6 + $0xf0] sm:$0xf]  ;;  %v2199_v26 = vld [vmem:[%s2624_s6 + $0xf4] sm:$0xf]  ;;  %v2028_v27 = vld [vmem:[%s2624_s6 + $0xf8] sm:$0xf0] }
 0x129   : > { %1591 = vst [vmem:[%s2686_s24 + $0x38] sm:$0xff] %v1559_v28  ;;  %v1138_v30 = vpop.f32.mrf.mxu2 }
 0x12a   : > { %v1227_v31 = vpop.f32.mrf.mxu3  ;;  %v962_v32 = vpop.f32.mrf.mxu0 }
 0x12b   : > { %v1228_v34 = vadd.f32 %v1227_v31, %v1138_v30  ;;  %v1051_v35 = vpop.f32.mrf.mxu1  ;;  %v2027_v30 = vor.u32 %v2200_v24, %v2026_v23 }
 0x12c   : > { %v1052_v42 = vadd.f32 %v1051_v35, %v962_v32 }
 0x12d   : > { %v1505_v36 = vadd.f32 %v2678_v60, %v1228_v34 }
 0x12e   : > { %v1506_v50 = vadd.f32 %v2675_v58, %v1052_v42 }
 0x12f   : > { %v1560_v39 = vpack.c.bf16 %v1505_v36, %v1504_v33  ;;  %v2031_v33 = vor.u32 %v2199_v26, %v2028_v27 }
 0x131   : > { %1592 = vst [vmem:[%s2686_s24 + $0x40] sm:$0xff] %v1560_v39  ;;  %v1140_v43 = vpop.f32.mrf.mxu2 }
 0x132   : > { %v1229_v45 = vpop.f32.mrf.mxu3  ;;  %v965_v46 = vpop.f32.mrf.mxu0 }
 0x133   : > { %v1230_v48 = vadd.f32 %v1229_v45, %v1140_v43  ;;  %v1054_v49 = vpop.f32.mrf.mxu1 }
 0x134   : > { %v1055_v53 = vadd.f32 %v1054_v49, %v965_v46 }
 0x135   : > { %v1507_v51 = vadd.f32 %v2678_v60, %v1230_v48  ;;  %1004 = vmatmul.bf16.gmra.mxu0 %v2011_v44 }
 0x136   : > { %1093 = vmatmul.bf16.gmra.mxu1 %v2015_v47  ;;  %1182 = vmatmul.bf16.gmra.mxu2 %v2011_v44  ;;  %v1508_v57 = vadd.f32 %v2675_v58, %v1055_v53 }
 0x137   : > { %v1561_v52 = vpack.c.bf16 %v1507_v51, %v1506_v50  ;;  %1271 = vmatmul.bf16.gmra.mxu3 %v2015_v47 }
 0x139   : > { %1593 = vst [vmem:[%s2686_s24 + $0x48] sm:$0xff] %v1561_v52  ;;  %v1143_v54 = vpop.f32.mrf.mxu2 }
 0x13a   : > { %v1232_v55 = vpop.f32.mrf.mxu3  ;;  %v967_v56 = vpop.f32.mrf.mxu0 }
 0x13b   : > { %v1233_v59 = vadd.f32 %v1232_v55, %v1143_v54  ;;  %v1056_v61 = vpop.f32.mrf.mxu1 }
 0x13c   : > { %v1057_v4 = vadd.f32 %v1056_v61, %v967_v56 }
 0x13d   : > { %v1509_v62 = vadd.f32 %v2678_v60, %v1233_v59 }
 0x13e   : > { %v1510_v12 = vadd.f32 %v2675_v58, %v1057_v4 }
 0x13f   : > { %v1562_v1 = vpack.c.bf16 %v1509_v62, %v1508_v57 }
 0x141   : > { %1594 = vst [vmem:[%s2686_s24 + $0x50] sm:$0xff] %v1562_v1  ;;  %v1145_v5 = vpop.f32.mrf.mxu2 }
 0x142   : > { %v1234_v7 = vpop.f32.mrf.mxu3  ;;  %v970_v8 = vpop.f32.mrf.mxu0 }
 0x143   : > { %v1235_v10 = vadd.f32 %v1234_v7, %v1145_v5  ;;  %v1059_v11 = vpop.f32.mrf.mxu1 }
 0x144   : > { %v1060_v15 = vadd.f32 %v1059_v11, %v970_v8 }
 0x145   : > { %v1511_v13 = vadd.f32 %v2678_v60, %v1235_v10  ;;  %1009 = vmatmul.bf16.gmra.mxu0 %v2019_v6 }
 0x146   : > { %1098 = vmatmul.bf16.gmra.mxu1 %v2023_v9  ;;  %1187 = vmatmul.bf16.gmra.mxu2 %v2019_v6  ;;  %v1512_v19 = vadd.f32 %v2675_v58, %v1060_v15 }
 0x147   : > { %v1563_v14 = vpack.c.bf16 %v1511_v13, %v1510_v12  ;;  %1276 = vmatmul.bf16.gmra.mxu3 %v2023_v9 }
 0x149   : > { %1595 = vst [vmem:[%s2686_s24 + $0x58] sm:$0xff] %v1563_v14  ;;  %v1148_v16 = vpop.f32.mrf.mxu2 }
 0x14a   : > { %v1237_v17 = vpop.f32.mrf.mxu3  ;;  %v972_v18 = vpop.f32.mrf.mxu0 }
 0x14b   : > { %v1238_v20 = vadd.f32 %v1237_v17, %v1148_v16  ;;  %v1061_v21 = vpop.f32.mrf.mxu1 }
 0x14c   : > { %v1062_v28 = vadd.f32 %v1061_v21, %v972_v18 }
 0x14d   : > { %v1513_v22 = vadd.f32 %v2678_v60, %v1238_v20 }
 0x14e   : > { %v1514_v36 = vadd.f32 %v2675_v58, %v1062_v28 }
 0x14f   : > { %v1564_v25 = vpack.c.bf16 %v1513_v22, %v1512_v19 }
 0x151   : > { %1596 = vst [vmem:[%s2686_s24 + $0x60] sm:$0xff] %v1564_v25  ;;  %v1150_v29 = vpop.f32.mrf.mxu2 }
 0x152   : > { %v1239_v31 = vpop.f32.mrf.mxu3  ;;  %v975_v32 = vpop.f32.mrf.mxu0 }
 0x153   : > { %v1240_v34 = vadd.f32 %v1239_v31, %v1150_v29  ;;  %v1064_v35 = vpop.f32.mrf.mxu1 }
 0x154   : > { %v1065_v39 = vadd.f32 %v1064_v35, %v975_v32 }
 0x155   : > { %v1515_v37 = vadd.f32 %v2678_v60, %v1240_v34  ;;  %1014 = vmatmul.bf16.gmra.mxu0 %v2027_v30 }
 0x156   : > { %1103 = vmatmul.bf16.gmra.mxu1 %v2031_v33  ;;  %1192 = vmatmul.bf16.gmra.mxu2 %v2027_v30  ;;  %v1516_v43 = vadd.f32 %v2675_v58, %v1065_v39 }
 0x157   : > { %v1565_v38 = vpack.c.bf16 %v1515_v37, %v1514_v36  ;;  %1281 = vmatmul.bf16.gmra.mxu3 %v2031_v33 }
 0x159   : > { %1597 = vst [vmem:[%s2686_s24 + $0x68] sm:$0xff] %v1565_v38  ;;  %v1153_v40 = vpop.f32.mrf.mxu2 }
 0x15a   : > { %v1242_v41 = vpop.f32.mrf.mxu3  ;;  %v977_v42 = vpop.f32.mrf.mxu0 }
 0x15b   : > { %v1243_v44 = vadd.f32 %v1242_v41, %v1153_v40  ;;  %v1066_v45 = vpop.f32.mrf.mxu1 }
 0x15c   : > { %v1067_v48 = vadd.f32 %v1066_v45, %v977_v42 }
 0x15d   : > { %v1517_v46 = vadd.f32 %v2678_v60, %v1243_v44 }
 0x15e   : > { %v1518_v54 = vadd.f32 %v2675_v58, %v1067_v48 }
 0x15f   : > { %v1566_v47 = vpack.c.bf16 %v1517_v46, %v1516_v43 }
 0x161   : > { %1598 = vst [vmem:[%s2686_s24 + $0x70] sm:$0xff] %v1566_v47  ;;  %v1155_v49 = vpop.f32.mrf.mxu2 }
 0x162   : > { %v1244_v50 = vpop.f32.mrf.mxu3  ;;  %v980_v51 = vpop.f32.mrf.mxu0 }
 0x163   : > { %v1245_v52 = vadd.f32 %v1244_v50, %v1155_v49  ;;  %v1069_v53 = vpop.f32.mrf.mxu1 }
 0x164   : > { %v1070_v57 = vadd.f32 %v1069_v53, %v980_v51 }
 0x165   : > { %v1519_v55 = vadd.f32 %v2678_v60, %v1245_v52 }
 0x166   : > { %v1520_v63 = vadd.f32 %v2675_v58, %v1070_v57 }
 0x167   : > { %v1567_v56 = vpack.c.bf16 %v1519_v55, %v1518_v54 }
 0x169   : > { %1599 = vst [vmem:[%s2686_s24 + $0x78] sm:$0xff] %v1567_v56  ;;  %v1158_v59 = vpop.f32.mrf.mxu2 }
 0x16a   : > { %v1247_v61 = vpop.f32.mrf.mxu3  ;;  %v982_v62 = vpop.f32.mrf.mxu0 }
 0x16b   : > { %v1248_v0 = vadd.f32 %v1247_v61, %v1158_v59  ;;  %v1071_v1 = vpop.f32.mrf.mxu1 }
 0x16c   : > { %v1072_v4 = vadd.f32 %v1071_v1, %v982_v62 }
 0x16d   : > { %v1521_v2 = vadd.f32 %v2678_v60, %v1248_v0 }
 0x16e   : > { %v1522_v10 = vadd.f32 %v2675_v58, %v1072_v4 }
 0x16f   : > { %v1568_v3 = vpack.c.bf16 %v1521_v2, %v1520_v63 }
 0x171   : > { %1600 = vst [vmem:[%s2686_s24 + $0x80] sm:$0xff] %v1568_v3  ;;  %v1160_v5 = vpop.f32.mrf.mxu2 }
 0x172   : > { %v1249_v6 = vpop.f32.mrf.mxu3  ;;  %v985_v7 = vpop.f32.mrf.mxu0 }
 0x173   : > { %v1250_v8 = vadd.f32 %v1249_v6, %v1160_v5  ;;  %v1074_v9 = vpop.f32.mrf.mxu1 }
 0x174   : > { %v1075_v13 = vadd.f32 %v1074_v9, %v985_v7 }
 0x175   : > { %v1523_v11 = vadd.f32 %v2678_v60, %v1250_v8 }
 0x176   : > { %v1524_v17 = vadd.f32 %v2675_v58, %v1075_v13 }
 0x177   : > { %v1569_v12 = vpack.c.bf16 %v1523_v11, %v1522_v10 }
 0x179   : > { %1601 = vst [vmem:[%s2686_s24 + $0x88] sm:$0xff] %v1569_v12  ;;  %v1163_v14 = vpop.f32.mrf.mxu2 }
 0x17a   : > { %v1252_v15 = vpop.f32.mrf.mxu3  ;;  %v987_v16 = vpop.f32.mrf.mxu0 }
 0x17b   : > { %v1253_v18 = vadd.f32 %v1252_v15, %v1163_v14  ;;  %v1076_v19 = vpop.f32.mrf.mxu1 }
 0x17c   : > { %v1077_v22 = vadd.f32 %v1076_v19, %v987_v16 }
 0x17d   : > { %v1525_v20 = vadd.f32 %v2678_v60, %v1253_v18 }
 0x17e   : > { %v1526_v28 = vadd.f32 %v2675_v58, %v1077_v22 }
 0x17f   : > { %v1570_v21 = vpack.c.bf16 %v1525_v20, %v1524_v17 }
 0x181   : > { %1602 = vst [vmem:[%s2686_s24 + $0x90] sm:$0xff] %v1570_v21  ;;  %v1165_v23 = vpop.f32.mrf.mxu2 }
 0x182   : > { %v1254_v24 = vpop.f32.mrf.mxu3  ;;  %v990_v25 = vpop.f32.mrf.mxu0 }
 0x183   : > { %v1255_v26 = vadd.f32 %v1254_v24, %v1165_v23  ;;  %v1079_v27 = vpop.f32.mrf.mxu1 }
 0x184   : > { %v1080_v31 = vadd.f32 %v1079_v27, %v990_v25 }
 0x185   : > { %v1527_v29 = vadd.f32 %v2678_v60, %v1255_v26 }
 0x186   : > { %v1528_v35 = vadd.f32 %v2675_v58, %v1080_v31 }
 0x187   : > { %v1571_v30 = vpack.c.bf16 %v1527_v29, %v1526_v28 }
 0x189   : > { %1603 = vst [vmem:[%s2686_s24 + $0x98] sm:$0xff] %v1571_v30  ;;  %v1168_v32 = vpop.f32.mrf.mxu2 }
 0x18a   : > { %v1257_v33 = vpop.f32.mrf.mxu3  ;;  %v992_v34 = vpop.f32.mrf.mxu0 }
 0x18b   : > { %v1258_v36 = vadd.f32 %v1257_v33, %v1168_v32  ;;  %v1081_v37 = vpop.f32.mrf.mxu1 }
 0x18c   : > { %v1082_v40 = vadd.f32 %v1081_v37, %v992_v34 }
 0x18d   : > { %v1529_v38 = vadd.f32 %v2678_v60, %v1258_v36 }
 0x18e   : > { %v1530_v46 = vadd.f32 %v2675_v58, %v1082_v40 }
 0x18f   : > { %v1572_v39 = vpack.c.bf16 %v1529_v38, %v1528_v35 }
 0x191   : > { %1604 = vst [vmem:[%s2686_s24 + $0xa0] sm:$0xff] %v1572_v39  ;;  %v1170_v41 = vpop.f32.mrf.mxu2 }
 0x192   : > { %v1259_v42 = vpop.f32.mrf.mxu3  ;;  %v995_v43 = vpop.f32.mrf.mxu0 }
 0x193   : > { %v1260_v44 = vadd.f32 %v1259_v42, %v1170_v41  ;;  %v1084_v45 = vpop.f32.mrf.mxu1 }
 0x194   : > { %v1085_v49 = vadd.f32 %v1084_v45, %v995_v43 }
 0x195   : > { %v1531_v47 = vadd.f32 %v2678_v60, %v1260_v44 }
 0x196   : > { %v1532_v53 = vadd.f32 %v2675_v58, %v1085_v49 }
 0x197   : > { %v1573_v48 = vpack.c.bf16 %v1531_v47, %v1530_v46 }
 0x199   : > { %1605 = vst [vmem:[%s2686_s24 + $0xa8] sm:$0xff] %v1573_v48  ;;  %v1173_v50 = vpop.f32.mrf.mxu2 }
 0x19a   : > { %v1262_v51 = vpop.f32.mrf.mxu3  ;;  %v997_v52 = vpop.f32.mrf.mxu0 }
 0x19b   : > { %v1263_v54 = vadd.f32 %v1262_v51, %v1173_v50  ;;  %v1086_v55 = vpop.f32.mrf.mxu1 }
 0x19c   : > { %v1087_v59 = vadd.f32 %v1086_v55, %v997_v52 }
 0x19d   : > { %v1533_v56 = vadd.f32 %v2678_v60, %v1263_v54 }
 0x19e   : > { %v1534_v2 = vadd.f32 %v2675_v58, %v1087_v59 }
 0x19f   : > { %v1574_v57 = vpack.c.bf16 %v1533_v56, %v1532_v53 }
 0x1a1   : > { %1606 = vst [vmem:[%s2686_s24 + $0xb0] sm:$0xff] %v1574_v57  ;;  %v1175_v61 = vpop.f32.mrf.mxu2 }
 0x1a2   : > { %v1264_v62 = vpop.f32.mrf.mxu3  ;;  %v1000_v63 = vpop.f32.mrf.mxu0 }
 0x1a3   : > { %v1265_v0 = vadd.f32 %v1264_v62, %v1175_v61  ;;  %v1089_v1 = vpop.f32.mrf.mxu1 }
 0x1a4   : > { %v1090_v5 = vadd.f32 %v1089_v1, %v1000_v63 }
 0x1a5   : > { %v1535_v3 = vadd.f32 %v2678_v60, %v1265_v0 }
 0x1a6   : > { %v1536_v9 = vadd.f32 %v2675_v58, %v1090_v5 }
 0x1a7   : > { %v1575_v4 = vpack.c.bf16 %v1535_v3, %v1534_v2 }
 0x1a9   : > { %1607 = vst [vmem:[%s2686_s24 + $0xb8] sm:$0xff] %v1575_v4  ;;  %v1178_v6 = vpop.f32.mrf.mxu2 }
 0x1aa   : > { %v1267_v7 = vpop.f32.mrf.mxu3  ;;  %v1002_v8 = vpop.f32.mrf.mxu0 }
 0x1ab   : > { %v1268_v10 = vadd.f32 %v1267_v7, %v1178_v6  ;;  %v1091_v11 = vpop.f32.mrf.mxu1 }
 0x1ac   : > { %v1092_v14 = vadd.f32 %v1091_v11, %v1002_v8 }
 0x1ad   : > { %v1537_v12 = vadd.f32 %v2678_v60, %v1268_v10 }
 0x1ae   : > { %v1538_v20 = vadd.f32 %v2675_v58, %v1092_v14  ;;  %v1725_v14 = vld [vmem:[%s2686_s24 + $0x18] sm:$0xff] (%p2465_p9) }
 0x1af   : > { %v1576_v13 = vpack.c.bf16 %v1537_v12, %v1536_v9  ;;  %1726 = vst [vmem:[%s2815_s30 + $0x48] sm:$0xff] (%p2465_p9), %v1725_v14 }
 0x1b1   : > { %1608 = vst [vmem:[%s2686_s24 + $0xc0] sm:$0xff] %v1576_v13  ;;  %v1180_v15 = vpop.f32.mrf.mxu2  ;;  %v1723_v13 = vld [vmem:[%s2686_s24 + $0x10] sm:$0xff] (%p2465_p9) }
 0x1b2   : > { %v1269_v16 = vpop.f32.mrf.mxu3  ;;  %v1005_v17 = vpop.f32.mrf.mxu0  ;;  %1724 = vst [vmem:[%s2815_s30 + $0x30] sm:$0xff] (%p2465_p9), %v1723_v13 }
 0x1b3   : > { %v1270_v18 = vadd.f32 %v1269_v16, %v1180_v15  ;;  %v1094_v19 = vpop.f32.mrf.mxu1  ;;  %v1727_v15 = vld [vmem:[%s2686_s24 + $0x20] sm:$0xff] (%p2465_p9)  ;;  %v1729_v16 = vld [vmem:[%s2686_s24 + $0x28] sm:$0xff] (%p2465_p9) }
 0x1b4   : > { %v1095_v23 = vadd.f32 %v1094_v19, %v1005_v17  ;;  %v1731_v17 = vld [vmem:[%s2686_s24 + $0x30] sm:$0xff] (%p2465_p9)  ;;  %1728 = vst [vmem:[%s2815_s30 + $0x60] sm:$0xff] (%p2465_p9), %v1727_v15  ;;  %v1735_v19 = vld [vmem:[%s2686_s24 + $0x40] sm:$0xff] (%p2465_p9) }
 0x1b5   : > { %v1539_v21 = vadd.f32 %v2678_v60, %v1270_v18  ;;  %v1733_v18 = vld [vmem:[%s2686_s24 + $0x38] sm:$0xff] (%p2465_p9)  ;;  %1730 = vst [vmem:[%s2815_s30 + $0x78] sm:$0xff] (%p2465_p9), %v1729_v16 }
 0x1b6   : > { %v1540_v27 = vadd.f32 %v2675_v58, %v1095_v23  ;;  %1732 = vst [vmem:[%s2815_s30 + $0x90] sm:$0xff] (%p2465_p9), %v1731_v17  ;;  %v1743_v23 = vld [vmem:[%s2686_s24 + $0x60] sm:$0xff] (%p2465_p9) }
 0x1b7   : > { %v1577_v22 = vpack.c.bf16 %v1539_v21, %v1538_v20  ;;  %v1737_v20 = vld [vmem:[%s2686_s24 + $0x48] sm:$0xff] (%p2465_p9)  ;;  %1734 = vst [vmem:[%s2815_s30 + $0xa8] sm:$0xff] (%p2465_p9), %v1733_v18  ;;  %v1739_v21 = vld [vmem:[%s2686_s24 + $0x50] sm:$0xff] (%p2465_p9) }
 0x1b8   : > { %1736 = vst [vmem:[%s2815_s30 + $0xc0] sm:$0xff] (%p2465_p9), %v1735_v19 }
 0x1b9   : > { %1609 = vst [vmem:[%s2686_s24 + $0xc8] sm:$0xff] %v1577_v22  ;;  %v1183_v24 = vpop.f32.mrf.mxu2  ;;  %v1741_v22 = vld [vmem:[%s2686_s24 + $0x58] sm:$0xff] (%p2465_p9) }
 0x1ba   : > { %v1272_v25 = vpop.f32.mrf.mxu3  ;;  %v1007_v26 = vpop.f32.mrf.mxu0  ;;  %1738 = vst [vmem:[%s2815_s30 + $0xd8] sm:$0xff] (%p2465_p9), %v1737_v20 }
 0x1bb   : > { %v1273_v28 = vadd.f32 %v1272_v25, %v1183_v24  ;;  %v1096_v29 = vpop.f32.mrf.mxu1  ;;  %1740 = vst [vmem:[%s2815_s30 + $0xf0] sm:$0xff] (%p2465_p9), %v1739_v21  ;;  %v1745_v24 = vld [vmem:[%s2686_s24 + $0x68] sm:$0xff] (%p2465_p9)  ;;  %v1747_v25 = vld [vmem:[%s2686_s24 + $0x70] sm:$0xff] (%p2465_p9) }
 0x1bc   : > { %v1097_v32 = vadd.f32 %v1096_v29, %v1007_v26  ;;  %1742 = vst [vmem:[%s2815_s30 + $0x108] sm:$0xff] (%p2465_p9), %v1741_v22  ;;  %v1749_v26 = vld [vmem:[%s2686_s24 + $0x78] sm:$0xff] (%p2465_p9)  ;;  %v1755_v29 = vld [vmem:[%s2686_s24 + $0x90] sm:$0xff] (%p2465_p9) }
 0x1bd   : > { %v1541_v30 = vadd.f32 %v2678_v60, %v1273_v28  ;;  %1744 = vst [vmem:[%s2815_s30 + $0x120] sm:$0xff] (%p2465_p9), %v1743_v23  ;;  %v1753_v28 = vld [vmem:[%s2686_s24 + $0x88] sm:$0xff] (%p2465_p9) }
 0x1be   : > { %v1542_v38 = vadd.f32 %v2675_v58, %v1097_v32  ;;  %1746 = vst [vmem:[%s2815_s30 + $0x138] sm:$0xff] (%p2465_p9), %v1745_v24  ;;  %v1761_v32 = vld [vmem:[%s2686_s24 + $0xa8] sm:$0xff] (%p2465_p9) }
 0x1bf   : > { %v1578_v31 = vpack.c.bf16 %v1541_v30, %v1540_v27  ;;  %v1751_v27 = vld [vmem:[%s2686_s24 + $0x80] sm:$0xff] (%p2465_p9)  ;;  %1748 = vst [vmem:[%s2815_s30 + $0x150] sm:$0xff] (%p2465_p9), %v1747_v25  ;;  %v1757_v30 = vld [vmem:[%s2686_s24 + $0x98] sm:$0xff] (%p2465_p9) }
 0x1c0   : > { %1750 = vst [vmem:[%s2815_s30 + $0x168] sm:$0xff] (%p2465_p9), %v1749_v26 }
 0x1c1   : > { %1610 = vst [vmem:[%s2686_s24 + $0xd0] sm:$0xff] %v1578_v31  ;;  %v1185_v33 = vpop.f32.mrf.mxu2  ;;  %v1759_v31 = vld [vmem:[%s2686_s24 + $0xa0] sm:$0xff] (%p2465_p9) }
 0x1c2   : > { %v1274_v34 = vpop.f32.mrf.mxu3  ;;  %v1010_v35 = vpop.f32.mrf.mxu0  ;;  %1752 = vst [vmem:[%s2815_s30 + $0x180] sm:$0xff] (%p2465_p9), %v1751_v27 }
 0x1c3   : > { %v1275_v36 = vadd.f32 %v1274_v34, %v1185_v33  ;;  %v1099_v37 = vpop.f32.mrf.mxu1  ;;  %1754 = vst [vmem:[%s2815_s30 + $0x198] sm:$0xff] (%p2465_p9), %v1753_v28  ;;  %v1763_v33 = vld [vmem:[%s2686_s24 + $0xb0] sm:$0xff] (%p2465_p9)  ;;  %v1765_v34 = vld [vmem:[%s2686_s24 + $0xb8] sm:$0xff] (%p2465_p9) }
 0x1c4   : > { %v1100_v41 = vadd.f32 %v1099_v37, %v1010_v35  ;;  %1756 = vst [vmem:[%s2815_s30 + $0x1b0] sm:$0xff] (%p2465_p9), %v1755_v29  ;;  %v1767_v35 = vld [vmem:[%s2686_s24 + $0xc0] sm:$0xff] (%p2465_p9) }
 0x1c5   : > { %v1543_v39 = vadd.f32 %v2678_v60, %v1275_v36  ;;  %1758 = vst [vmem:[%s2815_s30 + $0x1c8] sm:$0xff] (%p2465_p9), %v1757_v30  ;;  %v1769_v36 = vld [vmem:[%s2686_s24 + $0xc8] sm:$0xff] (%p2465_p9) }
 0x1c6   : > { %v1544_v45 = vadd.f32 %v2675_v58, %v1100_v41  ;;  %1760 = vst [vmem:[%s2815_s30 + $0x1e0] sm:$0xff] (%p2465_p9), %v1759_v31 }
 0x1c7   : > { %v1579_v40 = vpack.c.bf16 %v1543_v39, %v1542_v38  ;;  %1762 = vst [vmem:[%s2815_s30 + $0x1f8] sm:$0xff] (%p2465_p9), %v1761_v32 }
 0x1c8   : > { %1764 = vst [vmem:[%s2815_s30 + $0x210] sm:$0xff] (%p2465_p9), %v1763_v33  ;;  %v1771_v37 = vld [vmem:[%s2686_s24 + $0xd0] sm:$0xff] (%p2465_p9) }
 0x1c9   : > { %1611 = vst [vmem:[%s2686_s24 + $0xd8] sm:$0xff] %v1579_v40  ;;  %v1188_v42 = vpop.f32.mrf.mxu2 }
 0x1ca   : > { %v1277_v43 = vpop.f32.mrf.mxu3  ;;  %v1012_v44 = vpop.f32.mrf.mxu0  ;;  %1766 = vst [vmem:[%s2815_s30 + $0x228] sm:$0xff] (%p2465_p9), %v1765_v34 }
 0x1cb   : > { %v1278_v46 = vadd.f32 %v1277_v43, %v1188_v42  ;;  %v1101_v47 = vpop.f32.mrf.mxu1  ;;  %1768 = vst [vmem:[%s2815_s30 + $0x240] sm:$0xff] (%p2465_p9), %v1767_v35 }
 0x1cc   : > { %v1102_v50 = vadd.f32 %v1101_v47, %v1012_v44  ;;  %1770 = vst [vmem:[%s2815_s30 + $0x258] sm:$0xff] (%p2465_p9), %v1769_v36 }
 0x1cd   : > { %v1545_v48 = vadd.f32 %v2678_v60, %v1278_v46  ;;  %1772 = vst [vmem:[%s2815_s30 + $0x270] sm:$0xff] (%p2465_p9), %v1771_v37 }
 0x1ce   : > { %v1546_v56 = vadd.f32 %v2675_v58, %v1102_v50 }
 0x1cf   : > { %v1580_v49 = vpack.c.bf16 %v1545_v48, %v1544_v45 }
 0x1d0   : > { %v1773_v38 = vld [vmem:[%s2686_s24 + $0xd8] sm:$0xff] (%p2465_p9) }
 0x1d1   : > { %1612 = vst [vmem:[%s2686_s24 + $0xe0] sm:$0xff] %v1580_v49  ;;  %v1190_v51 = vpop.f32.mrf.mxu2 }
 0x1d2   : > { %v1279_v52 = vpop.f32.mrf.mxu3  ;;  %v1015_v54 = vpop.f32.mrf.mxu0  ;;  %1774 = vst [vmem:[%s2815_s30 + $0x288] sm:$0xff] (%p2465_p9), %v1773_v38 }
 0x1d3   : > { %v1280_v53 = vadd.f32 %v1279_v52, %v1190_v51  ;;  %v1104_v55 = vpop.f32.mrf.mxu1 }
 0x1d4   : > { %v1105_v61 = vadd.f32 %v1104_v55, %v1015_v54 }
 0x1d5   : > { %v1547_v57 = vadd.f32 %v2678_v60, %v1280_v53 }
 0x1d6   : > { %v1548_v0 = vadd.f32 %v2675_v58, %v1105_v61 }
 0x1d7   : > { %v1581_v59 = vpack.c.bf16 %v1547_v57, %v1546_v56 }
 0x1d8   : > { %v1775_v39 = vld [vmem:[%s2686_s24 + $0xe0] sm:$0xff] (%p2465_p9) }
 0x1d9   : > { %1613 = vst [vmem:[%s2686_s24 + $0xe8] sm:$0xff] %v1581_v59  ;;  %v1193_v62 = vpop.f32.mrf.mxu2 }
 0x1da   : > { %v1282_v63 = vpop.f32.mrf.mxu3  ;;  %v1017_v3 = vpop.f32.mrf.mxu0  ;;  %1776 = vst [vmem:[%s2815_s30 + $0x2a0] sm:$0xff] (%p2465_p9), %v1775_v39 }
 0x1db   : > { %v1283_v1 = vadd.f32 %v1282_v63, %v1193_v62  ;;  %v1106_v4 = vpop.f32.mrf.mxu1 }
 0x1dc   : > { %v1107_v6 = vadd.f32 %v1106_v4, %v1017_v3 }
 0x1dd   : > { %v1549_v2 = vadd.f32 %v2678_v60, %v1283_v1 }
 0x1de   : > { %v1550_v10 = vadd.f32 %v2675_v58, %v1107_v6  ;;  %v1719_v58 = vld [vmem:[%s2686_s24] sm:$0xff] (%p2465_p9) }
 0x1df   : > { %v1582_v5 = vpack.c.bf16 %v1549_v2, %v1548_v0  ;;  %1720 = vst [vmem:[%s2815_s30] sm:$0xff] (%p2465_p9), %v1719_v58 }
 0x1e0   : > { %v1777_v40 = vld [vmem:[%s2686_s24 + $0xe8] sm:$0xff] (%p2465_p9) }
 0x1e1   : > { %1614 = vst [vmem:[%s2686_s24 + $0xf0] sm:$0xff] %v1582_v5  ;;  %v1195_v7 = vpop.f32.mrf.mxu2 }
 0x1e2   : > { %v1284_v8 = vpop.f32.mrf.mxu3  ;;  %1778 = vst [vmem:[%s2815_s30 + $0x2b8] sm:$0xff] (%p2465_p9), %v1777_v40 }
 0x1e3   : > { %v1285_v9 = vadd.f32 %v1284_v8, %v1195_v7 }
 0x1e5   : > { %v1551_v11 = vadd.f32 %v2678_v60, %v1285_v9  ;;  %1622 = sbr.rel (!%p2465_p9) target bundleno = 498 (0x1f2), region = 82  ;;  %v1721_v60 = vld [vmem:[%s2686_s24 + $0x8] sm:$0xff] (%p2465_p9) }
 0x1e6   : > { %1722 = vst [vmem:[%s2815_s30 + $0x18] sm:$0xff] (%p2465_p9), %v1721_v60 }
 0x1e7   : > { %v1583_v12 = vpack.c.bf16 %v1551_v11, %v1550_v10 }
 0x1e8   : > { %v1779_v41 = vld [vmem:[%s2686_s24 + $0xf0] sm:$0xff] (%p2465_p9) }
 0x1e9   : > { %1615 = vst [vmem:[%s2686_s24 + $0xf8] sm:$0xff] %v1583_v12 }
 0x1ea   : > { %1780 = vst [vmem:[%s2815_s30 + $0x2d0] sm:$0xff] %v1779_v41 }
 0x1f0   : > { %v1781_v42 = vld [vmem:[%s2686_s24 + $0xf8] sm:$0xff] }
 0x1f1   : > { %1782 = vst [vmem:[%s2815_s30 + $0x2e8] sm:$0xff] %v1781_v42 }
 0x1f2 PF: > { %s13_s20 = sadd.s32 1, %s2376_s20   ;;  %s2912_s12 = smov %s2348_s13 }
 0x1f3   : > { %p10_p2 = scmp.ge.s32.totalorder %s13_s20, 8   ;;  %s2913_s13 = smov %s2470_s4 }
 0x1f4   : > { %s2914_s14 = smov %s2356_s15  ;;  %s2915_s15 = smov %s2459_s27 }
 0x1f5   : > { %s2916_s16 = smov %s2368_s18  ;;  %s2917_s17 = smov %s2372_s19 }
 0x1f6   : > { %s2918_s18 = smov %s2921_s22  ;;  %s2919_s19 = smov %s2925_s23 }
 0x1f7   :  { %12 = sbr.rel (!%p10_p2) target bundleno = 5 (0x5), region = 157 }

// kernel: attention_forward.5
= control target key start
LH: loop header
LB: loop body
LE: loop exit
PB: predicated region body
PF: predicated region fallthrough
CT: control target
= control target key end

     0   :  { %8 = vsyncpa [#allocation4], 0  ;;  %s2603_s0 = inlined_call_operand.vmem [shape: bf16[512,256], index: 0, kind: input, shape index: {}]   ;;  %s2604_s1 = inlined_call_operand.vmem [shape: bf16[256,256], index: 1, kind: input, shape index: {}]   ;;  %s2605_s2 = inlined_call_operand.vmem [shape: f32[1,256], index: 2, kind: input, shape index: {}]   ;;  %s2606_s3 = inlined_call_operand.hbm [shape: f32[512,256], index: 3, kind: output, shape index: {}]  }
   0x1   :  { %10 = vsyncpa [#allocation4 + $0x1], 0  ;;  %s2107_s12 = smov 0   ;;  %s2109_s13 = smov 0  }
   0x2   :  { %s2111_s14 = smov 0   ;;  %s2113_s15 = smov 0  }
   0x3   :  { %s2115_s16 = smov 0   ;;  %s2117_s17 = smov 0  }
   0x4 LB: > { %s1608_s18 = sadd.s32 4294967295, %s2083_s17   ;;  %s1609_s19 = sadd.s32 4294967294, %s2083_s17   ;;  %s2083_s17 = sphi %s2117_s17, %s16_s17   ;;  %s2079_s16 = sphi %s2115_s16, %s2613_s16   ;;  %s2075_s15 = sphi %s2113_s15, %s2612_s15   ;;  %s2071_s14 = sphi %s2111_s14, %s2611_s14   ;;  %s2067_s13 = sphi %s2109_s13, %s2610_s13   ;;  %s2063_s12 = sphi %s2107_s12, %s2609_s12  }
   0x5   : > { %s35_s20 = sadd.s32 1, %s2079_s16  ;;  %s126_s21 = sadd.s32 1, %s2071_s14 }
   0x6   : > { %p37_p0 = scmp.ge.s32.totalorder %s35_s20, 2  ;;  %p136_p1 = scmp.ne.s32.totalorder %s2071_s14, %s2067_s13 }
   0x7   : > { %p137_p2 = scmp.eq.s32.totalorder %s1608_s18, 1  ;;  %p142_p3 = scmp.ne.s32.totalorder %s2067_s13, %s2063_s12 }
   0x8   : > { %s2615_s20 = smov (%p37_p0, %s35_s20), 0  ;;  %p143_p5 = scmp.eq.s32.totalorder %s1609_s19, 1 }
   0x9   : > { %p2147_p4 = por %p137_p2, %p136_p1  ;;  %s121_s23 = ssub.s32 %s2079_s16, %s2615_s20 }
   0xa   : > { %p1614_p6 = scmp.ge.s32.totalorder %s2083_s17, 1  ;;  %p124_p7 = scmp.eq.s32.totalorder %s121_s23, 0 }
   0xb   : > { %p2154_p8 = por %p143_p5, %p142_p3  ;;  %p199_p9 = scmp.lt.s32.totalorder %s2083_s17, 3 }
   0xc   : > { %s2160_s25 = scalar_select %p124_p7, %s2071_s14, %s126_s21  }
   0xd   : > { %p200_p10 = pnand %p1614_p6, %p199_p9 }
   0xe   : > { %s1616_s5 = sshll.u32 (!%p200_p10), %s2075_s15, 5  ;;  %s1947_s28 = sshll.u32 (!%p200_p10), %s2075_s15, 9 }
   0xf   : > { %203 = sbr.rel (%p200_p10) target bundleno = 444 (0x1bc), region = 32  ;;  %p244_p11 = scmp.lt.s32.totalorder (!%p200_p10), %s1616_s5, 63 }
  0x10   : > { %s1489_s4 = scalar_lea.hbm (!%p200_p10), %s2606_s3, %s1947_s28  ;;  %s2025_s18 = scalar_lea.hbm (!%p200_p10), %s2606_s3, 1024 }
  0x11   : > { %s1492_s7 = sshll.u32 (!%p200_p10), %s1489_s4, 4  ;;  %s1493_s7 = int_to_ptr.hbm [resolvable:$true] %s1492_s7 }
  0x12   : > { %s2019_s8 = sshra.s32 (!%p200_p10), %s1493_s7, 4  ;;  %s2020_s8 = int_to_ptr.hbm [resolvable:$true] %s2019_s8 }
  0x13   : > { %s2021_s9 = scalar_lea.hbm (!%p200_p10), %s2020_s8, 512  ;;  %p2026_p1 = scmp.lt.s32.totalorder (!%p200_p10), %s2020_s8, %s2606_s3 }
  0x14   : > { %v1805_v0 = vld [vmem:[%s2604_s1 + $0x70] sm:$0xf]  ;;  %v1929_v1 = vld [vmem:[%s2604_s1 + $0x74] sm:$0xf0]  ;;  %v1928_v5 = vld [vmem:[%s2604_s1 + $0x74] sm:$0xf]  ;;  %p2022_p12 = scmp.ne.s32.totalorder %s2020_s8, %s2021_s9  ;;  %p2027_p2 = scmp.lt.s32.totalorder %s2025_s18, %s2021_s9 }
  0x15   : > { %v1869_v2 = vld [vmem:[%s2604_s1 + $0xf0] sm:$0xf]  ;;  %v1806_v3 = vor.u32 %v1929_v1, %v1805_v0  ;;  %v1945_v4 = vld [vmem:[%s2604_s1 + $0xf4] sm:$0xf0]  ;;  %v1807_v6 = vld [vmem:[%s2604_s1 + $0x78] sm:$0xf0] }
  0x16   : > { %v1870_v7 = vor.u32 %v1945_v4, %v1869_v2  ;;  %v1810_v8 = vor.u32 %v1928_v5, %v1807_v6  ;;  %v1944_v9 = vld [vmem:[%s2604_s1 + $0xf4] sm:$0xf]  ;;  %v1871_v10 = vld [vmem:[%s2604_s1 + $0xf8] sm:$0xf0]  ;;  %v1797_v11 = vld [vmem:[%s2604_s1 + $0x60] sm:$0xf]  ;;  %p2023_p13 = pnand %p2022_p12, %p2147_p4  ;;  %p2028_p3 = por %p2027_p2, %p2026_p1 }
  0x17   : > { %789 = vmatpush.bf16.msra.mxu0 %v1806_v3  ;;  %v1874_v12 = vor.u32 %v1944_v9, %v1871_v10  ;;  %v1927_v13 = vld [vmem:[%s2604_s1 + $0x64] sm:$0xf0]  ;;  %v1861_v14 = vld [vmem:[%s2604_s1 + $0xe0] sm:$0xf]  ;;  %v1926_v18 = vld [vmem:[%s2604_s1 + $0x64] sm:$0xf] }
  0x18   : > { %v1943_v15 = vld [vmem:[%s2604_s1 + $0xe4] sm:$0xf0]  ;;  %878 = vmatpush.bf16.msra.mxu1 %v1870_v7  ;;  %967 = vmatpush.bf16.msra.mxu2 %v1810_v8  ;;  %v1798_v16 = vor.u32 %v1927_v13, %v1797_v11  ;;  %v1799_v19 = vld [vmem:[%s2604_s1 + $0x68] sm:$0xf0]  ;;  %v1942_v20 = vld [vmem:[%s2604_s1 + $0xe4] sm:$0xf]  ;;  %p2024_p0 = pneg %p2023_p13 }
  0x19   : > { %v1862_v17 = vor.u32 %v1943_v15, %v1861_v14  ;;  %1056 = vmatpush.bf16.msra.mxu3 %v1874_v12  ;;  %v1802_v21 = vor.u32 %v1926_v18, %v1799_v19  ;;  %v1863_v22 = vld [vmem:[%s2604_s1 + $0xe8] sm:$0xf0]  ;;  %v1789_v23 = vld [vmem:[%s2604_s1 + $0x50] sm:$0xf]  ;;  %v1925_v24 = vld [vmem:[%s2604_s1 + $0x54] sm:$0xf0] }
  0x1a   : > { %v1866_v25 = vor.u32 %v1942_v20, %v1863_v22  ;;  %v1853_v26 = vld [vmem:[%s2604_s1 + $0xd0] sm:$0xf]  ;;  %v1941_v27 = vld [vmem:[%s2604_s1 + $0xd4] sm:$0xf0]  ;;  %v1924_v28 = vld [vmem:[%s2604_s1 + $0x54] sm:$0xf]  ;;  %v1790_v29 = vor.u32 %v1925_v24, %v1789_v23  ;;  %p2029_p5 = pnand %p2028_p3, %p2024_p0 }
  0x1b   : > { %790 = vmatpush.bf16.msra.mxu0 %v1798_v16  ;;  %v1791_v30 = vld [vmem:[%s2604_s1 + $0x58] sm:$0xf0]  ;;  %v1940_v31 = vld [vmem:[%s2604_s1 + $0xd4] sm:$0xf]  ;;  %v1854_v33 = vor.u32 %v1941_v27, %v1853_v26  ;;  %v1781_v35 = vld [vmem:[%s2604_s1 + $0x40] sm:$0xf] }
  0x1c   : > { %v1855_v32 = vld [vmem:[%s2604_s1 + $0xd8] sm:$0xf0]  ;;  %879 = vmatpush.bf16.msra.mxu1 %v1862_v17  ;;  %968 = vmatpush.bf16.msra.mxu2 %v1802_v21  ;;  %v1794_v34 = vor.u32 %v1924_v28, %v1791_v30  ;;  %v1923_v36 = vld [vmem:[%s2604_s1 + $0x44] sm:$0xf0]  ;;  %v1845_v37 = vld [vmem:[%s2604_s1 + $0xc0] sm:$0xf] }
  0x1d   : > { %1057 = vmatpush.bf16.msra.mxu3 %v1866_v25  ;;  %v1858_v38 = vor.u32 %v1940_v31, %v1855_v32  ;;  %v1939_v39 = vld [vmem:[%s2604_s1 + $0xc4] sm:$0xf0]  ;;  %v1922_v40 = vld [vmem:[%s2604_s1 + $0x44] sm:$0xf]  ;;  %v1783_v41 = vld [vmem:[%s2604_s1 + $0x48] sm:$0xf0]  ;;  %v1782_v44 = vor.u32 %v1923_v36, %v1781_v35 }
  0x1e   : > { %v1938_v42 = vld [vmem:[%s2604_s1 + $0xc4] sm:$0xf]  ;;  %v1847_v43 = vld [vmem:[%s2604_s1 + $0xc8] sm:$0xf0]  ;;  %v1846_v45 = vor.u32 %v1939_v39, %v1845_v37  ;;  %v1786_v46 = vor.u32 %v1922_v40, %v1783_v41  ;;  %v1773_v47 = vld [vmem:[%s2604_s1 + $0x30] sm:$0xf] }
  0x1f   : > { %791 = vmatpush.bf16.msra.mxu0 %v1790_v29  ;;  %v1921_v48 = vld [vmem:[%s2604_s1 + $0x34] sm:$0xf0]  ;;  %v1837_v49 = vld [vmem:[%s2604_s1 + $0xb0] sm:$0xf]  ;;  %v1850_v50 = vor.u32 %v1938_v42, %v1847_v43  ;;  %v1920_v52 = vld [vmem:[%s2604_s1 + $0x34] sm:$0xf] }
  0x20   : > { %880 = vmatpush.bf16.msra.mxu1 %v1854_v33  ;;  %969 = vmatpush.bf16.msra.mxu2 %v1794_v34  ;;  %v1937_v51 = vld [vmem:[%s2604_s1 + $0xb4] sm:$0xf0]  ;;  %v1775_v53 = vld [vmem:[%s2604_s1 + $0x38] sm:$0xf0]  ;;  %v1936_v54 = vld [vmem:[%s2604_s1 + $0xb4] sm:$0xf]  ;;  %v1774_v56 = vor.u32 %v1921_v48, %v1773_v47 }
  0x21   : > { %1058 = vmatpush.bf16.msra.mxu3 %v1858_v38  ;;  %v1839_v55 = vld [vmem:[%s2604_s1 + $0xb8] sm:$0xf0]  ;;  %v1838_v57 = vor.u32 %v1937_v51, %v1837_v49  ;;  %v1778_v58 = vor.u32 %v1920_v52, %v1775_v53  ;;  %v1765_v59 = vld [vmem:[%s2604_s1 + $0x20] sm:$0xf]  ;;  %v1919_v60 = vld [vmem:[%s2604_s1 + $0x24] sm:$0xf0] }
  0x22   : > { %v1829_v61 = vld [vmem:[%s2604_s1 + $0xa0] sm:$0xf]  ;;  %v1842_v62 = vor.u32 %v1936_v54, %v1839_v55  ;;  %v1935_v63 = vld [vmem:[%s2604_s1 + $0xa4] sm:$0xf0]  ;;  %v1918_v0 = vld [vmem:[%s2604_s1 + $0x24] sm:$0xf]  ;;  %v1766_v4 = vor.u32 %v1919_v60, %v1765_v59 }
  0x23   : > { %792 = vmatpush.bf16.msra.mxu0 %v1782_v44  ;;  %v1767_v1 = vld [vmem:[%s2604_s1 + $0x28] sm:$0xf0]  ;;  %v1934_v2 = vld [vmem:[%s2604_s1 + $0xa4] sm:$0xf]  ;;  %v1757_v5 = vld [vmem:[%s2604_s1 + $0x10] sm:$0xf]  ;;  %v1830_v6 = vor.u32 %v1935_v63, %v1829_v61 }
  0x24   : > { %881 = vmatpush.bf16.msra.mxu1 %v1846_v45  ;;  %970 = vmatpush.bf16.msra.mxu2 %v1786_v46  ;;  %v1831_v3 = vld [vmem:[%s2604_s1 + $0xa8] sm:$0xf0]  ;;  %v1770_v7 = vor.u32 %v1918_v0, %v1767_v1  ;;  %v1917_v8 = vld [vmem:[%s2604_s1 + $0x14] sm:$0xf0]  ;;  %v1821_v9 = vld [vmem:[%s2604_s1 + $0x90] sm:$0xf] }
  0x25   : > { %1059 = vmatpush.bf16.msra.mxu3 %v1850_v50  ;;  %v1933_v10 = vld [vmem:[%s2604_s1 + $0x94] sm:$0xf0]  ;;  %v1834_v11 = vor.u32 %v1934_v2, %v1831_v3  ;;  %v1916_v12 = vld [vmem:[%s2604_s1 + $0x14] sm:$0xf]  ;;  %v1759_v13 = vld [vmem:[%s2604_s1 + $0x18] sm:$0xf0]  ;;  %v1758_v16 = vor.u32 %v1917_v8, %v1757_v5 }
  0x26   : > { %v1932_v14 = vld [vmem:[%s2604_s1 + $0x94] sm:$0xf]  ;;  %v1823_v15 = vld [vmem:[%s2604_s1 + $0x98] sm:$0xf0]  ;;  %v1749_v17 = vld [vmem:[%s2604_s1] sm:$0xf]  ;;  %v1822_v18 = vor.u32 %v1933_v10, %v1821_v9  ;;  %v1762_v19 = vor.u32 %v1916_v12, %v1759_v13 }
  0x27   : > { %793 = vmatpush.bf16.msra.mxu0 %v1774_v56  ;;  %v1915_v20 = vld [vmem:[%s2604_s1 + $0x4] sm:$0xf0]  ;;  %v1813_v21 = vld [vmem:[%s2604_s1 + $0x80] sm:$0xf]  ;;  %s2617_s5 = smov (!%p244_p11, %s1616_s5), 63  ;;  %v1826_v22 = vor.u32 %v1932_v14, %v1823_v15 }
  0x28   : > { %882 = vmatpush.bf16.msra.mxu1 %v1838_v57  ;;  %971 = vmatpush.bf16.msra.mxu2 %v1778_v58  ;;  %v1931_v23 = vld [vmem:[%s2604_s1 + $0x84] sm:$0xf0]  ;;  %v1914_v24 = vld [vmem:[%s2604_s1 + $0x4] sm:$0xf]  ;;  %v1751_v25 = vld [vmem:[%s2604_s1 + $0x8] sm:$0xf0]  ;;  %v1750_v28 = vor.u32 %v1915_v20, %v1749_v17 }
  0x29   : > { %1060 = vmatpush.bf16.msra.mxu3 %v1842_v62  ;;  %v1930_v26 = vld [vmem:[%s2604_s1 + $0x84] sm:$0xf]  ;;  %v1815_v27 = vld [vmem:[%s2604_s1 + $0x88] sm:$0xf0]  ;;  %s1881_s10 = sshll.u32 %s2617_s5, 3  ;;  %v1814_v29 = vor.u32 %v1931_v23, %v1813_v21  ;;  %v1754_v30 = vor.u32 %v1914_v24, %v1751_v25  ;;  %s239_s5 = sand.u32 1, %s2067_s13  }
  0x2a   : > { %s2358_s19 = scalar_lea.vmem %s2603_s0, %s1881_s10  ;;  %v1818_v34 = vor.u32 %v1930_v26, %v1815_v27  ;;  %s1615_s26 = sshll.u32 %s239_s5, 9 }
  0x2b   : > { %794 = vmatpush.bf16.msra.mxu0 %v1766_v4  ;;  %v1621_v31 = vld [vmem:[%s2358_s19] sm:$0xf]  ;;  %v1883_v32 = vld [vmem:[%s2358_s19 + $0x4] sm:$0xf0]  ;;  %v1882_v33 = vld [vmem:[%s2358_s19 + $0x4] sm:$0xf] }
  0x2c   : > { %883 = vmatpush.bf16.msra.mxu1 %v1830_v6  ;;  %972 = vmatpush.bf16.msra.mxu2 %v1770_v7  ;;  %v1623_v35 = vld [vmem:[%s2358_s19 + $0x8] sm:$0xf0]  ;;  %v1622_v36 = vor.u32 %v1883_v32, %v1621_v31  ;;  %v1629_v38 = vld [vmem:[%s2358_s19 + $0x10] sm:$0xf]  ;;  %v1885_v39 = vld [vmem:[%s2358_s19 + $0x14] sm:$0xf0] }
  0x2d   : > { %1061 = vmatpush.bf16.msra.mxu3 %v1834_v11  ;;  %v1626_v37 = vor.u32 %v1882_v33, %v1623_v35  ;;  %v1884_v40 = vld [vmem:[%s2358_s19 + $0x14] sm:$0xf]  ;;  %v1631_v41 = vld [vmem:[%s2358_s19 + $0x18] sm:$0xf0]  ;;  %v1630_v42 = vor.u32 %v1885_v39, %v1629_v38  ;;  %v1637_v44 = vld [vmem:[%s2358_s19 + $0x20] sm:$0xf] }
  0x2e   : > { %v1634_v43 = vor.u32 %v1884_v40, %v1631_v41  ;;  %v1887_v45 = vld [vmem:[%s2358_s19 + $0x24] sm:$0xf0]  ;;  %v1886_v46 = vld [vmem:[%s2358_s19 + $0x24] sm:$0xf]  ;;  %v1639_v47 = vld [vmem:[%s2358_s19 + $0x28] sm:$0xf0] }
  0x2f   : > { %795 = vmatpush.bf16.msra.mxu0 %v1758_v16  ;;  %v1638_v48 = vor.u32 %v1887_v45, %v1637_v44  ;;  %v1642_v49 = vor.u32 %v1886_v46, %v1639_v47  ;;  %v1645_v50 = vld [vmem:[%s2358_s19 + $0x30] sm:$0xf]  ;;  %v1889_v51 = vld [vmem:[%s2358_s19 + $0x34] sm:$0xf0]  ;;  %v1888_v52 = vld [vmem:[%s2358_s19 + $0x34] sm:$0xf] }
  0x30   : > { %884 = vmatpush.bf16.msra.mxu1 %v1822_v18  ;;  %973 = vmatpush.bf16.msra.mxu2 %v1762_v19  ;;  %v1647_v53 = vld [vmem:[%s2358_s19 + $0x38] sm:$0xf0]  ;;  %v1646_v54 = vor.u32 %v1889_v51, %v1645_v50  ;;  %v1653_v56 = vld [vmem:[%s2358_s19 + $0x40] sm:$0xf]  ;;  %v1891_v57 = vld [vmem:[%s2358_s19 + $0x44] sm:$0xf0] }
  0x31   : > { %1062 = vmatpush.bf16.msra.mxu3 %v1826_v22  ;;  %v1650_v55 = vor.u32 %v1888_v52, %v1647_v53  ;;  %v1890_v58 = vld [vmem:[%s2358_s19 + $0x44] sm:$0xf]  ;;  %v1655_v59 = vld [vmem:[%s2358_s19 + $0x48] sm:$0xf0]  ;;  %v1654_v60 = vor.u32 %v1891_v57, %v1653_v56  ;;  %v1661_v62 = vld [vmem:[%s2358_s19 + $0x50] sm:$0xf] }
  0x32   : > { %v1658_v61 = vor.u32 %v1890_v58, %v1655_v59  ;;  %v1893_v63 = vld [vmem:[%s2358_s19 + $0x54] sm:$0xf0]  ;;  %v1892_v0 = vld [vmem:[%s2358_s19 + $0x54] sm:$0xf]  ;;  %v1663_v1 = vld [vmem:[%s2358_s19 + $0x58] sm:$0xf0] }
  0x33   : > { %796 = vmatpush.bf16.msra.mxu0 %v1750_v28  ;;  %v1662_v2 = vor.u32 %v1893_v63, %v1661_v62  ;;  %v1666_v3 = vor.u32 %v1892_v0, %v1663_v1  ;;  %v1669_v4 = vld [vmem:[%s2358_s19 + $0x60] sm:$0xf]  ;;  %v1895_v5 = vld [vmem:[%s2358_s19 + $0x64] sm:$0xf0]  ;;  %v1894_v6 = vld [vmem:[%s2358_s19 + $0x64] sm:$0xf] }
  0x34   : > { %885 = vmatpush.bf16.msra.mxu1 %v1814_v29  ;;  %974 = vmatpush.bf16.msra.mxu2 %v1754_v30  ;;  %v1671_v7 = vld [vmem:[%s2358_s19 + $0x68] sm:$0xf0]  ;;  %v1670_v8 = vor.u32 %v1895_v5, %v1669_v4  ;;  %v1677_v10 = vld [vmem:[%s2358_s19 + $0x70] sm:$0xf]  ;;  %v1897_v11 = vld [vmem:[%s2358_s19 + $0x74] sm:$0xf0] }
  0x35   : > { %1063 = vmatpush.bf16.msra.mxu3 %v1818_v34  ;;  %v1674_v9 = vor.u32 %v1894_v6, %v1671_v7  ;;  %v1896_v12 = vld [vmem:[%s2358_s19 + $0x74] sm:$0xf]  ;;  %v1679_v13 = vld [vmem:[%s2358_s19 + $0x78] sm:$0xf0]  ;;  %v1678_v14 = vor.u32 %v1897_v11, %v1677_v10  ;;  %v1685_v16 = vld [vmem:[%s2358_s19 + $0x80] sm:$0xf] }
  0x36   : > { %797 = vmatmul.bf16.vlgmr.msra.gmra.mxu0 %v1622_v36  ;;  %v1682_v15 = vor.u32 %v1896_v12, %v1679_v13  ;;  %v1899_v17 = vld [vmem:[%s2358_s19 + $0x84] sm:$0xf0]  ;;  %v1340_v18 = vld [vmem:[%s2605_s2] sm:$0x3]  ;;  %v1898_v19 = vld [vmem:[%s2358_s19 + $0x84] sm:$0xf] }
  0x37   : > { %886 = vmatmul.bf16.vlgmr.msra.gmra.mxu1 %v1626_v37  ;;  %975 = vmatmul.bf16.vlgmr.msra.gmra.mxu2 %v1622_v36  ;;  %v1687_v20 = vld [vmem:[%s2358_s19 + $0x88] sm:$0xf0]  ;;  %v1686_v21 = vor.u32 %v1899_v17, %v1685_v16  ;;  %v2402_v23 = vperm.slane %v1340_v18, 0  ;;  %s2405_s27 = scalar_lea.vmem [#allocation3], %s1615_s26  ;;  %v2408_v29 = vperm.slane %v1340_v18, 1  ;;  %s1475_s15 = scalar_lea.sflag [#allocation4], %s239_s5 }
  0x38   : > { %1064 = vmatmul.bf16.vlgmr.msra.gmra.mxu3 %v1626_v37  ;;  %v1690_v24 = vor.u32 %v1898_v19, %v1687_v20  ;;  %v1693_v37 = vld [vmem:[%s2358_s19 + $0x90] sm:$0xf]  ;;  %v1901_v38 = vld [vmem:[%s2358_s19 + $0x94] sm:$0xf0]  ;;  %v1900_v39 = vld [vmem:[%s2358_s19 + $0x94] sm:$0xf] }
  0x39   : > { %v1695_v40 = vld [vmem:[%s2358_s19 + $0x98] sm:$0xf0]  ;;  %v1701_v59 = vld [vmem:[%s2358_s19 + $0xa0] sm:$0xf]  ;;  %v1703_v62 = vld [vmem:[%s2358_s19 + $0xa8] sm:$0xf0] }
  0x3a   : > { %v1698_v45 = vor.u32 %v1900_v39, %v1695_v40  ;;  %v1709_v17 = vld [vmem:[%s2358_s19 + $0xb0] sm:$0xf]  ;;  %v1905_v18 = vld [vmem:[%s2358_s19 + $0xb4] sm:$0xf0]  ;;  %v1904_v19 = vld [vmem:[%s2358_s19 + $0xb4] sm:$0xf] }
  0x3b   : > { %v1711_v20 = vld [vmem:[%s2358_s19 + $0xb8] sm:$0xf0]  ;;  %s1490_s6 = sshll.u32 %s2405_s27, 4  ;;  %s1491_s6 = int_to_ptr.vmem [resolvable:$true] %s1490_s6 }
  0x46   : > { %802 = vmatmul.bf16.gmra.mxu0 %v1630_v42 }
  0x47   : > { %891 = vmatmul.bf16.gmra.mxu1 %v1634_v43  ;;  %980 = vmatmul.bf16.gmra.mxu2 %v1630_v42  ;;  %v1694_v42 = vor.u32 %v1901_v38, %v1693_v37 }
  0x48   : > { %1069 = vmatmul.bf16.gmra.mxu3 %v1634_v43 }
  0x56   : > { %807 = vmatmul.bf16.gmra.mxu0 %v1638_v48 }
  0x57   : > { %896 = vmatmul.bf16.gmra.mxu1 %v1642_v49  ;;  %985 = vmatmul.bf16.gmra.mxu2 %v1638_v48 }
  0x58   : > { %1074 = vmatmul.bf16.gmra.mxu3 %v1642_v49 }
  0x66   : > { %812 = vmatmul.bf16.gmra.mxu0 %v1646_v54 }
  0x67   : > { %901 = vmatmul.bf16.gmra.mxu1 %v1650_v55  ;;  %990 = vmatmul.bf16.gmra.mxu2 %v1646_v54 }
  0x68   : > { %1079 = vmatmul.bf16.gmra.mxu3 %v1650_v55 }
  0x76   : > { %817 = vmatmul.bf16.gmra.mxu0 %v1654_v60 }
  0x77   : > { %906 = vmatmul.bf16.gmra.mxu1 %v1658_v61  ;;  %995 = vmatmul.bf16.gmra.mxu2 %v1654_v60  ;;  %v1903_v60 = vld [vmem:[%s2358_s19 + $0xa4] sm:$0xf0] }
  0x78   : > { %1084 = vmatmul.bf16.gmra.mxu3 %v1658_v61  ;;  %v1902_v61 = vld [vmem:[%s2358_s19 + $0xa4] sm:$0xf]  ;;  %v1702_v0 = vor.u32 %v1903_v60, %v1701_v59 }
  0x86   : > { %822 = vmatmul.bf16.gmra.mxu0 %v1662_v2 }
  0x87   : > { %911 = vmatmul.bf16.gmra.mxu1 %v1666_v3  ;;  %1000 = vmatmul.bf16.gmra.mxu2 %v1662_v2 }
  0x88   : > { %1089 = vmatmul.bf16.gmra.mxu3 %v1666_v3  ;;  %v1706_v3 = vor.u32 %v1902_v61, %v1703_v62 }
  0x96   : > { %827 = vmatmul.bf16.gmra.mxu0 %v1670_v8 }
  0x97   : > { %916 = vmatmul.bf16.gmra.mxu1 %v1674_v9  ;;  %1005 = vmatmul.bf16.gmra.mxu2 %v1670_v8 }
  0x98   : > { %1094 = vmatmul.bf16.gmra.mxu3 %v1674_v9 }
  0xa6   : > { %832 = vmatmul.bf16.gmra.mxu0 %v1678_v14 }
  0xa7   : > { %921 = vmatmul.bf16.gmra.mxu1 %v1682_v15  ;;  %1010 = vmatmul.bf16.gmra.mxu2 %v1678_v14 }
  0xa8   : > { %1099 = vmatmul.bf16.gmra.mxu3 %v1682_v15 }
  0xb3   : > { %v798_v22 = vpop.f32.mrf.mxu0 }
  0xb4   : > { %v887_v25 = vpop.f32.mrf.mxu1 }
  0xb5   : > { %v888_v26 = vadd.f32 %v887_v25, %v798_v22  ;;  %v1710_v22 = vor.u32 %v1905_v18, %v1709_v17 }
  0xb6   : > { %837 = vmatmul.bf16.gmra.mxu0 %v1686_v21 }
  0xb7   : > { %v1346_v27 = vadd.f32 %v2402_v23, %v888_v26  ;;  %926 = vmatmul.bf16.gmra.mxu1 %v1690_v24  ;;  %1015 = vmatmul.bf16.gmra.mxu2 %v1686_v21  ;;  %v1714_v26 = vor.u32 %v1904_v19, %v1711_v20 }
  0xb8   : > { %1104 = vmatmul.bf16.gmra.mxu3 %v1690_v24 }
  0xb9   : > { %1410 = vst [vmem:[%s2405_s27] sm:$0xff] %v1346_v27 }
  0xba   : > { %v976_v28 = vpop.f32.mrf.mxu2 }
  0xbb   : > { %v1065_v30 = vpop.f32.mrf.mxu3  ;;  %v800_v31 = vpop.f32.mrf.mxu0 }
  0xbc   : > { %v1066_v32 = vadd.f32 %v1065_v30, %v976_v28  ;;  %v889_v33 = vpop.f32.mrf.mxu1 }
  0xbd   : > { %v890_v34 = vadd.f32 %v889_v33, %v800_v31 }
  0xbe   : > { %v1347_v35 = vadd.f32 %v2408_v29, %v1066_v32 }
  0xbf   : > { %v1348_v36 = vadd.f32 %v2402_v23, %v890_v34 }
  0xc0   : > { %1411 = vst [vmem:[%s2405_s27 + $0x8] sm:$0xff] %v1347_v35 }
  0xc1   : > { %1412 = vst [vmem:[%s2405_s27 + $0x10] sm:$0xff] %v1348_v36 }
  0xc2   : > { %v978_v41 = vpop.f32.mrf.mxu2 }
  0xc3   : > { %v1067_v43 = vpop.f32.mrf.mxu3  ;;  %v803_v44 = vpop.f32.mrf.mxu0 }
  0xc4   : > { %v1068_v46 = vadd.f32 %v1067_v43, %v978_v41  ;;  %v892_v47 = vpop.f32.mrf.mxu1  ;;  %v1717_v41 = vld [vmem:[%s2358_s19 + $0xc0] sm:$0xf]  ;;  %v1906_v43 = vld [vmem:[%s2358_s19 + $0xc4] sm:$0xf] }
  0xc5   : > { %v893_v48 = vadd.f32 %v892_v47, %v803_v44  ;;  %v1719_v44 = vld [vmem:[%s2358_s19 + $0xc8] sm:$0xf0] }
  0xc6   : > { %v1349_v49 = vadd.f32 %v2408_v29, %v1068_v46  ;;  %842 = vmatmul.bf16.gmra.mxu0 %v1694_v42 }
  0xc7   : > { %v1350_v50 = vadd.f32 %v2402_v23, %v893_v48  ;;  %931 = vmatmul.bf16.gmra.mxu1 %v1698_v45  ;;  %1020 = vmatmul.bf16.gmra.mxu2 %v1694_v42  ;;  %v1907_v42 = vld [vmem:[%s2358_s19 + $0xc4] sm:$0xf0] }
  0xc8   : > { %1413 = vst [vmem:[%s2405_s27 + $0x18] sm:$0xff] %v1349_v49  ;;  %1109 = vmatmul.bf16.gmra.mxu3 %v1698_v45  ;;  %v1718_v46 = vor.u32 %v1907_v42, %v1717_v41  ;;  %v1722_v49 = vor.u32 %v1906_v43, %v1719_v44 }
  0xc9   : > { %1414 = vst [vmem:[%s2405_s27 + $0x20] sm:$0xff] %v1350_v50 }
  0xca   : > { %v981_v51 = vpop.f32.mrf.mxu2 }
  0xcb   : > { %v1070_v52 = vpop.f32.mrf.mxu3  ;;  %v805_v53 = vpop.f32.mrf.mxu0 }
  0xcc   : > { %v1071_v54 = vadd.f32 %v1070_v52, %v981_v51  ;;  %v894_v55 = vpop.f32.mrf.mxu1 }
  0xcd   : > { %v895_v56 = vadd.f32 %v894_v55, %v805_v53 }
  0xce   : > { %v1351_v57 = vadd.f32 %v2408_v29, %v1071_v54 }
  0xcf   : > { %v1352_v58 = vadd.f32 %v2402_v23, %v895_v56 }
  0xd0   : > { %1415 = vst [vmem:[%s2405_s27 + $0x28] sm:$0xff] %v1351_v57 }
  0xd1   : > { %1416 = vst [vmem:[%s2405_s27 + $0x30] sm:$0xff] %v1352_v58 }
  0xd2   : > { %v983_v63 = vpop.f32.mrf.mxu2 }
  0xd3   : > { %v1072_v1 = vpop.f32.mrf.mxu3  ;;  %v808_v2 = vpop.f32.mrf.mxu0 }
  0xd4   : > { %v1073_v4 = vadd.f32 %v1072_v1, %v983_v63  ;;  %v897_v5 = vpop.f32.mrf.mxu1  ;;  %v1725_v63 = vld [vmem:[%s2358_s19 + $0xd0] sm:$0xf]  ;;  %v1908_v1 = vld [vmem:[%s2358_s19 + $0xd4] sm:$0xf] }
  0xd5   : > { %v898_v6 = vadd.f32 %v897_v5, %v808_v2  ;;  %v1727_v2 = vld [vmem:[%s2358_s19 + $0xd8] sm:$0xf0] }
  0xd6   : > { %v1353_v7 = vadd.f32 %v2408_v29, %v1073_v4  ;;  %847 = vmatmul.bf16.gmra.mxu0 %v1702_v0 }
  0xd7   : > { %v1354_v8 = vadd.f32 %v2402_v23, %v898_v6  ;;  %936 = vmatmul.bf16.gmra.mxu1 %v1706_v3  ;;  %1025 = vmatmul.bf16.gmra.mxu2 %v1702_v0  ;;  %v1909_v0 = vld [vmem:[%s2358_s19 + $0xd4] sm:$0xf0] }
  0xd8   : > { %1417 = vst [vmem:[%s2405_s27 + $0x38] sm:$0xff] %v1353_v7  ;;  %1114 = vmatmul.bf16.gmra.mxu3 %v1706_v3  ;;  %v1726_v4 = vor.u32 %v1909_v0, %v1725_v63  ;;  %v1730_v7 = vor.u32 %v1908_v1, %v1727_v2 }
  0xd9   : > { %1418 = vst [vmem:[%s2405_s27 + $0x40] sm:$0xff] %v1354_v8 }
  0xda   : > { %v986_v9 = vpop.f32.mrf.mxu2 }
  0xdb   : > { %v1075_v10 = vpop.f32.mrf.mxu3  ;;  %v810_v11 = vpop.f32.mrf.mxu0 }
  0xdc   : > { %v1076_v12 = vadd.f32 %v1075_v10, %v986_v9  ;;  %v899_v13 = vpop.f32.mrf.mxu1 }
  0xdd   : > { %v900_v14 = vadd.f32 %v899_v13, %v810_v11 }
  0xde   : > { %v1355_v15 = vadd.f32 %v2408_v29, %v1076_v12 }
  0xdf   : > { %v1356_v16 = vadd.f32 %v2402_v23, %v900_v14 }
  0xe0   : > { %1419 = vst [vmem:[%s2405_s27 + $0x48] sm:$0xff] %v1355_v15 }
  0xe1   : > { %1420 = vst [vmem:[%s2405_s27 + $0x50] sm:$0xff] %v1356_v16 }
  0xe2   : > { %v988_v21 = vpop.f32.mrf.mxu2 }
  0xe3   : > { %v1077_v24 = vpop.f32.mrf.mxu3  ;;  %v813_v25 = vpop.f32.mrf.mxu0 }
  0xe4   : > { %v1078_v27 = vadd.f32 %v1077_v24, %v988_v21  ;;  %v902_v28 = vpop.f32.mrf.mxu1  ;;  %v1733_v21 = vld [vmem:[%s2358_s19 + $0xe0] sm:$0xf]  ;;  %v1910_v24 = vld [vmem:[%s2358_s19 + $0xe4] sm:$0xf] }
  0xe5   : > { %v903_v30 = vadd.f32 %v902_v28, %v813_v25  ;;  %v1735_v25 = vld [vmem:[%s2358_s19 + $0xe8] sm:$0xf0] }
  0xe6   : > { %v1357_v31 = vadd.f32 %v2408_v29, %v1078_v27  ;;  %852 = vmatmul.bf16.gmra.mxu0 %v1710_v22 }
  0xe7   : > { %v1358_v32 = vadd.f32 %v2402_v23, %v903_v30  ;;  %941 = vmatmul.bf16.gmra.mxu1 %v1714_v26  ;;  %1030 = vmatmul.bf16.gmra.mxu2 %v1710_v22  ;;  %v1911_v22 = vld [vmem:[%s2358_s19 + $0xe4] sm:$0xf0] }
  0xe8   : > { %1421 = vst [vmem:[%s2405_s27 + $0x58] sm:$0xff] %v1357_v31  ;;  %1119 = vmatmul.bf16.gmra.mxu3 %v1714_v26  ;;  %v1734_v27 = vor.u32 %v1911_v22, %v1733_v21  ;;  %v1738_v31 = vor.u32 %v1910_v24, %v1735_v25 }
  0xe9   : > { %1422 = vst [vmem:[%s2405_s27 + $0x60] sm:$0xff] %v1358_v32 }
  0xea   : > { %v991_v33 = vpop.f32.mrf.mxu2 }
  0xeb   : > { %v1080_v34 = vpop.f32.mrf.mxu3  ;;  %v815_v35 = vpop.f32.mrf.mxu0 }
  0xec   : > { %v1081_v36 = vadd.f32 %v1080_v34, %v991_v33  ;;  %v904_v37 = vpop.f32.mrf.mxu1 }
  0xed   : > { %v905_v38 = vadd.f32 %v904_v37, %v815_v35 }
  0xee   : > { %v1359_v39 = vadd.f32 %v2408_v29, %v1081_v36 }
  0xef   : > { %v1360_v40 = vadd.f32 %v2402_v23, %v905_v38 }
  0xf0   : > { %1423 = vst [vmem:[%s2405_s27 + $0x68] sm:$0xff] %v1359_v39 }
  0xf1   : > { %1424 = vst [vmem:[%s2405_s27 + $0x70] sm:$0xff] %v1360_v40 }
  0xf2   : > { %v993_v45 = vpop.f32.mrf.mxu2 }
  0xf3   : > { %v1082_v47 = vpop.f32.mrf.mxu3  ;;  %v818_v48 = vpop.f32.mrf.mxu0 }
  0xf4   : > { %v1083_v50 = vadd.f32 %v1082_v47, %v993_v45  ;;  %v907_v51 = vpop.f32.mrf.mxu1  ;;  %v1741_v45 = vld [vmem:[%s2358_s19 + $0xf0] sm:$0xf]  ;;  %v1912_v47 = vld [vmem:[%s2358_s19 + $0xf4] sm:$0xf] }
  0xf5   : > { %v908_v52 = vadd.f32 %v907_v51, %v818_v48  ;;  %v1743_v48 = vld [vmem:[%s2358_s19 + $0xf8] sm:$0xf0] }
  0xf6   : > { %v1361_v53 = vadd.f32 %v2408_v29, %v1083_v50  ;;  %857 = vmatmul.bf16.gmra.mxu0 %v1718_v46 }
  0xf7   : > { %v1362_v54 = vadd.f32 %v2402_v23, %v908_v52  ;;  %946 = vmatmul.bf16.gmra.mxu1 %v1722_v49  ;;  %1035 = vmatmul.bf16.gmra.mxu2 %v1718_v46  ;;  %v1913_v46 = vld [vmem:[%s2358_s19 + $0xf4] sm:$0xf0] }
  0xf8   : > { %1425 = vst [vmem:[%s2405_s27 + $0x78] sm:$0xff] %v1361_v53  ;;  %1124 = vmatmul.bf16.gmra.mxu3 %v1722_v49  ;;  %v1742_v50 = vor.u32 %v1913_v46, %v1741_v45  ;;  %v1746_v53 = vor.u32 %v1912_v47, %v1743_v48 }
  0xf9   : > { %1426 = vst [vmem:[%s2405_s27 + $0x80] sm:$0xff] %v1362_v54 }
  0xfa   : > { %v996_v55 = vpop.f32.mrf.mxu2 }
  0xfb   : > { %v1085_v56 = vpop.f32.mrf.mxu3  ;;  %v820_v57 = vpop.f32.mrf.mxu0 }
  0xfc   : > { %v1086_v58 = vadd.f32 %v1085_v56, %v996_v55  ;;  %v909_v59 = vpop.f32.mrf.mxu1 }
  0xfd   : > { %v910_v60 = vadd.f32 %v909_v59, %v820_v57 }
  0xfe   : > { %v1363_v61 = vadd.f32 %v2408_v29, %v1086_v58 }
  0xff   : > { %v1364_v62 = vadd.f32 %v2402_v23, %v910_v60 }
 0x100   : > { %1427 = vst [vmem:[%s2405_s27 + $0x88] sm:$0xff] %v1363_v61 }
 0x101   : > { %1428 = vst [vmem:[%s2405_s27 + $0x90] sm:$0xff] %v1364_v62 }
 0x102   : > { %v998_v3 = vpop.f32.mrf.mxu2 }
 0x103   : > { %v1087_v5 = vpop.f32.mrf.mxu3  ;;  %v823_v6 = vpop.f32.mrf.mxu0 }
 0x104   : > { %v1088_v8 = vadd.f32 %v1087_v5, %v998_v3  ;;  %v912_v9 = vpop.f32.mrf.mxu1 }
 0x105   : > { %v913_v10 = vadd.f32 %v912_v9, %v823_v6 }
 0x106   : > { %v1365_v11 = vadd.f32 %v2408_v29, %v1088_v8  ;;  %862 = vmatmul.bf16.gmra.mxu0 %v1726_v4 }
 0x107   : > { %v1366_v12 = vadd.f32 %v2402_v23, %v913_v10  ;;  %951 = vmatmul.bf16.gmra.mxu1 %v1730_v7  ;;  %1040 = vmatmul.bf16.gmra.mxu2 %v1726_v4 }
 0x108   : > { %1429 = vst [vmem:[%s2405_s27 + $0x98] sm:$0xff] %v1365_v11  ;;  %1129 = vmatmul.bf16.gmra.mxu3 %v1730_v7 }
 0x109   : > { %1430 = vst [vmem:[%s2405_s27 + $0xa0] sm:$0xff] %v1366_v12 }
 0x10a   : > { %v1001_v13 = vpop.f32.mrf.mxu2 }
 0x10b   : > { %v1090_v14 = vpop.f32.mrf.mxu3  ;;  %v825_v15 = vpop.f32.mrf.mxu0 }
 0x10c   : > { %v1091_v16 = vadd.f32 %v1090_v14, %v1001_v13  ;;  %v914_v17 = vpop.f32.mrf.mxu1 }
 0x10d   : > { %v915_v18 = vadd.f32 %v914_v17, %v825_v15 }
 0x10e   : > { %v1367_v19 = vadd.f32 %v2408_v29, %v1091_v16 }
 0x10f   : > { %v1368_v20 = vadd.f32 %v2402_v23, %v915_v18 }
 0x110   : > { %1431 = vst [vmem:[%s2405_s27 + $0xa8] sm:$0xff] %v1367_v19 }
 0x111   : > { %1432 = vst [vmem:[%s2405_s27 + $0xb0] sm:$0xff] %v1368_v20 }
 0x112   : > { %v1003_v26 = vpop.f32.mrf.mxu2 }
 0x113   : > { %v1092_v28 = vpop.f32.mrf.mxu3  ;;  %v828_v30 = vpop.f32.mrf.mxu0 }
 0x114   : > { %v1093_v32 = vadd.f32 %v1092_v28, %v1003_v26  ;;  %v917_v33 = vpop.f32.mrf.mxu1 }
 0x115   : > { %v918_v34 = vadd.f32 %v917_v33, %v828_v30 }
 0x116   : > { %v1369_v35 = vadd.f32 %v2408_v29, %v1093_v32  ;;  %867 = vmatmul.bf16.gmra.mxu0 %v1734_v27 }
 0x117   : > { %v1370_v36 = vadd.f32 %v2402_v23, %v918_v34  ;;  %956 = vmatmul.bf16.gmra.mxu1 %v1738_v31  ;;  %1045 = vmatmul.bf16.gmra.mxu2 %v1734_v27 }
 0x118   : > { %1433 = vst [vmem:[%s2405_s27 + $0xb8] sm:$0xff] %v1369_v35  ;;  %1134 = vmatmul.bf16.gmra.mxu3 %v1738_v31 }
 0x119   : > { %1434 = vst [vmem:[%s2405_s27 + $0xc0] sm:$0xff] %v1370_v36 }
 0x11a   : > { %v1006_v37 = vpop.f32.mrf.mxu2 }
 0x11b   : > { %v1095_v38 = vpop.f32.mrf.mxu3  ;;  %v830_v39 = vpop.f32.mrf.mxu0 }
 0x11c   : > { %v1096_v40 = vadd.f32 %v1095_v38, %v1006_v37  ;;  %v919_v41 = vpop.f32.mrf.mxu1 }
 0x11d   : > { %v920_v42 = vadd.f32 %v919_v41, %v830_v39 }
 0x11e   : > { %v1371_v43 = vadd.f32 %v2408_v29, %v1096_v40 }
 0x11f   : > { %v1372_v44 = vadd.f32 %v2402_v23, %v920_v42 }
 0x120   : > { %1435 = vst [vmem:[%s2405_s27 + $0xc8] sm:$0xff] %v1371_v43 }
 0x121   : > { %1436 = vst [vmem:[%s2405_s27 + $0xd0] sm:$0xff] %v1372_v44 }
 0x122   : > { %v1008_v49 = vpop.f32.mrf.mxu2 }
 0x123   : > { %v1097_v51 = vpop.f32.mrf.mxu3  ;;  %v833_v52 = vpop.f32.mrf.mxu0 }
 0x124   : > { %v1098_v54 = vadd.f32 %v1097_v51, %v1008_v49  ;;  %v922_v55 = vpop.f32.mrf.mxu1 }
 0x125   : > { %v923_v56 = vadd.f32 %v922_v55, %v833_v52 }
 0x126   : > { %v1373_v57 = vadd.f32 %v2408_v29, %v1098_v54  ;;  %872 = vmatmul.bf16.gmra.mxu0 %v1742_v50 }
 0x127   : > { %v1374_v58 = vadd.f32 %v2402_v23, %v923_v56  ;;  %961 = vmatmul.bf16.gmra.mxu1 %v1746_v53  ;;  %1050 = vmatmul.bf16.gmra.mxu2 %v1742_v50 }
 0x128   : > { %1437 = vst [vmem:[%s2405_s27 + $0xd8] sm:$0xff] %v1373_v57  ;;  %1139 = vmatmul.bf16.gmra.mxu3 %v1746_v53 }
 0x129   : > { %1438 = vst [vmem:[%s2405_s27 + $0xe0] sm:$0xff] %v1374_v58 }
 0x12a   : > { %v1011_v59 = vpop.f32.mrf.mxu2 }
 0x12b   : > { %v1100_v60 = vpop.f32.mrf.mxu3  ;;  %v835_v61 = vpop.f32.mrf.mxu0 }
 0x12c   : > { %v1101_v62 = vadd.f32 %v1100_v60, %v1011_v59  ;;  %v924_v63 = vpop.f32.mrf.mxu1 }
 0x12d   : > { %v925_v0 = vadd.f32 %v924_v63, %v835_v61 }
 0x12e   : > { %v1375_v1 = vadd.f32 %v2408_v29, %v1101_v62 }
 0x12f   : > { %v1376_v2 = vadd.f32 %v2402_v23, %v925_v0 }
 0x130   : > { %1439 = vst [vmem:[%s2405_s27 + $0xe8] sm:$0xff] %v1375_v1 }
 0x131   : > { %1440 = vst [vmem:[%s2405_s27 + $0xf0] sm:$0xff] %v1376_v2 }
 0x132   : > { %v1013_v3 = vpop.f32.mrf.mxu2 }
 0x133   : > { %v1102_v4 = vpop.f32.mrf.mxu3  ;;  %v838_v5 = vpop.f32.mrf.mxu0 }
 0x134   : > { %v1103_v6 = vadd.f32 %v1102_v4, %v1013_v3  ;;  %v927_v7 = vpop.f32.mrf.mxu1 }
 0x135   : > { %v928_v8 = vadd.f32 %v927_v7, %v838_v5 }
 0x136   : > { %v1377_v9 = vadd.f32 %v2408_v29, %v1103_v6 }
 0x137   : > { %v1378_v10 = vadd.f32 %v2402_v23, %v928_v8 }
 0x138   : > { %1441 = vst [vmem:[%s2405_s27 + $0xf8] sm:$0xff] %v1377_v9 }
 0x139   : > { %1442 = vst [vmem:[%s2405_s27 + $0x100] sm:$0xff] %v1378_v10 }
 0x13a   : > { %v1016_v11 = vpop.f32.mrf.mxu2 }
 0x13b   : > { %v1105_v12 = vpop.f32.mrf.mxu3  ;;  %v840_v13 = vpop.f32.mrf.mxu0 }
 0x13c   : > { %v1106_v14 = vadd.f32 %v1105_v12, %v1016_v11  ;;  %v929_v15 = vpop.f32.mrf.mxu1 }
 0x13d   : > { %v930_v16 = vadd.f32 %v929_v15, %v840_v13 }
 0x13e   : > { %v1379_v17 = vadd.f32 %v2408_v29, %v1106_v14 }
 0x13f   : > { %v1380_v18 = vadd.f32 %v2402_v23, %v930_v16 }
 0x140   : > { %1443 = vst [vmem:[%s2405_s27 + $0x108] sm:$0xff] %v1379_v17 }
 0x141   : > { %1444 = vst [vmem:[%s2405_s27 + $0x110] sm:$0xff] %v1380_v18 }
 0x142   : > { %v1018_v19 = vpop.f32.mrf.mxu2 }
 0x143   : > { %v1107_v20 = vpop.f32.mrf.mxu3  ;;  %v843_v21 = vpop.f32.mrf.mxu0 }
 0x144   : > { %v1108_v22 = vadd.f32 %v1107_v20, %v1018_v19  ;;  %v932_v24 = vpop.f32.mrf.mxu1 }
 0x145   : > { %v933_v25 = vadd.f32 %v932_v24, %v843_v21 }
 0x146   : > { %v1381_v26 = vadd.f32 %v2408_v29, %v1108_v22 }
 0x147   : > { %v1382_v27 = vadd.f32 %v2402_v23, %v933_v25 }
 0x148   : > { %1445 = vst [vmem:[%s2405_s27 + $0x118] sm:$0xff] %v1381_v26 }
 0x149   : > { %1446 = vst [vmem:[%s2405_s27 + $0x120] sm:$0xff] %v1382_v27 }
 0x14a   : > { %v1021_v28 = vpop.f32.mrf.mxu2 }
 0x14b   : > { %v1110_v30 = vpop.f32.mrf.mxu3  ;;  %v845_v31 = vpop.f32.mrf.mxu0 }
 0x14c   : > { %v1111_v32 = vadd.f32 %v1110_v30, %v1021_v28  ;;  %v934_v33 = vpop.f32.mrf.mxu1 }
 0x14d   : > { %v935_v34 = vadd.f32 %v934_v33, %v845_v31 }
 0x14e   : > { %v1383_v35 = vadd.f32 %v2408_v29, %v1111_v32 }
 0x14f   : > { %v1384_v36 = vadd.f32 %v2402_v23, %v935_v34 }
 0x150   : > { %1447 = vst [vmem:[%s2405_s27 + $0x128] sm:$0xff] %v1383_v35 }
 0x151   : > { %1448 = vst [vmem:[%s2405_s27 + $0x130] sm:$0xff] %v1384_v36 }
 0x152   : > { %v1023_v37 = vpop.f32.mrf.mxu2 }
 0x153   : > { %v1112_v38 = vpop.f32.mrf.mxu3  ;;  %v848_v39 = vpop.f32.mrf.mxu0 }
 0x154   : > { %v1113_v40 = vadd.f32 %v1112_v38, %v1023_v37  ;;  %v937_v41 = vpop.f32.mrf.mxu1 }
 0x155   : > { %v938_v42 = vadd.f32 %v937_v41, %v848_v39 }
 0x156   : > { %v1385_v43 = vadd.f32 %v2408_v29, %v1113_v40 }
 0x157   : > { %v1386_v44 = vadd.f32 %v2402_v23, %v938_v42 }
 0x158   : > { %1449 = vst [vmem:[%s2405_s27 + $0x138] sm:$0xff] %v1385_v43 }
 0x159   : > { %1450 = vst [vmem:[%s2405_s27 + $0x140] sm:$0xff] %v1386_v44 }
 0x15a   : > { %v1026_v45 = vpop.f32.mrf.mxu2 }
 0x15b   : > { %v1115_v46 = vpop.f32.mrf.mxu3  ;;  %v850_v47 = vpop.f32.mrf.mxu0 }
 0x15c   : > { %v1116_v48 = vadd.f32 %v1115_v46, %v1026_v45  ;;  %v939_v49 = vpop.f32.mrf.mxu1 }
 0x15d   : > { %v940_v50 = vadd.f32 %v939_v49, %v850_v47 }
 0x15e   : > { %v1387_v51 = vadd.f32 %v2408_v29, %v1116_v48 }
 0x15f   : > { %v1388_v52 = vadd.f32 %v2402_v23, %v940_v50 }
 0x160   : > { %1451 = vst [vmem:[%s2405_s27 + $0x148] sm:$0xff] %v1387_v51 }
 0x161   : > { %1452 = vst [vmem:[%s2405_s27 + $0x150] sm:$0xff] %v1388_v52 }
 0x162   : > { %v1028_v53 = vpop.f32.mrf.mxu2 }
 0x163   : > { %v1117_v54 = vpop.f32.mrf.mxu3  ;;  %v853_v55 = vpop.f32.mrf.mxu0 }
 0x164   : > { %v1118_v56 = vadd.f32 %v1117_v54, %v1028_v53  ;;  %v942_v57 = vpop.f32.mrf.mxu1 }
 0x165   : > { %v943_v58 = vadd.f32 %v942_v57, %v853_v55 }
 0x166   : > { %v1389_v59 = vadd.f32 %v2408_v29, %v1118_v56 }
 0x167   : > { %v1390_v60 = vadd.f32 %v2402_v23, %v943_v58 }
 0x168   : > { %1453 = vst [vmem:[%s2405_s27 + $0x158] sm:$0xff] %v1389_v59 }
 0x169   : > { %1454 = vst [vmem:[%s2405_s27 + $0x160] sm:$0xff] %v1390_v60 }
 0x16a   : > { %v1031_v61 = vpop.f32.mrf.mxu2 }
 0x16b   : > { %v1120_v62 = vpop.f32.mrf.mxu3  ;;  %v855_v63 = vpop.f32.mrf.mxu0 }
 0x16c   : > { %v1121_v0 = vadd.f32 %v1120_v62, %v1031_v61  ;;  %v944_v1 = vpop.f32.mrf.mxu1 }
 0x16d   : > { %v945_v2 = vadd.f32 %v944_v1, %v855_v63 }
 0x16e   : > { %v1391_v3 = vadd.f32 %v2408_v29, %v1121_v0 }
 0x16f   : > { %v1392_v4 = vadd.f32 %v2402_v23, %v945_v2 }
 0x170   : > { %1455 = vst [vmem:[%s2405_s27 + $0x168] sm:$0xff] %v1391_v3 }
 0x171   : > { %1456 = vst [vmem:[%s2405_s27 + $0x170] sm:$0xff] %v1392_v4 }
 0x172   : > { %v1033_v5 = vpop.f32.mrf.mxu2 }
 0x173   : > { %v1122_v6 = vpop.f32.mrf.mxu3  ;;  %v858_v7 = vpop.f32.mrf.mxu0 }
 0x174   : > { %v1123_v8 = vadd.f32 %v1122_v6, %v1033_v5  ;;  %v947_v9 = vpop.f32.mrf.mxu1 }
 0x175   : > { %v948_v10 = vadd.f32 %v947_v9, %v858_v7 }
 0x176   : > { %v1393_v11 = vadd.f32 %v2408_v29, %v1123_v8 }
 0x177   : > { %v1394_v12 = vadd.f32 %v2402_v23, %v948_v10 }
 0x178   : > { %1457 = vst [vmem:[%s2405_s27 + $0x178] sm:$0xff] %v1393_v11 }
 0x179   : > { %1458 = vst [vmem:[%s2405_s27 + $0x180] sm:$0xff] %v1394_v12 }
 0x17a   : > { %v1036_v13 = vpop.f32.mrf.mxu2 }
 0x17b   : > { %v1125_v14 = vpop.f32.mrf.mxu3  ;;  %v860_v15 = vpop.f32.mrf.mxu0 }
 0x17c   : > { %v1126_v16 = vadd.f32 %v1125_v14, %v1036_v13  ;;  %v949_v17 = vpop.f32.mrf.mxu1 }
 0x17d   : > { %v950_v18 = vadd.f32 %v949_v17, %v860_v15 }
 0x17e   : > { %v1395_v19 = vadd.f32 %v2408_v29, %v1126_v16 }
 0x17f   : > { %v1396_v20 = vadd.f32 %v2402_v23, %v950_v18 }
 0x180   : > { %1459 = vst [vmem:[%s2405_s27 + $0x188] sm:$0xff] %v1395_v19 }
 0x181   : > { %1460 = vst [vmem:[%s2405_s27 + $0x190] sm:$0xff] %v1396_v20 }
 0x182   : > { %v1038_v21 = vpop.f32.mrf.mxu2 }
 0x183   : > { %v1127_v22 = vpop.f32.mrf.mxu3  ;;  %v863_v24 = vpop.f32.mrf.mxu0 }
 0x184   : > { %v1128_v25 = vadd.f32 %v1127_v22, %v1038_v21  ;;  %v952_v26 = vpop.f32.mrf.mxu1 }
 0x185   : > { %v953_v27 = vadd.f32 %v952_v26, %v863_v24 }
 0x186   : > { %v1397_v28 = vadd.f32 %v2408_v29, %v1128_v25 }
 0x187   : > { %v1398_v30 = vadd.f32 %v2402_v23, %v953_v27 }
 0x188   : > { %1461 = vst [vmem:[%s2405_s27 + $0x198] sm:$0xff] %v1397_v28 }
 0x189   : > { %1462 = vst [vmem:[%s2405_s27 + $0x1a0] sm:$0xff] %v1398_v30 }
 0x18a   : > { %v1041_v31 = vpop.f32.mrf.mxu2 }
 0x18b   : > { %v1130_v32 = vpop.f32.mrf.mxu3  ;;  %v865_v33 = vpop.f32.mrf.mxu0 }
 0x18c   : > { %v1131_v34 = vadd.f32 %v1130_v32, %v1041_v31  ;;  %v954_v35 = vpop.f32.mrf.mxu1 }
 0x18d   : > { %v955_v36 = vadd.f32 %v954_v35, %v865_v33 }
 0x18e   : > { %v1399_v37 = vadd.f32 %v2408_v29, %v1131_v34 }
 0x18f   : > { %v1400_v38 = vadd.f32 %v2402_v23, %v955_v36 }
 0x190   : > { %1463 = vst [vmem:[%s2405_s27 + $0x1a8] sm:$0xff] %v1399_v37 }
 0x191   : > { %1464 = vst [vmem:[%s2405_s27 + $0x1b0] sm:$0xff] %v1400_v38 }
 0x192   : > { %v1043_v39 = vpop.f32.mrf.mxu2 }
 0x193   : > { %v1132_v40 = vpop.f32.mrf.mxu3  ;;  %v868_v41 = vpop.f32.mrf.mxu0 }
 0x194   : > { %v1133_v42 = vadd.f32 %v1132_v40, %v1043_v39  ;;  %v957_v43 = vpop.f32.mrf.mxu1 }
 0x195   : > { %v958_v44 = vadd.f32 %v957_v43, %v868_v41 }
 0x196   : > { %v1401_v45 = vadd.f32 %v2408_v29, %v1133_v42 }
 0x197   : > { %v1402_v46 = vadd.f32 %v2402_v23, %v958_v44 }
 0x198   : > { %1465 = vst [vmem:[%s2405_s27 + $0x1b8] sm:$0xff] %v1401_v45 }
 0x199   : > { %1466 = vst [vmem:[%s2405_s27 + $0x1c0] sm:$0xff] %v1402_v46 }
 0x19a   : > { %v1046_v47 = vpop.f32.mrf.mxu2 }
 0x19b   : > { %v1135_v48 = vpop.f32.mrf.mxu3  ;;  %v870_v49 = vpop.f32.mrf.mxu0 }
 0x19c   : > { %v1136_v50 = vadd.f32 %v1135_v48, %v1046_v47  ;;  %v959_v51 = vpop.f32.mrf.mxu1 }
 0x19d   : > { %v960_v52 = vadd.f32 %v959_v51, %v870_v49 }
 0x19e   : > { %v1403_v53 = vadd.f32 %v2408_v29, %v1136_v50 }
 0x19f   : > { %v1404_v54 = vadd.f32 %v2402_v23, %v960_v52 }
 0x1a0   : > { %1467 = vst [vmem:[%s2405_s27 + $0x1c8] sm:$0xff] %v1403_v53 }
 0x1a1   : > { %1468 = vst [vmem:[%s2405_s27 + $0x1d0] sm:$0xff] %v1404_v54 }
 0x1a2   : > { %v1048_v55 = vpop.f32.mrf.mxu2 }
 0x1a3   : > { %v1137_v56 = vpop.f32.mrf.mxu3  ;;  %v873_v57 = vpop.f32.mrf.mxu0 }
 0x1a4   : > { %v1138_v58 = vadd.f32 %v1137_v56, %v1048_v55  ;;  %v962_v59 = vpop.f32.mrf.mxu1 }
 0x1a5   : > { %v963_v60 = vadd.f32 %v962_v59, %v873_v57 }
 0x1a6   : > { %v1405_v61 = vadd.f32 %v2408_v29, %v1138_v58 }
 0x1a7   : > { %v1406_v62 = vadd.f32 %v2402_v23, %v963_v60 }
 0x1a8   : > { %1469 = vst [vmem:[%s2405_s27 + $0x1d8] sm:$0xff] %v1405_v61 }
 0x1a9   : > { %1470 = vst [vmem:[%s2405_s27 + $0x1e0] sm:$0xff] %v1406_v62 }
 0x1aa   : > { %v1051_v63 = vpop.f32.mrf.mxu2 }
 0x1ab   : > { %v1140_v0 = vpop.f32.mrf.mxu3  ;;  %v875_v1 = vpop.f32.mrf.mxu0 }
 0x1ac   : > { %v1141_v2 = vadd.f32 %v1140_v0, %v1051_v63  ;;  %v964_v3 = vpop.f32.mrf.mxu1 }
 0x1ad   : > { %v965_v4 = vadd.f32 %v964_v3, %v875_v1 }
 0x1ae   : > { %v1407_v5 = vadd.f32 %v2408_v29, %v1141_v2 }
 0x1af   : > { %v1408_v6 = vadd.f32 %v2402_v23, %v965_v4 }
 0x1b0   : > { %1471 = vst [vmem:[%s2405_s27 + $0x1e8] sm:$0xff] %v1407_v5 }
 0x1b1   : > { %1472 = vst [vmem:[%s2405_s27 + $0x1f0] sm:$0xff] %v1408_v6 }
 0x1b2   : > { %v1053_v7 = vpop.f32.mrf.mxu2 }
 0x1b3   : > { %v1142_v8 = vpop.f32.mrf.mxu3 }
 0x1b4   : > { %v1143_v9 = vadd.f32 %v1142_v8, %v1053_v7 }
 0x1b6   : > { %v1409_v10 = vadd.f32 %v2408_v29, %v1143_v9 }
 0x1b8   : > { %1473 = vst [vmem:[%s2405_s27 + $0x1f8] sm:$0xff] %v1409_v10 }
 0x1b9   : > { %2032 = shalt.err (!%p2029_p5)
}
 0x1ba   : > { %s2085_s5 = smov 256   ;;  %s2086_s23 = smov 16  }
 0x1bb   : > { %1948 = dma.vmem_to_hbm [thread:$0]  (%p2147_p4), %s1491_s6, 8192, %s1493_s7, %s1475_s15, %s2085_s5, %s2085_s5, %s2086_s23  }
 0x1bc PF: > { %p1954_p6 = scmp.ge.s32.totalorder %s2083_s17, 2  ;;  %s1507_s26 = sand.u32 1, %s2063_s12  }
 0x1bd   : > { %s1508_s27 = scalar_lea.sflag [#allocation4], %s1507_s26 }
 0x1be   : > { %p1951_p7 = pnand %p1954_p6, %p2154_p8 }
 0x1c0   : > { %p1952_p9 = pneg %p1951_p7 }
 0x1c2   : > { %2058 = dma.done.wait (%p1952_p9), %s1508_s27, 8192  }
 0x1c3   : > { %2060 = vsyncadd (%p1952_p9), %s1508_s27, 4294959104  ;;  %s16_s17 = sadd.s32 1, %s2083_s17   ;;  %s2609_s12 = smov %s2067_s13 }
 0x1c4   : > { %p13_p10 = scmp.ge.s32.totalorder %s16_s17, 4   ;;  %s2610_s13 = smov %s2071_s14 }
 0x1c5   : > { %s2611_s14 = smov %s2160_s25  ;;  %s2612_s15 = smov %s2079_s16 }
 0x1c6   : > { %s2613_s16 = smov %s2615_s20  ;;  %15 = sbr.rel (!%p13_p10) target bundleno = 4 (0x4), region = 81 }
 0x1cb   :  { %1514 = vsyncpa [#allocation4], 1 }
 0x1cc   :  { %1516 = vsyncpa [#allocation4 + $0x1], 1 }

// kernel: attention_forward.4
= control target key start
LH: loop header
LB: loop body
LE: loop exit
PB: predicated region body
PF: predicated region fallthrough
CT: control target
= control target key end

     0   :  { %s6843_s12 = smov 0   ;;  %s6845_s13 = smov 0   ;;  %s9878_s0 = inlined_call_operand.vmem [shape: bf16[2,256,768], index: 0, kind: input, shape index: {}, may-alias: {0,1,2}]   ;;  %s9879_s1 = inlined_call_operand.vmem [shape: bf16[2,256,768], index: 1, kind: input, shape index: {}, may-alias: {0,1,2}]   ;;  %s9880_s2 = inlined_call_operand.vmem [shape: bf16[2,256,768], index: 2, kind: input, shape index: {}, may-alias: {0,1,2}]   ;;  %s9881_s3 = inlined_call_operand.vmem [shape: bf16[2,256,256], index: 3, kind: output, shape index: {}]  }
   0x1   :  { %s6847_s14 = smov 0   ;;  %s6849_s15 = smov 0  }
   0x2   :  { %s6851_s16 = smov 0  }
   0x3 LB: > { %s32_s17 = sadd.s32 1, %s6814_s15  ;;  %p48_p1 = scmp.ne.s32.totalorder %s6806_s13, %s6802_s12  ;;  %s6818_s16 = sphi %s6851_s16, %s13_s16   ;;  %s6814_s15 = sphi %s6849_s15, %s10397_s15   ;;  %s6810_s14 = sphi %s6847_s14, %s10396_s14   ;;  %s6806_s13 = sphi %s6845_s13, %s10395_s13   ;;  %s6802_s12 = sphi %s6843_s12, %s10394_s12  }
   0x4   : > { %p34_p0 = scmp.ge.s32.totalorder %s32_s17, 2  ;;  %p49_p2 = scmp.eq.s32.totalorder %s6818_s16, 0 }
   0x5   : > { %s41_s20 = sadd.s32 1, %s6806_s13  ;;  %p5645_p5 = scmp.ge.s32.totalorder %s6818_s16, 2 }
   0x6   : > { %s10399_s17 = smov (%p34_p0, %s32_s17), 0  ;;  %p6874_p3 = por %p49_p2, %p48_p1 }
   0x7   : > { %s36_s19 = ssub.s32 %s6814_s15, %s10399_s17  ;;  %158 = sbr.rel (%p5645_p5) target bundleno = 123 (0x7b), region = 16 }
   0x8   : > { %p39_p4 = scmp.eq.s32.totalorder %s36_s19, 0 }
   0xa   : > { %s6882_s21 = scalar_select %p39_p4, %s6806_s13, %s41_s20  }
   0xc   : > { %161 = sbr.rel (!%p6874_p3) target bundleno = 49 (0x31), region = 20  ;;  %s163_s22 = sand.u32 (%p6874_p3), 1, %s6806_s13  }
   0xd   : > { %s6221_s23 = smul.u32 (%p6874_p3), 768, %s6814_s15  ;;  %s5646_s24 = sshll.u32 (%p6874_p3), %s163_s22, 8 }
   0xe   : > { %s6897_s28 = scalar_lea.vmem (%p6874_p3), [#allocation5], %s5646_s24 }
   0xf   : > { %s6892_s27 = scalar_lea.vmem (%p6874_p3), %s9878_s0, %s6221_s23 }
  0x10   : > { %v262_v0 = vld [vmem:[%s6892_s27] sm:$0xff] (%p6874_p3)  ;;  %v264_v1 = vld [vmem:[%s6892_s27 + $0x18] sm:$0xff] (%p6874_p3)  ;;  %v266_v2 = vld [vmem:[%s6892_s27 + $0x30] sm:$0xff] (%p6874_p3) }
  0x11   : > { %263 = vst [vmem:[%s6897_s28] sm:$0xff] %v262_v0  ;;  %v268_v3 = vld [vmem:[%s6892_s27 + $0x48] sm:$0xff]  ;;  %v270_v4 = vld [vmem:[%s6892_s27 + $0x60] sm:$0xff]  ;;  %v272_v5 = vld [vmem:[%s6892_s27 + $0x78] sm:$0xff] }
  0x12   : > { %265 = vst [vmem:[%s6897_s28 + $0x8] sm:$0xff] %v264_v1  ;;  %v274_v6 = vld [vmem:[%s6892_s27 + $0x90] sm:$0xff]  ;;  %v276_v7 = vld [vmem:[%s6892_s27 + $0xa8] sm:$0xff]  ;;  %v278_v8 = vld [vmem:[%s6892_s27 + $0xc0] sm:$0xff] }
  0x13   : > { %267 = vst [vmem:[%s6897_s28 + $0x10] sm:$0xff] %v266_v2  ;;  %v280_v9 = vld [vmem:[%s6892_s27 + $0xd8] sm:$0xff]  ;;  %v282_v10 = vld [vmem:[%s6892_s27 + $0xf0] sm:$0xff]  ;;  %v284_v11 = vld [vmem:[%s6892_s27 + $0x108] sm:$0xff] }
  0x14   : > { %269 = vst [vmem:[%s6897_s28 + $0x18] sm:$0xff] %v268_v3  ;;  %v286_v12 = vld [vmem:[%s6892_s27 + $0x120] sm:$0xff]  ;;  %v288_v13 = vld [vmem:[%s6892_s27 + $0x138] sm:$0xff]  ;;  %v290_v14 = vld [vmem:[%s6892_s27 + $0x150] sm:$0xff] }
  0x15   : > { %271 = vst [vmem:[%s6897_s28 + $0x20] sm:$0xff] %v270_v4  ;;  %v292_v15 = vld [vmem:[%s6892_s27 + $0x168] sm:$0xff]  ;;  %v294_v16 = vld [vmem:[%s6892_s27 + $0x180] sm:$0xff]  ;;  %v296_v17 = vld [vmem:[%s6892_s27 + $0x198] sm:$0xff] }
  0x16   : > { %273 = vst [vmem:[%s6897_s28 + $0x28] sm:$0xff] %v272_v5  ;;  %v298_v18 = vld [vmem:[%s6892_s27 + $0x1b0] sm:$0xff]  ;;  %v300_v19 = vld [vmem:[%s6892_s27 + $0x1c8] sm:$0xff]  ;;  %v302_v20 = vld [vmem:[%s6892_s27 + $0x1e0] sm:$0xff] }
  0x17   : > { %275 = vst [vmem:[%s6897_s28 + $0x30] sm:$0xff] %v274_v6  ;;  %v304_v21 = vld [vmem:[%s6892_s27 + $0x1f8] sm:$0xff]  ;;  %v306_v22 = vld [vmem:[%s6892_s27 + $0x210] sm:$0xff]  ;;  %v308_v23 = vld [vmem:[%s6892_s27 + $0x228] sm:$0xff] }
  0x18   : > { %277 = vst [vmem:[%s6897_s28 + $0x38] sm:$0xff] %v276_v7  ;;  %v310_v24 = vld [vmem:[%s6892_s27 + $0x240] sm:$0xff]  ;;  %v312_v25 = vld [vmem:[%s6892_s27 + $0x258] sm:$0xff]  ;;  %v314_v26 = vld [vmem:[%s6892_s27 + $0x270] sm:$0xff] }
  0x19   : > { %279 = vst [vmem:[%s6897_s28 + $0x40] sm:$0xff] %v278_v8  ;;  %v316_v27 = vld [vmem:[%s6892_s27 + $0x288] sm:$0xff]  ;;  %v318_v28 = vld [vmem:[%s6892_s27 + $0x2a0] sm:$0xff]  ;;  %v320_v29 = vld [vmem:[%s6892_s27 + $0x2b8] sm:$0xff] }
  0x1a   : > { %281 = vst [vmem:[%s6897_s28 + $0x48] sm:$0xff] %v280_v9  ;;  %v322_v30 = vld [vmem:[%s6892_s27 + $0x2d0] sm:$0xff]  ;;  %v324_v31 = vld [vmem:[%s6892_s27 + $0x2e8] sm:$0xff] }
  0x1b   : > { %283 = vst [vmem:[%s6897_s28 + $0x50] sm:$0xff] %v282_v10 }
  0x1c   : > { %285 = vst [vmem:[%s6897_s28 + $0x58] sm:$0xff] %v284_v11 }
  0x1d   : > { %287 = vst [vmem:[%s6897_s28 + $0x60] sm:$0xff] %v286_v12 }
  0x1e   : > { %289 = vst [vmem:[%s6897_s28 + $0x68] sm:$0xff] %v288_v13 }
  0x1f   : > { %291 = vst [vmem:[%s6897_s28 + $0x70] sm:$0xff] %v290_v14 }
  0x20   : > { %293 = vst [vmem:[%s6897_s28 + $0x78] sm:$0xff] %v292_v15 }
  0x21   : > { %295 = vst [vmem:[%s6897_s28 + $0x80] sm:$0xff] %v294_v16 }
  0x22   : > { %297 = vst [vmem:[%s6897_s28 + $0x88] sm:$0xff] %v296_v17 }
  0x23   : > { %299 = vst [vmem:[%s6897_s28 + $0x90] sm:$0xff] %v298_v18 }
  0x24   : > { %301 = vst [vmem:[%s6897_s28 + $0x98] sm:$0xff] %v300_v19 }
  0x25   : > { %303 = vst [vmem:[%s6897_s28 + $0xa0] sm:$0xff] %v302_v20 }
  0x26   : > { %305 = vst [vmem:[%s6897_s28 + $0xa8] sm:$0xff] %v304_v21 }
  0x27   : > { %307 = vst [vmem:[%s6897_s28 + $0xb0] sm:$0xff] %v306_v22 }
  0x28   : > { %309 = vst [vmem:[%s6897_s28 + $0xb8] sm:$0xff] %v308_v23 }
  0x29   : > { %311 = vst [vmem:[%s6897_s28 + $0xc0] sm:$0xff] %v310_v24 }
  0x2a   : > { %313 = vst [vmem:[%s6897_s28 + $0xc8] sm:$0xff] %v312_v25 }
  0x2b   : > { %315 = vst [vmem:[%s6897_s28 + $0xd0] sm:$0xff] %v314_v26 }
  0x2c   : > { %317 = vst [vmem:[%s6897_s28 + $0xd8] sm:$0xff] %v316_v27 }
  0x2d   : > { %319 = vst [vmem:[%s6897_s28 + $0xe0] sm:$0xff] %v318_v28 }
  0x2e   : > { %321 = vst [vmem:[%s6897_s28 + $0xe8] sm:$0xff] %v320_v29 }
  0x2f   : > { %323 = vst [vmem:[%s6897_s28 + $0xf0] sm:$0xff] %v322_v30 }
  0x30   : > { %325 = vst [vmem:[%s6897_s28 + $0xf8] sm:$0xff] %v324_v31 }
  0x31 PF: > { %331 = sbr.rel (!%p6874_p3) target bundleno = 86 (0x56), region = 58  ;;  %s333_s29 = sand.u32 (%p6874_p3), 1, %s6806_s13  }
  0x32   : > { %s5649_s30 = smul.u32 (%p6874_p3), 768, %s6814_s15  ;;  %s5648_s4 = sshll.u32 (%p6874_p3), %s333_s29, 8 }
  0x33   : > { %s6972_s8 = scalar_lea.vmem (%p6874_p3), [#allocation6], %s5648_s4 }
  0x34   : > { %s6967_s7 = scalar_lea.vmem (%p6874_p3), %s9879_s1, %s5649_s30 }
  0x35   : > { %v5650_v32 = vld [vmem:[%s6967_s7 + $0x8] sm:$0xff] (%p6874_p3)  ;;  %v5651_v33 = vld [vmem:[%s6967_s7 + $0x20] sm:$0xff] (%p6874_p3)  ;;  %v5652_v34 = vld [vmem:[%s6967_s7 + $0x38] sm:$0xff] (%p6874_p3) }
  0x36   : > { %434 = vst [vmem:[%s6972_s8] sm:$0xff] %v5650_v32  ;;  %v5653_v35 = vld [vmem:[%s6967_s7 + $0x50] sm:$0xff]  ;;  %v5654_v36 = vld [vmem:[%s6967_s7 + $0x68] sm:$0xff]  ;;  %v5655_v37 = vld [vmem:[%s6967_s7 + $0x80] sm:$0xff] }
  0x37   : > { %436 = vst [vmem:[%s6972_s8 + $0x8] sm:$0xff] %v5651_v33  ;;  %v5656_v38 = vld [vmem:[%s6967_s7 + $0x98] sm:$0xff]  ;;  %v5657_v39 = vld [vmem:[%s6967_s7 + $0xb0] sm:$0xff]  ;;  %v5658_v40 = vld [vmem:[%s6967_s7 + $0xc8] sm:$0xff] }
  0x38   : > { %438 = vst [vmem:[%s6972_s8 + $0x10] sm:$0xff] %v5652_v34  ;;  %v5659_v41 = vld [vmem:[%s6967_s7 + $0xe0] sm:$0xff]  ;;  %v5660_v42 = vld [vmem:[%s6967_s7 + $0xf8] sm:$0xff]  ;;  %v5661_v43 = vld [vmem:[%s6967_s7 + $0x110] sm:$0xff] }
  0x39   : > { %440 = vst [vmem:[%s6972_s8 + $0x18] sm:$0xff] %v5653_v35  ;;  %v5662_v44 = vld [vmem:[%s6967_s7 + $0x128] sm:$0xff]  ;;  %v5663_v45 = vld [vmem:[%s6967_s7 + $0x140] sm:$0xff]  ;;  %v5664_v46 = vld [vmem:[%s6967_s7 + $0x158] sm:$0xff] }
  0x3a   : > { %442 = vst [vmem:[%s6972_s8 + $0x20] sm:$0xff] %v5654_v36  ;;  %v5665_v47 = vld [vmem:[%s6967_s7 + $0x170] sm:$0xff]  ;;  %v5666_v48 = vld [vmem:[%s6967_s7 + $0x188] sm:$0xff]  ;;  %v5667_v49 = vld [vmem:[%s6967_s7 + $0x1a0] sm:$0xff] }
  0x3b   : > { %444 = vst [vmem:[%s6972_s8 + $0x28] sm:$0xff] %v5655_v37  ;;  %v5668_v50 = vld [vmem:[%s6967_s7 + $0x1b8] sm:$0xff]  ;;  %v5669_v51 = vld [vmem:[%s6967_s7 + $0x1d0] sm:$0xff]  ;;  %v5670_v52 = vld [vmem:[%s6967_s7 + $0x1e8] sm:$0xff] }
  0x3c   : > { %446 = vst [vmem:[%s6972_s8 + $0x30] sm:$0xff] %v5656_v38  ;;  %v5671_v53 = vld [vmem:[%s6967_s7 + $0x200] sm:$0xff]  ;;  %v5672_v54 = vld [vmem:[%s6967_s7 + $0x218] sm:$0xff]  ;;  %v5673_v55 = vld [vmem:[%s6967_s7 + $0x230] sm:$0xff] }
  0x3d   : > { %448 = vst [vmem:[%s6972_s8 + $0x38] sm:$0xff] %v5657_v39  ;;  %v5674_v56 = vld [vmem:[%s6967_s7 + $0x248] sm:$0xff]  ;;  %v5675_v57 = vld [vmem:[%s6967_s7 + $0x260] sm:$0xff]  ;;  %v5676_v58 = vld [vmem:[%s6967_s7 + $0x278] sm:$0xff] }
  0x3e   : > { %450 = vst [vmem:[%s6972_s8 + $0x40] sm:$0xff] %v5658_v40  ;;  %v5677_v59 = vld [vmem:[%s6967_s7 + $0x290] sm:$0xff]  ;;  %v5678_v60 = vld [vmem:[%s6967_s7 + $0x2a8] sm:$0xff]  ;;  %v5679_v61 = vld [vmem:[%s6967_s7 + $0x2c0] sm:$0xff] }
  0x3f   : > { %452 = vst [vmem:[%s6972_s8 + $0x48] sm:$0xff] %v5659_v41  ;;  %v5680_v62 = vld [vmem:[%s6967_s7 + $0x2d8] sm:$0xff]  ;;  %v5681_v63 = vld [vmem:[%s6967_s7 + $0x2f0] sm:$0xff] }
  0x40   : > { %454 = vst [vmem:[%s6972_s8 + $0x50] sm:$0xff] %v5660_v42 }
  0x41   : > { %456 = vst [vmem:[%s6972_s8 + $0x58] sm:$0xff] %v5661_v43 }
  0x42   : > { %458 = vst [vmem:[%s6972_s8 + $0x60] sm:$0xff] %v5662_v44 }
  0x43   : > { %460 = vst [vmem:[%s6972_s8 + $0x68] sm:$0xff] %v5663_v45 }
  0x44   : > { %462 = vst [vmem:[%s6972_s8 + $0x70] sm:$0xff] %v5664_v46 }
  0x45   : > { %464 = vst [vmem:[%s6972_s8 + $0x78] sm:$0xff] %v5665_v47 }
  0x46   : > { %466 = vst [vmem:[%s6972_s8 + $0x80] sm:$0xff] %v5666_v48 }
  0x47   : > { %468 = vst [vmem:[%s6972_s8 + $0x88] sm:$0xff] %v5667_v49 }
  0x48   : > { %470 = vst [vmem:[%s6972_s8 + $0x90] sm:$0xff] %v5668_v50 }
  0x49   : > { %472 = vst [vmem:[%s6972_s8 + $0x98] sm:$0xff] %v5669_v51 }
  0x4a   : > { %474 = vst [vmem:[%s6972_s8 + $0xa0] sm:$0xff] %v5670_v52 }
  0x4b   : > { %476 = vst [vmem:[%s6972_s8 + $0xa8] sm:$0xff] %v5671_v53 }
  0x4c   : > { %478 = vst [vmem:[%s6972_s8 + $0xb0] sm:$0xff] %v5672_v54 }
  0x4d   : > { %480 = vst [vmem:[%s6972_s8 + $0xb8] sm:$0xff] %v5673_v55 }
  0x4e   : > { %482 = vst [vmem:[%s6972_s8 + $0xc0] sm:$0xff] %v5674_v56 }
  0x4f   : > { %484 = vst [vmem:[%s6972_s8 + $0xc8] sm:$0xff] %v5675_v57 }
  0x50   : > { %486 = vst [vmem:[%s6972_s8 + $0xd0] sm:$0xff] %v5676_v58 }
  0x51   : > { %488 = vst [vmem:[%s6972_s8 + $0xd8] sm:$0xff] %v5677_v59 }
  0x52   : > { %490 = vst [vmem:[%s6972_s8 + $0xe0] sm:$0xff] %v5678_v60 }
  0x53   : > { %492 = vst [vmem:[%s6972_s8 + $0xe8] sm:$0xff] %v5679_v61 }
  0x54   : > { %494 = vst [vmem:[%s6972_s8 + $0xf0] sm:$0xff] %v5680_v62 }
  0x55   : > { %496 = vst [vmem:[%s6972_s8 + $0xf8] sm:$0xff] %v5681_v63 }
  0x56 PF: > { %502 = sbr.rel (!%p6874_p3) target bundleno = 123 (0x7b), region = 96  ;;  %s504_s9 = sand.u32 (%p6874_p3), 1, %s6806_s13  }
  0x57   : > { %s5683_s10 = smul.u32 (%p6874_p3), 768, %s6814_s15  ;;  %s5682_s11 = sshll.u32 (%p6874_p3), %s504_s9, 8 }
  0x58   : > { %s7047_s18 = scalar_lea.vmem (%p6874_p3), [#allocation7], %s5682_s11 }
  0x59   : > { %s7042_s22 = scalar_lea.vmem (%p6874_p3), %s9880_s2, %s5683_s10 }
  0x5a   : > { %v5684_v0 = vld [vmem:[%s7042_s22 + $0x10] sm:$0xff] (%p6874_p3)  ;;  %v5685_v1 = vld [vmem:[%s7042_s22 + $0x28] sm:$0xff] (%p6874_p3)  ;;  %v5686_v2 = vld [vmem:[%s7042_s22 + $0x40] sm:$0xff] (%p6874_p3) }
  0x5b   : > { %605 = vst [vmem:[%s7047_s18] sm:$0xff] %v5684_v0  ;;  %v5687_v3 = vld [vmem:[%s7042_s22 + $0x58] sm:$0xff]  ;;  %v5688_v4 = vld [vmem:[%s7042_s22 + $0x70] sm:$0xff]  ;;  %v5689_v5 = vld [vmem:[%s7042_s22 + $0x88] sm:$0xff] }
  0x5c   : > { %607 = vst [vmem:[%s7047_s18 + $0x8] sm:$0xff] %v5685_v1  ;;  %v5690_v6 = vld [vmem:[%s7042_s22 + $0xa0] sm:$0xff]  ;;  %v5691_v7 = vld [vmem:[%s7042_s22 + $0xb8] sm:$0xff]  ;;  %v5692_v8 = vld [vmem:[%s7042_s22 + $0xd0] sm:$0xff] }
  0x5d   : > { %609 = vst [vmem:[%s7047_s18 + $0x10] sm:$0xff] %v5686_v2  ;;  %v5693_v9 = vld [vmem:[%s7042_s22 + $0xe8] sm:$0xff]  ;;  %v5694_v10 = vld [vmem:[%s7042_s22 + $0x100] sm:$0xff]  ;;  %v5695_v11 = vld [vmem:[%s7042_s22 + $0x118] sm:$0xff] }
  0x5e   : > { %611 = vst [vmem:[%s7047_s18 + $0x18] sm:$0xff] %v5687_v3  ;;  %v5696_v12 = vld [vmem:[%s7042_s22 + $0x130] sm:$0xff]  ;;  %v5697_v13 = vld [vmem:[%s7042_s22 + $0x148] sm:$0xff]  ;;  %v5698_v14 = vld [vmem:[%s7042_s22 + $0x160] sm:$0xff] }
  0x5f   : > { %613 = vst [vmem:[%s7047_s18 + $0x20] sm:$0xff] %v5688_v4  ;;  %v5699_v15 = vld [vmem:[%s7042_s22 + $0x178] sm:$0xff]  ;;  %v5700_v16 = vld [vmem:[%s7042_s22 + $0x190] sm:$0xff]  ;;  %v5701_v17 = vld [vmem:[%s7042_s22 + $0x1a8] sm:$0xff] }
  0x60   : > { %615 = vst [vmem:[%s7047_s18 + $0x28] sm:$0xff] %v5689_v5  ;;  %v5702_v18 = vld [vmem:[%s7042_s22 + $0x1c0] sm:$0xff]  ;;  %v5703_v19 = vld [vmem:[%s7042_s22 + $0x1d8] sm:$0xff]  ;;  %v5704_v20 = vld [vmem:[%s7042_s22 + $0x1f0] sm:$0xff] }
  0x61   : > { %617 = vst [vmem:[%s7047_s18 + $0x30] sm:$0xff] %v5690_v6  ;;  %v5705_v21 = vld [vmem:[%s7042_s22 + $0x208] sm:$0xff]  ;;  %v5706_v22 = vld [vmem:[%s7042_s22 + $0x220] sm:$0xff]  ;;  %v5707_v23 = vld [vmem:[%s7042_s22 + $0x238] sm:$0xff] }
  0x62   : > { %619 = vst [vmem:[%s7047_s18 + $0x38] sm:$0xff] %v5691_v7  ;;  %v5708_v24 = vld [vmem:[%s7042_s22 + $0x250] sm:$0xff]  ;;  %v5709_v25 = vld [vmem:[%s7042_s22 + $0x268] sm:$0xff]  ;;  %v5710_v26 = vld [vmem:[%s7042_s22 + $0x280] sm:$0xff] }
  0x63   : > { %621 = vst [vmem:[%s7047_s18 + $0x40] sm:$0xff] %v5692_v8  ;;  %v5711_v27 = vld [vmem:[%s7042_s22 + $0x298] sm:$0xff]  ;;  %v5712_v28 = vld [vmem:[%s7042_s22 + $0x2b0] sm:$0xff]  ;;  %v5713_v29 = vld [vmem:[%s7042_s22 + $0x2c8] sm:$0xff] }
  0x64   : > { %623 = vst [vmem:[%s7047_s18 + $0x48] sm:$0xff] %v5693_v9  ;;  %v5714_v30 = vld [vmem:[%s7042_s22 + $0x2e0] sm:$0xff]  ;;  %v5715_v31 = vld [vmem:[%s7042_s22 + $0x2f8] sm:$0xff] }
  0x65   : > { %625 = vst [vmem:[%s7047_s18 + $0x50] sm:$0xff] %v5694_v10 }
  0x66   : > { %627 = vst [vmem:[%s7047_s18 + $0x58] sm:$0xff] %v5695_v11 }
  0x67   : > { %629 = vst [vmem:[%s7047_s18 + $0x60] sm:$0xff] %v5696_v12 }
  0x68   : > { %631 = vst [vmem:[%s7047_s18 + $0x68] sm:$0xff] %v5697_v13 }
  0x69   : > { %633 = vst [vmem:[%s7047_s18 + $0x70] sm:$0xff] %v5698_v14 }
  0x6a   : > { %635 = vst [vmem:[%s7047_s18 + $0x78] sm:$0xff] %v5699_v15 }
  0x6b   : > { %637 = vst [vmem:[%s7047_s18 + $0x80] sm:$0xff] %v5700_v16 }
  0x6c   : > { %639 = vst [vmem:[%s7047_s18 + $0x88] sm:$0xff] %v5701_v17 }
  0x6d   : > { %641 = vst [vmem:[%s7047_s18 + $0x90] sm:$0xff] %v5702_v18 }
  0x6e   : > { %643 = vst [vmem:[%s7047_s18 + $0x98] sm:$0xff] %v5703_v19 }
  0x6f   : > { %645 = vst [vmem:[%s7047_s18 + $0xa0] sm:$0xff] %v5704_v20 }
  0x70   : > { %647 = vst [vmem:[%s7047_s18 + $0xa8] sm:$0xff] %v5705_v21 }
  0x71   : > { %649 = vst [vmem:[%s7047_s18 + $0xb0] sm:$0xff] %v5706_v22 }
  0x72   : > { %651 = vst [vmem:[%s7047_s18 + $0xb8] sm:$0xff] %v5707_v23 }
  0x73   : > { %653 = vst [vmem:[%s7047_s18 + $0xc0] sm:$0xff] %v5708_v24 }
  0x74   : > { %655 = vst [vmem:[%s7047_s18 + $0xc8] sm:$0xff] %v5709_v25 }
  0x75   : > { %657 = vst [vmem:[%s7047_s18 + $0xd0] sm:$0xff] %v5710_v26 }
  0x76   : > { %659 = vst [vmem:[%s7047_s18 + $0xd8] sm:$0xff] %v5711_v27 }
  0x77   : > { %661 = vst [vmem:[%s7047_s18 + $0xe0] sm:$0xff] %v5712_v28 }
  0x78   : > { %663 = vst [vmem:[%s7047_s18 + $0xe8] sm:$0xff] %v5713_v29 }
  0x79   : > { %665 = vst [vmem:[%s7047_s18 + $0xf0] sm:$0xff] %v5714_v30 }
  0x7a   : > { %667 = vst [vmem:[%s7047_s18 + $0xf8] sm:$0xff] %v5715_v31 }
  0x7b PF: > { %p5716_p6 = scmp.ge.s32.totalorder %s6818_s16, 1  ;;  %p672_p7 = scmp.lt.s32.totalorder %s6818_s16, 3 }
  0x7d   : > { %p673_p8 = pnand %p5716_p6, %p672_p7 }
  0x7f   : > { %676 = sbr.rel (%p673_p8) target bundleno = 3181 (0xc6d), region = 134 }
  0x84   : > { %s679_s23 = sand.u32 1, %s6802_s12   ;;  %vm747_vm0 = vcmask 7168   ;;  %p733_p9 = scmp.lt.s32.totalorder %s6810_s14, 1 }
  0x85   : > { %s7113_s24 = sshll.u32 %s679_s23, 8 }
  0x86   : > { %s7116_s25 = scalar_lea.vmem [#allocation6], %s7113_s24  ;;  %s7151_s12 = scalar_lea.vmem [#allocation5], %s7113_s24 }
  0x87   : > { %v5816_v32 = vld [vmem:[%s7116_s25 + $0x70] sm:$0xf]  ;;  %v6132_v33 = vld [vmem:[%s7116_s25 + $0x74] sm:$0xf0]  ;;  %v5812_v38 = vld [vmem:[%s7116_s25 + $0x60] sm:$0xf] }
  0x88   : > { %v5848_v34 = vld [vmem:[%s7116_s25 + $0xf0] sm:$0xf]  ;;  %v5817_v35 = vor.u32 %v6132_v33, %v5816_v32  ;;  %v6140_v36 = vld [vmem:[%s7116_s25 + $0xf4] sm:$0xf0]  ;;  %v6131_v39 = vld [vmem:[%s7116_s25 + $0x64] sm:$0xf0] }
  0x89   : > { %v5849_v37 = vor.u32 %v6140_v36, %v5848_v34  ;;  %v5844_v40 = vld [vmem:[%s7116_s25 + $0xe0] sm:$0xf]  ;;  %v6139_v41 = vld [vmem:[%s7116_s25 + $0xe4] sm:$0xf0]  ;;  %v5813_v42 = vor.u32 %v6131_v39, %v5812_v38  ;;  %v5808_v44 = vld [vmem:[%s7116_s25 + $0x50] sm:$0xf] }
  0x8a   : > { %1228 = vmatpush.bf16.xpose.msra.mxu0 %v5817_v35  ;;  %v5845_v43 = vor.u32 %v6139_v41, %v5844_v40  ;;  %v6130_v45 = vld [vmem:[%s7116_s25 + $0x54] sm:$0xf0]  ;;  %v5840_v46 = vld [vmem:[%s7116_s25 + $0xd0] sm:$0xf]  ;;  %v5804_v50 = vld [vmem:[%s7116_s25 + $0x40] sm:$0xf] }
  0x8b   : > { %1317 = vmatpush.bf16.xpose.msra.mxu1 %v5849_v37  ;;  %v6138_v47 = vld [vmem:[%s7116_s25 + $0xd4] sm:$0xf0]  ;;  %v5809_v48 = vor.u32 %v6130_v45, %v5808_v44  ;;  %v6129_v51 = vld [vmem:[%s7116_s25 + $0x44] sm:$0xf0]  ;;  %v5836_v52 = vld [vmem:[%s7116_s25 + $0xc0] sm:$0xf] }
  0x8c   : > { %v5841_v49 = vor.u32 %v6138_v47, %v5840_v46  ;;  %v6137_v53 = vld [vmem:[%s7116_s25 + $0xc4] sm:$0xf0]  ;;  %v5805_v54 = vor.u32 %v6129_v51, %v5804_v50  ;;  %v5800_v56 = vld [vmem:[%s7116_s25 + $0x30] sm:$0xf]  ;;  %v6128_v57 = vld [vmem:[%s7116_s25 + $0x34] sm:$0xf0] }
  0x8d   : > { %v5837_v55 = vor.u32 %v6137_v53, %v5836_v52  ;;  %v5832_v58 = vld [vmem:[%s7116_s25 + $0xb0] sm:$0xf]  ;;  %v6136_v59 = vld [vmem:[%s7116_s25 + $0xb4] sm:$0xf0]  ;;  %v5801_v60 = vor.u32 %v6128_v57, %v5800_v56  ;;  %v5796_v62 = vld [vmem:[%s7116_s25 + $0x20] sm:$0xf] }
  0x8e   : > { %v5833_v61 = vor.u32 %v6136_v59, %v5832_v58  ;;  %v6127_v63 = vld [vmem:[%s7116_s25 + $0x24] sm:$0xf0]  ;;  %v5828_v0 = vld [vmem:[%s7116_s25 + $0xa0] sm:$0xf]  ;;  %v5792_v4 = vld [vmem:[%s7116_s25 + $0x10] sm:$0xf] }
  0x8f   : > { %v6135_v1 = vld [vmem:[%s7116_s25 + $0xa4] sm:$0xf0]  ;;  %v5797_v2 = vor.u32 %v6127_v63, %v5796_v62  ;;  %v6126_v5 = vld [vmem:[%s7116_s25 + $0x14] sm:$0xf0]  ;;  %v5824_v6 = vld [vmem:[%s7116_s25 + $0x90] sm:$0xf] }
  0x90   : > { %v5829_v3 = vor.u32 %v6135_v1, %v5828_v0  ;;  %v6134_v7 = vld [vmem:[%s7116_s25 + $0x94] sm:$0xf0]  ;;  %v5793_v8 = vor.u32 %v6126_v5, %v5792_v4  ;;  %v5788_v10 = vld [vmem:[%s7116_s25] sm:$0xf]  ;;  %v6125_v11 = vld [vmem:[%s7116_s25 + $0x4] sm:$0xf0] }
  0x91   : > { %v5825_v9 = vor.u32 %v6134_v7, %v5824_v6  ;;  %v5820_v12 = vld [vmem:[%s7116_s25 + $0x80] sm:$0xf]  ;;  %v6133_v13 = vld [vmem:[%s7116_s25 + $0x84] sm:$0xf0]  ;;  %v5789_v14 = vor.u32 %v6125_v11, %v5788_v10  ;;  %v5728_v19 = vld [vmem:[%s7151_s12 + $0x10] sm:$0xf] }
  0x92   : > { %1229 = vmatpush.bf16.xpose.msra.mxu0 %v5813_v42  ;;  %v5821_v15 = vor.u32 %v6133_v13, %v5820_v12  ;;  %v5724_v16 = vld [vmem:[%s7151_s12] sm:$0xf]  ;;  %v6109_v17 = vld [vmem:[%s7151_s12 + $0x4] sm:$0xf0]  ;;  %v6110_v20 = vld [vmem:[%s7151_s12 + $0x14] sm:$0xf0] }
  0x93   : > { %1318 = vmatpush.bf16.xpose.msra.mxu1 %v5845_v43  ;;  %v5725_v18 = vor.u32 %v6109_v17, %v5724_v16  ;;  %v5729_v21 = vor.u32 %v6110_v20, %v5728_v19  ;;  %v5732_v22 = vld [vmem:[%s7151_s12 + $0x20] sm:$0xf]  ;;  %v6111_v23 = vld [vmem:[%s7151_s12 + $0x24] sm:$0xf0]  ;;  %v5736_v25 = vld [vmem:[%s7151_s12 + $0x30] sm:$0xf] }
  0x94   : > { %v5733_v24 = vor.u32 %v6111_v23, %v5732_v22  ;;  %v6112_v26 = vld [vmem:[%s7151_s12 + $0x34] sm:$0xf0]  ;;  %v5740_v28 = vld [vmem:[%s7151_s12 + $0x40] sm:$0xf]  ;;  %v6113_v29 = vld [vmem:[%s7151_s12 + $0x44] sm:$0xf0] }
  0x95   : > { %v5737_v27 = vor.u32 %v6112_v26, %v5736_v25  ;;  %v5741_v30 = vor.u32 %v6113_v29, %v5740_v28  ;;  %v5744_v31 = vld [vmem:[%s7151_s12 + $0x50] sm:$0xf]  ;;  %v6114_v32 = vld [vmem:[%s7151_s12 + $0x54] sm:$0xf0]  ;;  %v5748_v34 = vld [vmem:[%s7151_s12 + $0x60] sm:$0xf] }
  0x96   : > { %v5745_v33 = vor.u32 %v6114_v32, %v5744_v31  ;;  %v6115_v35 = vld [vmem:[%s7151_s12 + $0x64] sm:$0xf0]  ;;  %v5752_v37 = vld [vmem:[%s7151_s12 + $0x70] sm:$0xf]  ;;  %v6116_v38 = vld [vmem:[%s7151_s12 + $0x74] sm:$0xf0] }
  0x97   : > { %v5749_v36 = vor.u32 %v6115_v35, %v5748_v34  ;;  %v5753_v39 = vor.u32 %v6116_v38, %v5752_v37  ;;  %v5756_v40 = vld [vmem:[%s7151_s12 + $0x80] sm:$0xf]  ;;  %v6117_v41 = vld [vmem:[%s7151_s12 + $0x84] sm:$0xf0]  ;;  %v5760_v52 = vld [vmem:[%s7151_s12 + $0x90] sm:$0xf] }
  0x98   : > { %v5757_v42 = vor.u32 %v6117_v41, %v5756_v40  ;;  %v6118_v53 = vld [vmem:[%s7151_s12 + $0x94] sm:$0xf0]  ;;  %v6820_v13 = vmov -inf   ;;  %v5764_v16 = vld [vmem:[%s7151_s12 + $0xa0] sm:$0xf]  ;;  %v6821_v31 = vmov 0  }
  0x99   : > { %748 = vst.msk [vmem:[#allocation2] sm:$0xff] %vm747_vm0, %v6820_v13  ;;  %v6119_v17 = vld [vmem:[%s7151_s12 + $0xa4] sm:$0xf0]  ;;  %6265 = vset.pattern.permute.xlu2 %v6821_v31  ;;  %6266 = vset.pattern.permute.xlu0 %v6821_v31  ;;  %v5768_v41 = vld [vmem:[%s7151_s12 + $0xb0] sm:$0xf]  ;;  %s7645_s26 = scalar_lea.vmem [#allocation7], %s7113_s24 }
  0x9a   : > { %1230 = vmatpush.bf16.xpose.msra.mxu0 %v5809_v48  ;;  %749 = vst.msk [vmem:[#allocation2 + $0x8] sm:$0xff] %vm747_vm0, %v6820_v13  ;;  %6267 = vset.pattern.permute.xlu1 %v6821_v31  ;;  %v6121_v31 = vld [vmem:[%s7151_s12 + $0xc4] sm:$0xf0]  ;;  %s10401_s14 = smov (!%p733_p9, %s6810_s14), 1 }
  0x9b   : > { %1319 = vmatpush.bf16.xpose.msra.mxu1 %v5841_v49  ;;  %750 = vst.msk [vmem:[#allocation2 + $0x10] sm:$0xff] %vm747_vm0, %v6820_v13  ;;  %s6108_s27 = sshll.u32 %s10401_s14, 8 }
  0x9c   : > { %751 = vst.msk [vmem:[#allocation2 + $0x18] sm:$0xff] %vm747_vm0, %v6820_v13  ;;  %s8439_s30 = scalar_lea.vmem %s9881_s3, %s6108_s27 }
  0x9d   : > { %752 = vst.msk [vmem:[#allocation2 + $0x20] sm:$0xff] %vm747_vm0, %v6820_v13 }
  0x9e   : > { %753 = vst.msk [vmem:[#allocation2 + $0x28] sm:$0xff] %vm747_vm0, %v6820_v13 }
  0x9f   : > { %754 = vst.msk [vmem:[#allocation2 + $0x30] sm:$0xff] %vm747_vm0, %v6820_v13 }
  0xa0   : > { %755 = vst.msk [vmem:[#allocation2 + $0x38] sm:$0xff] %vm747_vm0, %v6820_v13  ;;  %v1406_v32 = vld [vmem:[#allocation2] sm:$0xff] }
  0xa1   : > { %756 = vst.msk [vmem:[#allocation2 + $0x40] sm:$0xff] %vm747_vm0, %v6820_v13 }
  0xa2   : > { %1231 = vmatpush.bf16.xpose.msra.mxu0 %v5805_v54  ;;  %757 = vst.msk [vmem:[#allocation2 + $0x48] sm:$0xff] %vm747_vm0, %v6820_v13 }
  0xa3   : > { %1320 = vmatpush.bf16.xpose.msra.mxu1 %v5837_v55  ;;  %v5761_v55 = vor.u32 %v6118_v53, %v5760_v52  ;;  %758 = vst.msk [vmem:[#allocation2 + $0x50] sm:$0xff] %vm747_vm0, %v6820_v13  ;;  %v7400_v53 = vld [vmem:[#allocation2 + $0x10] sm:$0xff] }
  0xa4   : > { %759 = vst.msk [vmem:[#allocation2 + $0x58] sm:$0xff] %vm747_vm0, %v6820_v13 }
  0xa5   : > { %760 = vst.msk [vmem:[#allocation2 + $0x60] sm:$0xff] %vm747_vm0, %v6820_v13 }
  0xa6   : > { %761 = vst.msk [vmem:[#allocation2 + $0x68] sm:$0xff] %vm747_vm0, %v6820_v13 }
  0xa7   : > { %762 = vst.msk [vmem:[#allocation2 + $0x70] sm:$0xff] %vm747_vm0, %v6820_v13 }
  0xa8   : > { %763 = vst.msk [vmem:[#allocation2 + $0x78] sm:$0xff] %vm747_vm0, %v6820_v13 }
  0xa9   : > { %764 = vst.msk [vmem:[#allocation2 + $0x80] sm:$0xff] %vm747_vm0, %v6820_v13 }
  0xaa   : > { %1232 = vmatpush.bf16.xpose.msra.mxu0 %v5801_v60  ;;  %765 = vst.msk [vmem:[#allocation2 + $0x88] sm:$0xff] %vm747_vm0, %v6820_v13 }
  0xab   : > { %1321 = vmatpush.bf16.xpose.msra.mxu1 %v5833_v61  ;;  %766 = vst.msk [vmem:[#allocation2 + $0x90] sm:$0xff] %vm747_vm0, %v6820_v13 }
  0xac   : > { %767 = vst.msk [vmem:[#allocation2 + $0x98] sm:$0xff] %vm747_vm0, %v6820_v13 }
  0xad   : > { %768 = vst.msk [vmem:[#allocation2 + $0xa0] sm:$0xff] %vm747_vm0, %v6820_v13 }
  0xae   : > { %769 = vst.msk [vmem:[#allocation2 + $0xa8] sm:$0xff] %vm747_vm0, %v6820_v13 }
  0xaf   : > { %770 = vst.msk [vmem:[#allocation2 + $0xb0] sm:$0xff] %vm747_vm0, %v6820_v13 }
  0xb0   : > { %771 = vst.msk [vmem:[#allocation2 + $0xb8] sm:$0xff] %vm747_vm0, %v6820_v13 }
  0xb1   : > { %772 = vst.msk [vmem:[#allocation2 + $0xc0] sm:$0xff] %vm747_vm0, %v6820_v13 }
  0xb2   : > { %1233 = vmatpush.bf16.xpose.msra.mxu0 %v5797_v2  ;;  %773 = vst.msk [vmem:[#allocation2 + $0xc8] sm:$0xff] %vm747_vm0, %v6820_v13 }
  0xb3   : > { %1322 = vmatpush.bf16.xpose.msra.mxu1 %v5829_v3  ;;  %774 = vst.msk [vmem:[#allocation2 + $0xd0] sm:$0xff] %vm747_vm0, %v6820_v13 }
  0xb4   : > { %775 = vst.msk [vmem:[#allocation2 + $0xd8] sm:$0xff] %vm747_vm0, %v6820_v13 }
  0xb5   : > { %776 = vst.msk [vmem:[#allocation2 + $0xe0] sm:$0xff] %vm747_vm0, %v6820_v13 }
  0xb6   : > { %777 = vst.msk [vmem:[#allocation2 + $0xe8] sm:$0xff] %vm747_vm0, %v6820_v13 }
  0xb7   : > { %778 = vst.msk [vmem:[#allocation2 + $0xf0] sm:$0xff] %vm747_vm0, %v6820_v13 }
  0xb8   : > { %779 = vst.msk [vmem:[#allocation2 + $0xf8] sm:$0xff] %vm747_vm0, %v6820_v13 }
  0xb9   : > { %780 = vst.msk [vmem:[#allocation2 + $0x100] sm:$0xff] %vm747_vm0, %v6820_v13 }
  0xba   : > { %1234 = vmatpush.bf16.xpose.msra.mxu0 %v5793_v8  ;;  %781 = vst.msk [vmem:[#allocation2 + $0x108] sm:$0xff] %vm747_vm0, %v6820_v13 }
  0xbb   : > { %1323 = vmatpush.bf16.xpose.msra.mxu1 %v5825_v9  ;;  %782 = vst.msk [vmem:[#allocation2 + $0x110] sm:$0xff] %vm747_vm0, %v6820_v13 }
  0xbc   : > { %783 = vst.msk [vmem:[#allocation2 + $0x118] sm:$0xff] %vm747_vm0, %v6820_v13 }
  0xbd   : > { %784 = vst.msk [vmem:[#allocation2 + $0x120] sm:$0xff] %vm747_vm0, %v6820_v13 }
  0xbe   : > { %785 = vst.msk [vmem:[#allocation2 + $0x128] sm:$0xff] %vm747_vm0, %v6820_v13 }
  0xbf   : > { %786 = vst.msk [vmem:[#allocation2 + $0x130] sm:$0xff] %vm747_vm0, %v6820_v13 }
  0xc0   : > { %787 = vst.msk [vmem:[#allocation2 + $0x138] sm:$0xff] %vm747_vm0, %v6820_v13 }
  0xc1   : > { %788 = vst.msk [vmem:[#allocation2 + $0x140] sm:$0xff] %vm747_vm0, %v6820_v13 }
  0xc2   : > { %1235 = vmatpush.bf16.xpose.msra.mxu0 %v5789_v14  ;;  %789 = vst.msk [vmem:[#allocation2 + $0x148] sm:$0xff] %vm747_vm0, %v6820_v13 }
  0xc3   : > { %1324 = vmatpush.bf16.xpose.msra.mxu1 %v5821_v15  ;;  %790 = vst.msk [vmem:[#allocation2 + $0x150] sm:$0xff] %vm747_vm0, %v6820_v13 }
  0xc4   : > { %791 = vst.msk [vmem:[#allocation2 + $0x158] sm:$0xff] %vm747_vm0, %v6820_v13 }
  0xc5   : > { %792 = vst.msk [vmem:[#allocation2 + $0x160] sm:$0xff] %vm747_vm0, %v6820_v13 }
  0xc6   : > { %793 = vst.msk [vmem:[#allocation2 + $0x168] sm:$0xff] %vm747_vm0, %v6820_v13 }
  0xc7   : > { %794 = vst.msk [vmem:[#allocation2 + $0x170] sm:$0xff] %vm747_vm0, %v6820_v13 }
  0xc8   : > { %795 = vst.msk [vmem:[#allocation2 + $0x178] sm:$0xff] %vm747_vm0, %v6820_v13 }
  0xc9   : > { %1236 = vmatmul.bf16.vlgmr.msra.gmra.mxu0 %v5725_v18  ;;  %796 = vst.msk [vmem:[#allocation2 + $0x180] sm:$0xff] %vm747_vm0, %v6820_v13 }
  0xca   : > { %1325 = vmatmul.bf16.vlgmr.msra.gmra.mxu1 %v5725_v18  ;;  %v5765_v18 = vor.u32 %v6119_v17, %v5764_v16  ;;  %797 = vst.msk [vmem:[#allocation2 + $0x188] sm:$0xff] %vm747_vm0, %v6820_v13 }
  0xcb   : > { %798 = vst.msk [vmem:[#allocation2 + $0x190] sm:$0xff] %vm747_vm0, %v6820_v13 }
  0xcc   : > { %799 = vst.msk [vmem:[#allocation2 + $0x198] sm:$0xff] %vm747_vm0, %v6820_v13 }
  0xcd   : > { %800 = vst.msk [vmem:[#allocation2 + $0x1a0] sm:$0xff] %vm747_vm0, %v6820_v13 }
  0xce   : > { %801 = vst.msk [vmem:[#allocation2 + $0x1a8] sm:$0xff] %vm747_vm0, %v6820_v13 }
  0xcf   : > { %802 = vst.msk [vmem:[#allocation2 + $0x1b0] sm:$0xff] %vm747_vm0, %v6820_v13 }
  0xd0   : > { %803 = vst.msk [vmem:[#allocation2 + $0x1b8] sm:$0xff] %vm747_vm0, %v6820_v13 }
  0xd1   : > { %804 = vst.msk [vmem:[#allocation2 + $0x1c0] sm:$0xff] %vm747_vm0, %v6820_v13 }
  0xd2   : > { %805 = vst.msk [vmem:[#allocation2 + $0x1c8] sm:$0xff] %vm747_vm0, %v6820_v13 }
  0xd3   : > { %806 = vst.msk [vmem:[#allocation2 + $0x1d0] sm:$0xff] %vm747_vm0, %v6820_v13 }
  0xd4   : > { %807 = vst.msk [vmem:[#allocation2 + $0x1d8] sm:$0xff] %vm747_vm0, %v6820_v13 }
  0xd5   : > { %808 = vst.msk [vmem:[#allocation2 + $0x1e0] sm:$0xff] %vm747_vm0, %v6820_v13 }
  0xd6   : > { %809 = vst.msk [vmem:[#allocation2 + $0x1e8] sm:$0xff] %vm747_vm0, %v6820_v13 }
  0xd7   : > { %810 = vst.msk [vmem:[#allocation2 + $0x1f0] sm:$0xff] %vm747_vm0, %v6820_v13 }
  0xd8   : > { %811 = vst.msk [vmem:[#allocation2 + $0x1f8] sm:$0xff] %vm747_vm0, %v6820_v13  ;;  %v7432_v13 = vld [vmem:[#allocation2 + $0x20] sm:$0xff] }
  0xd9   : > { %1241 = vmatmul.bf16.gmra.mxu0 %v5729_v21 }
  0xda   : > { %1330 = vmatmul.bf16.gmra.mxu1 %v5729_v21 }
  0xe9   : > { %1246 = vmatmul.bf16.gmra.mxu0 %v5733_v24 }
  0xea   : > { %1335 = vmatmul.bf16.gmra.mxu1 %v5733_v24 }
  0xf9   : > { %1251 = vmatmul.bf16.gmra.mxu0 %v5737_v27 }
  0xfa   : > { %1340 = vmatmul.bf16.gmra.mxu1 %v5737_v27 }
 0x109   : > { %1256 = vmatmul.bf16.gmra.mxu0 %v5741_v30 }
 0x10a   : > { %1345 = vmatmul.bf16.gmra.mxu1 %v5741_v30 }
 0x119   : > { %1261 = vmatmul.bf16.gmra.mxu0 %v5745_v33 }
 0x11a   : > { %1350 = vmatmul.bf16.gmra.mxu1 %v5745_v33 }
 0x129   : > { %1266 = vmatmul.bf16.gmra.mxu0 %v5749_v36 }
 0x12a   : > { %1355 = vmatmul.bf16.gmra.mxu1 %v5749_v36 }
 0x139   : > { %1271 = vmatmul.bf16.gmra.mxu0 %v5753_v39 }
 0x13a   : > { %1360 = vmatmul.bf16.gmra.mxu1 %v5753_v39 }
 0x146   : > { %v7171_v43 = vpop.f32.mrf.mxu0 }
 0x147   : > { %v7173_v44 = vpop.f32.mrf.mxu1 }
 0x148   : > { %v1438_v45 = vmax.f32 %v7171_v43, %v7173_v44 }
 0x149   : > { %1276 = vmatmul.bf16.gmra.mxu0 %v5757_v42 }
 0x14a   : > { %1365 = vmatmul.bf16.gmra.mxu1 %v5757_v42  ;;  %1439 = vmax.xlane.f32.xlu0 %v1438_v45  ;;  %v6120_v42 = vld [vmem:[%s7151_s12 + $0xb4] sm:$0xf0] }
 0x14e   : > { %v7177_v46 = vpop.f32.mrf.mxu0 }
 0x14f   : > { %v7179_v47 = vpop.f32.mrf.mxu1 }
 0x150   : > { %v1441_v48 = vmax.f32 %v7177_v46, %v7179_v47 }
 0x152   : > { %1442 = vmax.xlane.f32.xlu0 %v1441_v48  ;;  %v5769_v48 = vor.u32 %v6120_v42, %v5768_v41  ;;  %v7505_v41 = vld [vmem:[#allocation2 + $0x38] sm:$0xff] }
 0x156   : > { %v7183_v49 = vpop.f32.mrf.mxu0 }
 0x157   : > { %v7185_v50 = vpop.f32.mrf.mxu1 }
 0x158   : > { %v1444_v51 = vmax.f32 %v7183_v49, %v7185_v50 }
 0x159   : > { %1281 = vmatmul.bf16.gmra.mxu0 %v5761_v55 }
 0x15a   : > { %1445 = vmax.xlane.f32.xlu1 %v1444_v51  ;;  %1370 = vmatmul.bf16.gmra.mxu1 %v5761_v55  ;;  %v7396_v51 = vld [vmem:[#allocation2 + $0x8] sm:$0xff] }
 0x15e   : > { %v7191_v54 = vpop.f32.mrf.mxu0 }
 0x15f   : > { %v7193_v56 = vpop.f32.mrf.mxu1 }
 0x160   : > { %v1447_v57 = vmax.f32 %v7191_v54, %v7193_v56 }
 0x162   : > { %1448 = vmax.xlane.f32.xlu1 %v1447_v57  ;;  %v7409_v57 = vld [vmem:[#allocation2 + $0x18] sm:$0xff] }
 0x166   : > { %v7197_v58 = vpop.f32.mrf.mxu0 }
 0x167   : > { %v7199_v59 = vpop.f32.mrf.mxu1 }
 0x168   : > { %v1450_v60 = vmax.f32 %v7197_v58, %v7199_v59 }
 0x169   : > { %1286 = vmatmul.bf16.gmra.mxu0 %v5765_v18 }
 0x16a   : > { %1451 = vmax.xlane.f32.xlu2 %v1450_v60  ;;  %1375 = vmatmul.bf16.gmra.mxu1 %v5765_v18  ;;  %v7456_v18 = vld [vmem:[#allocation2 + $0x28] sm:$0xff] }
 0x16e   : > { %v7203_v61 = vpop.f32.mrf.mxu0 }
 0x16f   : > { %v7205_v62 = vpop.f32.mrf.mxu1 }
 0x170   : > { %v1453_v63 = vmax.f32 %v7203_v61, %v7205_v62 }
 0x172   : > { %1454 = vmax.xlane.f32.xlu2 %v1453_v63 }
 0x176   : > { %v7209_v0 = vpop.f32.mrf.mxu0 }
 0x177   : > { %v7211_v1 = vpop.f32.mrf.mxu1 }
 0x178   : > { %v1456_v2 = vmax.f32 %v7209_v0, %v7211_v1 }
 0x179   : > { %1291 = vmatmul.bf16.gmra.mxu0 %v5769_v48 }
 0x17a   : > { %1457 = vmax.xlane.f32.xlu0 %v1456_v2  ;;  %1380 = vmatmul.bf16.gmra.mxu1 %v5769_v48 }
 0x17e   : > { %v7215_v3 = vpop.f32.mrf.mxu0 }
 0x17f   : > { %v7217_v4 = vpop.f32.mrf.mxu1 }
 0x180   : > { %v1459_v5 = vmax.f32 %v7215_v3, %v7217_v4 }
 0x182   : > { %1460 = vmax.xlane.f32.xlu1 %v1459_v5 }
 0x186   : > { %v7221_v6 = vpop.f32.mrf.mxu0 }
 0x187   : > { %v7223_v7 = vpop.f32.mrf.mxu1 }
 0x188   : > { %v1462_v8 = vmax.f32 %v7221_v6, %v7223_v7 }
 0x18a   : > { %1463 = vmax.xlane.f32.xlu2 %v1462_v8 }
 0x18e   : > { %v7227_v9 = vpop.f32.mrf.mxu0 }
 0x18f   : > { %v7229_v10 = vpop.f32.mrf.mxu1 }
 0x190   : > { %v1465_v11 = vmax.f32 %v7227_v9, %v7229_v10 }
 0x192   : > { %1466 = vmax.xlane.f32.xlu0 %v1465_v11  ;;  %v9886_v11 = vmov 0.0  }
 0x193   : > { %812 = vst.msk [vmem:[#allocation3] sm:$0xff] %vm747_vm0, %v9886_v11 }
 0x194   : > { %813 = vst.msk [vmem:[#allocation3 + $0x8] sm:$0xff] %vm747_vm0, %v9886_v11 }
 0x195   : > { %814 = vst.msk [vmem:[#allocation3 + $0x10] sm:$0xff] %vm747_vm0, %v9886_v11 }
 0x196   : > { %v7233_v12 = vpop.f32.mrf.mxu0  ;;  %815 = vst.msk [vmem:[#allocation3 + $0x18] sm:$0xff] %vm747_vm0, %v9886_v11 }
 0x197   : > { %v7237_v14 = vpop.f32.mrf.mxu1  ;;  %816 = vst.msk [vmem:[#allocation3 + $0x20] sm:$0xff] %vm747_vm0, %v9886_v11 }
 0x198   : > { %v1468_v15 = vmax.f32 %v7233_v12, %v7237_v14  ;;  %817 = vst.msk [vmem:[#allocation3 + $0x28] sm:$0xff] %vm747_vm0, %v9886_v11 }
 0x199   : > { %818 = vst.msk [vmem:[#allocation3 + $0x30] sm:$0xff] %vm747_vm0, %v9886_v11 }
 0x19a   : > { %1469 = vmax.xlane.f32.xlu1 %v1468_v15  ;;  %819 = vst.msk [vmem:[#allocation3 + $0x38] sm:$0xff] %vm747_vm0, %v9886_v11 }
 0x19b   : > { %820 = vst.msk [vmem:[#allocation3 + $0x40] sm:$0xff] %vm747_vm0, %v9886_v11 }
 0x19c   : > { %821 = vst.msk [vmem:[#allocation3 + $0x48] sm:$0xff] %vm747_vm0, %v9886_v11 }
 0x19d   : > { %822 = vst.msk [vmem:[#allocation3 + $0x50] sm:$0xff] %vm747_vm0, %v9886_v11 }
 0x19e   : > { %v7257_v19 = vpop.f32.mrf.mxu0  ;;  %823 = vst.msk [vmem:[#allocation3 + $0x58] sm:$0xff] %vm747_vm0, %v9886_v11 }
 0x19f   : > { %v7261_v20 = vpop.f32.mrf.mxu1  ;;  %824 = vst.msk [vmem:[#allocation3 + $0x60] sm:$0xff] %vm747_vm0, %v9886_v11 }
 0x1a0   : > { %v1471_v21 = vmax.f32 %v7257_v19, %v7261_v20  ;;  %825 = vst.msk [vmem:[#allocation3 + $0x68] sm:$0xff] %vm747_vm0, %v9886_v11 }
 0x1a1   : > { %826 = vst.msk [vmem:[#allocation3 + $0x70] sm:$0xff] %vm747_vm0, %v9886_v11 }
 0x1a2   : > { %1472 = vmax.xlane.f32.xlu2 %v1471_v21  ;;  %827 = vst.msk [vmem:[#allocation3 + $0x78] sm:$0xff] %vm747_vm0, %v9886_v11 }
 0x1a3   : > { %828 = vst.msk [vmem:[#allocation3 + $0x80] sm:$0xff] %vm747_vm0, %v9886_v11 }
 0x1a4   : > { %829 = vst.msk [vmem:[#allocation3 + $0x88] sm:$0xff] %vm747_vm0, %v9886_v11 }
 0x1a5   : > { %830 = vst.msk [vmem:[#allocation3 + $0x90] sm:$0xff] %vm747_vm0, %v9886_v11 }
 0x1a6   : > { %v7279_v22 = vpop.f32.mrf.mxu0  ;;  %831 = vst.msk [vmem:[#allocation3 + $0x98] sm:$0xff] %vm747_vm0, %v9886_v11 }
 0x1a7   : > { %9995 = vst [vmem:[#allocation8_spill] sm:$0xff] %v7279_v22  ;;  %v7283_v23 = vpop.f32.mrf.mxu1 }
 0x1a8   : > { %9996 = vst [vmem:[#allocation9_spill] sm:$0xff] %v7283_v23  ;;  %v1474_v24 = vmax.f32 %v7279_v22, %v7283_v23  ;;  %v5884_v23 = vld [vmem:[%s7645_s26 + $0x80] sm:$0xf]  ;;  %v6149_v22 = vld [vmem:[%s7645_s26 + $0x84] sm:$0xf0] }
 0x1a9   : > { %832 = vst.msk [vmem:[#allocation3 + $0xa0] sm:$0xff] %vm747_vm0, %v9886_v11 }
 0x1aa   : > { %1475 = vmax.xlane.f32.xlu0 %v1474_v24  ;;  %833 = vst.msk [vmem:[#allocation3 + $0xa8] sm:$0xff] %vm747_vm0, %v9886_v11 }
 0x1ab   : > { %834 = vst.msk [vmem:[#allocation3 + $0xb0] sm:$0xff] %vm747_vm0, %v9886_v11 }
 0x1ac   : > { %835 = vst.msk [vmem:[#allocation3 + $0xb8] sm:$0xff] %vm747_vm0, %v9886_v11 }
 0x1ad   : > { %836 = vst.msk [vmem:[#allocation3 + $0xc0] sm:$0xff] %vm747_vm0, %v9886_v11 }
 0x1ae   : > { %v7301_v25 = vpop.f32.mrf.mxu0  ;;  %837 = vst.msk [vmem:[#allocation3 + $0xc8] sm:$0xff] %vm747_vm0, %v9886_v11 }
 0x1af   : > { %9997 = vst [vmem:[#allocation10_spill] sm:$0xff] %v7301_v25  ;;  %v7305_v26 = vpop.f32.mrf.mxu1 }
 0x1b0   : > { %9998 = vst [vmem:[#allocation11_spill] sm:$0xff] %v7305_v26  ;;  %v1477_v27 = vmax.f32 %v7301_v25, %v7305_v26 }
 0x1b1   : > { %838 = vst.msk [vmem:[#allocation3 + $0xd0] sm:$0xff] %vm747_vm0, %v9886_v11 }
 0x1b2   : > { %1478 = vmax.xlane.f32.xlu1 %v1477_v27  ;;  %v7478_v27 = vld [vmem:[#allocation2 + $0x30] sm:$0xff]  ;;  %839 = vst.msk [vmem:[#allocation3 + $0xd8] sm:$0xff] %vm747_vm0, %v9886_v11 }
 0x1b3   : > { %840 = vst.msk [vmem:[#allocation3 + $0xe0] sm:$0xff] %vm747_vm0, %v9886_v11 }
 0x1b4   : > { %841 = vst.msk [vmem:[#allocation3 + $0xe8] sm:$0xff] %vm747_vm0, %v9886_v11 }
 0x1b5   : > { %842 = vst.msk [vmem:[#allocation3 + $0xf0] sm:$0xff] %vm747_vm0, %v9886_v11 }
 0x1b6   : > { %v7323_v28 = vpop.f32.mrf.mxu0  ;;  %843 = vst.msk [vmem:[#allocation3 + $0xf8] sm:$0xff] %vm747_vm0, %v9886_v11 }
 0x1b7   : > { %9999 = vst [vmem:[#allocation12_spill] sm:$0xff] %v7323_v28  ;;  %v7327_v29 = vpop.f32.mrf.mxu1 }
 0x1b8   : > { %10000 = vst [vmem:[#allocation13_spill] sm:$0xff] %v7327_v29  ;;  %v1480_v30 = vmax.f32 %v7323_v28, %v7327_v29  ;;  %v6146_v28 = vld [vmem:[%s7645_s26 + $0x54] sm:$0xf0] }
 0x1b9   : > { %844 = vst.msk [vmem:[#allocation3 + $0x100] sm:$0xff] %vm747_vm0, %v9886_v11 }
 0x1ba   : > { %1481 = vmax.xlane.f32.xlu2 %v1480_v30  ;;  %v5772_v30 = vld [vmem:[%s7151_s12 + $0xc0] sm:$0xf]  ;;  %845 = vst.msk [vmem:[#allocation3 + $0x108] sm:$0xff] %vm747_vm0, %v9886_v11 }
 0x1bb   : > { %846 = vst.msk [vmem:[#allocation3 + $0x110] sm:$0xff] %vm747_vm0, %v9886_v11 }
 0x1bc   : > { %847 = vst.msk [vmem:[#allocation3 + $0x118] sm:$0xff] %vm747_vm0, %v9886_v11 }
 0x1bd   : > { %v1440_v33 = vpop.xlane.xlu0 %1439  ;;  %848 = vst.msk [vmem:[#allocation3 + $0x120] sm:$0xff] %vm747_vm0, %v9886_v11 }
 0x1be   : > { %v1534_v34 = vmax.f32 %v1406_v32, %v1440_v33  ;;  %v7347_v35 = vpop.f32.mrf.mxu0  ;;  %v5773_v33 = vor.u32 %v6121_v31, %v5772_v30  ;;  %v7555_v30 = vld [vmem:[#allocation2 + $0x48] sm:$0xff]  ;;  %849 = vst.msk [vmem:[#allocation3 + $0x128] sm:$0xff] %vm747_vm0, %v9886_v11 }
 0x1bf   : > { %10001 = vst [vmem:[#allocation14_spill] sm:$0xff] %v7347_v35  ;;  %v7351_v36 = vpop.f32.mrf.mxu1 }
 0x1c0   : > { %10002 = vst [vmem:[#allocation15_spill] sm:$0xff] %v7351_v36  ;;  %v1483_v37 = vmax.f32 %v7347_v35, %v7351_v36  ;;  %v1566_v60 = vsub.f32 %v1406_v32, %v1534_v34  ;;  %1296 = vmatmul.bf16.gmra.mxu0 %v5773_v33  ;;  %1385 = vmatmul.bf16.gmra.mxu1 %v5773_v33  ;;  %v6155_v36 = vld [vmem:[%s7645_s26 + $0xe4] sm:$0xf0] }
 0x1c1   : > { %2833 = vst.msk [vmem:[#allocation2] sm:$0xff] %vm747_vm0, %v1534_v34 }
 0x1c2   : > { %1484 = vmax.xlane.f32.xlu0 %v1483_v37  ;;  %v1598_v8 = vmul.f32 1.442695, %v1566_v60  ;;  %850 = vst.msk [vmem:[#allocation3 + $0x130] sm:$0xff] %vm747_vm0, %v9886_v11 }
 0x1c3   : > { %851 = vst.msk [vmem:[#allocation3 + $0x138] sm:$0xff] %vm747_vm0, %v9886_v11 }
 0x1c4   : > { %6268 = vpow2.f32 %v1598_v8  ;;  %852 = vst.msk [vmem:[#allocation3 + $0x140] sm:$0xff] %vm747_vm0, %v9886_v11 }
 0x1c5   : > { %v1443_v52 = vpop.xlane.xlu0 %1442  ;;  %853 = vst.msk [vmem:[#allocation3 + $0x148] sm:$0xff] %vm747_vm0, %v9886_v11 }
 0x1c6   : > { %v7368_v38 = vpop.f32.mrf.mxu0  ;;  %v7407_v55 = vmax.f32 %v7396_v51, %v1443_v52  ;;  %854 = vst.msk [vmem:[#allocation3 + $0x150] sm:$0xff] %vm747_vm0, %v9886_v11 }
 0x1c7   : > { %10003 = vst [vmem:[#allocation16_spill] sm:$0xff] %v7368_v38  ;;  %v7372_v39 = vpop.f32.mrf.mxu1 }
 0x1c8   : > { %10004 = vst [vmem:[#allocation17_spill] sm:$0xff] %v7372_v39  ;;  %v1486_v40 = vmax.f32 %v7368_v38, %v7372_v39  ;;  %v1567_v31 = vsub.f32 %v7396_v51, %v7407_v55 }
 0x1c9   : > { %2834 = vst.msk [vmem:[#allocation2 + $0x8] sm:$0xff] %vm747_vm0, %v7407_v55 }
 0x1ca   : > { %1487 = vmax.xlane.f32.xlu1 %v1486_v40  ;;  %v7451_v17 = vpop.eup %6268  ;;  %v1600_v51 = vmul.f32 1.442695, %v1567_v31  ;;  %855 = vst.msk [vmem:[#allocation3 + $0x158] sm:$0xff] %vm747_vm0, %v9886_v11 }
 0x1cb   : > { %10005 = vst [vmem:[#allocation18_spill] sm:$0xff] %v7451_v17 }
 0x1cc   : > { %6270 = vpow2.f32 %v1600_v51  ;;  %856 = vst.msk [vmem:[#allocation3 + $0x160] sm:$0xff] %vm747_vm0, %v9886_v11 }
 0x1cd   : > { %v1446_v45 = vpop.xlane.xlu1 %1445  ;;  %857 = vst.msk [vmem:[#allocation3 + $0x168] sm:$0xff] %vm747_vm0, %v9886_v11 }
 0x1ce   : > { %v7414_v63 = vmax.f32 %v7400_v53, %v1446_v45  ;;  %v7497_v37 = vpop.f32.mrf.mxu0  ;;  %858 = vst.msk [vmem:[#allocation3 + $0x170] sm:$0xff] %vm747_vm0, %v9886_v11 }
 0x1cf   : > { %10006 = vst [vmem:[#allocation19_spill] sm:$0xff] %v7497_v37  ;;  %v7499_v40 = vpop.f32.mrf.mxu1 }
 0x1d0   : > { %2835 = vst.msk [vmem:[#allocation2 + $0x10] sm:$0xff] %vm747_vm0, %v7414_v63  ;;  %v1489_v48 = vmax.f32 %v7497_v37, %v7499_v40  ;;  %v5908_v37 = vld [vmem:[%s7645_s26 + $0xe0] sm:$0xf] }
 0x1d1   : > { %10007 = vst [vmem:[#allocation20_spill] sm:$0xff] %v7499_v40 }
 0x1d2   : > { %1664 = vperm.xlu2 %6265, %v1534_v34   ;;  %859 = vst.msk [vmem:[#allocation3 + $0x178] sm:$0xff] %vm747_vm0, %v9886_v11 }
 0x1d3   : > { %860 = vst.msk [vmem:[#allocation3 + $0x180] sm:$0xff] %vm747_vm0, %v9886_v11 }
 0x1d4   : > { %861 = vst.msk [vmem:[#allocation3 + $0x188] sm:$0xff] %vm747_vm0, %v9886_v11 }
 0x1d5   : > { %v1449_v2 = vpop.xlane.xlu1 %1448  ;;  %862 = vst.msk [vmem:[#allocation3 + $0x190] sm:$0xff] %vm747_vm0, %v9886_v11 }
 0x1d6   : > { %v7421_v5 = vmax.f32 %v7409_v57, %v1449_v2  ;;  %1669 = vperm.xlu0 %6266, %v7407_v55   ;;  %v7526_v60 = vpop.f32.mrf.mxu0  ;;  %v7532_v2 = vld [vmem:[#allocation2 + $0x40] sm:$0xff]  ;;  %863 = vst.msk [vmem:[#allocation3 + $0x198] sm:$0xff] %vm747_vm0, %v9886_v11 }
 0x1d7   : > { %v7524_v52 = vpop.f32.mrf.mxu1  ;;  %10009 = vst [vmem:[#allocation22_spill] sm:$0xff] %v7526_v60 }
 0x1d8   : > { %2836 = vst.msk [vmem:[#allocation2 + $0x18] sm:$0xff] %vm747_vm0, %v7421_v5  ;;  %v1492_v8 = vmax.f32 %v7526_v60, %v7524_v52  ;;  %v5876_v60 = vld [vmem:[%s7645_s26 + $0x60] sm:$0xf]  ;;  %v1569_v35 = vsub.f32 %v7409_v57, %v7421_v5 }
 0x1d9   : > { %10008 = vst [vmem:[#allocation21_spill] sm:$0xff] %v7524_v52 }
 0x1da   : > { %864 = vst.msk [vmem:[#allocation3 + $0x1a0] sm:$0xff] %vm747_vm0, %v9886_v11  ;;  %v1604_v57 = vmul.f32 1.442695, %v1569_v35 }
 0x1db   : > { %865 = vst.msk [vmem:[#allocation3 + $0x1a8] sm:$0xff] %vm747_vm0, %v9886_v11 }
 0x1dc   : > { %866 = vst.msk [vmem:[#allocation3 + $0x1b0] sm:$0xff] %vm747_vm0, %v9886_v11 }
 0x1dd   : > { %v1452_v15 = vpop.xlane.xlu2 %1451  ;;  %867 = vst.msk [vmem:[#allocation3 + $0x1b8] sm:$0xff] %vm747_vm0, %v9886_v11 }
 0x1de   : > { %v7441_v16 = vmax.f32 %v7432_v13, %v1452_v15  ;;  %868 = vst.msk [vmem:[#allocation3 + $0x1c0] sm:$0xff] %vm747_vm0, %v9886_v11 }
 0x1df   : > { %v7595_v31 = vpop.f32.mrf.mxu1  ;;  %869 = vst.msk [vmem:[#allocation3 + $0x1c8] sm:$0xff] %vm747_vm0, %v9886_v11  ;;  %v6156_v11 = vld [vmem:[%s7645_s26 + $0xf4] sm:$0xf0] }
 0x1e0   : > { %2837 = vst.msk [vmem:[#allocation2 + $0x20] sm:$0xff] %vm747_vm0, %v7441_v16 }
 0x1e1   : > { %10011 = vst [vmem:[#allocation24_spill] sm:$0xff] %v7595_v31 }
 0x1e3   : > { %2273 = vperm.xlu1 %6267, %v7451_v17   ;;  %v5904_v17 = vld [vmem:[%s7645_s26 + $0xd0] sm:$0xf] }
 0x1e5   : > { %v1455_v21 = vpop.xlane.xlu2 %1454 }
 0x1e6   : > { %v7465_v24 = vmax.f32 %v7456_v18, %v1455_v21 }
 0x1e7   : > { %v7718_v38 = vpop.f32.mrf.mxu1 }
 0x1e8   : > { %2838 = vst.msk [vmem:[#allocation2 + $0x28] sm:$0xff] %vm747_vm0, %v7465_v24 }
 0x1eb   : > { %1674 = vperm.xlu1 %6267, %v7414_v63  }
 0x1ed   : > { %v1458_v32 = vpop.xlane.xlu0 %1457 }
 0x1ee   : > { %v7489_v34 = vmax.f32 %v7478_v27, %v1458_v32  ;;  %v1568_v32 = vsub.f32 %v7400_v53, %v7414_v63  ;;  %v7580_v53 = vld [vmem:[#allocation2 + $0x50] sm:$0xff]  ;;  %v1570_v63 = vsub.f32 %v7432_v13, %v7441_v16 }
 0x1f0   : > { %2839 = vst.msk [vmem:[#allocation2 + $0x30] sm:$0xff] %vm747_vm0, %v7489_v34  ;;  %v1602_v55 = vmul.f32 1.442695, %v1568_v32  ;;  %v1606_v13 = vmul.f32 1.442695, %v1570_v63 }
 0x1f2   : > { %6272 = vpow2.f32 %v1602_v55  ;;  %v7614_v55 = vld [vmem:[#allocation2 + $0x58] sm:$0xff] }
 0x1f3   : > { %6274 = vpow2.f32 %v1606_v13 }
 0x1f4   : > { %6276 = vpow2.f32 %v1604_v57 }
 0x1f5   : > { %v1461_v42 = vpop.xlane.xlu1 %1460 }
 0x1f6   : > { %v7514_v45 = vmax.f32 %v7505_v41, %v1461_v42 }
 0x1f8   : > { %2840 = vst.msk [vmem:[#allocation2 + $0x38] sm:$0xff] %vm747_vm0, %v7514_v45 }
 0x1fb   : > { %1490 = vmax.xlane.f32.xlu2 %v1489_v48 }
 0x1fd   : > { %v1464_v15 = vpop.xlane.xlu2 %1463 }
 0x1fe   : > { %v7543_v21 = vmax.f32 %v7532_v2, %v1464_v15  ;;  %v7593_v15 = vpop.f32.mrf.mxu0 }
 0x1ff   : > { %10010 = vst [vmem:[#allocation23_spill] sm:$0xff] %v7593_v15  ;;  %v1495_v32 = vmax.f32 %v7593_v15, %v7595_v31  ;;  %v6148_v31 = vld [vmem:[%s7645_s26 + $0x74] sm:$0xf0]  ;;  %v5912_v15 = vld [vmem:[%s7645_s26 + $0xf0] sm:$0xf] }
 0x200   : > { %2841 = vst.msk [vmem:[#allocation2 + $0x40] sm:$0xff] %vm747_vm0, %v7543_v21  ;;  %1493 = vmax.xlane.f32.xlu0 %v1492_v8  ;;  %v5913_v40 = vor.u32 %v6156_v11, %v5912_v15  ;;  %v10015_v11 = vmov 0.0   ;;  %v5864_v15 = vld [vmem:[%s7645_s26 + $0x30] sm:$0xf] }
 0x201   : > { %870 = vst.msk [vmem:[#allocation3 + $0x1d0] sm:$0xff] %vm747_vm0, %v10015_v11 }
 0x202   : > { %2680 = vmatpush.bf16.msra.mxu3 %v5913_v40  ;;  %871 = vst.msk [vmem:[#allocation3 + $0x1d8] sm:$0xff] %vm747_vm0, %v10015_v11  ;;  %v5868_v40 = vld [vmem:[%s7645_s26 + $0x40] sm:$0xf] }
 0x203   : > { %872 = vst.msk [vmem:[#allocation3 + $0x1e0] sm:$0xff] %vm747_vm0, %v10015_v11 }
 0x204   : > { %873 = vst.msk [vmem:[#allocation3 + $0x1e8] sm:$0xff] %vm747_vm0, %v10015_v11 }
 0x205   : > { %v1467_v33 = vpop.xlane.xlu0 %1466  ;;  %874 = vst.msk [vmem:[#allocation3 + $0x1f0] sm:$0xff] %vm747_vm0, %v10015_v11 }
 0x206   : > { %v7568_v42 = vmax.f32 %v7555_v30, %v1467_v33  ;;  %v7607_v33 = vpop.eup %6270  ;;  %875 = vst.msk [vmem:[#allocation3 + $0x1f8] sm:$0xff] %vm747_vm0, %v10015_v11  ;;  %v7716_v39 = vpop.f32.mrf.mxu0 }
 0x207   : > { %10012 = vst [vmem:[#allocation25_spill] sm:$0xff] %v7607_v33  ;;  %v7611_v51 = vpop.eup %6272 }
 0x208   : > { %2842 = vst.msk [vmem:[#allocation2 + $0x48] sm:$0xff] %vm747_vm0, %v7568_v42  ;;  %v7636_v13 = vpop.eup %6274 }
 0x209   : > { %10013 = vst [vmem:[#allocation26_spill] sm:$0xff] %v7611_v51 }
 0x20a   : > { %10014 = vst [vmem:[#allocation27_spill] sm:$0xff] %v7636_v13 }
 0x20d   : > { %v1470_v48 = vpop.xlane.xlu1 %1469 }
 0x20e   : > { %v7591_v8 = vmax.f32 %v7580_v53, %v1470_v48 }
 0x210   : > { %2843 = vst.msk [vmem:[#allocation2 + $0x50] sm:$0xff] %vm747_vm0, %v7591_v8 }
 0x213   : > { %2278 = vperm.xlu2 %6265, %v7607_v33   ;;  %v6147_v33 = vld [vmem:[%s7645_s26 + $0x64] sm:$0xf0] }
 0x214   : > { %2283 = vperm.xlu0 %6266, %v7611_v51   ;;  %v5877_v29 = vor.u32 %v6147_v33, %v5876_v60  ;;  %v6153_v60 = vld [vmem:[%s7645_s26 + $0xc4] sm:$0xf0]  ;;  %v6144_v33 = vld [vmem:[%s7645_s26 + $0x34] sm:$0xf0] }
 0x215   : > { %v1473_v63 = vpop.xlane.xlu2 %1472  ;;  %1496 = vmax.xlane.f32.xlu1 %v1495_v32  ;;  %v7639_v32 = vld [vmem:[#allocation2 + $0x60] sm:$0xff]  ;;  %v5865_v57 = vor.u32 %v6144_v33, %v5864_v15  ;;  %v6151_v15 = vld [vmem:[%s7645_s26 + $0xa4] sm:$0xf0] }
 0x216   : > { %v7624_v48 = vmax.f32 %v7614_v55, %v1473_v63  ;;  %v5880_v63 = vld [vmem:[%s7645_s26 + $0x70] sm:$0xf] }
 0x217   : > { %v5881_v52 = vor.u32 %v6148_v31, %v5880_v63  ;;  %v5909_v31 = vor.u32 %v6155_v36, %v5908_v37  ;;  %v5872_v63 = vld [vmem:[%s7645_s26 + $0x50] sm:$0xf] }
 0x218   : > { %2844 = vst.msk [vmem:[#allocation2 + $0x58] sm:$0xff] %vm747_vm0, %v7624_v48  ;;  %v5873_v36 = vor.u32 %v6146_v28, %v5872_v63  ;;  %v6152_v63 = vld [vmem:[%s7645_s26 + $0xb4] sm:$0xf0] }
 0x219   : > { %2591 = vmatpush.bf16.msra.mxu2 %v5881_v52  ;;  %2681 = vmatpush.bf16.msra.mxu3 %v5909_v31  ;;  %v6145_v52 = vld [vmem:[%s7645_s26 + $0x44] sm:$0xf0]  ;;  %v5896_v31 = vld [vmem:[%s7645_s26 + $0xb0] sm:$0xf] }
 0x21a   : > { %v5897_v11 = vor.u32 %v6152_v63, %v5896_v31  ;;  %v5856_v63 = vld [vmem:[%s7645_s26 + $0x10] sm:$0xf] }
 0x21b   : > { %1679 = vperm.xlu2 %6265, %v7421_v5   ;;  %v7671_v5 = vld [vmem:[#allocation2 + $0x68] sm:$0xff] }
 0x21c   : > { %2293 = vperm.xlu0 %6266, %v7636_v13  }
 0x21d   : > { %v1476_v51 = vpop.xlane.xlu0 %1475  ;;  %2592 = vmatpush.bf16.msra.mxu2 %v5877_v29  ;;  %v5869_v29 = vor.u32 %v6145_v52, %v5868_v40  ;;  %v5776_v52 = vld [vmem:[%s7151_s12 + $0xd0] sm:$0xf] }
 0x21e   : > { %v7654_v13 = vmax.f32 %v7639_v32, %v1476_v51  ;;  %v6154_v51 = vld [vmem:[%s7645_s26 + $0xd4] sm:$0xf0] }
 0x21f   : > { %v5905_v37 = vor.u32 %v6154_v51, %v5904_v17  ;;  %v7694_v51 = vld [vmem:[#allocation2 + $0x70] sm:$0xff] }
 0x220   : > { %2845 = vst.msk [vmem:[#allocation2 + $0x60] sm:$0xff] %vm747_vm0, %v7654_v13 }
 0x221   : > { %2593 = vmatpush.bf16.msra.mxu2 %v5873_v36  ;;  %2682 = vmatpush.bf16.msra.mxu3 %v5905_v37  ;;  %v7696_v36 = vpop.eup %6276 }
 0x222   : > { %10016 = vst [vmem:[#allocation28_spill] sm:$0xff] %v7696_v36 }
 0x223   : > { %1684 = vperm.xlu2 %6265, %v7441_v16   ;;  %v5900_v16 = vld [vmem:[%s7645_s26 + $0xc0] sm:$0xf] }
 0x224   : > { %v5901_v17 = vor.u32 %v6153_v60, %v5900_v16  ;;  %v5860_v16 = vld [vmem:[%s7645_s26 + $0x20] sm:$0xf] }
 0x225   : > { %v1479_v35 = vpop.xlane.xlu1 %1478  ;;  %2594 = vmatpush.bf16.msra.mxu2 %v5869_v29  ;;  %v6143_v29 = vld [vmem:[%s7645_s26 + $0x24] sm:$0xf0] }
 0x226   : > { %v7684_v28 = vmax.f32 %v7671_v5, %v1479_v35  ;;  %2683 = vmatpush.bf16.msra.mxu3 %v5901_v17  ;;  %v6122_v35 = vld [vmem:[%s7151_s12 + $0xd4] sm:$0xf0]  ;;  %v5892_v17 = vld [vmem:[%s7645_s26 + $0xa0] sm:$0xf]  ;;  %v5861_v33 = vor.u32 %v6143_v29, %v5860_v16  ;;  %v6141_v29 = vld [vmem:[%s7645_s26 + $0x4] sm:$0xf0] }
 0x227   : > { %v5777_v60 = vor.u32 %v6122_v35, %v5776_v52  ;;  %v5893_v31 = vor.u32 %v6151_v15, %v5892_v17  ;;  %v7714_v52 = vld [vmem:[#allocation2 + $0x78] sm:$0xff]  ;;  %v5852_v16 = vld [vmem:[%s7645_s26] sm:$0xf] }
 0x228   : > { %2846 = vst.msk [vmem:[#allocation2 + $0x68] sm:$0xff] %vm747_vm0, %v7684_v28 }
 0x229   : > { %2595 = vmatpush.bf16.msra.mxu2 %v5865_v57  ;;  %1301 = vmatmul.bf16.gmra.mxu0 %v5777_v60  ;;  %v6150_v57 = vld [vmem:[%s7645_s26 + $0x94] sm:$0xf0] }
 0x22a   : > { %2684 = vmatpush.bf16.msra.mxu3 %v5897_v11  ;;  %1390 = vmatmul.bf16.gmra.mxu1 %v5777_v60 }
 0x22d   : > { %v1482_v37 = vpop.xlane.xlu2 %1481  ;;  %2596 = vmatpush.bf16.msra.mxu2 %v5861_v33  ;;  %v5853_v33 = vor.u32 %v6141_v29, %v5852_v16  ;;  %v1498_v29 = vmax.f32 %v7716_v39, %v7718_v38 }
 0x22e   : > { %v7699_v40 = vmax.f32 %v7694_v51, %v1482_v37  ;;  %2288 = vperm.xlu1 %6267, %v7696_v36   ;;  %v6142_v37 = vld [vmem:[%s7645_s26 + $0x14] sm:$0xf0]  ;;  %v5888_v36 = vld [vmem:[%s7645_s26 + $0x90] sm:$0xf]  ;;  %2685 = vmatpush.bf16.msra.mxu3 %v5893_v31 }
 0x22f   : > { %v5857_v35 = vor.u32 %v6142_v37, %v5856_v63  ;;  %v5889_v11 = vor.u32 %v6150_v57, %v5888_v36  ;;  %v5885_v36 = vor.u32 %v6149_v22, %v5884_v23  ;;  %v7732_v37 = vld [vmem:[#allocation2 + $0x80] sm:$0xff]  ;;  %v7738_v57 = vpop.f32.mrf.mxu0 }
 0x230   : > { %2847 = vst.msk [vmem:[#allocation2 + $0x70] sm:$0xff] %vm747_vm0, %v7699_v40 }
 0x231   : > { %2597 = vmatpush.bf16.msra.mxu2 %v5857_v35  ;;  %10017 = vst [vmem:[#allocation29_spill] sm:$0xff] %v7738_v57 }
 0x232   : > { %2686 = vmatpush.bf16.msra.mxu3 %v5889_v11 }
 0x235   : > { %v1665_v17 = vpop.permute.xlu2 %1664  ;;  %v1485_v15 = vpop.xlane.xlu0 %1484  ;;  %2598 = vmatpush.bf16.msra.mxu2 %v5853_v33 }
 0x236   : > { %v1822_v60 = vsub.f32 %v7171_v43, %v1665_v17  ;;  %v1823_v26 = vsub.f32 %v7173_v44, %v1665_v17  ;;  %v7727_v25 = vmax.f32 %v7714_v52, %v1485_v15  ;;  %1689 = vperm.xlu1 %6267, %v7465_v24   ;;  %2687 = vmatpush.bf16.msra.mxu3 %v5885_v36 }
 0x238   : > { %v1886_v63 = vmul.f32 1.442695, %v1822_v60  ;;  %v1888_v31 = vmul.f32 1.442695, %v1823_v26  ;;  %2848 = vst.msk [vmem:[#allocation2 + $0x78] sm:$0xff] %vm747_vm0, %v7727_v25  ;;  %v7740_v26 = vpop.f32.mrf.mxu1 }
 0x239   : > { %10018 = vst [vmem:[#allocation30_spill] sm:$0xff] %v7740_v26  ;;  %v1501_v23 = vmax.f32 %v7738_v57, %v7740_v26 }
 0x23a   : > { %6278 = vpow2.f32 %v1886_v63 }
 0x23b   : > { %6280 = vpow2.f32 %v1888_v31  ;;  %v1573_v31 = vsub.f32 %v7505_v41, %v7514_v45  ;;  %v1571_v41 = vsub.f32 %v7456_v18, %v7465_v24 }
 0x23d   : > { %v1488_v43 = vpop.xlane.xlu1 %1487 }
 0x23e   : > { %1699 = vperm.xlu1 %6267, %v7514_v45   ;;  %v7736_v44 = vmax.f32 %v7732_v37, %v1488_v43 }
 0x240   : > { %v6279_v35 = vpop.eup %6278  ;;  %2849 = vst.msk [vmem:[#allocation2 + $0x80] sm:$0xff] %vm747_vm0, %v7736_v44 }
 0x241   : > { %v6281_v22 = vpop.eup %6280 }
 0x242   : > { %v7746_v11 = vadd.f32 %v6281_v22, %v6279_v35 }
 0x246   : > { %1502 = vmax.xlane.f32.xlu0 %v1501_v23 }
 0x248   : > { %v1670_v16 = vpop.permute.xlu0 %1669 }
 0x249   : > { %v1824_v17 = vsub.f32 %v7177_v46, %v1670_v16  ;;  %v1825_v15 = vsub.f32 %v7179_v47, %v1670_v16  ;;  %v1612_v46 = vmul.f32 1.442695, %v1573_v31  ;;  %v5780_v47 = vld [vmem:[%s7151_s12 + $0xe0] sm:$0xf]  ;;  %v6123_v16 = vld [vmem:[%s7151_s12 + $0xe4] sm:$0xf0] }
 0x24b   : > { %v1890_v60 = vmul.f32 1.442695, %v1824_v17  ;;  %v1892_v33 = vmul.f32 1.442695, %v1825_v15  ;;  %v5781_v17 = vor.u32 %v6123_v16, %v5780_v47  ;;  %v7787_v47 = vld [vmem:[#allocation2 + $0x90] sm:$0xff]  ;;  %v1572_v16 = vsub.f32 %v7478_v27, %v7489_v34 }
 0x24c   : > { %1499 = vmax.xlane.f32.xlu2 %v1498_v29 }
 0x24d   : > { %6282 = vpow2.f32 %v1890_v60  ;;  %1306 = vmatmul.bf16.gmra.mxu0 %v5781_v17  ;;  %1395 = vmatmul.bf16.gmra.mxu1 %v5781_v17 }
 0x24e   : > { %6284 = vpow2.f32 %v1892_v33  ;;  %v7767_v33 = vpop.f32.mrf.mxu0 }
 0x24f   : > { %6286 = vpow2.f32 %v1612_v46  ;;  %10020 = vst [vmem:[#allocation32_spill] sm:$0xff] %v7767_v33 }
 0x253   : > { %v6283_v63 = vpop.eup %6282 }
 0x254   : > { %v6285_v36 = vpop.eup %6284  ;;  %v2463_v43 = vpack.c.bf16 %v6283_v63, %v6279_v35 }
 0x255   : > { %v7754_v23 = vpop.permute.xlu1 %2273  ;;  %v2464_v26 = vpack.c.bf16 %v6285_v36, %v6281_v22  ;;  %v7756_v57 = vadd.f32 %v6285_v36, %v6283_v63  ;;  %v7765_v60 = vpop.eup %6286  ;;  %v7780_v36 = vld [vmem:[#allocation2 + $0x88] sm:$0xff] }
 0x256   : > { %10019 = vst [vmem:[#allocation31_spill] sm:$0xff] %v7754_v23  ;;  %2599 = vmatmul.bf16.vlgmr.msra.gmra.mxu2 %v2463_v43  ;;  %v7769_v63 = vpop.f32.mrf.mxu1 }
 0x257   : > { %2688 = vmatmul.bf16.vlgmr.msra.gmra.mxu3 %v2464_v26  ;;  %v1608_v26 = vmul.f32 1.442695, %v1571_v41  ;;  %10021 = vst [vmem:[#allocation33_spill] sm:$0xff] %v7769_v63 }
 0x25a   : > { %1704 = vperm.xlu0 %6266, %v7543_v21  }
 0x25d   : > { %v1675_v45 = vpop.permute.xlu1 %1674 }
 0x25e   : > { %v1826_v35 = vsub.f32 %v7183_v49, %v1675_v45  ;;  %v1827_v22 = vsub.f32 %v7185_v50, %v1675_v45  ;;  %v1504_v49 = vmax.f32 %v7767_v33, %v7769_v63  ;;  %v5784_v45 = vld [vmem:[%s7151_s12 + $0xf0] sm:$0xf] }
 0x260   : > { %v1894_v29 = vmul.f32 1.442695, %v1826_v35  ;;  %v1896_v15 = vmul.f32 1.442695, %v1827_v22  ;;  %v6124_v35 = vld [vmem:[%s7151_s12 + $0xf4] sm:$0xf0] }
 0x261   : > { %v1610_v22 = vmul.f32 1.442695, %v1572_v16 }
 0x262   : > { %6288 = vpow2.f32 %v1894_v29  ;;  %2308 = vperm.xlu0 %6266, %v7765_v60  }
 0x263   : > { %6290 = vpow2.f32 %v1896_v15  ;;  %v5785_v15 = vor.u32 %v6124_v35, %v5784_v45 }
 0x264   : > { %1694 = vperm.xlu2 %6265, %v7489_v34   ;;  %6292 = vpow2.f32 %v1608_v26  ;;  %v7800_v26 = vpop.f32.mrf.mxu1 }
 0x265   : > { %1311 = vmatmul.bf16.gmra.mxu0 %v5785_v15  ;;  %1400 = vmatmul.bf16.gmra.mxu1 %v5785_v15  ;;  %6294 = vpow2.f32 %v1610_v22  ;;  %v7813_v15 = vld [vmem:[#allocation2 + $0x98] sm:$0xff] }
 0x268   : > { %v6289_v50 = vpop.eup %6288  ;;  %1505 = vmax.xlane.f32.xlu1 %v1504_v49  ;;  %v7802_v49 = vpop.f32.mrf.mxu0 }
 0x269   : > { %v6291_v18 = vpop.eup %6290 }
 0x26a   : > { %v7775_v24 = vadd.f32 %v6291_v18, %v6289_v50  ;;  %v7777_v31 = vpop.eup %6292 }
 0x26c   : > { %2298 = vperm.xlu2 %6265, %v7777_v31   ;;  %v7809_v45 = vpop.f32.mrf.mxu1 }
 0x26d   : > { %10024 = vst [vmem:[#allocation36_spill] sm:$0xff] %v7809_v45 }
 0x26e   : > { %v1491_v43 = vpop.xlane.xlu2 %1490 }
 0x26f   : > { %v7783_v46 = vmax.f32 %v7780_v36, %v1491_v43 }
 0x270   : > { %v7811_v35 = vpop.f32.mrf.mxu0 }
 0x271   : > { %2850 = vst.msk [vmem:[#allocation2 + $0x88] sm:$0xff] %vm747_vm0, %v7783_v46 }
 0x273   : > { %v1494_v17 = vpop.xlane.xlu0 %1493 }
 0x274   : > { %v7792_v41 = vmax.f32 %v7787_v47, %v1494_v17  ;;  %v7806_v17 = vpop.eup %6294 }
 0x275   : > { %10023 = vst [vmem:[#allocation35_spill] sm:$0xff] %v7806_v17 }
 0x276   : > { %v7796_v29 = vpop.permute.xlu2 %2278  ;;  %2851 = vst.msk [vmem:[#allocation2 + $0x90] sm:$0xff] %vm747_vm0, %v7792_v41 }
 0x277   : > { %10022 = vst [vmem:[#allocation34_spill] sm:$0xff] %v7796_v29 }
 0x27e   : > { %v1680_v27 = vpop.permute.xlu2 %1679 }
 0x27f   : > { %v1828_v34 = vsub.f32 %v7191_v54, %v1680_v27  ;;  %v1829_v43 = vsub.f32 %v7193_v56, %v1680_v27  ;;  %v1510_v56 = vmax.f32 %v7811_v35, %v7809_v45 }
 0x281   : > { %v1898_v16 = vmul.f32 1.442695, %v1828_v34  ;;  %v1900_v29 = vmul.f32 1.442695, %v1829_v43  ;;  %2303 = vperm.xlu1 %6267, %v7806_v17  }
 0x283   : > { %6296 = vpow2.f32 %v1898_v16 }
 0x284   : > { %6298 = vpow2.f32 %v1900_v29 }
 0x286   : > { %v1685_v22 = vpop.permute.xlu2 %1684 }
 0x287   : > { %v1830_v23 = vsub.f32 %v7197_v58, %v1685_v22  ;;  %v1831_v54 = vsub.f32 %v7199_v59, %v1685_v22  ;;  %v1507_v22 = vmax.f32 %v7802_v49, %v7800_v26 }
 0x288   : > { %v1497_v27 = vpop.xlane.xlu1 %1496 }
 0x289   : > { %v6297_v34 = vpop.eup %6296  ;;  %v1902_v43 = vmul.f32 1.442695, %v1830_v23  ;;  %v1904_v17 = vmul.f32 1.442695, %v1831_v54  ;;  %1714 = vperm.xlu1 %6267, %v7591_v8   ;;  %v7821_v29 = vmax.f32 %v7813_v15, %v1497_v27 }
 0x28a   : > { %v6299_v16 = vpop.eup %6298  ;;  %v2465_v63 = vpack.c.bf16 %v6297_v34, %v6289_v50  ;;  %v1576_v50 = vsub.f32 %v7580_v53, %v7591_v8 }
 0x28b   : > { %6300 = vpow2.f32 %v1902_v43  ;;  %v2466_v33 = vpack.c.bf16 %v6299_v16, %v6291_v18  ;;  %2852 = vst.msk [vmem:[#allocation2 + $0x98] sm:$0xff] %vm747_vm0, %v7821_v29  ;;  %v7825_v58 = vadd.f32 %v6299_v16, %v6297_v34 }
 0x28c   : > { %6302 = vpow2.f32 %v1904_v17  ;;  %2604 = vmatmul.bf16.gmra.mxu2 %v2465_v63  ;;  %1511 = vmax.xlane.f32.xlu0 %v1510_v56  ;;  %v1618_v18 = vmul.f32 1.442695, %v1576_v50  ;;  %v7840_v17 = vpop.permute.xlu0 %2283  ;;  %v7847_v50 = vpop.f32.mrf.mxu0 }
 0x28d   : > { %2693 = vmatmul.bf16.gmra.mxu3 %v2466_v33  ;;  %v1574_v33 = vsub.f32 %v7532_v2, %v7543_v21  ;;  %10026 = vst [vmem:[#allocation38_spill] sm:$0xff] %v7840_v17 }
 0x28e   : > { %6304 = vpow2.f32 %v1618_v18  ;;  %10028 = vst [vmem:[#allocation40_spill] sm:$0xff] %v7847_v50 }
 0x28f   : > { %v1614_v56 = vmul.f32 1.442695, %v1574_v33 }
 0x291   : > { %v6301_v59 = vpop.eup %6300  ;;  %6306 = vpow2.f32 %v1614_v56 }
 0x292   : > { %v6303_v23 = vpop.eup %6302 }
 0x293   : > { %v7829_v54 = vadd.f32 %v6303_v23, %v6301_v59 }
 0x294   : > { %v7838_v63 = vpop.eup %6304  ;;  %v7852_v18 = vpop.permute.xlu0 %2293 }
 0x295   : > { %1508 = vmax.xlane.f32.xlu2 %v1507_v22  ;;  %v7845_v22 = vpop.f32.mrf.mxu1  ;;  %10029 = vst [vmem:[#allocation41_spill] sm:$0xff] %v7852_v18 }
 0x296   : > { %10027 = vst [vmem:[#allocation39_spill] sm:$0xff] %v7845_v22  ;;  %v1513_v2 = vmax.f32 %v7847_v50, %v7845_v22 }
 0x297   : > { %v7856_v33 = vpop.eup %6306 }
 0x298   : > { %10030 = vst [vmem:[#allocation42_spill] sm:$0xff] %v7856_v33 }
 0x2a0   : > { %v7833_v27 = vpop.permute.xlu1 %2288  ;;  %1719 = vperm.xlu0 %6266, %v7624_v48  }
 0x2a1   : > { %10025 = vst [vmem:[#allocation37_spill] sm:$0xff] %v7833_v27 }
 0x2a8   : > { %v1690_v34 = vpop.permute.xlu1 %1689  ;;  %2323 = vperm.xlu0 %6266, %v7838_v63  }
 0x2a9   : > { %v1832_v43 = vsub.f32 %v7203_v61, %v1690_v34  ;;  %v1833_v53 = vsub.f32 %v7205_v62, %v1690_v34 }
 0x2ab   : > { %v1906_v8 = vmul.f32 1.442695, %v1832_v43  ;;  %v1908_v16 = vmul.f32 1.442695, %v1833_v53 }
 0x2ad   : > { %6308 = vpow2.f32 %v1906_v8  ;;  %1709 = vperm.xlu2 %6265, %v7568_v42  }
 0x2ae   : > { %6310 = vpow2.f32 %v1908_v16 }
 0x2b0   : > { %v1700_v21 = vpop.permute.xlu1 %1699 }
 0x2b1   : > { %v1836_v61 = vsub.f32 %v7215_v3, %v1700_v21  ;;  %v1837_v62 = vsub.f32 %v7217_v4, %v1700_v21  ;;  %v7861_v3 = vld [vmem:[#allocation2 + $0xa8] sm:$0xff] }
 0x2b3   : > { %v6309_v56 = vpop.eup %6308  ;;  %v1914_v34 = vmul.f32 1.442695, %v1836_v61  ;;  %v1916_v43 = vmul.f32 1.442695, %v1837_v62  ;;  %1514 = vmax.xlane.f32.xlu1 %v1513_v2 }
 0x2b4   : > { %v6311_v53 = vpop.eup %6310  ;;  %v2467_v8 = vpack.c.bf16 %v6309_v56, %v6301_v59  ;;  %v1575_v59 = vsub.f32 %v7555_v30, %v7568_v42 }
 0x2b5   : > { %6312 = vpow2.f32 %v1914_v34  ;;  %2313 = vperm.xlu2 %6265, %v7856_v33   ;;  %v2468_v16 = vpack.c.bf16 %v6311_v53, %v6303_v23  ;;  %v7859_v17 = vadd.f32 %v6311_v53, %v6309_v56  ;;  %v7870_v23 = vld [vmem:[#allocation2 + $0xa0] sm:$0xff]  ;;  %v7877_v53 = vpop.f32.mrf.mxu1 }
 0x2b6   : > { %6314 = vpow2.f32 %v1916_v43  ;;  %2609 = vmatmul.bf16.gmra.mxu2 %v2467_v8  ;;  %v1616_v43 = vmul.f32 1.442695, %v1575_v59  ;;  %10031 = vst [vmem:[#allocation43_spill] sm:$0xff] %v7877_v53  ;;  %v7879_v8 = vpop.f32.mrf.mxu0 }
 0x2b7   : > { %2698 = vmatmul.bf16.gmra.mxu3 %v2468_v16  ;;  %10032 = vst [vmem:[#allocation44_spill] sm:$0xff] %v7879_v8 }
 0x2b8   : > { %6316 = vpow2.f32 %v1616_v43 }
 0x2b9   : > { %v1503_v4 = vpop.xlane.xlu0 %1502 }
 0x2ba   : > { %v7864_v21 = vmax.f32 %v7861_v3, %v1503_v4 }
 0x2bb   : > { %v6313_v61 = vpop.eup %6312 }
 0x2bc   : > { %v6315_v62 = vpop.eup %6314  ;;  %2854 = vst.msk [vmem:[#allocation2 + $0xa8] sm:$0xff] %vm747_vm0, %v7864_v21 }
 0x2bd   : > { %v7872_v2 = vadd.f32 %v6315_v62, %v6313_v61 }
 0x2be   : > { %v7885_v27 = vpop.eup %6316  ;;  %v7889_v59 = vpop.f32.mrf.mxu0 }
 0x2bf   : > { %v1500_v56 = vpop.xlane.xlu2 %1499  ;;  %10033 = vst [vmem:[#allocation45_spill] sm:$0xff] %v7885_v27 }
 0x2c0   : > { %v7875_v34 = vmax.f32 %v7870_v23, %v1500_v56  ;;  %v7887_v56 = vpop.f32.mrf.mxu1  ;;  %10035 = vst [vmem:[#allocation47_spill] sm:$0xff] %v7889_v59 }
 0x2c1   : > { %10034 = vst [vmem:[#allocation46_spill] sm:$0xff] %v7887_v56  ;;  %v1519_v43 = vmax.f32 %v7889_v59, %v7887_v56 }
 0x2c2   : > { %2853 = vst.msk [vmem:[#allocation2 + $0xa0] sm:$0xff] %vm747_vm0, %v7875_v34 }
 0x2c7   : > { %v1695_v16 = vpop.permute.xlu2 %1694 }
 0x2c8   : > { %v1834_v30 = vsub.f32 %v7209_v0, %v1695_v16  ;;  %v1835_v42 = vsub.f32 %v7211_v1, %v1695_v16 }
 0x2ca   : > { %v1910_v4 = vmul.f32 1.442695, %v1834_v30  ;;  %v1912_v18 = vmul.f32 1.442695, %v1835_v42  ;;  %v7897_v42 = vld [vmem:[#allocation2 + $0xb0] sm:$0xff] }
 0x2cc   : > { %6318 = vpow2.f32 %v1910_v4  ;;  %2318 = vperm.xlu1 %6267, %v7885_v27  }
 0x2cd   : > { %6320 = vpow2.f32 %v1912_v18  ;;  %v1516_v18 = vmax.f32 %v7879_v8, %v7877_v53 }
 0x2d2   : > { %v6319_v22 = vpop.eup %6318  ;;  %1520 = vmax.xlane.f32.xlu0 %v1519_v43 }
 0x2d3   : > { %v6321_v0 = vpop.eup %6320  ;;  %v2469_v50 = vpack.c.bf16 %v6313_v61, %v6319_v22  ;;  %v1705_v61 = vpop.permute.xlu0 %1704 }
 0x2d4   : > { %1729 = vperm.xlu1 %6267, %v7684_v28   ;;  %v2470_v1 = vpack.c.bf16 %v6315_v62, %v6321_v0  ;;  %v7895_v16 = vadd.f32 %v6321_v0, %v6319_v22  ;;  %v1579_v22 = vsub.f32 %v7671_v5, %v7684_v28  ;;  %v7921_v5 = vpop.f32.mrf.mxu1  ;;  %v7923_v28 = vpop.f32.mrf.mxu0 }
 0x2d5   : > { %2614 = vmatmul.bf16.gmra.mxu2 %v2469_v50  ;;  %10040 = vst [vmem:[#allocation52_spill] sm:$0xff] %v7921_v5 }
 0x2d6   : > { %2703 = vmatmul.bf16.gmra.mxu3 %v2470_v1  ;;  %v1624_v50 = vmul.f32 1.442695, %v1579_v22  ;;  %10041 = vst [vmem:[#allocation53_spill] sm:$0xff] %v7923_v28 }
 0x2d8   : > { %6322 = vpow2.f32 %v1624_v50  ;;  %v7931_v50 = vld [vmem:[#allocation2 + $0xc0] sm:$0xff] }
 0x2d9   : > { %v2600_v30 = vpop.f32.mrf.mxu2 }
 0x2da   : > { %v2689_v4 = vpop.f32.mrf.mxu3 }
 0x2db   : > { %v7901_v27 = vadd.f32 %v2689_v4, %v2600_v30  ;;  %v1506_v56 = vpop.xlane.xlu1 %1505  ;;  %v7918_v30 = vpop.permute.xlu0 %2308  ;;  %v1522_v4 = vmax.f32 %v7923_v28, %v7921_v5  ;;  %v1838_v5 = vsub.f32 %v7221_v6, %v1705_v61 }
 0x2dc   : > { %v7904_v43 = vmax.f32 %v7897_v42, %v1506_v56  ;;  %v1577_v56 = vsub.f32 %v7614_v55, %v7624_v48  ;;  %10039 = vst [vmem:[#allocation51_spill] sm:$0xff] %v7918_v30 }
 0x2dd   : > { %10036 = vst [vmem:[#allocation48_spill] sm:$0xff] %v7901_v27  ;;  %v1918_v59 = vmul.f32 1.442695, %v1838_v5 }
 0x2de   : > { %1517 = vmax.xlane.f32.xlu2 %v1516_v18  ;;  %2855 = vst.msk [vmem:[#allocation2 + $0xb0] sm:$0xff] %vm747_vm0, %v7904_v43  ;;  %v7911_v62 = vpop.eup %6322  ;;  %v1620_v0 = vmul.f32 1.442695, %v1577_v56 }
 0x2df   : > { %10037 = vst [vmem:[#allocation49_spill] sm:$0xff] %v7911_v62 }
 0x2e0   : > { %6324 = vpow2.f32 %v1620_v0 }
 0x2e6   : > { %1734 = vperm.xlu0 %6266, %v7699_v40   ;;  %v7929_v48 = vpop.eup %6324 }
 0x2e7   : > { %10042 = vst [vmem:[#allocation54_spill] sm:$0xff] %v7929_v48 }
 0x2ee   : > { %2338 = vperm.xlu0 %6266, %v7911_v62  }
 0x2f3   : > { %v7916_v1 = vpop.permute.xlu1 %2303 }
 0x2f4   : > { %10038 = vst [vmem:[#allocation50_spill] sm:$0xff] %v7916_v1  ;;  %v7934_v1 = vpop.permute.xlu2 %2298 }
 0x2f5   : > { %10043 = vst [vmem:[#allocation55_spill] sm:$0xff] %v7934_v1 }
 0x2f6   : > { %1724 = vperm.xlu2 %6265, %v7654_v13  }
 0x2fb   : > { %v1715_v18 = vpop.permute.xlu1 %1714 }
 0x2fc   : > { %v1842_v22 = vsub.f32 %v7233_v12, %v1715_v18  ;;  %v1843_v55 = vsub.f32 %v7237_v14, %v1715_v18  ;;  %v7943_v14 = vpop.f32.mrf.mxu2  ;;  %v7945_v18 = vld [vmem:[#allocation2 + $0xb8] sm:$0xff] }
 0x2fd   : > { %10044 = vst [vmem:[#allocation56_spill] sm:$0xff] %v7943_v14 }
 0x2fe   : > { %v1926_v56 = vmul.f32 1.442695, %v1842_v22  ;;  %v1928_v30 = vmul.f32 1.442695, %v1843_v55  ;;  %2328 = vperm.xlu2 %6265, %v7929_v48   ;;  %1523 = vmax.xlane.f32.xlu1 %v1522_v4  ;;  %v7949_v4 = vpop.f32.mrf.mxu0  ;;  %v7951_v55 = vpop.f32.mrf.mxu1  ;;  %v1839_v48 = vsub.f32 %v7223_v7, %v1705_v61 }
 0x2ff   : > { %v1512_v0 = vpop.xlane.xlu0 %1511  ;;  %10045 = vst [vmem:[#allocation57_spill] sm:$0xff] %v7949_v4 }
 0x300   : > { %6326 = vpow2.f32 %v1926_v56  ;;  %v7937_v27 = vmax.f32 %v7931_v50, %v1512_v0  ;;  %10046 = vst [vmem:[#allocation58_spill] sm:$0xff] %v7951_v55  ;;  %v1578_v56 = vsub.f32 %v7639_v32, %v7654_v13  ;;  %v7955_v0 = vpop.f32.mrf.mxu3  ;;  %v1920_v32 = vmul.f32 1.442695, %v1839_v48 }
 0x301   : > { %6328 = vpow2.f32 %v1928_v30  ;;  %10047 = vst [vmem:[#allocation59_spill] sm:$0xff] %v7955_v0 }
 0x302   : > { %2857 = vst.msk [vmem:[#allocation2 + $0xc0] sm:$0xff] %vm747_vm0, %v7937_v27  ;;  %v1622_v28 = vmul.f32 1.442695, %v1578_v56 }
 0x304   : > { %6330 = vpow2.f32 %v1622_v28 }
 0x305   : > { %6332 = vpow2.f32 %v1918_v59 }
 0x306   : > { %v7941_v12 = vpop.eup %6326  ;;  %v7972_v33 = vpop.f32.mrf.mxu0  ;;  %6334 = vpow2.f32 %v1920_v32 }
 0x307   : > { %v7947_v22 = vpop.eup %6328  ;;  %10049 = vst [vmem:[#allocation61_spill] sm:$0xff] %v7972_v33  ;;  %v7974_v6 = vpop.f32.mrf.mxu1 }
 0x308   : > { %v1509_v30 = vpop.xlane.xlu2 %1508  ;;  %v7959_v1 = vadd.f32 %v7947_v22, %v7941_v12  ;;  %10050 = vst [vmem:[#allocation62_spill] sm:$0xff] %v7974_v6  ;;  %v1528_v28 = vmax.f32 %v7972_v33, %v7974_v6 }
 0x309   : > { %v7962_v14 = vmax.f32 %v7945_v18, %v1509_v30 }
 0x30a   : > { %v7980_v48 = vpop.eup %6330 }
 0x30b   : > { %2856 = vst.msk [vmem:[#allocation2 + $0xb8] sm:$0xff] %vm747_vm0, %v7962_v14 }
 0x30c   : > { %10051 = vst [vmem:[#allocation63_spill] sm:$0xff] %v7980_v48 }
 0x30f   : > { %v2605_v13 = vpop.f32.mrf.mxu2 }
 0x310   : > { %v2694_v0 = vpop.f32.mrf.mxu3  ;;  %v1710_v53 = vpop.permute.xlu2 %1709 }
 0x311   : > { %v7968_v8 = vadd.f32 %v2694_v0, %v2605_v13  ;;  %v1840_v62 = vsub.f32 %v7227_v9, %v1710_v53  ;;  %v1841_v30 = vsub.f32 %v7229_v10, %v1710_v53  ;;  %v7983_v53 = vpop.eup %6332 }
 0x312   : > { %v1720_v45 = vpop.permute.xlu0 %1719 }
 0x313   : > { %10048 = vst [vmem:[#allocation60_spill] sm:$0xff] %v7968_v8  ;;  %v1922_v56 = vmul.f32 1.442695, %v1840_v62  ;;  %v1924_v7 = vmul.f32 1.442695, %v1841_v30  ;;  %v1844_v61 = vsub.f32 %v7257_v19, %v1720_v45  ;;  %v1845_v5 = vsub.f32 %v7261_v20, %v1720_v45  ;;  %v7985_v19 = vpop.eup %6334  ;;  %v8046_v8 = vld [vmem:[#allocation2 + $0xd0] sm:$0xff] }
 0x315   : > { %6336 = vpow2.f32 %v1922_v56  ;;  %v1930_v9 = vmul.f32 1.442695, %v1844_v61  ;;  %v1932_v10 = vmul.f32 1.442695, %v1845_v5  ;;  %v7995_v56 = vld [vmem:[#allocation2 + $0xc8] sm:$0xff] }
 0x316   : > { %6338 = vpow2.f32 %v1924_v7  ;;  %v1525_v7 = vmax.f32 %v7949_v4, %v7951_v55 }
 0x317   : > { %6340 = vpow2.f32 %v1930_v9  ;;  %2333 = vperm.xlu1 %6267, %v7980_v48   ;;  %v1582_v9 = vsub.f32 %v7732_v37, %v7736_v44  ;;  %v10083_v48 = vld [vmem:[#allocation14_spill] sm:$0xff] }
 0x318   : > { %6342 = vpow2.f32 %v1932_v10  ;;  %1529 = vmax.xlane.f32.xlu0 %v1528_v28 }
 0x319   : > { %v1630_v10 = vmul.f32 1.442695, %v1582_v9 }
 0x31b   : > { %v6337_v59 = vpop.eup %6336  ;;  %6344 = vpow2.f32 %v1630_v10 }
 0x31c   : > { %v6339_v20 = vpop.eup %6338  ;;  %v2471_v45 = vpack.c.bf16 %v6337_v59, %v7983_v53 }
 0x31d   : > { %v6341_v62 = vpop.eup %6340  ;;  %v2472_v0 = vpack.c.bf16 %v6339_v20, %v7985_v19  ;;  %v7989_v13 = vadd.f32 %v6339_v20, %v6337_v59  ;;  %v8008_v59 = vpop.f32.mrf.mxu2 }
 0x31e   : > { %v6343_v32 = vpop.eup %6342  ;;  %2619 = vmatmul.bf16.gmra.mxu2 %v2471_v45  ;;  %v2473_v28 = vpack.c.bf16 %v6341_v62, %v7941_v12  ;;  %10052 = vst [vmem:[#allocation64_spill] sm:$0xff] %v8008_v59  ;;  %v8010_v20 = vpop.f32.mrf.mxu3  ;;  %v1580_v45 = vsub.f32 %v7694_v51, %v7699_v40  ;;  %v8029_v51 = vld [vmem:[#allocation2 + $0xd8] sm:$0xff] }
 0x31f   : > { %2708 = vmatmul.bf16.gmra.mxu3 %v2472_v0  ;;  %1744 = vperm.xlu1 %6267, %v7736_v44   ;;  %v7992_v30 = vadd.f32 %v6343_v32, %v6341_v62  ;;  %10053 = vst [vmem:[#allocation65_spill] sm:$0xff] %v8010_v20 }
 0x320   : > { %2079 = vadd.xlane.f32.xlu0 %v7746_v11  ;;  %v2474_v11 = vpack.c.bf16 %v6343_v32, %v7947_v22  ;;  %v1626_v44 = vmul.f32 1.442695, %v1580_v45  ;;  %v8020_v22 = vpop.permute.xlu0 %2323  ;;  %v10060_v45 = vld [vmem:[#allocation10_spill] sm:$0xff] }
 0x321   : > { %v8015_v62 = vpop.eup %6344  ;;  %10055 = vst [vmem:[#allocation67_spill] sm:$0xff] %v8020_v22  ;;  %v8044_v22 = vpop.permute.xlu2 %2313 }
 0x322   : > { %6346 = vpow2.f32 %v1626_v44  ;;  %10062 = vst [vmem:[#allocation10_spill] sm:$0xff] %v8044_v22 }
 0x326   : > { %v1515_v61 = vpop.xlane.xlu1 %1514 }
 0x327   : > { %1526 = vmax.xlane.f32.xlu2 %v1525_v7  ;;  %v8000_v5 = vmax.f32 %v7995_v56, %v1515_v61  ;;  %v8025_v7 = vpop.f32.mrf.mxu1  ;;  %v8027_v61 = vpop.f32.mrf.mxu0 }
 0x328   : > { %10057 = vst [vmem:[#allocation69_spill] sm:$0xff] %v8025_v7  ;;  %v1531_v40 = vmax.f32 %v8027_v61, %v8025_v7  ;;  %v8034_v9 = vpop.eup %6346 }
 0x329   : > { %2858 = vst.msk [vmem:[#allocation2 + $0xc8] sm:$0xff] %vm747_vm0, %v8000_v5 }
 0x32a   : > { %10058 = vst [vmem:[#allocation70_spill] sm:$0xff] %v8027_v61 }
 0x32b   : > { %10059 = vst [vmem:[#allocation71_spill] sm:$0xff] %v8034_v9 }
 0x32e   : > { %2624 = vmatmul.bf16.gmra.mxu2 %v2473_v28 }
 0x32f   : > { %2713 = vmatmul.bf16.gmra.mxu3 %v2474_v11 }
 0x334   : > { %1749 = vperm.xlu0 %6266, %v7783_v46  }
 0x339   : > { %v2610_v0 = vpop.f32.mrf.mxu2 }
 0x33a   : > { %v2699_v12 = vpop.f32.mrf.mxu3 }
 0x33b   : > { %v8017_v37 = vadd.f32 %v2699_v12, %v2610_v0  ;;  %v10061_v12 = vld [vmem:[#allocation11_spill] sm:$0xff] }
 0x33c   : > { %2353 = vperm.xlu0 %6266, %v8015_v62  }
 0x33d   : > { %10054 = vst [vmem:[#allocation66_spill] sm:$0xff] %v8017_v37 }
 0x33e   : > { %v8022_v32 = vpop.permute.xlu1 %2318 }
 0x33f   : > { %10056 = vst [vmem:[#allocation68_spill] sm:$0xff] %v8022_v32  ;;  %1739 = vperm.xlu2 %6265, %v7727_v25  }
 0x344   : > { %1764 = vperm.xlu0 %6266, %v7875_v34  }
 0x345   : > { %v1521_v28 = vpop.xlane.xlu0 %1520 }
 0x346   : > { %v1730_v11 = vpop.permute.xlu1 %1729  ;;  %v8037_v10 = vmax.f32 %v8029_v51, %v1521_v28 }
 0x347   : > { %v1848_v0 = vsub.f32 %v10060_v45, %v1730_v11  ;;  %v1849_v44 = vsub.f32 %v10061_v12, %v1730_v11  ;;  %2343 = vperm.xlu2 %6265, %v8034_v9   ;;  %v1581_v11 = vsub.f32 %v7714_v52, %v7727_v25 }
 0x348   : > { %2860 = vst.msk [vmem:[#allocation2 + $0xd8] sm:$0xff] %vm747_vm0, %v8037_v10 }
 0x349   : > { %v1938_v37 = vmul.f32 1.442695, %v1848_v0  ;;  %v1940_v32 = vmul.f32 1.442695, %v1849_v44  ;;  %1532 = vmax.xlane.f32.xlu1 %v1531_v40  ;;  %v1628_v0 = vmul.f32 1.442695, %v1581_v11 }
 0x34a   : > { %v10064_v44 = vld [vmem:[#allocation9_spill] sm:$0xff]  ;;  %v8065_v11 = vld [vmem:[#allocation2 + $0xe0] sm:$0xff] }
 0x34b   : > { %6348 = vpow2.f32 %v1938_v37  ;;  %v10063_v37 = vld [vmem:[#allocation8_spill] sm:$0xff] }
 0x34c   : > { %6350 = vpow2.f32 %v1940_v32 }
 0x34d   : > { %6352 = vpow2.f32 %v1628_v0  ;;  %v8082_v0 = vpop.f32.mrf.mxu2 }
 0x34e   : > { %10068 = vst [vmem:[#allocation72_spill] sm:$0xff] %v8082_v0 }
 0x351   : > { %v6349_v28 = vpop.eup %6348  ;;  %v1518_v20 = vpop.xlane.xlu2 %1517 }
 0x352   : > { %v6351_v59 = vpop.eup %6350  ;;  %v8049_v45 = vmax.f32 %v8046_v8, %v1518_v20 }
 0x353   : > { %v8053_v12 = vadd.f32 %v6351_v59, %v6349_v28  ;;  %v8059_v20 = vpop.eup %6352 }
 0x354   : > { %2859 = vst.msk [vmem:[#allocation2 + $0xd0] sm:$0xff] %vm747_vm0, %v8049_v45 }
 0x355   : > { %10065 = vst [vmem:[#allocation11_spill] sm:$0xff] %v8059_v20 }
 0x359   : > { %v1725_v40 = vpop.permute.xlu2 %1724 }
 0x35a   : > { %v1846_v32 = vsub.f32 %v10063_v37, %v1725_v40  ;;  %v1847_v22 = vsub.f32 %v10064_v44, %v1725_v40  ;;  %v8084_v40 = vpop.f32.mrf.mxu3  ;;  %v8089_v37 = vld [vmem:[#allocation2 + $0xf0] sm:$0xff]  ;;  %v8100_v44 = vpop.f32.mrf.mxu2 }
 0x35b   : > { %10069 = vst [vmem:[#allocation73_spill] sm:$0xff] %v8084_v40 }
 0x35c   : > { %v1934_v7 = vmul.f32 1.442695, %v1846_v32  ;;  %v1936_v61 = vmul.f32 1.442695, %v1847_v22  ;;  %10072 = vst [vmem:[#allocation76_spill] sm:$0xff] %v8100_v44 }
 0x35e   : > { %6354 = vpow2.f32 %v1934_v7 }
 0x35f   : > { %6356 = vpow2.f32 %v1936_v61  ;;  %v1585_v61 = vsub.f32 %v7813_v15, %v7821_v29 }
 0x362   : > { %2348 = vperm.xlu1 %6267, %v8059_v20   ;;  %v8113_v44 = vpop.f32.mrf.mxu2 }
 0x364   : > { %v6355_v25 = vpop.eup %6354 }
 0x365   : > { %v6357_v52 = vpop.eup %6356  ;;  %v2475_v9 = vpack.c.bf16 %v6349_v28, %v6355_v25  ;;  %v1735_v28 = vpop.permute.xlu0 %1734 }
 0x366   : > { %v2476_v6 = vpack.c.bf16 %v6351_v59, %v6357_v52  ;;  %v8062_v33 = vadd.f32 %v6357_v52, %v6355_v25  ;;  %v1636_v59 = vmul.f32 1.442695, %v1585_v61  ;;  %v2014_v25 = vld [vmem:[#allocation3] sm:$0xff]  ;;  %v8102_v52 = vpop.f32.mrf.mxu3  ;;  %v8105_v61 = vpop.permute.xlu2 %2328 }
 0x367   : > { %2629 = vmatmul.bf16.gmra.mxu2 %v2475_v9  ;;  %10073 = vst [vmem:[#allocation77_spill] sm:$0xff] %v8102_v52  ;;  %v8111_v52 = vld [vmem:[#allocation2 + $0xe8] sm:$0xff] }
 0x368   : > { %2718 = vmatmul.bf16.gmra.mxu3 %v2476_v6  ;;  %6358 = vpow2.f32 %v1636_v59  ;;  %10074 = vst [vmem:[#allocation78_spill] sm:$0xff] %v8105_v61  ;;  %v10075_v59 = vld [vmem:[#allocation16_spill] sm:$0xff] }
 0x369   : > { %10078 = vst [vmem:[#allocation16_spill] sm:$0xff] %v8113_v44 }
 0x36e   : > { %2091 = vadd.xlane.f32.xlu0 %v7829_v54  ;;  %v8075_v6 = vpop.eup %6358  ;;  %v1583_v54 = vsub.f32 %v7780_v36, %v7783_v46 }
 0x36f   : > { %10066 = vst [vmem:[#allocation8_spill] sm:$0xff] %v8075_v6 }
 0x370   : > { %2082 = vadd.xlane.f32.xlu2 %v7756_v57  ;;  %v8080_v57 = vpop.permute.xlu0 %2338  ;;  %v1632_v9 = vmul.f32 1.442695, %v1583_v54 }
 0x371   : > { %v1524_v22 = vpop.xlane.xlu1 %1523  ;;  %10067 = vst [vmem:[#allocation9_spill] sm:$0xff] %v8080_v57 }
 0x372   : > { %v8069_v7 = vmax.f32 %v8065_v11, %v1524_v22  ;;  %6360 = vpow2.f32 %v1632_v9  ;;  %v10076_v9 = vld [vmem:[#allocation17_spill] sm:$0xff] }
 0x374   : > { %2861 = vst.msk [vmem:[#allocation2 + $0xe0] sm:$0xff] %vm747_vm0, %v8069_v7 }
 0x378   : > { %v8098_v46 = vpop.eup %6360 }
 0x379   : > { %10071 = vst [vmem:[#allocation75_spill] sm:$0xff] %v8098_v46 }
 0x382   : > { %2368 = vperm.xlu0 %6266, %v8075_v6  }
 0x388   : > { %1754 = vperm.xlu2 %6265, %v7792_v41  }
 0x389   : > { %v8087_v15 = vpop.permute.xlu1 %2333 }
 0x38a   : > { %10070 = vst [vmem:[#allocation74_spill] sm:$0xff] %v8087_v15  ;;  %1779 = vperm.xlu0 %6266, %v7962_v14  }
 0x38b   : > { %v1530_v32 = vpop.xlane.xlu0 %1529 }
 0x38c   : > { %v8093_v36 = vmax.f32 %v8089_v37, %v1530_v32  ;;  %2085 = vadd.xlane.f32.xlu1 %v7775_v24  ;;  %v10077_v24 = vld [vmem:[#allocation18_spill] sm:$0xff] }
 0x38d   : > { %v2046_v57 = vmul.f32 %v10077_v24, %v2014_v25  ;;  %v1584_v25 = vsub.f32 %v7787_v47, %v7792_v41  ;;  %v10084_v41 = vld [vmem:[#allocation15_spill] sm:$0xff] }
 0x38e   : > { %2863 = vst.msk [vmem:[#allocation2 + $0xf0] sm:$0xff] %vm747_vm0, %v8093_v36 }
 0x390   : > { %2358 = vperm.xlu2 %6265, %v8098_v46   ;;  %v8115_v46 = vpop.f32.mrf.mxu3 }
 0x391   : > { %v1745_v22 = vpop.permute.xlu1 %1744  ;;  %10079 = vst [vmem:[#allocation17_spill] sm:$0xff] %v8115_v46 }
 0x392   : > { %v1854_v54 = vsub.f32 %v10075_v59, %v1745_v22  ;;  %v1855_v32 = vsub.f32 %v10076_v9, %v1745_v22  ;;  %v1634_v9 = vmul.f32 1.442695, %v1584_v25  ;;  %v10085_v25 = vld [vmem:[#allocation19_spill] sm:$0xff] }
 0x393   : > { %v2080_v15 = vpop.xlane.xlu0 %2079 }
 0x394   : > { %v1950_v40 = vmul.f32 1.442695, %v1854_v54  ;;  %v1952_v0 = vmul.f32 1.442695, %v1855_v32  ;;  %v2174_v20 = vadd.f32 %v2080_v15, %v2046_v57  ;;  %v10080_v57 = vld [vmem:[#allocation12_spill] sm:$0xff] }
 0x396   : > { %6362 = vpow2.f32 %v1950_v40  ;;  %2207 = vst.msk [vmem:[#allocation3] sm:$0xff] %vm747_vm0, %v2174_v20  ;;  %v1850_v40 = vsub.f32 %v10080_v57, %v1735_v28  ;;  %v10081_v20 = vld [vmem:[#allocation13_spill] sm:$0xff] }
 0x397   : > { %6364 = vpow2.f32 %v1952_v0  ;;  %v1851_v0 = vsub.f32 %v10081_v20, %v1735_v28  ;;  %v10086_v20 = vld [vmem:[#allocation20_spill] sm:$0xff] }
 0x398   : > { %v1942_v32 = vmul.f32 1.442695, %v1850_v40  ;;  %6366 = vpow2.f32 %v1634_v9 }
 0x399   : > { %v1944_v46 = vmul.f32 1.442695, %v1851_v0 }
 0x39a   : > { %v1527_v61 = vpop.xlane.xlu2 %1526  ;;  %6368 = vpow2.f32 %v1942_v32 }
 0x39b   : > { %v8118_v59 = vmax.f32 %v8111_v52, %v1527_v61  ;;  %6370 = vpow2.f32 %v1944_v46 }
 0x39c   : > { %v6363_v22 = vpop.eup %6362 }
 0x39d   : > { %v6365_v54 = vpop.eup %6364  ;;  %2862 = vst.msk [vmem:[#allocation2 + $0xe8] sm:$0xff] %vm747_vm0, %v8118_v59 }
 0x39e   : > { %v8126_v15 = vadd.f32 %v6365_v54, %v6363_v22 }
 0x3a1   : > { %v2620_v24 = vpop.f32.mrf.mxu2 }
 0x3a2   : > { %v2709_v61 = vpop.f32.mrf.mxu3  ;;  %v1740_v44 = vpop.permute.xlu2 %1739 }
 0x3a3   : > { %v8128_v6 = vadd.f32 %v2709_v61, %v2620_v24  ;;  %v1852_v47 = vsub.f32 %v10083_v48, %v1740_v44  ;;  %v1853_v55 = vsub.f32 %v10084_v41, %v1740_v44  ;;  %v8137_v48 = vpop.eup %6366 }
 0x3a4   : > { %v8141_v9 = vpop.eup %6368 }
 0x3a5   : > { %10082 = vst [vmem:[#allocation18_spill] sm:$0xff] %v8128_v6  ;;  %v1946_v57 = vmul.f32 1.442695, %v1852_v47  ;;  %v1948_v4 = vmul.f32 1.442695, %v1853_v55  ;;  %1759 = vperm.xlu1 %6267, %v7821_v29   ;;  %v8143_v29 = vpop.eup %6370 }
 0x3a6   : > { %v1750_v28 = vpop.permute.xlu0 %1749 }
 0x3a7   : > { %6372 = vpow2.f32 %v1946_v57  ;;  %v1856_v40 = vsub.f32 %v10085_v25, %v1750_v28  ;;  %v1857_v0 = vsub.f32 %v10086_v20, %v1750_v28 }
 0x3a8   : > { %6374 = vpow2.f32 %v1948_v4 }
 0x3a9   : > { %v1954_v24 = vmul.f32 1.442695, %v1856_v40  ;;  %v1956_v61 = vmul.f32 1.442695, %v1857_v0  ;;  %v8135_v6 = vpop.f32.mrf.mxu2  ;;  %v1588_v0 = vsub.f32 %v7897_v42, %v7904_v43 }
 0x3aa   : > { %v8139_v44 = vpop.f32.mrf.mxu3 }
 0x3ab   : > { %10087 = vst [vmem:[#allocation12_spill] sm:$0xff] %v8139_v44  ;;  %6376 = vpow2.f32 %v1954_v24  ;;  %v8158_v24 = vld [vmem:[#allocation2 + $0xf8] sm:$0xff] }
 0x3ac   : > { %6378 = vpow2.f32 %v1956_v61 }
 0x3ad   : > { %v6373_v55 = vpop.eup %6372  ;;  %2363 = vperm.xlu1 %6267, %v8137_v48  }
 0x3ae   : > { %v6375_v46 = vpop.eup %6374  ;;  %v2477_v4 = vpack.c.bf16 %v6373_v55, %v8141_v9 }
 0x3af   : > { %v2478_v32 = vpack.c.bf16 %v6375_v46, %v8143_v29  ;;  %v8148_v47 = vadd.f32 %v6375_v46, %v6373_v55  ;;  %v1642_v55 = vmul.f32 1.442695, %v1588_v0 }
 0x3b0   : > { %2634 = vmatmul.bf16.gmra.mxu2 %v2477_v4 }
 0x3b1   : > { %v6377_v41 = vpop.eup %6376  ;;  %2723 = vmatmul.bf16.gmra.mxu3 %v2478_v32  ;;  %v2625_v57 = vpop.f32.mrf.mxu2  ;;  %6380 = vpow2.f32 %v1642_v55  ;;  %v10092_v55 = vld [vmem:[#allocation25_spill] sm:$0xff] }
 0x3b2   : > { %v6379_v28 = vpop.eup %6378  ;;  %v2714_v25 = vpop.f32.mrf.mxu3  ;;  %v2479_v4 = vpack.c.bf16 %v6377_v41, %v6363_v22 }
 0x3b3   : > { %v8150_v40 = vadd.f32 %v2714_v25, %v2625_v57  ;;  %v8152_v20 = vadd.f32 %v6379_v28, %v6377_v41  ;;  %v2480_v32 = vpack.c.bf16 %v6379_v28, %v6365_v54  ;;  %v8170_v57 = vpop.permute.xlu0 %2353  ;;  %v8180_v41 = vpop.permute.xlu2 %2343  ;;  %v2018_v28 = vld [vmem:[#allocation3 + $0x20] sm:$0xff] }
 0x3b4   : > { %2100 = vadd.xlane.f32.xlu0 %v7872_v2  ;;  %10089 = vst [vmem:[#allocation14_spill] sm:$0xff] %v8170_v57  ;;  %v1587_v57 = vsub.f32 %v7861_v3, %v7864_v21 }
 0x3b5   : > { %10088 = vst [vmem:[#allocation13_spill] sm:$0xff] %v8150_v40 }
 0x3b6   : > { %10090 = vst [vmem:[#allocation15_spill] sm:$0xff] %v8180_v41  ;;  %v1640_v41 = vmul.f32 1.442695, %v1587_v57 }
 0x3b7   : > { %v8165_v2 = vpop.eup %6380 }
 0x3b9   : > { %2088 = vadd.xlane.f32.xlu2 %v7825_v58  ;;  %v1586_v58 = vsub.f32 %v7870_v23, %v7875_v34  ;;  %v2015_v23 = vld [vmem:[#allocation3 + $0x8] sm:$0xff]  ;;  %v10091_v34 = vld [vmem:[#allocation27_spill] sm:$0xff] }
 0x3ba   : > { %v2050_v25 = vmul.f32 %v10091_v34, %v2018_v28 }
 0x3bb   : > { %v1638_v42 = vmul.f32 1.442695, %v1586_v58  ;;  %v8177_v54 = vpop.permute.xlu0 %1764 }
 0x3bc   : > { %v1533_v61 = vpop.xlane.xlu1 %1532 }
 0x3bd   : > { %v8161_v46 = vmax.f32 %v8158_v24, %v1533_v61  ;;  %6382 = vpow2.f32 %v1638_v42 }
 0x3be   : > { %6384 = vpow2.f32 %v1640_v41 }
 0x3bf   : > { %2864 = vst.msk [vmem:[#allocation2 + $0xf8] sm:$0xff] %vm747_vm0, %v8161_v46 }
 0x3c0   : > { %2639 = vmatmul.bf16.gmra.mxu2 %v2479_v4  ;;  %v2047_v4 = vmul.f32 %v10092_v55, %v2015_v23  ;;  %v10096_v23 = vld [vmem:[#allocation21_spill] sm:$0xff] }
 0x3c1   : > { %2728 = vmatmul.bf16.gmra.mxu3 %v2480_v32  ;;  %v8184_v32 = vpop.f32.mrf.mxu2 }
 0x3c2   : > { %10093 = vst [vmem:[#allocation19_spill] sm:$0xff] %v8184_v32 }
 0x3c3   : > { %v8175_v22 = vpop.eup %6382 }
 0x3c8   : > { %2383 = vperm.xlu0 %6266, %v8165_v2  }
 0x3d0   : > { %1794 = vperm.xlu0 %6266, %v8049_v45  }
 0x3d1   : > { %1769 = vperm.xlu2 %6265, %v7864_v21  }
 0x3d4   : > { %v8199_v57 = vpop.permute.xlu1 %2348 }
 0x3d7   : > { %2094 = vadd.xlane.f32.xlu1 %v7859_v17  ;;  %v8186_v17 = vpop.f32.mrf.mxu3 }
 0x3d8   : > { %10094 = vst [vmem:[#allocation20_spill] sm:$0xff] %v8186_v17 }
 0x3d9   : > { %2373 = vperm.xlu2 %6265, %v8175_v22  }
 0x3e1   : > { %v2092_v0 = vpop.xlane.xlu0 %2091 }
 0x3e2   : > { %v2178_v61 = vadd.f32 %v2092_v0, %v2050_v25  ;;  %v10095_v25 = vld [vmem:[#allocation22_spill] sm:$0xff] }
 0x3e3   : > { %v2083_v58 = vpop.xlane.xlu2 %2082 }
 0x3e4   : > { %2211 = vst.msk [vmem:[#allocation3 + $0x20] sm:$0xff] %vm747_vm0, %v2178_v61  ;;  %v2175_v42 = vadd.f32 %v2083_v58, %v2047_v4  ;;  %v8197_v61 = vpop.eup %6384  ;;  %v10097_v58 = vld [vmem:[#allocation26_spill] sm:$0xff] }
 0x3e6   : > { %2208 = vst.msk [vmem:[#allocation3 + $0x8] sm:$0xff] %vm747_vm0, %v2175_v42 }
 0x3ea   : > { %v2630_v40 = vpop.f32.mrf.mxu2 }
 0x3eb   : > { %v1755_v28 = vpop.permute.xlu2 %1754  ;;  %v2719_v34 = vpop.f32.mrf.mxu3 }
 0x3ec   : > { %v1858_v0 = vsub.f32 %v10095_v25, %v1755_v28  ;;  %v1859_v55 = vsub.f32 %v10096_v23, %v1755_v28  ;;  %v8194_v32 = vadd.f32 %v2719_v34, %v2630_v40  ;;  %v2016_v40 = vld [vmem:[#allocation3 + $0x10] sm:$0xff] }
 0x3ed   : > { %v2048_v42 = vmul.f32 %v10097_v58, %v2016_v40 }
 0x3ee   : > { %v1958_v44 = vmul.f32 1.442695, %v1858_v0  ;;  %v1960_v17 = vmul.f32 1.442695, %v1859_v55  ;;  %v10099_v0 = vld [vmem:[#allocation23_spill] sm:$0xff]  ;;  %v10100_v55 = vld [vmem:[#allocation24_spill] sm:$0xff] }
 0x3f0   : > { %6386 = vpow2.f32 %v1958_v44  ;;  %1774 = vperm.xlu1 %6267, %v7904_v43   ;;  %v1591_v44 = vsub.f32 %v7995_v56, %v8000_v5 }
 0x3f1   : > { %6388 = vpow2.f32 %v1960_v17 }
 0x3f2   : > { %v1648_v17 = vmul.f32 1.442695, %v1591_v44 }
 0x3f4   : > { %6390 = vpow2.f32 %v1648_v17  ;;  %v8215_v34 = vpop.permute.xlu0 %2368  ;;  %v2021_v17 = vld [vmem:[#allocation3 + $0x38] sm:$0xff] }
 0x3f5   : > { %10098 = vst [vmem:[#allocation27_spill] sm:$0xff] %v8215_v34 }
 0x3f6   : > { %v6387_v3 = vpop.eup %6386 }
 0x3f7   : > { %v6389_v21 = vpop.eup %6388 }
 0x3f8   : > { %2378 = vperm.xlu1 %6267, %v8197_v61   ;;  %v8202_v4 = vadd.f32 %v6389_v21, %v6387_v3 }
 0x3fa   : > { %2109 = vadd.xlane.f32.xlu0 %v7959_v1  ;;  %v8210_v28 = vpop.eup %6390  ;;  %v1589_v1 = vsub.f32 %v7945_v18, %v7962_v14  ;;  %v2102_v14 = vadd.f32 %v7985_v19, %v7983_v53  ;;  %v2017_v19 = vld [vmem:[#allocation3 + $0x18] sm:$0xff] }
 0x3fc   : > { %v1644_v56 = vmul.f32 1.442695, %v1589_v1  ;;  %v8228_v1 = vpop.permute.xlu2 %2358 }
 0x3fe   : > { %6392 = vpow2.f32 %v1644_v56 }
 0x3ff   : > { %v2086_v43 = vpop.xlane.xlu1 %2085 }
 0x400   : > { %v2176_v41 = vadd.f32 %v2086_v43, %v2048_v42  ;;  %v8221_v42 = vpop.permute.xlu0 %1779 }
 0x402   : > { %2209 = vst.msk [vmem:[#allocation3 + $0x10] sm:$0xff] %vm747_vm0, %v2176_v41  ;;  %2097 = vadd.xlane.f32.xlu2 %v7895_v16 }
 0x404   : > { %v8225_v18 = vpop.eup %6392 }
 0x40e   : > { %2398 = vperm.xlu0 %6266, %v8210_v28  }
 0x416   : > { %1809 = vperm.xlu0 %6266, %v8118_v59  }
 0x417   : > { %v1760_v25 = vpop.permute.xlu1 %1759 }
 0x418   : > { %v1860_v23 = vsub.f32 %v10099_v0, %v1760_v25  ;;  %v1861_v40 = vsub.f32 %v10100_v55, %v1760_v25  ;;  %v2053_v0 = vmul.f32 %v7765_v60, %v2021_v17  ;;  %v8234_v55 = vpop.f32.mrf.mxu2  ;;  %v1863_v60 = vsub.f32 %v7718_v38, %v8177_v54 }
 0x419   : > { %10101 = vst [vmem:[#allocation25_spill] sm:$0xff] %v8234_v55  ;;  %v10132_v55 = vld [vmem:[#allocation52_spill] sm:$0xff] }
 0x41a   : > { %v1962_v16 = vmul.f32 1.442695, %v1860_v23  ;;  %v1964_v58 = vmul.f32 1.442695, %v1861_v40  ;;  %1784 = vperm.xlu2 %6265, %v7937_v27   ;;  %v10102_v40 = vld [vmem:[#allocation28_spill] sm:$0xff] }
 0x41b   : > { %v1968_v17 = vmul.f32 1.442695, %v1863_v60 }
 0x41c   : > { %6394 = vpow2.f32 %v1962_v16  ;;  %v2049_v16 = vmul.f32 %v10102_v40, %v2017_v19  ;;  %v10105_v40 = vld [vmem:[#allocation30_spill] sm:$0xff] }
 0x41d   : > { %6396 = vpow2.f32 %v1964_v58 }
 0x422   : > { %v6395_v44 = vpop.eup %6394  ;;  %2388 = vperm.xlu2 %6265, %v8225_v18   ;;  %2103 = vadd.xlane.f32.xlu1 %v2102_v14 }
 0x423   : > { %v6397_v43 = vpop.eup %6396  ;;  %v2481_v41 = vpack.c.bf16 %v6395_v44, %v6387_v3  ;;  %v8237_v3 = vpop.f32.mrf.mxu3 }
 0x424   : > { %v2482_v25 = vpack.c.bf16 %v6397_v43, %v6389_v21  ;;  %v8230_v56 = vadd.f32 %v6397_v43, %v6395_v44  ;;  %10103 = vst [vmem:[#allocation22_spill] sm:$0xff] %v8237_v3  ;;  %v1862_v21 = vsub.f32 %v7716_v39, %v8177_v54 }
 0x425   : > { %2644 = vmatmul.bf16.gmra.mxu2 %v2481_v41  ;;  %v1590_v41 = vsub.f32 %v7931_v50, %v7937_v27 }
 0x426   : > { %2733 = vmatmul.bf16.gmra.mxu3 %v2482_v25  ;;  %v1966_v44 = vmul.f32 1.442695, %v1862_v21 }
 0x427   : > { %v2101_v23 = vpop.xlane.xlu0 %2100 }
 0x428   : > { %v2181_v53 = vadd.f32 %v2101_v23, %v2053_v0  ;;  %6398 = vpow2.f32 %v1966_v44 }
 0x429   : > { %6400 = vpow2.f32 %v1968_v17 }
 0x42a   : > { %2214 = vst.msk [vmem:[#allocation3 + $0x38] sm:$0xff] %vm747_vm0, %v2181_v53  ;;  %v10104_v53 = vld [vmem:[#allocation29_spill] sm:$0xff] }
 0x42c   : > { %v2089_v58 = vpop.xlane.xlu2 %2088 }
 0x42d   : > { %v2177_v14 = vadd.f32 %v2089_v58, %v2049_v16 }
 0x42e   : > { %v8255_v50 = vpop.eup %6398 }
 0x42f   : > { %2210 = vst.msk [vmem:[#allocation3 + $0x18] sm:$0xff] %vm747_vm0, %v2177_v14  ;;  %v1646_v14 = vmul.f32 1.442695, %v1590_v41  ;;  %v8257_v54 = vpop.eup %6400 }
 0x433   : > { %v2635_v43 = vpop.f32.mrf.mxu2 }
 0x434   : > { %v2724_v25 = vpop.f32.mrf.mxu3  ;;  %v1770_v0 = vpop.permute.xlu2 %1769 }
 0x435   : > { %v8246_v23 = vadd.f32 %v2724_v25, %v2635_v43  ;;  %v1864_v19 = vsub.f32 %v10104_v53, %v1770_v0  ;;  %v1865_v16 = vsub.f32 %v10105_v40, %v1770_v0  ;;  %v1594_v53 = vsub.f32 %v8065_v11, %v8069_v7 }
 0x436   : > { %v1592_v11 = vsub.f32 %v8046_v8, %v8049_v45 }
 0x437   : > { %v1970_v39 = vmul.f32 1.442695, %v1864_v19  ;;  %v1972_v58 = vmul.f32 1.442695, %v1865_v16  ;;  %v2019_v19 = vld [vmem:[#allocation3 + $0x28] sm:$0xff] }
 0x438   : > { %v1654_v40 = vmul.f32 1.442695, %v1594_v53  ;;  %v2051_v16 = vmul.f32 %v7777_v31, %v2019_v19  ;;  %v1869_v31 = vsub.f32 %v7800_v26, %v8221_v42  ;;  %v10109_v19 = vld [vmem:[#allocation33_spill] sm:$0xff]  ;;  %v2024_v26 = vld [vmem:[#allocation3 + $0x50] sm:$0xff] }
 0x439   : > { %6402 = vpow2.f32 %v1970_v39 }
 0x43a   : > { %6404 = vpow2.f32 %v1972_v58 }
 0x43b   : > { %v8250_v38 = vpop.f32.mrf.mxu2  ;;  %1789 = vperm.xlu1 %6267, %v8000_v5   ;;  %6406 = vpow2.f32 %v1646_v14  ;;  %v8266_v5 = vpop.permute.xlu1 %2363 }
 0x43c   : > { %v8253_v27 = vpop.f32.mrf.mxu3  ;;  %6408 = vpow2.f32 %v1654_v40 }
 0x43f   : > { %v6403_v21 = vpop.eup %6402 }
 0x440   : > { %v6405_v60 = vpop.eup %6404  ;;  %2118 = vadd.xlane.f32.xlu0 %v8053_v12  ;;  %v2483_v44 = vpack.c.bf16 %v6403_v21, %v8255_v50 }
 0x441   : > { %v2484_v43 = vpack.c.bf16 %v6405_v60, %v8257_v54  ;;  %v8262_v41 = vadd.f32 %v6405_v60, %v6403_v21  ;;  %v8264_v17 = vpop.eup %6406  ;;  %v8279_v21 = vpop.permute.xlu0 %2383  ;;  %v1868_v60 = vsub.f32 %v7802_v49, %v8221_v42 }
 0x442   : > { %2649 = vmatmul.bf16.gmra.mxu2 %v2483_v44  ;;  %v8276_v14 = vpop.eup %6408  ;;  %10107 = vst [vmem:[#allocation26_spill] sm:$0xff] %v8279_v21  ;;  %v1650_v44 = vmul.f32 1.442695, %v1592_v11 }
 0x443   : > { %2738 = vmatmul.bf16.gmra.mxu3 %v2484_v43  ;;  %v2640_v25 = vpop.f32.mrf.mxu2  ;;  %2393 = vperm.xlu1 %6267, %v8264_v17   ;;  %v1980_v43 = vmul.f32 1.442695, %v1869_v31 }
 0x444   : > { %v2729_v0 = vpop.f32.mrf.mxu3  ;;  %6410 = vpow2.f32 %v1650_v44 }
 0x445   : > { %v8271_v12 = vadd.f32 %v2729_v0, %v2640_v25  ;;  %v10108_v0 = vld [vmem:[#allocation32_spill] sm:$0xff] }
 0x447   : > { %10106 = vst [vmem:[#allocation21_spill] sm:$0xff] %v8271_v12  ;;  %v10131_v12 = vld [vmem:[#allocation53_spill] sm:$0xff] }
 0x44a   : > { %v2095_v39 = vpop.xlane.xlu1 %2094  ;;  %v8292_v49 = vpop.eup %6410 }
 0x44b   : > { %v2179_v58 = vadd.f32 %v2095_v39, %v2051_v16  ;;  %2106 = vadd.xlane.f32.xlu2 %v7989_v13  ;;  %v1978_v13 = vmul.f32 1.442695, %v1868_v60  ;;  %v8290_v16 = vpop.permute.xlu0 %1794  ;;  %v8300_v60 = vpop.permute.xlu2 %2373 }
 0x44d   : > { %2212 = vst.msk [vmem:[#allocation3 + $0x28] sm:$0xff] %vm747_vm0, %v2179_v58  ;;  %6412 = vpow2.f32 %v1978_v13  ;;  %v2056_v58 = vmul.f32 %v7838_v63, %v2024_v26  ;;  %v10110_v63 = vld [vmem:[#allocation35_spill] sm:$0xff]  ;;  %v10111_v26 = vld [vmem:[#allocation36_spill] sm:$0xff] }
 0x44e   : > { %6414 = vpow2.f32 %v1980_v43 }
 0x453   : > { %v8294_v42 = vpop.eup %6412 }
 0x454   : > { %2413 = vperm.xlu0 %6266, %v8276_v14   ;;  %v8297_v39 = vpop.eup %6414 }
 0x462   : > { %v1775_v25 = vpop.permute.xlu1 %1774 }
 0x463   : > { %v1866_v53 = vsub.f32 %v10108_v0, %v1775_v25  ;;  %v1867_v40 = vsub.f32 %v10109_v19, %v1775_v25  ;;  %1799 = vperm.xlu2 %6265, %v8037_v10  }
 0x465   : > { %v1974_v8 = vmul.f32 1.442695, %v1866_v53  ;;  %v1976_v45 = vmul.f32 1.442695, %v1867_v40  ;;  %v2020_v53 = vld [vmem:[#allocation3 + $0x30] sm:$0xff] }
 0x466   : > { %v2052_v19 = vmul.f32 %v10110_v63, %v2020_v53 }
 0x467   : > { %6416 = vpow2.f32 %v1974_v8 }
 0x468   : > { %6418 = vpow2.f32 %v1976_v45 }
 0x46b   : > { %2403 = vperm.xlu2 %6265, %v8292_v49  }
 0x46d   : > { %v6417_v11 = vpop.eup %6416  ;;  %v2110_v31 = vpop.xlane.xlu0 %2109  ;;  %2112 = vadd.xlane.f32.xlu1 %v7992_v30 }
 0x46e   : > { %v6419_v44 = vpop.eup %6418  ;;  %v2184_v13 = vadd.f32 %v2110_v31, %v2056_v58  ;;  %v2485_v43 = vpack.c.bf16 %v8294_v42, %v6417_v11 }
 0x46f   : > { %v2486_v25 = vpack.c.bf16 %v8297_v39, %v6419_v44  ;;  %v8305_v0 = vadd.f32 %v6419_v44, %v6417_v11  ;;  %v1593_v11 = vsub.f32 %v8029_v51, %v8037_v10  ;;  %v8322_v51 = vpop.permute.xlu1 %2378  ;;  %v4795_v10 = vld [vmem:[#allocation3] sm:$0xff] }
 0x470   : > { %2217 = vst.msk [vmem:[#allocation3 + $0x50] sm:$0xff] %vm747_vm0, %v2184_v13  ;;  %2654 = vmatmul.bf16.gmra.mxu2 %v2485_v43  ;;  %v1597_v43 = vsub.f32 %v8158_v24, %v8161_v46  ;;  %v2022_v24 = vld [vmem:[#allocation3 + $0x40] sm:$0xff] }
 0x471   : > { %2743 = vmatmul.bf16.gmra.mxu3 %v2486_v25  ;;  %v1652_v13 = vmul.f32 1.442695, %v1593_v11 }
 0x472   : > { %v1660_v25 = vmul.f32 1.442695, %v1597_v43 }
 0x475   : > { %v2098_v40 = vpop.xlane.xlu2 %2097 }
 0x476   : > { %v2180_v8 = vadd.f32 %v2098_v40, %v2052_v19 }
 0x478   : > { %2213 = vst.msk [vmem:[#allocation3 + $0x30] sm:$0xff] %vm747_vm0, %v2180_v8 }
 0x47d   : > { %v1785_v30 = vpop.permute.xlu2 %1784 }
 0x47e   : > { %v1870_v45 = vsub.f32 %v7811_v35, %v1785_v30  ;;  %v1871_v58 = vsub.f32 %v10111_v26, %v1785_v30  ;;  %2127 = vadd.xlane.f32.xlu0 %v8126_v15  ;;  %v8331_v26 = vpop.f32.mrf.mxu2 }
 0x480   : > { %v1982_v31 = vmul.f32 1.442695, %v1870_v45  ;;  %v1984_v44 = vmul.f32 1.442695, %v1871_v58  ;;  %v8333_v58 = vpop.f32.mrf.mxu3  ;;  %v8335_v11 = vpop.permute.xlu0 %2398 }
 0x481   : > { %10113 = vst [vmem:[#allocation23_spill] sm:$0xff] %v8335_v11 }
 0x482   : > { %6420 = vpow2.f32 %v1982_v31  ;;  %v1595_v31 = vsub.f32 %v8111_v52, %v8118_v59  ;;  %v10116_v52 = vld [vmem:[#allocation49_spill] sm:$0xff] }
 0x483   : > { %6422 = vpow2.f32 %v1984_v44 }
 0x484   : > { %6424 = vpow2.f32 %v1652_v13  ;;  %v1656_v13 = vmul.f32 1.442695, %v1595_v31 }
 0x485   : > { %6426 = vpow2.f32 %v1660_v25  ;;  %v8350_v21 = vpop.permute.xlu2 %2388 }
 0x486   : > { %1804 = vperm.xlu1 %6267, %v8069_v7   ;;  %6428 = vrcp.f32 %v4795_v10  ;;  %v10112_v7 = vld [vmem:[#allocation42_spill] sm:$0xff]  ;;  %10118 = vst [vmem:[#allocation28_spill] sm:$0xff] %v8350_v21 }
 0x487   : > { %v2054_v40 = vmul.f32 %v10112_v7, %v2022_v24  ;;  %6430 = vpow2.f32 %v1656_v13  ;;  %v10114_v24 = vld [vmem:[#allocation40_spill] sm:$0xff]  ;;  %v2120_v13 = vadd.f32 %v8143_v29, %v8141_v9 }
 0x488   : > { %v6421_v35 = vpop.eup %6420  ;;  %v8341_v25 = vpop.permute.xlu0 %1809  ;;  %v10122_v9 = vld [vmem:[#allocation44_spill] sm:$0xff] }
 0x489   : > { %v6423_v53 = vpop.eup %6422  ;;  %v1874_v29 = vsub.f32 %v10122_v9, %v8290_v16 }
 0x48a   : > { %v8318_v63 = vadd.f32 %v6423_v53, %v6421_v35  ;;  %v8320_v15 = vpop.eup %6424 }
 0x48b   : > { %v8325_v19 = vpop.eup %6426 }
 0x48c   : > { %v6429_v45 = vpop.eup %6428 }
 0x48d   : > { %v8347_v31 = vpop.eup %6430 }
 0x48e   : > { %2408 = vperm.xlu1 %6267, %v8320_v15   ;;  %10117 = vst [vmem:[#allocation24_spill] sm:$0xff] %v8347_v31 }
 0x492   : > { %2428 = vperm.xlu0 %6266, %v8325_v19  }
 0x494   : > { %2115 = vadd.xlane.f32.xlu2 %v8062_v33 }
 0x495   : > { %v2104_v8 = vpop.xlane.xlu1 %2103 }
 0x496   : > { %v2182_v30 = vadd.f32 %v2104_v8, %v2054_v40  ;;  %v10115_v40 = vld [vmem:[#allocation39_spill] sm:$0xff] }
 0x498   : > { %2215 = vst.msk [vmem:[#allocation3 + $0x40] sm:$0xff] %vm747_vm0, %v2182_v30  ;;  %v2027_v30 = vld [vmem:[#allocation3 + $0x68] sm:$0xff] }
 0x499   : > { %v2059_v59 = vmul.f32 %v10116_v52, %v2027_v30 }
 0x49a   : > { %4893 = vperm.xlu0 %6266, %v6429_v45  }
 0x4a8   : > { %v2645_v44 = vpop.f32.mrf.mxu2 }
 0x4a9   : > { %v2734_v33 = vpop.f32.mrf.mxu3 }
 0x4aa   : > { %v8339_v43 = vadd.f32 %v2734_v33, %v2645_v44 }
 0x4ac   : > { %1814 = vperm.xlu2 %6265, %v8093_v36  }
 0x4ad   : > { %v1790_v10 = vpop.permute.xlu1 %1789 }
 0x4ae   : > { %v1872_v7 = vsub.f32 %v10114_v24, %v1790_v10  ;;  %v1873_v8 = vsub.f32 %v10115_v40, %v1790_v10 }
 0x4b0   : > { %v1986_v45 = vmul.f32 1.442695, %v1872_v7  ;;  %v1988_v11 = vmul.f32 1.442695, %v1873_v8  ;;  %v2023_v8 = vld [vmem:[#allocation3 + $0x48] sm:$0xff] }
 0x4b2   : > { %6432 = vpow2.f32 %v1986_v45  ;;  %v10120_v45 = vld [vmem:[#allocation45_spill] sm:$0xff] }
 0x4b3   : > { %6434 = vpow2.f32 %v1988_v11  ;;  %v2119_v44 = vpop.xlane.xlu0 %2118  ;;  %v8357_v11 = vpop.f32.mrf.mxu2  ;;  %v2055_v52 = vmul.f32 %v10120_v45, %v2023_v8  ;;  %v10124_v45 = vld [vmem:[#allocation47_spill] sm:$0xff] }
 0x4b4   : > { %v2187_v33 = vadd.f32 %v2119_v44, %v2059_v59  ;;  %2418 = vperm.xlu2 %6265, %v8347_v31   ;;  %10119 = vst [vmem:[#allocation29_spill] sm:$0xff] %v8357_v11  ;;  %v8360_v59 = vpop.f32.mrf.mxu3 }
 0x4b5   : > { %10121 = vst [vmem:[#allocation30_spill] sm:$0xff] %v8360_v59 }
 0x4b6   : > { %2220 = vst.msk [vmem:[#allocation3 + $0x68] sm:$0xff] %vm747_vm0, %v2187_v33 }
 0x4b8   : > { %v6433_v10 = vpop.eup %6432  ;;  %2121 = vadd.xlane.f32.xlu1 %v2120_v13  ;;  %v1990_v13 = vmul.f32 1.442695, %v1874_v29 }
 0x4b9   : > { %v6435_v24 = vpop.eup %6434  ;;  %v2487_v7 = vpack.c.bf16 %v6433_v10, %v6421_v35  ;;  %v10123_v35 = vld [vmem:[#allocation43_spill] sm:$0xff] }
 0x4ba   : > { %v2488_v40 = vpack.c.bf16 %v6435_v24, %v6423_v53  ;;  %v8355_v30 = vadd.f32 %v6435_v24, %v6433_v10  ;;  %v1875_v53 = vsub.f32 %v10123_v35, %v8290_v16  ;;  %6436 = vpow2.f32 %v1990_v13  ;;  %v4798_v16 = vld [vmem:[#allocation3 + $0x18] sm:$0xff] }
 0x4bb   : > { %2659 = vmatmul.bf16.gmra.mxu2 %v2487_v7 }
 0x4bc   : > { %2748 = vmatmul.bf16.gmra.mxu3 %v2488_v40  ;;  %v1992_v24 = vmul.f32 1.442695, %v1875_v53 }
 0x4be   : > { %v2107_v44 = vpop.xlane.xlu2 %2106  ;;  %6438 = vpow2.f32 %v1992_v24  ;;  %v6040_v24 = vld [vmem:[%s7116_s25 + $0xf4] sm:$0xf] }
 0x4bf   : > { %v2183_v33 = vadd.f32 %v2107_v44, %v2055_v52  ;;  %v10125_v52 = vld [vmem:[#allocation46_spill] sm:$0xff] }
 0x4c0   : > { %v8374_v29 = vpop.eup %6436 }
 0x4c1   : > { %2216 = vst.msk [vmem:[#allocation3 + $0x48] sm:$0xff] %vm747_vm0, %v2183_v33  ;;  %v1596_v33 = vsub.f32 %v8089_v37, %v8093_v36 }
 0x4c4   : > { %2136 = vadd.xlane.f32.xlu0 %v8230_v56  ;;  %v1658_v56 = vmul.f32 1.442695, %v1596_v33  ;;  %v8376_v35 = vpop.eup %6438  ;;  %v10126_v33 = vld [vmem:[#allocation54_spill] sm:$0xff] }
 0x4c5   : > { %v2650_v10 = vpop.f32.mrf.mxu2 }
 0x4c6   : > { %v2739_v7 = vpop.f32.mrf.mxu3  ;;  %v1800_v40 = vpop.permute.xlu2 %1799 }
 0x4c7   : > { %v8368_v8 = vadd.f32 %v2739_v7, %v2650_v10  ;;  %v1876_v34 = vsub.f32 %v10124_v45, %v1800_v40  ;;  %v1877_v44 = vsub.f32 %v10125_v52, %v1800_v40  ;;  %v6180_v10 = vld [vmem:[%s7116_s25 + $0x78] sm:$0xf0] }
 0x4c8   : > { %v6188_v40 = vld [vmem:[%s7116_s25 + $0xf8] sm:$0xf0]  ;;  %v4804_v21 = vld [vmem:[#allocation3 + $0x48] sm:$0xff] }
 0x4c9   : > { %v1994_v9 = vmul.f32 1.442695, %v1876_v34  ;;  %v1996_v59 = vmul.f32 1.442695, %v1877_v44  ;;  %v6041_v45 = vor.u32 %v6188_v40, %v6040_v24  ;;  %v8389_v44 = vpop.permute.xlu1 %2393 }
 0x4cb   : > { %6440 = vpow2.f32 %v1994_v9  ;;  %3242 = vmatpush.bf16.xpose.msrb.mxu3 %v6041_v45  ;;  %v2025_v9 = vld [vmem:[#allocation3 + $0x58] sm:$0xff] }
 0x4cc   : > { %6442 = vpow2.f32 %v1996_v59  ;;  %v6008_v59 = vld [vmem:[%s7116_s25 + $0x74] sm:$0xf] }
 0x4cd   : > { %6444 = vrcp.f32 %v4798_v16  ;;  %v6009_v7 = vor.u32 %v6180_v10, %v6008_v59  ;;  %v2030_v59 = vld [vmem:[#allocation3 + $0x80] sm:$0xff] }
 0x4ce   : > { %6446 = vpow2.f32 %v1658_v56  ;;  %v2057_v56 = vmul.f32 %v10126_v33, %v2025_v9 }
 0x4cf   : > { %3153 = vmatpush.bf16.xpose.msrb.mxu2 %v6009_v7  ;;  %v10128_v7 = vld [vmem:[#allocation57_spill] sm:$0xff] }
 0x4d0   : > { %v1880_v40 = vsub.f32 %v10128_v7, %v8341_v25 }
 0x4d1   : > { %v6441_v53 = vpop.eup %6440  ;;  %1819 = vperm.xlu1 %6267, %v8161_v46  }
 0x4d2   : > { %v6443_v34 = vpop.eup %6442  ;;  %v2489_v37 = vpack.c.bf16 %v6441_v53, %v8374_v29 }
 0x4d3   : > { %v2490_v36 = vpack.c.bf16 %v6443_v34, %v8376_v35  ;;  %v8381_v13 = vadd.f32 %v6443_v34, %v6441_v53  ;;  %v6445_v52 = vpop.eup %6444  ;;  %v8396_v34 = vpop.permute.xlu0 %2413 }
 0x4d4   : > { %2664 = vmatmul.bf16.gmra.mxu2 %v2489_v37  ;;  %v8387_v46 = vpop.eup %6446  ;;  %10127 = vst [vmem:[#allocation32_spill] sm:$0xff] %v8396_v34  ;;  %v8398_v37 = vpop.f32.mrf.mxu2  ;;  %v6036_v34 = vld [vmem:[%s7116_s25 + $0xe4] sm:$0xf] }
 0x4d5   : > { %2753 = vmatmul.bf16.gmra.mxu3 %v2490_v36  ;;  %v8400_v36 = vpop.f32.mrf.mxu3 }
 0x4d8   : > { %4908 = vperm.xlu0 %6266, %v6445_v52   ;;  %v4797_v52 = vld [vmem:[#allocation3 + $0x10] sm:$0xff] }
 0x4d9   : > { %2423 = vperm.xlu1 %6267, %v8387_v46   ;;  %6448 = vrcp.f32 %v4797_v52  ;;  %v8416_v52 = vpop.permute.xlu2 %2403 }
 0x4da   : > { %10133 = vst [vmem:[#allocation35_spill] sm:$0xff] %v8416_v52 }
 0x4dd   : > { %2124 = vadd.xlane.f32.xlu2 %v8148_v47  ;;  %v2062_v47 = vmul.f32 %v8015_v62, %v2030_v59  ;;  %v6187_v59 = vld [vmem:[%s7116_s25 + $0xe8] sm:$0xf0] }
 0x4e0   : > { %v2113_v16 = vpop.xlane.xlu1 %2112 }
 0x4e1   : > { %v2185_v53 = vadd.f32 %v2113_v16, %v2057_v56  ;;  %v6004_v16 = vld [vmem:[%s7116_s25 + $0x64] sm:$0xf] }
 0x4e3   : > { %2218 = vst.msk [vmem:[#allocation3 + $0x58] sm:$0xff] %vm747_vm0, %v2185_v53  ;;  %v6179_v53 = vld [vmem:[%s7116_s25 + $0x68] sm:$0xf0] }
 0x4e4   : > { %v6005_v62 = vor.u32 %v6179_v53, %v6004_v16  ;;  %v10135_v53 = vld [vmem:[#allocation63_spill] sm:$0xff] }
 0x4e5   : > { %2133 = vadd.xlane.f32.xlu2 %v8202_v4  ;;  %v10129_v4 = vld [vmem:[#allocation58_spill] sm:$0xff] }
 0x4e6   : > { %v1881_v9 = vsub.f32 %v10129_v4, %v8341_v25  ;;  %3154 = vmatpush.bf16.xpose.msrb.mxu2 %v6005_v62  ;;  %v6449_v4 = vpop.eup %6448 }
 0x4e8   : > { %v2004_v11 = vmul.f32 1.442695, %v1881_v9 }
 0x4f1   : > { %v2128_v10 = vpop.xlane.xlu0 %2127 }
 0x4f2   : > { %v2190_v24 = vadd.f32 %v2128_v10, %v2062_v47  ;;  %v2002_v47 = vmul.f32 1.442695, %v1880_v40  ;;  %v6037_v10 = vor.u32 %v6187_v59, %v6036_v34  ;;  %v10136_v59 = vld [vmem:[#allocation31_spill] sm:$0xff] }
 0x4f3   : > { %v2655_v45 = vpop.f32.mrf.mxu2 }
 0x4f4   : > { %2223 = vst.msk [vmem:[#allocation3 + $0x80] sm:$0xff] %vm747_vm0, %v2190_v24  ;;  %v2744_v33 = vpop.f32.mrf.mxu3  ;;  %3243 = vmatpush.bf16.xpose.msrb.mxu3 %v6037_v10  ;;  %6450 = vpow2.f32 %v2002_v47  ;;  %v2431_v47 = vmul.f32 0.0, %v10136_v59  ;;  %v10137_v10 = vld [vmem:[#allocation48_spill] sm:$0xff] }
 0x4f5   : > { %v8408_v56 = vadd.f32 %v2744_v33, %v2655_v45  ;;  %6452 = vpow2.f32 %v2004_v11 }
 0x4f7   : > { %10130 = vst [vmem:[#allocation33_spill] sm:$0xff] %v8408_v56  ;;  %v10142_v56 = vld [vmem:[#allocation8_spill] sm:$0xff] }
 0x4f8   : > { %v1805_v7 = vpop.permute.xlu1 %1804 }
 0x4f9   : > { %v1878_v3 = vsub.f32 %v10131_v12, %v1805_v7  ;;  %v1879_v25 = vsub.f32 %v10132_v55, %v1805_v7  ;;  %v2026_v12 = vld [vmem:[#allocation3 + $0x60] sm:$0xff]  ;;  %v2769_v7 = vadd.f32 %v10137_v10, %v2431_v47  ;;  %v4796_v47 = vld [vmem:[#allocation3 + $0x8] sm:$0xff] }
 0x4fa   : > { %v8418_v34 = vpop.eup %6450 }
 0x4fb   : > { %v1998_v24 = vmul.f32 1.442695, %v1878_v3  ;;  %v2000_v45 = vmul.f32 1.442695, %v1879_v25  ;;  %v8420_v40 = vpop.eup %6452 }
 0x4fd   : > { %6454 = vpow2.f32 %v1998_v24  ;;  %4903 = vperm.xlu2 %6265, %v6449_v4   ;;  %v4801_v24 = vld [vmem:[#allocation3 + $0x30] sm:$0xff] }
 0x4fe   : > { %6456 = vpow2.f32 %v2000_v45  ;;  %v6000_v4 = vld [vmem:[%s7116_s25 + $0x54] sm:$0xf] }
 0x4ff   : > { %6458 = vrcp.f32 %v4801_v24 }
 0x500   : > { %6460 = vrcp.f32 %v4796_v47  ;;  %v4800_v47 = vld [vmem:[#allocation3 + $0x28] sm:$0xff] }
 0x502   : > { %2145 = vadd.xlane.f32.xlu0 %v8305_v0  ;;  %v2058_v0 = vmul.f32 %v10135_v53, %v2026_v12  ;;  %v6032_v12 = vld [vmem:[%s7116_s25 + $0xd4] sm:$0xf]  ;;  %v6186_v53 = vld [vmem:[%s7116_s25 + $0xd8] sm:$0xf0] }
 0x503   : > { %v6455_v55 = vpop.eup %6454  ;;  %2130 = vadd.xlane.f32.xlu1 %v8152_v20  ;;  %v6033_v10 = vor.u32 %v6186_v53, %v6032_v12  ;;  %v8456_v12 = vpop.permute.xlu1 %2408 }
 0x504   : > { %v6457_v3 = vpop.eup %6456  ;;  %v8425_v9 = vpop.permute.xlu0 %2428  ;;  %v2491_v11 = vpack.c.bf16 %v8418_v34, %v6455_v55  ;;  %10140 = vst [vmem:[#allocation42_spill] sm:$0xff] %v8456_v12 }
 0x505   : > { %10134 = vst [vmem:[#allocation36_spill] sm:$0xff] %v8425_v9  ;;  %v2492_v33 = vpack.c.bf16 %v8420_v40, %v6457_v3  ;;  %v8429_v16 = vadd.f32 %v6457_v3, %v6455_v55  ;;  %v6178_v55 = vld [vmem:[%s7116_s25 + $0x58] sm:$0xf0]  ;;  %3244 = vmatpush.bf16.xpose.msrb.mxu3 %v6033_v10  ;;  %v6459_v9 = vpop.eup %6458 }
 0x506   : > { %2669 = vmatmul.bf16.gmra.mxu2 %v2491_v11  ;;  %v6461_v24 = vpop.eup %6460 }
 0x507   : > { %2758 = vmatmul.bf16.gmra.mxu3 %v2492_v33  ;;  %v2116_v62 = vpop.xlane.xlu2 %2115  ;;  %v6001_v33 = vor.u32 %v6178_v55, %v6000_v4 }
 0x508   : > { %v2186_v20 = vadd.f32 %v2116_v62, %v2058_v0  ;;  %v10138_v0 = vld [vmem:[#allocation61_spill] sm:$0xff] }
 0x509   : > { %3155 = vmatpush.bf16.xpose.msrb.mxu2 %v6001_v33 }
 0x50a   : > { %2219 = vst.msk [vmem:[#allocation3 + $0x60] sm:$0xff] %vm747_vm0, %v2186_v20  ;;  %v10139_v20 = vld [vmem:[#allocation62_spill] sm:$0xff] }
 0x50c   : > { %v4894_v25 = vpop.permute.xlu0 %4893 }
 0x50d   : > { %v5051_v45 = vmul.f32 %v4894_v25, %v2769_v7 }
 0x50f   : > { %v5083_v3 = vpack.c.bf16 %v5051_v45, %v5051_v45  ;;  %v1815_v11 = vpop.permute.xlu2 %1814 }
 0x510   : > { %v1882_v62 = vsub.f32 %v10138_v0, %v1815_v11  ;;  %v1883_v59 = vsub.f32 %v10139_v20, %v1815_v11  ;;  %v10141_v11 = vld [vmem:[#allocation71_spill] sm:$0xff]  ;;  %v6177_v20 = vld [vmem:[%s7116_s25 + $0x48] sm:$0xf0] }
 0x511   : > { %5115 = vst [vmem:[%s8439_s30] sm:$0xf] %v5083_v3  ;;  %v2028_v3 = vld [vmem:[#allocation3 + $0x70] sm:$0xff]  ;;  %v2033_v0 = vld [vmem:[#allocation3 + $0x98] sm:$0xff] }
 0x512   : > { %v2006_v7 = vmul.f32 1.442695, %v1882_v62  ;;  %v2008_v25 = vmul.f32 1.442695, %v1883_v59  ;;  %v2060_v33 = vmul.f32 %v10141_v11, %v2028_v3  ;;  %v5996_v62 = vld [vmem:[%s7116_s25 + $0x44] sm:$0xf]  ;;  %v2065_v52 = vmul.f32 %v10142_v56, %v2033_v0 }
 0x513   : > { %v6028_v59 = vld [vmem:[%s7116_s25 + $0xc4] sm:$0xf]  ;;  %v5997_v10 = vor.u32 %v6177_v20, %v5996_v62  ;;  %v10143_v0 = vld [vmem:[#allocation70_spill] sm:$0xff] }
 0x514   : > { %6462 = vpow2.f32 %v2006_v7  ;;  %v6185_v7 = vld [vmem:[%s7116_s25 + $0xc8] sm:$0xf0] }
 0x515   : > { %6464 = vpow2.f32 %v2008_v25  ;;  %v6029_v25 = vor.u32 %v6185_v7, %v6028_v59  ;;  %3156 = vmatpush.bf16.xpose.msrb.mxu2 %v5997_v10  ;;  %v10144_v59 = vld [vmem:[#allocation69_spill] sm:$0xff]  ;;  %v10145_v10 = vld [vmem:[#allocation64_spill] sm:$0xff] }
 0x516   : > { %4923 = vperm.xlu0 %6266, %v6459_v9   ;;  %6466 = vrcp.f32 %v4800_v47  ;;  %v10146_v7 = vld [vmem:[#allocation65_spill] sm:$0xff] }
 0x517   : > { %3245 = vmatpush.bf16.xpose.msrb.mxu3 %v6029_v25  ;;  %v2697_v25 = vadd.f32 %v10146_v7, %v10145_v10  ;;  %v8484_v31 = vpop.permute.xlu2 %2418 }
 0x518   : > { %10148 = vst [vmem:[#allocation40_spill] sm:$0xff] %v8484_v31 }
 0x51a   : > { %v8448_v45 = vpop.eup %6462 }
 0x51b   : > { %v8450_v4 = vpop.eup %6464 }
 0x51c   : > { %4898 = vperm.xlu1 %6267, %v6461_v24   ;;  %v8454_v55 = vadd.f32 %v8450_v4, %v8448_v45  ;;  %v8465_v24 = vpop.f32.mrf.mxu2 }
 0x526   : > { %2142 = vadd.xlane.f32.xlu2 %v8262_v41  ;;  %v8468_v41 = vpop.f32.mrf.mxu3 }
 0x52b   : > { %v2122_v9 = vpop.xlane.xlu1 %2121 }
 0x52c   : > { %v2188_v53 = vadd.f32 %v2122_v9, %v2060_v33  ;;  %v6467_v33 = vpop.eup %6466 }
 0x52e   : > { %2221 = vst.msk [vmem:[#allocation3 + $0x70] sm:$0xff] %vm747_vm0, %v2188_v53 }
 0x537   : > { %v2137_v3 = vpop.xlane.xlu0 %2136 }
 0x538   : > { %v2193_v11 = vadd.f32 %v2137_v3, %v2065_v52  ;;  %v2138_v52 = vadd.f32 %v8257_v54, %v8255_v50  ;;  %v10147_v3 = vld [vmem:[#allocation37_spill] sm:$0xff] }
 0x53a   : > { %2226 = vst.msk [vmem:[#allocation3 + $0x98] sm:$0xff] %vm747_vm0, %v2193_v11  ;;  %v2434_v11 = vmul.f32 0.0, %v10147_v3 }
 0x53e   : > { %4918 = vperm.xlu2 %6265, %v6467_v33   ;;  %v2660_v9 = vpop.f32.mrf.mxu2 }
 0x53f   : > { %v2749_v53 = vpop.f32.mrf.mxu3 }
 0x540   : > { %v8471_v62 = vadd.f32 %v2749_v53, %v2660_v9  ;;  %2154 = vadd.xlane.f32.xlu0 %v8355_v30  ;;  %v5992_v9 = vld [vmem:[%s7116_s25 + $0x34] sm:$0xf]  ;;  %v6176_v53 = vld [vmem:[%s7116_s25 + $0x38] sm:$0xf0] }
 0x541   : > { %v6024_v30 = vld [vmem:[%s7116_s25 + $0xb4] sm:$0xf] }
 0x543   : > { %v1820_v56 = vpop.permute.xlu1 %1819 }
 0x544   : > { %v1884_v20 = vsub.f32 %v10143_v0, %v1820_v56  ;;  %v1885_v47 = vsub.f32 %v10144_v59, %v1820_v56  ;;  %v5993_v0 = vor.u32 %v6176_v53, %v5992_v9  ;;  %v6184_v56 = vld [vmem:[%s7116_s25 + $0xb8] sm:$0xf0]  ;;  %v2772_v59 = vadd.f32 %v2697_v25, %v2434_v11 }
 0x545   : > { %v6025_v50 = vor.u32 %v6184_v56, %v6024_v30  ;;  %v2032_v56 = vld [vmem:[#allocation3 + $0x90] sm:$0xff] }
 0x546   : > { %v2010_v33 = vmul.f32 1.442695, %v1884_v20  ;;  %v2012_v12 = vmul.f32 1.442695, %v1885_v47  ;;  %2139 = vadd.xlane.f32.xlu1 %v2138_v52  ;;  %3157 = vmatpush.bf16.xpose.msrb.mxu2 %v5993_v0  ;;  %v2029_v20 = vld [vmem:[#allocation3 + $0x78] sm:$0xff]  ;;  %v8487_v3 = vpop.f32.mrf.mxu2 }
 0x547   : > { %3246 = vmatpush.bf16.xpose.msrb.mxu3 %v6025_v50 }
 0x548   : > { %6468 = vpow2.f32 %v2010_v33  ;;  %v10149_v33 = vld [vmem:[#allocation11_spill] sm:$0xff] }
 0x549   : > { %6470 = vpow2.f32 %v2012_v12  ;;  %v2061_v9 = vmul.f32 %v10149_v33, %v2029_v20  ;;  %v8492_v12 = vpop.f32.mrf.mxu3  ;;  %v10151_v33 = vld [vmem:[#allocation60_spill] sm:$0xff] }
 0x54a   : > { %v4909_v54 = vpop.permute.xlu0 %4908  ;;  %6472 = vrcp.f32 %v4804_v21 }
 0x54b   : > { %v5054_v10 = vmul.f32 %v4909_v54, %v2772_v59  ;;  %v4799_v59 = vld [vmem:[#allocation3 + $0x20] sm:$0xff] }
 0x54c   : > { %6474 = vrcp.f32 %v4799_v59  ;;  %v6175_v59 = vld [vmem:[%s7116_s25 + $0x28] sm:$0xf0] }
 0x54d   : > { %v5086_v47 = vpack.c.bf16 %v5054_v10, %v5054_v10 }
 0x54e   : > { %v6469_v52 = vpop.eup %6468 }
 0x54f   : > { %v6471_v7 = vpop.eup %6470  ;;  %5118 = vst [vmem:[%s8439_s30 + $0x18] sm:$0xf] %v5086_v47  ;;  %v2493_v53 = vpack.c.bf16 %v6469_v52, %v8448_v45  ;;  %v2064_v45 = vmul.f32 %v8137_v48, %v2032_v56  ;;  %v10150_v47 = vld [vmem:[#allocation38_spill] sm:$0xff]  ;;  %v5988_v56 = vld [vmem:[%s7116_s25 + $0x24] sm:$0xf] }
 0x550   : > { %v2125_v25 = vpop.xlane.xlu2 %2124  ;;  %v2494_v11 = vpack.c.bf16 %v6471_v7, %v8450_v4  ;;  %v8495_v30 = vadd.f32 %v6471_v7, %v6469_v52  ;;  %v6473_v21 = vpop.eup %6472  ;;  %v2433_v52 = vmul.f32 0.0, %v10150_v47  ;;  %v10153_v47 = vld [vmem:[#allocation75_spill] sm:$0xff] }
 0x551   : > { %v2189_v0 = vadd.f32 %v2125_v25, %v2061_v9  ;;  %2674 = vmatmul.bf16.gmra.mxu2 %v2493_v53 }
 0x552   : > { %2763 = vmatmul.bf16.gmra.mxu3 %v2494_v11  ;;  %v6475_v7 = vpop.eup %6474  ;;  %v2771_v9 = vadd.f32 %v10151_v33, %v2433_v52  ;;  %v8506_v11 = vpop.permute.xlu1 %2423 }
 0x553   : > { %2222 = vst.msk [vmem:[#allocation3 + $0x78] sm:$0xff] %vm747_vm0, %v2189_v0  ;;  %v2036_v0 = vld [vmem:[#allocation3 + $0xb0] sm:$0xff] }
 0x554   : > { %4938 = vperm.xlu0 %6266, %v6473_v21   ;;  %10152 = vst [vmem:[#allocation39_spill] sm:$0xff] %v8506_v11  ;;  %v2031_v21 = vld [vmem:[#allocation3 + $0x88] sm:$0xff] }
 0x555   : > { %v2063_v52 = vmul.f32 %v10153_v47, %v2031_v21  ;;  %v10155_v21 = vld [vmem:[#allocation77_spill] sm:$0xff]  ;;  %v5984_v47 = vld [vmem:[%s7116_s25 + $0x14] sm:$0xf] }
 0x557   : > { %v2665_v50 = vpop.f32.mrf.mxu2 }
 0x558   : > { %v2754_v54 = vpop.f32.mrf.mxu3  ;;  %v2134_v10 = vpop.xlane.xlu2 %2133 }
 0x559   : > { %v8499_v4 = vadd.f32 %v2754_v54, %v2665_v50  ;;  %v2192_v20 = vadd.f32 %v2134_v10, %v2064_v45  ;;  %v6020_v50 = vld [vmem:[%s7116_s25 + $0xa4] sm:$0xf]  ;;  %v2068_v45 = vmul.f32 %v8165_v2, %v2036_v0  ;;  %v5989_v54 = vor.u32 %v6175_v59, %v5988_v56  ;;  %v6183_v10 = vld [vmem:[%s7116_s25 + $0xa8] sm:$0xf0]  ;;  %v10156_v59 = vld [vmem:[#allocation50_spill] sm:$0xff] }
 0x55a   : > { %v6021_v33 = vor.u32 %v6183_v10, %v6020_v50  ;;  %v10154_v0 = vld [vmem:[#allocation76_spill] sm:$0xff]  ;;  %v2437_v50 = vmul.f32 0.0, %v10156_v59  ;;  %v10159_v59 = vld [vmem:[#allocation34_spill] sm:$0xff] }
 0x55b   : > { %2225 = vst.msk [vmem:[#allocation3 + $0x90] sm:$0xff] %vm747_vm0, %v2192_v20  ;;  %3158 = vmatpush.bf16.xpose.msrb.mxu2 %v5989_v54  ;;  %v2705_v56 = vadd.f32 %v10155_v21, %v10154_v0  ;;  %v2147_v54 = vadd.f32 %v8297_v39, %v8294_v42  ;;  %v4807_v10 = vld [vmem:[#allocation3 + $0x60] sm:$0xff]  ;;  %v6182_v0 = vld [vmem:[%s7116_s25 + $0x98] sm:$0xf0] }
 0x55c   : > { %3247 = vmatpush.bf16.xpose.msrb.mxu3 %v6021_v33  ;;  %v10158_v33 = vld [vmem:[#allocation59_spill] sm:$0xff] }
 0x55f   : > { %4913 = vperm.xlu1 %6267, %v6475_v7   ;;  %v4803_v7 = vld [vmem:[#allocation3 + $0x40] sm:$0xff] }
 0x560   : > { %v4904_v53 = vpop.permute.xlu2 %4903  ;;  %6476 = vrcp.f32 %v4803_v7  ;;  %v10157_v7 = vld [vmem:[#allocation56_spill] sm:$0xff] }
 0x561   : > { %v5053_v48 = vmul.f32 %v4904_v53, %v2771_v9  ;;  %6478 = vrcp.f32 %v4807_v10  ;;  %v10161_v10 = vld [vmem:[#allocation73_spill] sm:$0xff] }
 0x563   : > { %v5085_v25 = vpack.c.bf16 %v5053_v48, %v5053_v48  ;;  %v8517_v48 = vpop.f32.mrf.mxu2 }
 0x565   : > { %5117 = vst [vmem:[%s8439_s30 + $0x10] sm:$0xf] %v5085_v25  ;;  %v8519_v25 = vpop.f32.mrf.mxu3 }
 0x566   : > { %v6477_v2 = vpop.eup %6476 }
 0x567   : > { %2151 = vadd.xlane.f32.xlu2 %v8318_v63 }
 0x575   : > { %v2146_v20 = vpop.xlane.xlu0 %2145 }
 0x576   : > { %v2196_v9 = vadd.f32 %v2146_v20, %v2068_v45  ;;  %v2131_v53 = vpop.xlane.xlu1 %2130  ;;  %v2775_v45 = vadd.f32 %v2705_v56, %v2437_v50  ;;  %v2432_v50 = vmul.f32 0.0, %v10159_v59 }
 0x577   : > { %v2191_v63 = vadd.f32 %v2131_v53, %v2063_v52  ;;  %v6174_v52 = vld [vmem:[%s7116_s25 + $0x18] sm:$0xf0] }
 0x578   : > { %2229 = vst.msk [vmem:[#allocation3 + $0xb0] sm:$0xff] %vm747_vm0, %v2196_v9  ;;  %v2692_v9 = vadd.f32 %v10158_v33, %v10157_v7 }
 0x579   : > { %2224 = vst.msk [vmem:[#allocation3 + $0x88] sm:$0xff] %vm747_vm0, %v2191_v63 }
 0x57a   : > { %v2770_v31 = vadd.f32 %v2692_v9, %v2432_v50  ;;  %v10162_v9 = vld [vmem:[#allocation55_spill] sm:$0xff] }
 0x57e   : > { %2163 = vadd.xlane.f32.xlu0 %v8429_v16  ;;  %v6016_v16 = vld [vmem:[%s7116_s25 + $0x94] sm:$0xf] }
 0x57f   : > { %4933 = vperm.xlu2 %6265, %v6477_v2   ;;  %v5985_v2 = vor.u32 %v6174_v52, %v5984_v47  ;;  %v6017_v56 = vor.u32 %v6182_v0, %v6016_v16  ;;  %v4802_v52 = vld [vmem:[#allocation3 + $0x38] sm:$0xff] }
 0x580   : > { %6480 = vrcp.f32 %v4802_v52  ;;  %v6012_v52 = vld [vmem:[%s7116_s25 + $0x84] sm:$0xf] }
 0x581   : > { %3159 = vmatpush.bf16.xpose.msrb.mxu2 %v5985_v2  ;;  %3248 = vmatpush.bf16.xpose.msrb.mxu3 %v6017_v56  ;;  %v2436_v2 = vmul.f32 0.0, %v10162_v9  ;;  %v2039_v56 = vld [vmem:[#allocation3 + $0xc8] sm:$0xff] }
 0x582   : > { %v2071_v59 = vmul.f32 %v8210_v28, %v2039_v56  ;;  %v6157_v56 = vld [vmem:[%s7151_s12 + $0x8] sm:$0xf0] }
 0x588   : > { %v4924_v20 = vpop.permute.xlu0 %4923 }
 0x589   : > { %v5057_v53 = vmul.f32 %v4924_v20, %v2775_v45  ;;  %2148 = vadd.xlane.f32.xlu1 %v2147_v54  ;;  %v2670_v63 = vpop.f32.mrf.mxu2  ;;  %v6479_v45 = vpop.eup %6478  ;;  %v2035_v20 = vld [vmem:[#allocation3 + $0xa8] sm:$0xff] }
 0x58a   : > { %v2759_v21 = vpop.f32.mrf.mxu3  ;;  %v2067_v47 = vmul.f32 %v8197_v61, %v2035_v20  ;;  %v6173_v20 = vld [vmem:[%s7116_s25 + $0x8] sm:$0xf0] }
 0x58b   : > { %v5089_v42 = vpack.c.bf16 %v5057_v53, %v5057_v53  ;;  %v8533_v39 = vadd.f32 %v2759_v21, %v2670_v63  ;;  %v10160_v53 = vld [vmem:[#allocation72_spill] sm:$0xff] }
 0x58c   : > { %v2702_v63 = vadd.f32 %v10161_v10, %v10160_v53 }
 0x58d   : > { %5121 = vst [vmem:[%s8439_s30 + $0x30] sm:$0xf] %v5089_v42 }
 0x58e   : > { %v4899_v11 = vpop.permute.xlu1 %4898 }
 0x58f   : > { %v5052_v7 = vmul.f32 %v4899_v11, %v2770_v31  ;;  %v2774_v31 = vadd.f32 %v2702_v63, %v2436_v2  ;;  %v6481_v11 = vpop.eup %6480  ;;  %v10163_v63 = vld [vmem:[#allocation12_spill] sm:$0xff] }
 0x590   : > { %v2712_v9 = vadd.f32 %v10163_v63, %v8135_v6  ;;  %v10164_v2 = vld [vmem:[#allocation68_spill] sm:$0xff] }
 0x591   : > { %v5084_v54 = vpack.c.bf16 %v5052_v7, %v5052_v7  ;;  %v2034_v7 = vld [vmem:[#allocation3 + $0xa0] sm:$0xff]  ;;  %v8561_v6 = vpop.f32.mrf.mxu2 }
 0x592   : > { %4953 = vperm.xlu0 %6266, %v6479_v45   ;;  %v4806_v45 = vld [vmem:[#allocation3 + $0x58] sm:$0xff]  ;;  %v2038_v63 = vld [vmem:[#allocation3 + $0xc0] sm:$0xff] }
 0x593   : > { %5116 = vst [vmem:[%s8439_s30 + $0x8] sm:$0xf] %v5084_v54  ;;  %v5980_v54 = vld [vmem:[%s7116_s25 + $0x4] sm:$0xf]  ;;  %6482 = vrcp.f32 %v4806_v45 }
 0x599   : > { %v2143_v16 = vpop.xlane.xlu2 %2142 }
 0x59a   : > { %v2195_v33 = vadd.f32 %v2143_v16, %v2067_v47  ;;  %v5981_v47 = vor.u32 %v6173_v20, %v5980_v54  ;;  %v6181_v16 = vld [vmem:[%s7116_s25 + $0x88] sm:$0xf0]  ;;  %v4813_v54 = vld [vmem:[#allocation3 + $0x90] sm:$0xff] }
 0x59b   : > { %v6013_v53 = vor.u32 %v6181_v16, %v6012_v52 }
 0x59c   : > { %2228 = vst.msk [vmem:[#allocation3 + $0xa8] sm:$0xff] %vm747_vm0, %v2195_v33  ;;  %v2066_v33 = vmul.f32 %v8175_v22, %v2034_v7  ;;  %3160 = vmatpush.bf16.xpose.msrb.mxu2 %v5981_v47  ;;  %v2440_v22 = vmul.f32 0.0, %v10164_v2  ;;  %v10165_v7 = vld [vmem:[#allocation41_spill] sm:$0xff]  ;;  %v10166_v47 = vld [vmem:[#allocation66_spill] sm:$0xff] }
 0x59d   : > { %3249 = vmatpush.bf16.xpose.msrb.mxu3 %v6013_v53  ;;  %v2435_v45 = vmul.f32 0.0, %v10165_v7  ;;  %v5920_v53 = vld [vmem:[%s7151_s12 + $0x14] sm:$0xf] }
 0x59f   : > { %v2773_v52 = vadd.f32 %v10166_v47, %v2435_v45  ;;  %v5924_v47 = vld [vmem:[%s7151_s12 + $0x24] sm:$0xf] }
 0x5a1   : > { %v4919_v0 = vpop.permute.xlu2 %4918 }
 0x5a2   : > { %v5056_v21 = vmul.f32 %v4919_v0, %v2774_v31  ;;  %4928 = vperm.xlu1 %6267, %v6481_v11   ;;  %v2778_v31 = vadd.f32 %v2712_v9, %v2440_v22  ;;  %v4810_v0 = vld [vmem:[#allocation3 + $0x78] sm:$0xff] }
 0x5a3   : > { %6484 = vrcp.f32 %v4810_v0  ;;  %v4816_v9 = vld [vmem:[#allocation3 + $0xa8] sm:$0xff] }
 0x5a4   : > { %v5088_v61 = vpack.c.bf16 %v5056_v21, %v5056_v21  ;;  %6486 = vrcp.f32 %v4813_v54 }
 0x5a5   : > { %6488 = vrcp.f32 %v4816_v9  ;;  %v5928_v9 = vld [vmem:[%s7151_s12 + $0x34] sm:$0xf] }
 0x5a6   : > { %5120 = vst [vmem:[%s8439_s30 + $0x28] sm:$0xf] %v5088_v61  ;;  %v5916_v61 = vld [vmem:[%s7151_s12 + $0x4] sm:$0xf] }
 0x5a8   : > { %2160 = vadd.xlane.f32.xlu2 %v8381_v13  ;;  %v6483_v13 = vpop.eup %6482 }
 0x5a9   : > { %v6485_v20 = vpop.eup %6484 }
 0x5aa   : > { %v6487_v22 = vpop.eup %6486 }
 0x5b3   : > { %v2155_v50 = vpop.xlane.xlu0 %2154 }
 0x5b4   : > { %v2199_v42 = vadd.f32 %v2155_v50, %v2071_v59  ;;  %v5917_v59 = vor.u32 %v6157_v56, %v5916_v61  ;;  %v6489_v61 = vpop.eup %6488  ;;  %v10167_v56 = vld [vmem:[#allocation10_spill] sm:$0xff] }
 0x5b6   : > { %2232 = vst.msk [vmem:[#allocation3 + $0xc8] sm:$0xff] %vm747_vm0, %v2199_v42  ;;  %3161 = vmatmul.bf16.vlgmr.msrb.gmra.mxu2 %v5917_v59  ;;  %3250 = vmatmul.bf16.vlgmr.msrb.gmra.mxu3 %v5917_v59  ;;  %v8563_v42 = vpop.f32.mrf.mxu3  ;;  %v2439_v59 = vmul.f32 0.0, %v10167_v56 }
 0x5b9   : > { %v2140_v10 = vpop.xlane.xlu1 %2139 }
 0x5ba   : > { %v2194_v28 = vadd.f32 %v2140_v10, %v2066_v33  ;;  %v6158_v10 = vld [vmem:[%s7151_s12 + $0x18] sm:$0xf0] }
 0x5bb   : > { %v5921_v2 = vor.u32 %v6158_v10, %v5920_v53 }
 0x5bc   : > { %2227 = vst.msk [vmem:[#allocation3 + $0xa0] sm:$0xff] %vm747_vm0, %v2194_v28  ;;  %2172 = vadd.xlane.f32.xlu0 %v8495_v30  ;;  %v2156_v30 = vadd.f32 %v8376_v35, %v8374_v29 }
 0x5c0   : > { %4948 = vperm.xlu2 %6265, %v6483_v13  }
 0x5c6   : > { %v4939_v11 = vpop.permute.xlu0 %4938  ;;  %3166 = vmatmul.bf16.gmra.mxu2 %v5921_v2  ;;  %3255 = vmatmul.bf16.gmra.mxu3 %v5921_v2  ;;  %v6160_v2 = vld [vmem:[%s7151_s12 + $0x38] sm:$0xf0] }
 0x5c7   : > { %v5060_v21 = vmul.f32 %v4939_v11, %v2778_v31  ;;  %v2070_v31 = vmul.f32 %v8264_v17, %v2038_v63  ;;  %v2037_v63 = vld [vmem:[#allocation3 + $0xb8] sm:$0xff] }
 0x5c9   : > { %v5092_v50 = vpack.c.bf16 %v5060_v21, %v5060_v21  ;;  %v4805_v21 = vld [vmem:[#allocation3 + $0x50] sm:$0xff] }
 0x5ca   : > { %6490 = vrcp.f32 %v4805_v21  ;;  %v10169_v21 = vld [vmem:[#allocation74_spill] sm:$0xff] }
 0x5cb   : > { %5124 = vst [vmem:[%s8439_s30 + $0x48] sm:$0xf] %v5092_v50  ;;  %v10168_v50 = vld [vmem:[#allocation18_spill] sm:$0xff] }
 0x5cc   : > { %2157 = vadd.xlane.f32.xlu1 %v2156_v30  ;;  %v2777_v30 = vadd.f32 %v10168_v50, %v2439_v59 }
 0x5d0   : > { %4968 = vperm.xlu0 %6266, %v6485_v20   ;;  %v6491_v45 = vpop.eup %6490 }
 0x5d1   : > { %v4914_v16 = vpop.permute.xlu1 %4913 }
 0x5d2   : > { %v5055_v29 = vmul.f32 %v4914_v16, %v2773_v52  ;;  %v6159_v52 = vld [vmem:[%s7151_s12 + $0x28] sm:$0xf0] }
 0x5d3   : > { %v5925_v16 = vor.u32 %v6159_v52, %v5924_v47  ;;  %v10170_v47 = vld [vmem:[#allocation16_spill] sm:$0xff] }
 0x5d4   : > { %v5087_v35 = vpack.c.bf16 %v5055_v29, %v5055_v29  ;;  %v2675_v33 = vpop.f32.mrf.mxu2 }
 0x5d5   : > { %v2764_v28 = vpop.f32.mrf.mxu3 }
 0x5d6   : > { %5119 = vst [vmem:[%s8439_s30 + $0x20] sm:$0xf] %v5087_v35  ;;  %v8570_v13 = vadd.f32 %v2764_v28, %v2675_v33  ;;  %3171 = vmatmul.bf16.gmra.mxu2 %v5925_v16  ;;  %v2042_v35 = vld [vmem:[#allocation3 + $0xe0] sm:$0xff]  ;;  %3260 = vmatmul.bf16.gmra.mxu3 %v5925_v16  ;;  %v4809_v28 = vld [vmem:[#allocation3 + $0x70] sm:$0xff] }
 0x5d7   : > { %v2074_v33 = vmul.f32 %v8276_v14, %v2042_v35  ;;  %v4812_v14 = vld [vmem:[#allocation3 + $0x88] sm:$0xff]  ;;  %v10172_v35 = vld [vmem:[#allocation51_spill] sm:$0xff] }
 0x5d8   : > { %4983 = vperm.xlu0 %6266, %v6487_v22   ;;  %v2069_v22 = vmul.f32 %v8225_v18, %v2037_v63  ;;  %v5936_v63 = vld [vmem:[%s7151_s12 + $0x54] sm:$0xf] }
 0x5da   : > { %v2152_v11 = vpop.xlane.xlu2 %2151 }
 0x5db   : > { %v2198_v0 = vadd.f32 %v2152_v11, %v2070_v31 }
 0x5dd   : > { %2231 = vst.msk [vmem:[#allocation3 + $0xc0] sm:$0xff] %vm747_vm0, %v2198_v0 }
 0x5e0   : > { %4998 = vperm.xlu0 %6266, %v6489_v61   ;;  %v2443_v61 = vmul.f32 0.0, %v10169_v21 }
 0x5e2   : > { %v4934_v7 = vpop.permute.xlu2 %4933  ;;  %v2781_v56 = vadd.f32 %v8194_v32, %v2443_v61  ;;  %v10171_v32 = vld [vmem:[#allocation17_spill] sm:$0xff] }
 0x5e3   : > { %v5059_v17 = vmul.f32 %v4934_v7, %v2777_v30  ;;  %v4815_v30 = vld [vmem:[#allocation3 + $0xa0] sm:$0xff]  ;;  %v2707_v52 = vadd.f32 %v10171_v32, %v10170_v47  ;;  %v4808_v61 = vld [vmem:[#allocation3 + $0x68] sm:$0xff]  ;;  %v2045_v32 = vld [vmem:[#allocation3 + $0xf8] sm:$0xff] }
 0x5e4   : > { %v4819_v54 = vld [vmem:[#allocation3 + $0xc0] sm:$0xff] }
 0x5e5   : > { %v5091_v20 = vpack.c.bf16 %v5059_v17, %v5059_v17  ;;  %4943 = vperm.xlu1 %6267, %v6491_v45   ;;  %6492 = vrcp.f32 %v4819_v54  ;;  %v5932_v17 = vld [vmem:[%s7151_s12 + $0x44] sm:$0xf]  ;;  %v6161_v45 = vld [vmem:[%s7151_s12 + $0x48] sm:$0xf0] }
 0x5e6   : > { %6494 = vrcp.f32 %v4809_v28  ;;  %v5933_v54 = vor.u32 %v6161_v45, %v5932_v17  ;;  %v4811_v17 = vld [vmem:[#allocation3 + $0x80] sm:$0xff] }
 0x5e7   : > { %5123 = vst [vmem:[%s8439_s30 + $0x40] sm:$0xf] %v5091_v20  ;;  %6496 = vrcp.f32 %v4812_v14  ;;  %v2165_v20 = vadd.f32 %v8420_v40, %v8418_v34  ;;  %v10173_v14 = vld [vmem:[#allocation19_spill] sm:$0xff] }
 0x5e8   : > { %6498 = vrcp.f32 %v4815_v30 }
 0x5e9   : > { %2169 = vadd.xlane.f32.xlu2 %v8454_v55  ;;  %v5929_v55 = vor.u32 %v6160_v2, %v5928_v9  ;;  %v6162_v9 = vld [vmem:[%s7151_s12 + $0x58] sm:$0xf0] }
 0x5ea   : > { %v5937_v40 = vor.u32 %v6162_v9, %v5936_v63  ;;  %v5944_v63 = vld [vmem:[%s7151_s12 + $0x74] sm:$0xf]  ;;  %v6164_v9 = vld [vmem:[%s7151_s12 + $0x78] sm:$0xf0] }
 0x5eb   : > { %v6493_v29 = vpop.eup %6492  ;;  %3176 = vmatmul.bf16.gmra.mxu2 %v5929_v55  ;;  %3265 = vmatmul.bf16.gmra.mxu3 %v5929_v55  ;;  %v2041_v55 = vld [vmem:[#allocation3 + $0xd8] sm:$0xff] }
 0x5ec   : > { %5013 = vperm.xlu0 %6266, %v6493_v29   ;;  %v6495_v0 = vpop.eup %6494 }
 0x5ed   : > { %v6497_v7 = vpop.eup %6496 }
 0x5ee   : > { %v6499_v29 = vpop.eup %6498 }
 0x5f1   : > { %v2164_v53 = vpop.xlane.xlu0 %2163 }
 0x5f2   : > { %v2202_v10 = vadd.f32 %v2164_v53, %v2074_v33  ;;  %v2438_v33 = vmul.f32 0.0, %v10172_v35 }
 0x5f4   : > { %2235 = vst.msk [vmem:[#allocation3 + $0xe0] sm:$0xff] %vm747_vm0, %v2202_v10  ;;  %v2776_v53 = vadd.f32 %v2707_v52, %v2438_v33 }
 0x5fb   : > { %3181 = vmatmul.bf16.gmra.mxu2 %v5933_v54  ;;  %3270 = vmatmul.bf16.gmra.mxu3 %v5933_v54  ;;  %v5940_v54 = vld [vmem:[%s7151_s12 + $0x64] sm:$0xf] }
 0x5fc   : > { %v2149_v31 = vpop.xlane.xlu1 %2148 }
 0x5fd   : > { %v2197_v11 = vadd.f32 %v2149_v31, %v2069_v22  ;;  %v2073_v22 = vmul.f32 %v8320_v15, %v2041_v55  ;;  %v2040_v55 = vld [vmem:[#allocation3 + $0xd0] sm:$0xff] }
 0x5ff   : > { %2230 = vst.msk [vmem:[#allocation3 + $0xb8] sm:$0xff] %vm747_vm0, %v2197_v11 }
 0x601   : > { %4963 = vperm.xlu2 %6265, %v6495_v0   ;;  %v10174_v0 = vld [vmem:[#allocation20_spill] sm:$0xff] }
 0x602   : > { %v2717_v21 = vadd.f32 %v10174_v0, %v10173_v14 }
 0x604   : > { %v4954_v59 = vpop.permute.xlu0 %4953 }
 0x605   : > { %v5063_v50 = vmul.f32 %v4954_v59, %v2781_v56  ;;  %v10175_v56 = vld [vmem:[#allocation78_spill] sm:$0xff] }
 0x606   : > { %v4818_v16 = vld [vmem:[#allocation3 + $0xb8] sm:$0xff]  ;;  %v2442_v59 = vmul.f32 0.0, %v10175_v56  ;;  %v4823_v56 = vld [vmem:[#allocation3 + $0xe0] sm:$0xff] }
 0x607   : > { %v5095_v18 = vpack.c.bf16 %v5063_v50, %v5063_v50  ;;  %6500 = vrcp.f32 %v4818_v16  ;;  %v2077_v16 = vmul.f32 %v8325_v19, %v2045_v32  ;;  %v2727_v19 = vadd.f32 %v8253_v27, %v8250_v38  ;;  %v8616_v38 = vpop.f32.mrf.mxu2  ;;  %v8618_v27 = vpop.f32.mrf.mxu3 }
 0x608   : > { %6502 = vrcp.f32 %v4808_v61  ;;  %v2780_v50 = vadd.f32 %v2717_v21, %v2442_v59 }
 0x609   : > { %5127 = vst [vmem:[%s8439_s30 + $0x60] sm:$0xf] %v5095_v18  ;;  %4978 = vperm.xlu2 %6265, %v6497_v7  }
 0x60b   : > { %3186 = vmatmul.bf16.gmra.mxu2 %v5937_v40  ;;  %3275 = vmatmul.bf16.gmra.mxu3 %v5937_v40  ;;  %v4820_v40 = vld [vmem:[#allocation3 + $0xc8] sm:$0xff] }
 0x60d   : > { %v6501_v34 = vpop.eup %6500 }
 0x60e   : > { %v6503_v45 = vpop.eup %6502 }
 0x60f   : > { %2166 = vadd.xlane.f32.xlu1 %v2165_v20  ;;  %v6163_v20 = vld [vmem:[%s7151_s12 + $0x68] sm:$0xf0] }
 0x610   : > { %v5941_v47 = vor.u32 %v6163_v20, %v5940_v54  ;;  %v2742_v54 = vadd.f32 %v8400_v36, %v8398_v37  ;;  %v10176_v36 = vld [vmem:[#allocation67_spill] sm:$0xff] }
 0x611   : > { %4993 = vperm.xlu2 %6265, %v6499_v29   ;;  %v4814_v29 = vld [vmem:[#allocation3 + $0x98] sm:$0xff] }
 0x614   : > { %v4929_v10 = vpop.permute.xlu1 %4928 }
 0x615   : > { %v5058_v28 = vmul.f32 %v4929_v10, %v2776_v53  ;;  %v4817_v10 = vld [vmem:[#allocation3 + $0xb0] sm:$0xff] }
 0x617   : > { %v5090_v2 = vpack.c.bf16 %v5058_v28, %v5058_v28 }
 0x619   : > { %5122 = vst [vmem:[%s8439_s30 + $0x38] sm:$0xf] %v5090_v2  ;;  %5008 = vperm.xlu2 %6265, %v6501_v34   ;;  %v5945_v2 = vor.u32 %v6164_v9, %v5944_v63  ;;  %v2072_v34 = vmul.f32 %v8292_v49, %v2040_v55  ;;  %v10177_v63 = vld [vmem:[#allocation13_spill] sm:$0xff] }
 0x61b   : > { %v2161_v31 = vpop.xlane.xlu2 %2160  ;;  %3191 = vmatmul.bf16.gmra.mxu2 %v5941_v47  ;;  %3280 = vmatmul.bf16.gmra.mxu3 %v5941_v47 }
 0x61c   : > { %v2201_v11 = vadd.f32 %v2161_v31, %v2073_v22  ;;  %v2446_v31 = vmul.f32 0.0, %v8199_v57  ;;  %v2449_v57 = vmul.f32 0.0, %v8266_v5 }
 0x61e   : > { %2234 = vst.msk [vmem:[#allocation3 + $0xd8] sm:$0xff] %vm747_vm0, %v2201_v11  ;;  %v2784_v0 = vadd.f32 %v2727_v19, %v2446_v31  ;;  %v2044_v19 = vld [vmem:[#allocation3 + $0xf0] sm:$0xff] }
 0x623   : > { %v4949_v18 = vpop.permute.xlu2 %4948 }
 0x624   : > { %v5062_v30 = vmul.f32 %v4949_v18, %v2780_v50  ;;  %v2787_v50 = vadd.f32 %v8339_v43, %v2449_v57 }
 0x625   : > { %v4822_v15 = vld [vmem:[#allocation3 + $0xd8] sm:$0xff] }
 0x626   : > { %v5094_v7 = vpack.c.bf16 %v5062_v30, %v5062_v30  ;;  %6504 = vrcp.f32 %v4822_v15  ;;  %v5948_v30 = vld [vmem:[%s7151_s12 + $0x84] sm:$0xf]  ;;  %v6165_v15 = vld [vmem:[%s7151_s12 + $0x88] sm:$0xf0] }
 0x627   : > { %6506 = vrcp.f32 %v4811_v17  ;;  %v5949_v17 = vor.u32 %v6165_v15, %v5948_v30  ;;  %v2732_v15 = vadd.f32 %v8333_v58, %v8331_v26 }
 0x628   : > { %5126 = vst [vmem:[%s8439_s30 + $0x58] sm:$0xf] %v5094_v7  ;;  %4958 = vperm.xlu1 %6267, %v6503_v45   ;;  %6508 = vrcp.f32 %v4814_v29 }
 0x629   : > { %6510 = vrcp.f32 %v4817_v10 }
 0x62a   : > { %6512 = vrcp.f32 %v4820_v40  ;;  %v2455_v40 = vmul.f32 0.0, %v8389_v44 }
 0x62b   : > { %3196 = vmatmul.bf16.gmra.mxu2 %v5945_v2  ;;  %3285 = vmatmul.bf16.gmra.mxu3 %v5945_v2  ;;  %6514 = vrcp.f32 %v4823_v56  ;;  %v10178_v56 = vld [vmem:[#allocation15_spill] sm:$0xff] }
 0x62c   : > { %v6505_v52 = vpop.eup %6504 }
 0x62d   : > { %5028 = vperm.xlu0 %6266, %v6505_v52   ;;  %v6507_v35 = vpop.eup %6506  ;;  %v2452_v52 = vmul.f32 0.0, %v8322_v51 }
 0x62e   : > { %v6509_v28 = vpop.eup %6508 }
 0x62f   : > { %v2173_v33 = vpop.xlane.xlu0 %2172  ;;  %v6511_v22 = vpop.eup %6510  ;;  %v2790_v29 = vadd.f32 %v2742_v54, %v2452_v52 }
 0x630   : > { %v2205_v53 = vadd.f32 %v2173_v33, %v2077_v16  ;;  %4973 = vperm.xlu1 %6267, %v6507_v35   ;;  %v6513_v59 = vpop.eup %6512  ;;  %v2441_v33 = vmul.f32 0.0, %v10176_v36 }
 0x631   : > { %v6515_v32 = vpop.eup %6514 }
 0x632   : > { %2238 = vst.msk [vmem:[#allocation3 + $0xf8] sm:$0xff] %vm747_vm0, %v2205_v53  ;;  %v2779_v9 = vadd.f32 %v10177_v63, %v2441_v33  ;;  %v10179_v33 = vld [vmem:[#allocation28_spill] sm:$0xff] }
 0x638   : > { %4988 = vperm.xlu1 %6267, %v6509_v28  }
 0x639   : > { %v8627_v47 = vpop.f32.mrf.mxu2  ;;  %v8629_v5 = vpop.f32.mrf.mxu3  ;;  %v4826_v43 = vld [vmem:[#allocation3 + $0xf8] sm:$0xff] }
 0x63b   : > { %3201 = vmatmul.bf16.gmra.mxu2 %v5949_v17  ;;  %3290 = vmatmul.bf16.gmra.mxu3 %v5949_v17  ;;  %v2448_v17 = vmul.f32 0.0, %v8228_v1 }
 0x63f   : > { %v2158_v11 = vpop.xlane.xlu1 %2157 }
 0x640   : > { %v2200_v14 = vadd.f32 %v2158_v11, %v2072_v34  ;;  %5003 = vperm.xlu1 %6267, %v6511_v22   ;;  %v2076_v22 = vmul.f32 %v8387_v46, %v2044_v19  ;;  %v2793_v11 = vadd.f32 %v8471_v62, %v2455_v40 }
 0x641   : > { %v8634_v10 = vpop.f32.mrf.mxu2  ;;  %v8636_v28 = vpop.f32.mrf.mxu3 }
 0x642   : > { %2233 = vst.msk [vmem:[#allocation3 + $0xd0] sm:$0xff] %vm747_vm0, %v2200_v14  ;;  %v4969_v21 = vpop.permute.xlu0 %4968 }
 0x643   : > { %v5066_v61 = vmul.f32 %v4969_v21, %v2784_v0 }
 0x645   : > { %v5098_v49 = vpack.c.bf16 %v5066_v61, %v5066_v61 }
 0x647   : > { %5130 = vst [vmem:[%s8439_s30 + $0x78] sm:$0xf] %v5098_v49 }
 0x648   : > { %5018 = vperm.xlu1 %6267, %v6513_v59   ;;  %v2445_v59 = vmul.f32 0.0, %v10178_v56 }
 0x649   : > { %v4821_v18 = vld [vmem:[#allocation3 + $0xd0] sm:$0xff]  ;;  %v8644_v0 = vpop.f32.mrf.mxu2  ;;  %v8646_v21 = vpop.f32.mrf.mxu3 }
 0x64a   : > { %v4984_v7 = vpop.permute.xlu0 %4983  ;;  %6516 = vrcp.f32 %v4821_v18  ;;  %v2783_v44 = vadd.f32 %v8246_v23, %v2445_v59  ;;  %v5952_v59 = vld [vmem:[%s7151_s12 + $0x94] sm:$0xf] }
 0x64b   : > { %v5069_v45 = vmul.f32 %v4984_v7, %v2787_v50  ;;  %6518 = vrcp.f32 %v4826_v43 }
 0x64d   : > { %v5101_v20 = vpack.c.bf16 %v5069_v45, %v5069_v45  ;;  %v2786_v45 = vadd.f32 %v2732_v15, %v2448_v17  ;;  %v10183_v17 = vld [vmem:[#allocation9_spill] sm:$0xff] }
 0x64f   : > { %5133 = vst [vmem:[%s8439_s30 + $0x90] sm:$0xf] %v5101_v20 }
 0x650   : > { %v6517_v16 = vpop.eup %6516  ;;  %5033 = vperm.xlu1 %6267, %v6515_v32  }
 0x651   : > { %5023 = vperm.xlu2 %6265, %v6517_v16   ;;  %v6519_v2 = vpop.eup %6518  ;;  %v8652_v18 = vpop.f32.mrf.mxu2  ;;  %v2451_v16 = vmul.f32 0.0, %v8300_v60 }
 0x652   : > { %v4999_v35 = vpop.permute.xlu0 %4998  ;;  %v8654_v30 = vpop.f32.mrf.mxu3 }
 0x653   : > { %v5072_v37 = vmul.f32 %v4999_v35, %v2790_v29  ;;  %v2789_v26 = vadd.f32 %v8368_v8, %v2451_v16  ;;  %v2747_v29 = vadd.f32 %v8468_v41, %v8465_v24  ;;  %v10180_v24 = vld [vmem:[#allocation24_spill] sm:$0xff] }
 0x655   : > { %v5104_v53 = vpack.c.bf16 %v5072_v37, %v5072_v37 }
 0x657   : > { %5136 = vst [vmem:[%s8439_s30 + $0xa8] sm:$0xf] %v5104_v53  ;;  %v4944_v51 = vpop.permute.xlu1 %4943  ;;  %v2454_v53 = vmul.f32 0.0, %v10179_v33 }
 0x658   : > { %v5061_v55 = vmul.f32 %v4944_v51, %v2779_v9  ;;  %5048 = vperm.xlu1 %6267, %v6519_v2   ;;  %v2043_v2 = vld [vmem:[#allocation3 + $0xe8] sm:$0xff] }
 0x659   : > { %v8660_v32 = vpop.f32.mrf.mxu2  ;;  %v2792_v63 = vadd.f32 %v2747_v29, %v2454_v53  ;;  %v2075_v41 = vmul.f32 %v10180_v24, %v2043_v2  ;;  %v10185_v53 = vld [vmem:[#allocation14_spill] sm:$0xff] }
 0x65a   : > { %v5093_v34 = vpack.c.bf16 %v5061_v55, %v5061_v55  ;;  %v8662_v52 = vpop.f32.mrf.mxu3  ;;  %v3367_v55 = vmax.f32 %v8634_v10, %v8636_v28 }
 0x65c   : > { %5125 = vst [vmem:[%s8439_s30 + $0x50] sm:$0xf] %v5093_v34  ;;  %v2170_v31 = vpop.xlane.xlu2 %2169 }
 0x65d   : > { %v2204_v14 = vadd.f32 %v2170_v31, %v2076_v22  ;;  %v3376_v22 = vmax.f32 %v8660_v32, %v8662_v52 }
 0x65e   : > { %v5014_v61 = vpop.permute.xlu0 %5013 }
 0x65f   : > { %2237 = vst.msk [vmem:[#allocation3 + $0xf0] sm:$0xff] %vm747_vm0, %v2204_v14  ;;  %v5075_v49 = vmul.f32 %v5014_v61, %v2793_v11 }
 0x661   : > { %v5107_v57 = vpack.c.bf16 %v5075_v49, %v5075_v49  ;;  %v8669_v37 = vpop.f32.mrf.mxu2 }
 0x662   : > { %v8671_v36 = vpop.f32.mrf.mxu3 }
 0x663   : > { %5139 = vst [vmem:[%s8439_s30 + $0xc0] sm:$0xf] %v5107_v57  ;;  %v6166_v57 = vld [vmem:[%s7151_s12 + $0x98] sm:$0xf0] }
 0x664   : > { %v4964_v46 = vpop.permute.xlu2 %4963 }
 0x665   : > { %v5065_v50 = vmul.f32 %v4964_v46, %v2783_v44  ;;  %v5953_v44 = vor.u32 %v6166_v57, %v5952_v59  ;;  %v10190_v57 = vld [vmem:[#allocation27_spill] sm:$0xff] }
 0x666   : > { %v4825_v62 = vld [vmem:[#allocation3 + $0xf0] sm:$0xff] }
 0x667   : > { %v5097_v7 = vpack.c.bf16 %v5065_v50, %v5065_v50  ;;  %6520 = vrcp.f32 %v4825_v62  ;;  %3206 = vmatmul.bf16.gmra.mxu2 %v5953_v44  ;;  %3295 = vmatmul.bf16.gmra.mxu3 %v5953_v44  ;;  %v10181_v50 = vld [vmem:[#allocation25_spill] sm:$0xff]  ;;  %v10182_v62 = vld [vmem:[#allocation22_spill] sm:$0xff]  ;;  %v2450_v44 = vmul.f32 0.0, %v10190_v57 }
 0x668   : > { %v2722_v15 = vadd.f32 %v10182_v62, %v10181_v50  ;;  %v10192_v50 = vld [vmem:[#allocation35_spill] sm:$0xff] }
 0x669   : > { %5129 = vst [vmem:[%s8439_s30 + $0x70] sm:$0xf] %v5097_v7  ;;  %v3370_v7 = vmax.f32 %v8644_v0, %v8646_v21  ;;  %v2457_v62 = vmul.f32 0.0, %v10192_v50 }
 0x66c   : > { %v4979_v54 = vpop.permute.xlu2 %4978 }
 0x66d   : > { %v6521_v23 = vpop.eup %6520  ;;  %v5068_v20 = vmul.f32 %v4979_v54, %v2786_v45  ;;  %v2444_v45 = vmul.f32 0.0, %v10183_v17  ;;  %v2795_v17 = vadd.f32 %v8499_v4, %v2457_v62  ;;  %v10197_v4 = vld [vmem:[#allocation33_spill] sm:$0xff] }
 0x66e   : > { %5043 = vperm.xlu0 %6266, %v6521_v23   ;;  %v8675_v8 = vpop.f32.mrf.mxu2  ;;  %v8679_v19 = vpop.f32.mrf.mxu3 }
 0x66f   : > { %v5100_v43 = vpack.c.bf16 %v5068_v20, %v5068_v20  ;;  %v2782_v20 = vadd.f32 %v2722_v15, %v2444_v45 }
 0x671   : > { %5132 = vst [vmem:[%s8439_s30 + $0x88] sm:$0xf] %v5100_v43  ;;  %v2757_v43 = vadd.f32 %v8519_v25, %v8517_v48  ;;  %v10187_v25 = vld [vmem:[#allocation21_spill] sm:$0xff] }
 0x674   : > { %v4994_v58 = vpop.permute.xlu2 %4993 }
 0x675   : > { %v5071_v1 = vmul.f32 %v4994_v58, %v2789_v26  ;;  %v10184_v58 = vld [vmem:[#allocation42_spill] sm:$0xff] }
 0x676   : > { %v8686_v31 = vpop.f32.mrf.mxu2  ;;  %v8688_v11 = vpop.f32.mrf.mxu3 }
 0x677   : > { %v5103_v35 = vpack.c.bf16 %v5071_v1, %v5071_v1  ;;  %v3385_v61 = vmax.f32 %v8686_v31, %v8688_v11  ;;  %v2458_v1 = vmul.f32 0.0, %v10184_v58 }
 0x679   : > { %5135 = vst [vmem:[%s8439_s30 + $0xa0] sm:$0xf] %v5103_v35  ;;  %v3379_v35 = vmax.f32 %v8669_v37, %v8671_v36  ;;  %v2796_v33 = vadd.f32 %v2757_v43, %v2458_v1 }
 0x67c   : > { %v5009_v9 = vpop.permute.xlu2 %5008 }
 0x67d   : > { %v5074_v60 = vmul.f32 %v5009_v9, %v2792_v63  ;;  %v2447_v63 = vmul.f32 0.0, %v10185_v53 }
 0x67e   : > { %v8692_v49 = vpop.f32.mrf.mxu2  ;;  %v8694_v56 = vpop.f32.mrf.mxu3 }
 0x67f   : > { %v5106_v51 = vpack.c.bf16 %v5074_v60, %v5074_v60 }
 0x681   : > { %5138 = vst [vmem:[%s8439_s30 + $0xb8] sm:$0xf] %v5106_v51  ;;  %v2785_v51 = vadd.f32 %v10187_v25, %v2447_v63  ;;  %v2752_v25 = vadd.f32 %v8492_v12, %v8487_v3  ;;  %v10201_v12 = vld [vmem:[#allocation32_spill] sm:$0xff] }
 0x682   : > { %3368 = vmax.xlane.f32.xlu1 %v3367_v55  ;;  %v2167_v34 = vpop.xlane.xlu1 %2166  ;;  %v2459_v57 = vmul.f32 0.0, %v10201_v12 }
 0x683   : > { %v2203_v40 = vadd.f32 %v2167_v34, %v2075_v41 }
 0x684   : > { %v2797_v62 = vadd.f32 %v8533_v39, %v2459_v57 }
 0x685   : > { %2236 = vst.msk [vmem:[#allocation3 + $0xe8] sm:$0xff] %vm747_vm0, %v2203_v40  ;;  %v3388_v40 = vmax.f32 %v8692_v49, %v8694_v56 }
 0x686   : > { %v8703_v54 = vpop.f32.mrf.mxu2  ;;  %v8705_v23 = vpop.f32.mrf.mxu3 }
 0x68a   : > { %3377 = vmax.xlane.f32.xlu1 %v3376_v22  ;;  %v10188_v22 = vld [vmem:[#allocation29_spill] sm:$0xff] }
 0x68c   : > { %v4824_v14 = vld [vmem:[#allocation3 + $0xe8] sm:$0xff] }
 0x68d   : > { %6522 = vrcp.f32 %v4824_v14  ;;  %v10189_v14 = vld [vmem:[#allocation30_spill] sm:$0xff] }
 0x68e   : > { %v8714_v60 = vpop.f32.mrf.mxu2  ;;  %v8716_v48 = vpop.f32.mrf.mxu3 }
 0x68f   : > { %10186 = vst [vmem:[#allocation49_spill] sm:$0xff] %v8716_v48  ;;  %v3394_v55 = vmax.f32 %v8714_v60, %v8716_v48 }
 0x692   : > { %3386 = vmax.xlane.f32.xlu1 %v3385_v61  ;;  %v2737_v61 = vadd.f32 %v10189_v14, %v10188_v22 }
 0x693   : > { %v6523_v46 = vpop.eup %6522 }
 0x694   : > { %5038 = vperm.xlu2 %6265, %v6523_v46  }
 0x696   : > { %v8728_v46 = vpop.f32.mrf.mxu2  ;;  %v8731_v15 = vpop.f32.mrf.mxu3 }
 0x697   : > { %10191 = vst [vmem:[#allocation45_spill] sm:$0xff] %v8728_v46 }
 0x698   : > { %3371 = vmax.xlane.f32.xlu0 %v3370_v7  ;;  %10193 = vst [vmem:[#allocation44_spill] sm:$0xff] %v8731_v15  ;;  %v2788_v7 = vadd.f32 %v2737_v61, %v2450_v44  ;;  %v3364_v61 = vmax.f32 %v8627_v47, %v8629_v5 }
 0x69a   : > { %v4959_v16 = vpop.permute.xlu1 %4958  ;;  %3395 = vmax.xlane.f32.xlu1 %v3394_v55  ;;  %v10198_v55 = vld [vmem:[#allocation23_spill] sm:$0xff] }
 0x69b   : > { %v5064_v26 = vmul.f32 %v4959_v16, %v2782_v20 }
 0x69d   : > { %v5096_v29 = vpack.c.bf16 %v5064_v26, %v5064_v26  ;;  %v3397_v26 = vmax.f32 %v8728_v46, %v8731_v15 }
 0x69e   : > { %v8741_v53 = vpop.f32.mrf.mxu3 }
 0x69f   : > { %5128 = vst [vmem:[%s8439_s30 + $0x68] sm:$0xf] %v5096_v29  ;;  %v5029_v9 = vpop.permute.xlu0 %5028  ;;  %v10194_v29 = vld [vmem:[#allocation26_spill] sm:$0xff] }
 0x6a0   : > { %v5078_v2 = vmul.f32 %v5029_v9, %v2796_v33  ;;  %3380 = vmax.xlane.f32.xlu0 %v3379_v35  ;;  %v2453_v35 = vmul.f32 0.0, %v10194_v29  ;;  %v8738_v33 = vpop.f32.mrf.mxu2  ;;  %10196 = vst [vmem:[#allocation47_spill] sm:$0xff] %v8741_v53  ;;  %v10204_v29 = vld [vmem:[#allocation36_spill] sm:$0xff] }
 0x6a1   : > { %10195 = vst [vmem:[#allocation43_spill] sm:$0xff] %v8738_v33  ;;  %v2462_v39 = vmul.f32 0.0, %v10204_v29 }
 0x6a2   : > { %v5110_v24 = vpack.c.bf16 %v5078_v2, %v5078_v2  ;;  %v4974_v41 = vpop.permute.xlu1 %4973  ;;  %v2791_v63 = vadd.f32 %v10197_v4, %v2453_v35 }
 0x6a3   : > { %v5067_v34 = vmul.f32 %v4974_v41, %v2785_v51 }
 0x6a4   : > { %5142 = vst [vmem:[%s8439_s30 + $0xd8] sm:$0xf] %v5110_v24  ;;  %v2456_v24 = vmul.f32 0.0, %v10198_v55 }
 0x6a5   : > { %v5099_v59 = vpack.c.bf16 %v5067_v34, %v5067_v34 }
 0x6a6   : > { %v8750_v34 = vpop.f32.mrf.mxu3 }
 0x6a7   : > { %5131 = vst [vmem:[%s8439_s30 + $0x80] sm:$0xf] %v5099_v59 }
 0x6a8   : > { %3389 = vmax.xlane.f32.xlu0 %v3388_v40  ;;  %v8748_v41 = vpop.f32.mrf.mxu2  ;;  %10200 = vst [vmem:[#allocation54_spill] sm:$0xff] %v8750_v34  ;;  %v2794_v40 = vadd.f32 %v2752_v25, %v2456_v24  ;;  %v3391_v24 = vmax.f32 %v8703_v54, %v8705_v23 }
 0x6a9   : > { %10199 = vst [vmem:[#allocation46_spill] sm:$0xff] %v8748_v41  ;;  %v3403_v22 = vmax.f32 %v8748_v41, %v8750_v34 }
 0x6aa   : > { %v4989_v45 = vpop.permute.xlu1 %4988 }
 0x6ab   : > { %v5070_v20 = vmul.f32 %v4989_v45, %v2788_v7  ;;  %v5024_v43 = vpop.permute.xlu2 %5023  ;;  %3404 = vmax.xlane.f32.xlu1 %v3403_v22  ;;  %v3373_v45 = vmax.f32 %v8652_v18, %v8654_v30  ;;  %v5960_v22 = vld [vmem:[%s7151_s12 + $0xb4] sm:$0xf] }
 0x6ac   : > { %v5077_v16 = vmul.f32 %v5024_v43, %v2795_v17  ;;  %v2767_v43 = vadd.f32 %v8618_v27, %v8616_v38  ;;  %v3382_v38 = vmax.f32 %v8675_v8, %v8679_v19 }
 0x6ad   : > { %v5102_v58 = vpack.c.bf16 %v5070_v20, %v5070_v20 }
 0x6ae   : > { %v5109_v1 = vpack.c.bf16 %v5077_v16, %v5077_v16  ;;  %v8760_v50 = vpop.f32.mrf.mxu3 }
 0x6af   : > { %5134 = vst [vmem:[%s8439_s30 + $0x98] sm:$0xf] %v5102_v58  ;;  %v6167_v58 = vld [vmem:[%s7151_s12 + $0xa8] sm:$0xf0] }
 0x6b0   : > { %5141 = vst [vmem:[%s8439_s30 + $0xd0] sm:$0xf] %v5109_v1  ;;  %3398 = vmax.xlane.f32.xlu0 %v3397_v26  ;;  %v8758_v44 = vpop.f32.mrf.mxu2  ;;  %v5956_v26 = vld [vmem:[%s7151_s12 + $0xa4] sm:$0xf] }
 0x6b1   : > { %10202 = vst [vmem:[#allocation57_spill] sm:$0xff] %v8758_v44  ;;  %v3406_v7 = vmax.f32 %v8758_v44, %v8760_v50  ;;  %v5957_v1 = vor.u32 %v6167_v58, %v5956_v26 }
 0x6b2   : > { %v5004_v9 = vpop.permute.xlu1 %5003  ;;  %10203 = vst [vmem:[#allocation58_spill] sm:$0xff] %v8760_v50  ;;  %v8907_v50 = vld [vmem:[#allocation2 + $0x148] sm:$0xff] }
 0x6b3   : > { %v5073_v2 = vmul.f32 %v5004_v9, %v2791_v63  ;;  %3211 = vmatmul.bf16.gmra.mxu2 %v5957_v1  ;;  %3300 = vmatmul.bf16.gmra.mxu3 %v5957_v1  ;;  %v2800_v63 = vadd.f32 %v2767_v43, %v2462_v39 }
 0x6b5   : > { %v5105_v51 = vpack.c.bf16 %v5073_v2, %v5073_v2 }
 0x6b6   : > { %v8775_v4 = vpop.f32.mrf.mxu3 }
 0x6b7   : > { %5137 = vst [vmem:[%s8439_s30 + $0xb0] sm:$0xf] %v5105_v51 }
 0x6b8   : > { %3407 = vmax.xlane.f32.xlu0 %v3406_v7  ;;  %v8773_v35 = vpop.f32.mrf.mxu2  ;;  %10206 = vst [vmem:[#allocation52_spill] sm:$0xff] %v8775_v4 }
 0x6b9   : > { %10205 = vst [vmem:[#allocation53_spill] sm:$0xff] %v8773_v35  ;;  %v3409_v7 = vmax.f32 %v8773_v35, %v8775_v4 }
 0x6ba   : > { %v5019_v14 = vpop.permute.xlu1 %5018 }
 0x6bb   : > { %v5076_v59 = vmul.f32 %v5019_v14, %v2794_v40  ;;  %v3400_v40 = vmax.f32 %v8738_v33, %v8741_v53  ;;  %v6168_v14 = vld [vmem:[%s7151_s12 + $0xb8] sm:$0xf0]  ;;  %v5968_v53 = vld [vmem:[%s7151_s12 + $0xd4] sm:$0xf] }
 0x6bc   : > { %v6170_v33 = vld [vmem:[%s7151_s12 + $0xd8] sm:$0xf0] }
 0x6bd   : > { %v5108_v3 = vpack.c.bf16 %v5076_v59, %v5076_v59  ;;  %3365 = vmax.xlane.f32.xlu2 %v3364_v61  ;;  %v10209_v61 = vld [vmem:[#allocation39_spill] sm:$0xff]  ;;  %v5969_v4 = vor.u32 %v6170_v33, %v5968_v53 }
 0x6be   : > { %v8782_v51 = vpop.f32.mrf.mxu3  ;;  %v2461_v59 = vmul.f32 0.0, %v10209_v61  ;;  %v8826_v61 = vld [vmem:[#allocation2 + $0x128] sm:$0xff] }
 0x6bf   : > { %5140 = vst [vmem:[%s8439_s30 + $0xc8] sm:$0xf] %v5108_v3  ;;  %v5961_v3 = vor.u32 %v6168_v14, %v5960_v22 }
 0x6c0   : > { %v8780_v25 = vpop.f32.mrf.mxu2  ;;  %10208 = vst [vmem:[#allocation31_spill] sm:$0xff] %v8782_v51  ;;  %v2799_v12 = vadd.f32 %v8570_v13, %v2461_v59  ;;  %v8801_v13 = vld [vmem:[#allocation2 + $0x108] sm:$0xff] }
 0x6c1   : > { %10207 = vst [vmem:[#allocation63_spill] sm:$0xff] %v8780_v25  ;;  %v3412_v55 = vmax.f32 %v8780_v25, %v8782_v51 }
 0x6c2   : > { %v5034_v17 = vpop.permute.xlu1 %5033 }
 0x6c3   : > { %v5079_v20 = vmul.f32 %v5034_v17, %v2797_v62  ;;  %3413 = vmax.xlane.f32.xlu1 %v3412_v55  ;;  %3216 = vmatmul.bf16.gmra.mxu2 %v5961_v3  ;;  %v3334_v55 = vld [vmem:[#allocation2 + $0x110] sm:$0xff] }
 0x6c4   : > { %3305 = vmatmul.bf16.gmra.mxu3 %v5961_v3 }
 0x6c5   : > { %v5111_v16 = vpack.c.bf16 %v5079_v20, %v5079_v20  ;;  %3374 = vmax.xlane.f32.xlu2 %v3373_v45  ;;  %v2762_v45 = vadd.f32 %v8563_v42, %v8561_v6  ;;  %v10210_v20 = vld [vmem:[#allocation40_spill] sm:$0xff] }
 0x6c6   : > { %v2460_v43 = vmul.f32 0.0, %v10210_v20  ;;  %v8810_v6 = vld [vmem:[#allocation2 + $0x120] sm:$0xff] }
 0x6c7   : > { %5143 = vst [vmem:[%s8439_s30 + $0xe0] sm:$0xf] %v5111_v16 }
 0x6c8   : > { %v2798_v16 = vadd.f32 %v2762_v45, %v2460_v43  ;;  %v6169_v45 = vld [vmem:[%s7151_s12 + $0xc8] sm:$0xf0] }
 0x6ca   : > { %v5049_v9 = vpop.permute.xlu1 %5048 }
 0x6cb   : > { %v5082_v27 = vmul.f32 %v5049_v9, %v2800_v63  ;;  %v8889_v63 = vld [vmem:[#allocation2 + $0x130] sm:$0xff] }
 0x6cd   : > { %v5114_v2 = vpack.c.bf16 %v5082_v27, %v5082_v27  ;;  %3383 = vmax.xlane.f32.xlu2 %v3382_v38  ;;  %v8818_v38 = vld [vmem:[#allocation2 + $0x138] sm:$0xff] }
 0x6cf   : > { %5146 = vst [vmem:[%s8439_s30 + $0xf8] sm:$0xf] %v5114_v2 }
 0x6d5   : > { %3392 = vmax.xlane.f32.xlu2 %v3391_v24 }
 0x6dd   : > { %3401 = vmax.xlane.f32.xlu2 %v3400_v40 }
 0x6e0   : > { %v5044_v57 = vpop.permute.xlu0 %5043 }
 0x6e1   : > { %v5081_v62 = vmul.f32 %v5044_v57, %v2799_v12  ;;  %v8836_v57 = vld [vmem:[#allocation2 + $0x140] sm:$0xff] }
 0x6e3   : > { %v5113_v17 = vpack.c.bf16 %v5081_v62, %v5081_v62 }
 0x6e5   : > { %5145 = vst [vmem:[%s8439_s30 + $0xf0] sm:$0xf] %v5113_v17  ;;  %3410 = vmax.xlane.f32.xlu2 %v3409_v7  ;;  %v5964_v17 = vld [vmem:[%s7151_s12 + $0xc4] sm:$0xf] }
 0x6e6   : > { %v5965_v43 = vor.u32 %v6169_v45, %v5964_v17 }
 0x6e8   : > { %3221 = vmatmul.bf16.gmra.mxu2 %v5965_v43  ;;  %3310 = vmatmul.bf16.gmra.mxu3 %v5965_v43  ;;  %v8875_v43 = vld [vmem:[#allocation2 + $0x118] sm:$0xff] }
 0x6ee   : > { %v5039_v26 = vpop.permute.xlu2 %5038 }
 0x6ef   : > { %v5080_v58 = vmul.f32 %v5039_v26, %v2798_v16  ;;  %v8845_v16 = vld [vmem:[#allocation2 + $0x150] sm:$0xff]  ;;  %v8847_v26 = vld [vmem:[#allocation2 + $0x158] sm:$0xff] }
 0x6f1   : > { %v5112_v1 = vpack.c.bf16 %v5080_v58, %v5080_v58 }
 0x6f3   : > { %5144 = vst [vmem:[%s8439_s30 + $0xe8] sm:$0xf] %v5112_v1 }
 0x6f5   : > { %v3369_v29 = vpop.xlane.xlu1 %3368 }
 0x6f6   : > { %v8804_v39 = vmax.f32 %v8801_v13, %v3369_v29 }
 0x6f8   : > { %4761 = vst.msk [vmem:[#allocation2 + $0x108] sm:$0xff] %vm747_vm0, %v8804_v39  ;;  %3226 = vmatmul.bf16.gmra.mxu2 %v5969_v4  ;;  %3315 = vmatmul.bf16.gmra.mxu3 %v5969_v4  ;;  %v10222_v33 = vsub.f32 %v8801_v13, %v8804_v39  ;;  %v6068_v13 = vld [vmem:[%s7645_s26 + $0x64] sm:$0xf] }
 0x6fa   : > { %v3526_v53 = vmul.f32 1.442695, %v10222_v33  ;;  %v6100_v33 = vld [vmem:[%s7645_s26 + $0xe4] sm:$0xf] }
 0x6fd   : > { %3595 = vperm.xlu2 %6265, %v8804_v39   ;;  %v3378_v42 = vpop.xlane.xlu1 %3377  ;;  %v6195_v39 = vld [vmem:[%s7645_s26 + $0x68] sm:$0xf0] }
 0x6fe   : > { %v8814_v9 = vmax.f32 %v8810_v6, %v3378_v42  ;;  %v8859_v42 = vpop.f32.mrf.mxu2  ;;  %v6069_v46 = vor.u32 %v6195_v39, %v6068_v13  ;;  %v6092_v13 = vld [vmem:[%s7645_s26 + $0xc4] sm:$0xf] }
 0x6ff   : > { %10212 = vst [vmem:[#allocation61_spill] sm:$0xff] %v8859_v42 }
 0x700   : > { %4764 = vst.msk [vmem:[#allocation2 + $0x120] sm:$0xff] %vm747_vm0, %v8814_v9 }
 0x705   : > { %v3387_v27 = vpop.xlane.xlu1 %3386 }
 0x706   : > { %v8821_v2 = vmax.f32 %v8818_v38, %v3387_v27  ;;  %v8861_v27 = vpop.f32.mrf.mxu3  ;;  %v8871_v17 = vpop.f32.mrf.mxu2 }
 0x707   : > { %10213 = vst [vmem:[#allocation62_spill] sm:$0xff] %v8861_v27  ;;  %v3415_v35 = vmax.f32 %v8859_v42, %v8861_v27  ;;  %v6171_v27 = vld [vmem:[%s7151_s12 + $0xe8] sm:$0xf0]  ;;  %v6072_v42 = vld [vmem:[%s7645_s26 + $0x74] sm:$0xf] }
 0x708   : > { %4767 = vst.msk [vmem:[#allocation2 + $0x138] sm:$0xff] %vm747_vm0, %v8821_v2 }
 0x709   : > { %10214 = vst [vmem:[#allocation71_spill] sm:$0xff] %v8871_v17 }
 0x70b   : > { %v3372_v24 = vpop.xlane.xlu0 %3371 }
 0x70c   : > { %v3462_v40 = vmax.f32 %v3334_v55, %v3372_v24  ;;  %v8863_v24 = vld [vmem:[#allocation2 + $0x168] sm:$0xff] }
 0x70d   : > { %v3396_v20 = vpop.xlane.xlu1 %3395 }
 0x70e   : > { %v3494_v22 = vsub.f32 %v3334_v55, %v3462_v40  ;;  %4762 = vst.msk [vmem:[#allocation2 + $0x110] sm:$0xff] %vm747_vm0, %v3462_v40  ;;  %3600 = vperm.xlu1 %6267, %v3462_v40   ;;  %v8850_v58 = vmax.f32 %v8845_v16, %v3396_v20  ;;  %v3332_v55 = vld [vmem:[#allocation2 + $0x100] sm:$0xff]  ;;  %v8873_v45 = vpop.f32.mrf.mxu3 }
 0x70f   : > { %10215 = vst [vmem:[#allocation8_spill] sm:$0xff] %v8873_v45 }
 0x710   : > { %v3528_v14 = vmul.f32 1.442695, %v3494_v22  ;;  %4770 = vst.msk [vmem:[#allocation2 + $0x150] sm:$0xff] %vm747_vm0, %v8850_v58 }
 0x712   : > { %6524 = vpow2.f32 %v3528_v14 }
 0x713   : > { %v3381_v59 = vpop.xlane.xlu0 %3380 }
 0x714   : > { %v8829_v3 = vmax.f32 %v8826_v61, %v3381_v59 }
 0x716   : > { %4765 = vst.msk [vmem:[#allocation2 + $0x128] sm:$0xff] %vm747_vm0, %v8829_v3 }
 0x718   : > { %v8833_v12 = vpop.eup %6524 }
 0x719   : > { %10211 = vst [vmem:[#allocation48_spill] sm:$0xff] %v8833_v12  ;;  %4210 = vperm.xlu1 %6267, %v8833_v12  }
 0x71b   : > { %v3390_v62 = vpop.xlane.xlu0 %3389 }
 0x71c   : > { %v8839_v7 = vmax.f32 %v8836_v57, %v3390_v62 }
 0x71e   : > { %4768 = vst.msk [vmem:[#allocation2 + $0x140] sm:$0xff] %vm747_vm0, %v8839_v7  ;;  %v3405_v40 = vpop.xlane.xlu1 %3404 }
 0x71f   : > { %v8866_v14 = vmax.f32 %v8863_v24, %v3405_v40 }
 0x721   : > { %4773 = vst.msk [vmem:[#allocation2 + $0x168] sm:$0xff] %vm747_vm0, %v8866_v14 }
 0x723   : > { %v3399_v1 = vpop.xlane.xlu0 %3398 }
 0x724   : > { %v8855_v29 = vmax.f32 %v8847_v26, %v3399_v1 }
 0x726   : > { %4771 = vst.msk [vmem:[#allocation2 + $0x158] sm:$0xff] %vm747_vm0, %v8855_v29 }
 0x730   : > { %v3366_v22 = vpop.xlane.xlu2 %3365 }
 0x731   : > { %v3460_v59 = vmax.f32 %v3332_v55, %v3366_v22 }
 0x733   : > { %v3492_v62 = vsub.f32 %v3332_v55, %v3460_v59  ;;  %4760 = vst.msk [vmem:[#allocation2 + $0x100] sm:$0xff] %vm747_vm0, %v3460_v59  ;;  %3590 = vperm.xlu0 %6266, %v3460_v59   ;;  %v8884_v55 = vpop.f32.mrf.mxu2  ;;  %v8886_v59 = vpop.f32.mrf.mxu3 }
 0x734   : > { %10217 = vst [vmem:[#allocation69_spill] sm:$0xff] %v8884_v55  ;;  %v3421_v51 = vmax.f32 %v8884_v55, %v8886_v59 }
 0x735   : > { %v3524_v20 = vmul.f32 1.442695, %v3492_v62  ;;  %10218 = vst [vmem:[#allocation64_spill] sm:$0xff] %v8886_v59  ;;  %v8891_v62 = vld [vmem:[#allocation2 + $0x170] sm:$0xff] }
 0x736   : > { %10219 = vst [vmem:[#allocation65_spill] sm:$0xff] %v8891_v62  ;;  %v3414_v59 = vpop.xlane.xlu1 %3413 }
 0x737   : > { %6526 = vpow2.f32 %v3524_v20  ;;  %v3408_v20 = vpop.xlane.xlu0 %3407 }
 0x738   : > { %v3375_v1 = vpop.xlane.xlu2 %3374  ;;  %6528 = vpow2.f32 %v3526_v53 }
 0x739   : > { %v8878_v40 = vmax.f32 %v8875_v43, %v3375_v1  ;;  %v8894_v1 = vmax.f32 %v8891_v62, %v3408_v20  ;;  %v8909_v20 = vld [vmem:[#allocation2 + $0x180] sm:$0xff]  ;;  %v6104_v62 = vld [vmem:[%s7645_s26 + $0xf4] sm:$0xf] }
 0x73a   : > { %10220 = vst [vmem:[#allocation37_spill] sm:$0xff] %v8909_v20 }
 0x73b   : > { %4763 = vst.msk [vmem:[#allocation2 + $0x118] sm:$0xff] %vm747_vm0, %v8878_v40 }
 0x73c   : > { %4774 = vst.msk [vmem:[#allocation2 + $0x170] sm:$0xff] %vm747_vm0, %v8894_v1 }
 0x73d   : > { %v8882_v22 = vpop.eup %6526 }
 0x73e   : > { %10216 = vst [vmem:[#allocation70_spill] sm:$0xff] %v8882_v22  ;;  %4200 = vperm.xlu2 %6265, %v8882_v22   ;;  %v8959_v53 = vpop.eup %6528 }
 0x740   : > { %v3384_v12 = vpop.xlane.xlu2 %3383 }
 0x741   : > { %v8899_v25 = vmax.f32 %v8889_v63, %v3384_v12  ;;  %v8912_v12 = vmax.f32 %v8909_v20, %v3414_v59  ;;  %v8928_v59 = vld [vmem:[#allocation2 + $0x178] sm:$0xff]  ;;  %v8948_v20 = vpop.f32.mrf.mxu2 }
 0x743   : > { %4766 = vst.msk [vmem:[#allocation2 + $0x130] sm:$0xff] %vm747_vm0, %v8899_v25  ;;  %3422 = vmax.xlane.f32.xlu1 %v3421_v51  ;;  %v8921_v51 = vld [vmem:[#allocation2 + $0x160] sm:$0xff] }
 0x744   : > { %10221 = vst [vmem:[#allocation11_spill] sm:$0xff] %v8912_v12 }
 0x745   : > { %4776 = vst.msk [vmem:[#allocation2 + $0x180] sm:$0xff] %vm747_vm0, %v8912_v12  ;;  %v6196_v12 = vld [vmem:[%s7645_s26 + $0x78] sm:$0xf0] }
 0x748   : > { %v3393_v55 = vpop.xlane.xlu2 %3392 }
 0x749   : > { %v8915_v44 = vmax.f32 %v8907_v50, %v3393_v55 }
 0x74b   : > { %4769 = vst.msk [vmem:[#allocation2 + $0x148] sm:$0xff] %vm747_vm0, %v8915_v44 }
 0x750   : > { %v3402_v22 = vpop.xlane.xlu2 %3401 }
 0x751   : > { %v8924_v34 = vmax.f32 %v8921_v51, %v3402_v22  ;;  %v3418_v22 = vmax.f32 %v8871_v17, %v8873_v45  ;;  %v6204_v45 = vld [vmem:[%s7645_s26 + $0xf8] sm:$0xf0]  ;;  %v6073_v17 = vor.u32 %v6196_v12, %v6072_v42  ;;  %v3495_v42 = vsub.f32 %v8875_v43, %v8878_v40 }
 0x752   : > { %v6105_v15 = vor.u32 %v6204_v45, %v6104_v62  ;;  %v8964_v45 = vpop.f32.mrf.mxu2  ;;  %v3496_v12 = vsub.f32 %v8810_v6, %v8814_v9  ;;  %v6194_v43 = vld [vmem:[%s7645_s26 + $0x58] sm:$0xf0]  ;;  %v6060_v6 = vld [vmem:[%s7645_s26 + $0x44] sm:$0xf] }
 0x753   : > { %4772 = vst.msk [vmem:[#allocation2 + $0x160] sm:$0xff] %vm747_vm0, %v8924_v34  ;;  %4518 = vmatpush.bf16.msrb.mxu0 %v6073_v17  ;;  %6205 = vmatpush.bf16.msra.mxu2 %v6073_v17  ;;  %v6064_v17 = vld [vmem:[%s7645_s26 + $0x54] sm:$0xf] }
 0x754   : > { %4607 = vmatpush.bf16.msrb.mxu1 %v6105_v15  ;;  %6213 = vmatpush.bf16.msra.mxu3 %v6105_v15  ;;  %v6096_v15 = vld [vmem:[%s7645_s26 + $0xd4] sm:$0xf] }
 0x757   : > { %4519 = vmatpush.bf16.msrb.mxu0 %v6069_v46  ;;  %6206 = vmatpush.bf16.msra.mxu2 %v6069_v46  ;;  %v6065_v46 = vor.u32 %v6194_v43, %v6064_v17 }
 0x758   : > { %v3411_v55 = vpop.xlane.xlu2 %3410 }
 0x759   : > { %v8931_v41 = vmax.f32 %v8928_v59, %v3411_v55  ;;  %v5972_v55 = vld [vmem:[%s7151_s12 + $0xe4] sm:$0xf] }
 0x75a   : > { %v5973_v4 = vor.u32 %v6171_v27, %v5972_v55  ;;  %v3530_v27 = vmul.f32 1.442695, %v3495_v42  ;;  %v6056_v42 = vld [vmem:[%s7645_s26 + $0x34] sm:$0xf]  ;;  %v8984_v17 = vpop.f32.mrf.mxu2 }
 0x75b   : > { %4775 = vst.msk [vmem:[#allocation2 + $0x178] sm:$0xff] %vm747_vm0, %v8931_v41  ;;  %4520 = vmatpush.bf16.msrb.mxu0 %v6065_v46  ;;  %6207 = vmatpush.bf16.msra.mxu2 %v6065_v46  ;;  %v6200_v46 = vld [vmem:[%s7645_s26 + $0xb8] sm:$0xf0] }
 0x75c   : > { %3620 = vperm.xlu1 %6267, %v8899_v25   ;;  %3231 = vmatmul.bf16.gmra.mxu2 %v5973_v4  ;;  %6530 = vpow2.f32 %v3530_v27  ;;  %v6192_v27 = vld [vmem:[%s7645_s26 + $0x38] sm:$0xf0]  ;;  %10224 = vst [vmem:[#allocation60_spill] sm:$0xff] %v8984_v17 }
 0x75d   : > { %3416 = vmax.xlane.f32.xlu0 %v3415_v35  ;;  %v8950_v35 = vpop.f32.mrf.mxu3  ;;  %3320 = vmatmul.bf16.gmra.mxu3 %v5973_v4  ;;  %v3532_v4 = vmul.f32 1.442695, %v3496_v12 }
 0x75f   : > { %6532 = vpow2.f32 %v3532_v4 }
 0x762   : > { %v8979_v39 = vpop.eup %6530 }
 0x763   : > { %10223 = vst [vmem:[#allocation38_spill] sm:$0xff] %v8979_v39 }
 0x765   : > { %v8966_v62 = vpop.f32.mrf.mxu3  ;;  %v8993_v4 = vpop.eup %6532 }
 0x766   : > { %10226 = vst [vmem:[#allocation76_spill] sm:$0xff] %v8993_v4 }
 0x767   : > { %3419 = vmax.xlane.f32.xlu2 %v3418_v22  ;;  %v6203_v22 = vld [vmem:[%s7645_s26 + $0xe8] sm:$0xf0] }
 0x768   : > { %v6101_v48 = vor.u32 %v6203_v22, %v6100_v33  ;;  %v6201_v22 = vld [vmem:[%s7645_s26 + $0xc8] sm:$0xf0] }
 0x769   : > { %v6093_v43 = vor.u32 %v6201_v22, %v6092_v13  ;;  %v6084_v13 = vld [vmem:[%s7645_s26 + $0xa4] sm:$0xf]  ;;  %v6199_v22 = vld [vmem:[%s7645_s26 + $0xa8] sm:$0xf0] }
 0x76a   : > { %4608 = vmatpush.bf16.msrb.mxu1 %v6101_v48  ;;  %6214 = vmatpush.bf16.msra.mxu3 %v6101_v48  ;;  %v6202_v48 = vld [vmem:[%s7645_s26 + $0xd8] sm:$0xf0] }
 0x76b   : > { %v6097_v55 = vor.u32 %v6202_v48, %v6096_v15  ;;  %v6088_v15 = vld [vmem:[%s7645_s26 + $0xb4] sm:$0xf]  ;;  %v6057_v48 = vor.u32 %v6192_v27, %v6056_v42  ;;  %v6085_v27 = vor.u32 %v6199_v22, %v6084_v13 }
 0x76c   : > { %v6048_v42 = vld [vmem:[%s7645_s26 + $0x14] sm:$0xf] }
 0x76d   : > { %v8986_v12 = vpop.f32.mrf.mxu3 }
 0x76e   : > { %4609 = vmatpush.bf16.msrb.mxu1 %v6097_v55  ;;  %6215 = vmatpush.bf16.msra.mxu3 %v6097_v55  ;;  %10225 = vst [vmem:[#allocation75_spill] sm:$0xff] %v8986_v12  ;;  %v6089_v55 = vor.u32 %v6200_v46, %v6088_v15  ;;  %v6080_v15 = vld [vmem:[%s7645_s26 + $0x94] sm:$0xf]  ;;  %v6198_v46 = vld [vmem:[%s7645_s26 + $0x98] sm:$0xf0] }
 0x771   : > { %4205 = vperm.xlu0 %6266, %v8959_v53  }
 0x772   : > { %4610 = vmatpush.bf16.msrb.mxu1 %v6093_v43  ;;  %6216 = vmatpush.bf16.msra.mxu3 %v6093_v43  ;;  %v6190_v43 = vld [vmem:[%s7645_s26 + $0x18] sm:$0xf0] }
 0x776   : > { %4611 = vmatpush.bf16.msrb.mxu1 %v6089_v55  ;;  %6217 = vmatpush.bf16.msra.mxu3 %v6089_v55  ;;  %v6044_v55 = vld [vmem:[%s7645_s26 + $0x4] sm:$0xf] }
 0x779   : > { %3605 = vperm.xlu0 %6266, %v8878_v40   ;;  %v6193_v40 = vld [vmem:[%s7645_s26 + $0x48] sm:$0xf0] }
 0x77a   : > { %v6061_v33 = vor.u32 %v6193_v40, %v6060_v6  ;;  %v6052_v6 = vld [vmem:[%s7645_s26 + $0x24] sm:$0xf]  ;;  %v6191_v40 = vld [vmem:[%s7645_s26 + $0x28] sm:$0xf0]  ;;  %4612 = vmatpush.bf16.msrb.mxu1 %v6085_v27  ;;  %6218 = vmatpush.bf16.msra.mxu3 %v6085_v27 }
 0x77c   : > { %4521 = vmatpush.bf16.msrb.mxu0 %v6061_v33  ;;  %6208 = vmatpush.bf16.msra.mxu2 %v6061_v33  ;;  %v6053_v33 = vor.u32 %v6191_v40, %v6052_v6  ;;  %v10227_v40 = vsub.f32 %v8889_v63, %v8899_v25 }
 0x77e   : > { %v3536_v13 = vmul.f32 1.442695, %v10227_v40 }
 0x77f   : > { %3610 = vperm.xlu2 %6265, %v8814_v9   ;;  %v3430_v9 = vmax.f32 %v8984_v17, %v8986_v12  ;;  %v6189_v12 = vld [vmem:[%s7645_s26 + $0x8] sm:$0xf0]  ;;  %v6076_v17 = vld [vmem:[%s7645_s26 + $0x84] sm:$0xf] }
 0x780   : > { %4522 = vmatpush.bf16.msrb.mxu0 %v6057_v48  ;;  %6209 = vmatpush.bf16.msra.mxu2 %v6057_v48  ;;  %v6081_v48 = vor.u32 %v6198_v46, %v6080_v15  ;;  %6534 = vpow2.f32 %v3536_v13  ;;  %v9036_v13 = vld [vmem:[#allocation2 + $0x198] sm:$0xff] }
 0x781   : > { %4215 = vperm.xlu0 %6266, %v8979_v39   ;;  %v6197_v39 = vld [vmem:[%s7645_s26 + $0x88] sm:$0xf0] }
 0x782   : > { %4613 = vmatpush.bf16.msrb.mxu1 %v6081_v48  ;;  %v6077_v6 = vor.u32 %v6197_v39, %v6076_v17  ;;  %6219 = vmatpush.bf16.msra.mxu3 %v6081_v48  ;;  %v3424_v48 = vmax.f32 %v8948_v20, %v8950_v35 }
 0x784   : > { %4523 = vmatpush.bf16.msrb.mxu0 %v6053_v33  ;;  %6210 = vmatpush.bf16.msra.mxu2 %v6053_v33  ;;  %v3596_v33 = vpop.permute.xlu2 %3595 }
 0x786   : > { %3431 = vmax.xlane.f32.xlu1 %v3430_v9  ;;  %v6049_v9 = vor.u32 %v6190_v43, %v6048_v42  ;;  %4614 = vmatpush.bf16.msrb.mxu1 %v6077_v6  ;;  %v9012_v22 = vpop.eup %6534  ;;  %v3751_v42 = vsub.f32 %v8636_v28, %v3596_v33  ;;  %v9017_v43 = vpop.permute.xlu1 %3600  ;;  %v3427_v28 = vmax.f32 %v8964_v45, %v8966_v62 }
 0x787   : > { %4220 = vperm.xlu2 %6265, %v8993_v4   ;;  %v6045_v4 = vor.u32 %v6189_v12, %v6044_v55  ;;  %6220 = vmatpush.bf16.msra.mxu3 %v6077_v6  ;;  %v3750_v12 = vsub.f32 %v8634_v10, %v3596_v33 }
 0x788   : > { %4524 = vmatpush.bf16.msrb.mxu0 %v6049_v9  ;;  %6211 = vmatpush.bf16.msra.mxu2 %v6049_v9  ;;  %v3818_v17 = vmul.f32 1.442695, %v3751_v42  ;;  %v5976_v42 = vld [vmem:[%s7151_s12 + $0xf4] sm:$0xf] }
 0x789   : > { %3615 = vperm.xlu0 %6266, %v8829_v3   ;;  %v3816_v39 = vmul.f32 1.442695, %v3750_v12 }
 0x78b   : > { %6536 = vpow2.f32 %v3816_v39  ;;  %v6172_v39 = vld [vmem:[%s7151_s12 + $0xf8] sm:$0xf0] }
 0x78c   : > { %4525 = vmatpush.bf16.msrb.mxu0 %v6045_v4  ;;  %6212 = vmatpush.bf16.msra.mxu2 %v6045_v4  ;;  %6538 = vpow2.f32 %v3818_v17  ;;  %v3497_v17 = vsub.f32 %v8826_v61, %v8829_v3 }
 0x78e   : > { %v9026_v46 = vpop.permute.xlu1 %4210 }
 0x791   : > { %v9022_v10 = vpop.eup %6536 }
 0x79f   : > { %4230 = vperm.xlu1 %6267, %v9012_v22  }
 0x7a5   : > { %v3591_v27 = vpop.permute.xlu0 %3590 }
 0x7a6   : > { %v3748_v25 = vsub.f32 %v8627_v47, %v3591_v27  ;;  %v3749_v63 = vsub.f32 %v8629_v5, %v3591_v27  ;;  %v9028_v47 = vpop.eup %6538  ;;  %v5977_v27 = vor.u32 %v6172_v39, %v5976_v42  ;;  %v9080_v39 = vld [vmem:[#allocation2 + $0x190] sm:$0xff] }
 0x7a7   : > { %3635 = vperm.xlu1 %6267, %v8915_v44  }
 0x7a8   : > { %v3812_v4 = vmul.f32 1.442695, %v3748_v25  ;;  %v3814_v15 = vmul.f32 1.442695, %v3749_v63  ;;  %v9047_v25 = vpop.f32.mrf.mxu2  ;;  %v9049_v63 = vpop.f32.mrf.mxu3  ;;  %3236 = vmatmul.bf16.gmra.mxu2 %v5977_v27  ;;  %3325 = vmatmul.bf16.gmra.mxu3 %v5977_v27  ;;  %v3501_v27 = vsub.f32 %v8907_v50, %v8915_v44  ;;  %v3752_v44 = vsub.f32 %v8644_v0, %v9017_v43 }
 0x7a9   : > { %10228 = vst [vmem:[#allocation77_spill] sm:$0xff] %v9047_v25  ;;  %v3753_v50 = vsub.f32 %v8646_v21, %v9017_v43 }
 0x7aa   : > { %6540 = vpow2.f32 %v3812_v4  ;;  %10229 = vst [vmem:[#allocation50_spill] sm:$0xff] %v9049_v63  ;;  %v3534_v4 = vmul.f32 1.442695, %v3497_v17 }
 0x7ab   : > { %6542 = vpow2.f32 %v3814_v15  ;;  %v3499_v15 = vsub.f32 %v8818_v38, %v8821_v2 }
 0x7ac   : > { %6544 = vpow2.f32 %v3534_v4 }
 0x7ad   : > { %v3538_v61 = vmul.f32 1.442695, %v3499_v15  ;;  %v3542_v15 = vmul.f32 1.442695, %v3501_v27  ;;  %v3820_v27 = vmul.f32 1.442695, %v3752_v44 }
 0x7af   : > { %6546 = vpow2.f32 %v3538_v61 }
 0x7b0   : > { %v6541_v5 = vpop.eup %6540  ;;  %3428 = vmax.xlane.f32.xlu2 %v3427_v28  ;;  %v9053_v28 = vpop.f32.mrf.mxu2  ;;  %6548 = vpow2.f32 %v3542_v15 }
 0x7b1   : > { %v6543_v9 = vpop.eup %6542  ;;  %v4390_v55 = vpack.c.bf16 %v9022_v10, %v6541_v5  ;;  %10230 = vst [vmem:[#allocation56_spill] sm:$0xff] %v9053_v28 }
 0x7b2   : > { %v4391_v6 = vpack.c.bf16 %v9028_v47, %v6543_v9  ;;  %v9034_v40 = vadd.f32 %v6543_v9, %v6541_v5  ;;  %v9055_v5 = vpop.f32.mrf.mxu3  ;;  %v9057_v3 = vpop.eup %6544 }
 0x7b3   : > { %4526 = vmatmul.bf16.vlgmr.msrb.gmra.mxu0 %v4390_v55  ;;  %3425 = vmax.xlane.f32.xlu0 %v3424_v48  ;;  %10231 = vst [vmem:[#allocation59_spill] sm:$0xff] %v9055_v5  ;;  %v9065_v55 = vld [vmem:[#allocation2 + $0x188] sm:$0xff] }
 0x7b4   : > { %4615 = vmatmul.bf16.vlgmr.msrb.gmra.mxu1 %v4391_v6 }
 0x7b5   : > { %v9067_v6 = vpop.eup %6546 }
 0x7b6   : > { %v3423_v33 = vpop.xlane.xlu1 %3422 }
 0x7b7   : > { %v9039_v12 = vmax.f32 %v9036_v13, %v3423_v33 }
 0x7b8   : > { %v9061_v9 = vpop.f32.mrf.mxu2 }
 0x7b9   : > { %4779 = vst.msk [vmem:[#allocation2 + $0x198] sm:$0xff] %vm747_vm0, %v9039_v12 }
 0x7ba   : > { %10232 = vst [vmem:[#allocation34_spill] sm:$0xff] %v9061_v9  ;;  %v9063_v48 = vpop.f32.mrf.mxu3 }
 0x7bb   : > { %10233 = vst [vmem:[#allocation72_spill] sm:$0xff] %v9063_v48  ;;  %v3439_v38 = vmax.f32 %v9061_v9, %v9063_v48 }
 0x7c7   : > { %4225 = vperm.xlu0 %6266, %v9057_v3  }
 0x7c8   : > { %3625 = vperm.xlu2 %6265, %v8821_v2   ;;  %v9076_v2 = vpop.permute.xlu2 %4200 }
 0x7c9   : > { %10234 = vst [vmem:[#allocation73_spill] sm:$0xff] %v9076_v2 }
 0x7ce   : > { %v9104_v43 = vpop.permute.xlu1 %3620 }
 0x7cf   : > { %3630 = vperm.xlu0 %6266, %v8839_v7  }
 0x7d0   : > { %v3417_v33 = vpop.xlane.xlu0 %3416  ;;  %4235 = vperm.xlu2 %6265, %v9067_v6  }
 0x7d1   : > { %v9074_v42 = vmax.f32 %v9065_v55, %v3417_v33  ;;  %3440 = vmax.xlane.f32.xlu1 %v3439_v38 }
 0x7d3   : > { %4777 = vst.msk [vmem:[#allocation2 + $0x188] sm:$0xff] %vm747_vm0, %v9074_v42 }
 0x7da   : > { %v3420_v17 = vpop.xlane.xlu2 %3419 }
 0x7db   : > { %v9085_v4 = vmax.f32 %v9080_v39, %v3420_v17  ;;  %v9097_v17 = vpop.eup %6548 }
 0x7dc   : > { %10236 = vst [vmem:[#allocation12_spill] sm:$0xff] %v9097_v17 }
 0x7dd   : > { %4778 = vst.msk [vmem:[#allocation2 + $0x190] sm:$0xff] %vm747_vm0, %v9085_v4 }
 0x7e2   : > { %v3611_v61 = vpop.permute.xlu2 %3610 }
 0x7e3   : > { %v3756_v38 = vsub.f32 %v8660_v32, %v3611_v61  ;;  %v3757_v33 = vsub.f32 %v8662_v52, %v3611_v61  ;;  %v9091_v2 = vpop.permute.xlu0 %4205  ;;  %v3822_v32 = vmul.f32 1.442695, %v3753_v50  ;;  %v3433_v50 = vmax.f32 %v9047_v25, %v9049_v63 }
 0x7e4   : > { %10235 = vst [vmem:[#allocation55_spill] sm:$0xff] %v9091_v2 }
 0x7e5   : > { %v3828_v48 = vmul.f32 1.442695, %v3756_v38  ;;  %v3830_v9 = vmul.f32 1.442695, %v3757_v33 }
 0x7e7   : > { %6550 = vpow2.f32 %v3828_v48 }
 0x7e8   : > { %6552 = vpow2.f32 %v3830_v9 }
 0x7e9   : > { %6554 = vpow2.f32 %v3820_v27  ;;  %v3436_v27 = vmax.f32 %v9053_v28, %v9055_v5 }
 0x7ea   : > { %4245 = vperm.xlu1 %6267, %v9097_v17   ;;  %6556 = vpow2.f32 %v3822_v32 }
 0x7eb   : > { %v3606_v15 = vpop.permute.xlu0 %3605 }
 0x7ec   : > { %v3754_v52 = vsub.f32 %v8652_v18, %v3606_v15  ;;  %v3755_v61 = vsub.f32 %v8654_v30, %v3606_v15  ;;  %v9118_v15 = vld [vmem:[#allocation2 + $0x1b0] sm:$0xff] }
 0x7ed   : > { %v6551_v38 = vpop.eup %6550 }
 0x7ee   : > { %v6553_v33 = vpop.eup %6552  ;;  %v3824_v0 = vmul.f32 1.442695, %v3754_v52  ;;  %v3826_v2 = vmul.f32 1.442695, %v3755_v61 }
 0x7ef   : > { %v9102_v21 = vadd.f32 %v6553_v33, %v6551_v38  ;;  %v9109_v48 = vpop.eup %6554 }
 0x7f0   : > { %6558 = vpow2.f32 %v3824_v0  ;;  %v9111_v18 = vpop.eup %6556 }
 0x7f1   : > { %6560 = vpow2.f32 %v3826_v2 }
 0x7f2   : > { %3650 = vperm.xlu1 %6267, %v8924_v34  }
 0x7f3   : > { %v9107_v9 = vpop.permute.xlu0 %4215 }
 0x7f4   : > { %10237 = vst [vmem:[#allocation68_spill] sm:$0xff] %v9107_v9 }
 0x7f6   : > { %v6559_v30 = vpop.eup %6558 }
 0x7f7   : > { %v6561_v44 = vpop.eup %6560  ;;  %v4392_v32 = vpack.c.bf16 %v6559_v30, %v9109_v48 }
 0x7f8   : > { %v4393_v2 = vpack.c.bf16 %v6561_v44, %v9111_v18  ;;  %v9121_v52 = vadd.f32 %v6561_v44, %v6559_v30  ;;  %v3500_v30 = vsub.f32 %v8836_v57, %v8839_v7 }
 0x7f9   : > { %3434 = vmax.xlane.f32.xlu0 %v3433_v50  ;;  %3437 = vmax.xlane.f32.xlu2 %v3436_v27  ;;  %v3432_v61 = vpop.xlane.xlu1 %3431 }
 0x7fa   : > { %4531 = vmatmul.bf16.gmra.mxu0 %v4392_v32  ;;  %4620 = vmatmul.bf16.gmra.mxu1 %v4393_v2  ;;  %v9124_v0 = vmax.f32 %v9118_v15, %v3432_v61  ;;  %v3540_v27 = vmul.f32 1.442695, %v3500_v30  ;;  %v9132_v32 = vpop.f32.mrf.mxu2  ;;  %v9134_v2 = vpop.f32.mrf.mxu3 }
 0x7fb   : > { %v3616_v9 = vpop.permute.xlu0 %3615  ;;  %10238 = vst [vmem:[#allocation41_spill] sm:$0xff] %v9132_v32  ;;  %v9162_v30 = vpop.permute.xlu2 %4220 }
 0x7fc   : > { %4782 = vst.msk [vmem:[#allocation2 + $0x1b0] sm:$0xff] %vm747_vm0, %v9124_v0  ;;  %v3758_v17 = vsub.f32 %v8669_v37, %v3616_v9  ;;  %v3759_v63 = vsub.f32 %v8671_v36, %v3616_v9  ;;  %v3502_v36 = vsub.f32 %v8845_v16, %v8850_v58 }
 0x7fd   : > { %10239 = vst [vmem:[#allocation66_spill] sm:$0xff] %v9134_v2 }
 0x7fe   : > { %v3832_v44 = vmul.f32 1.442695, %v3758_v17  ;;  %v3834_v50 = vmul.f32 1.442695, %v3759_v63  ;;  %v3544_v17 = vmul.f32 1.442695, %v3502_v36 }
 0x800   : > { %6562 = vpow2.f32 %v3832_v44 }
 0x801   : > { %6564 = vpow2.f32 %v3834_v50 }
 0x802   : > { %6566 = vpow2.f32 %v3540_v27  ;;  %v9142_v7 = vpop.f32.mrf.mxu2  ;;  %v9144_v63 = vpop.f32.mrf.mxu3  ;;  %v9164_v27 = vld [vmem:[#allocation2 + $0x1a8] sm:$0xff] }
 0x803   : > { %10241 = vst [vmem:[#allocation18_spill] sm:$0xff] %v9142_v7  ;;  %6568 = vpow2.f32 %v3544_v17 }
 0x804   : > { %10242 = vst [vmem:[#allocation74_spill] sm:$0xff] %v9144_v63 }
 0x806   : > { %v6563_v61 = vpop.eup %6562 }
 0x807   : > { %v6565_v25 = vpop.eup %6564  ;;  %v4394_v5 = vpack.c.bf16 %v6563_v61, %v6551_v38 }
 0x808   : > { %v4395_v28 = vpack.c.bf16 %v6565_v25, %v6553_v33  ;;  %v9136_v37 = vadd.f32 %v6565_v25, %v6563_v61  ;;  %v9140_v57 = vpop.eup %6566 }
 0x809   : > { %10240 = vst [vmem:[#allocation10_spill] sm:$0xff] %v9140_v57 }
 0x80a   : > { %4536 = vmatmul.bf16.gmra.mxu0 %v4394_v5  ;;  %4625 = vmatmul.bf16.gmra.mxu1 %v4395_v28  ;;  %v9151_v25 = vpop.f32.mrf.mxu2  ;;  %v9153_v16 = vpop.f32.mrf.mxu3 }
 0x80b   : > { %10244 = vst [vmem:[#allocation17_spill] sm:$0xff] %v9151_v25  ;;  %v9155_v28 = vpop.eup %6568  ;;  %v3448_v5 = vmax.f32 %v9151_v25, %v9153_v16 }
 0x80c   : > { %10245 = vst [vmem:[#allocation51_spill] sm:$0xff] %v9153_v16 }
 0x80d   : > { %4240 = vperm.xlu0 %6266, %v9140_v57   ;;  %10246 = vst [vmem:[#allocation19_spill] sm:$0xff] %v9155_v28 }
 0x811   : > { %3640 = vperm.xlu2 %6265, %v8850_v58   ;;  %v9148_v38 = vpop.permute.xlu1 %4230 }
 0x812   : > { %10243 = vst [vmem:[#allocation16_spill] sm:$0xff] %v9148_v38  ;;  %v9171_v38 = vld [vmem:[#allocation2 + $0x1a0] sm:$0xff] }
 0x815   : > { %3645 = vperm.xlu0 %6266, %v8855_v29  }
 0x819   : > { %4250 = vperm.xlu2 %6265, %v9155_v28   ;;  %v3636_v33 = vpop.permute.xlu1 %3635 }
 0x81a   : > { %v3766_v9 = vsub.f32 %v8703_v54, %v3636_v33  ;;  %v3767_v58 = vsub.f32 %v8705_v23, %v3636_v33  ;;  %v3504_v23 = vsub.f32 %v8921_v51, %v8924_v34 }
 0x81c   : > { %v3848_v44 = vmul.f32 1.442695, %v3766_v9  ;;  %v3850_v50 = vmul.f32 1.442695, %v3767_v58  ;;  %3449 = vmax.xlane.f32.xlu1 %v3448_v5  ;;  %v3760_v5 = vsub.f32 %v8675_v8, %v9104_v43  ;;  %v3761_v58 = vsub.f32 %v8679_v19, %v9104_v43 }
 0x81e   : > { %6570 = vpow2.f32 %v3848_v44  ;;  %v3836_v34 = vmul.f32 1.442695, %v3760_v5  ;;  %v3838_v8 = vmul.f32 1.442695, %v3761_v58 }
 0x81f   : > { %6572 = vpow2.f32 %v3850_v50  ;;  %v3548_v50 = vmul.f32 1.442695, %v3504_v23 }
 0x821   : > { %6574 = vpow2.f32 %v3548_v50 }
 0x822   : > { %6576 = vpow2.f32 %v3836_v34  ;;  %v3442_v34 = vmax.f32 %v9132_v32, %v9134_v2 }
 0x823   : > { %v3429_v61 = vpop.xlane.xlu2 %3428  ;;  %6578 = vpow2.f32 %v3838_v8  ;;  %v3445_v8 = vmax.f32 %v9142_v7, %v9144_v63 }
 0x824   : > { %v9166_v36 = vpop.eup %6570  ;;  %v9169_v17 = vmax.f32 %v9164_v27, %v3429_v61 }
 0x825   : > { %v9173_v54 = vpop.eup %6572 }
 0x826   : > { %4781 = vst.msk [vmem:[#allocation2 + $0x1a8] sm:$0xff] %vm747_vm0, %v9169_v17  ;;  %v3426_v33 = vpop.xlane.xlu0 %3425  ;;  %v9183_v9 = vadd.f32 %v9173_v54, %v9166_v36 }
 0x827   : > { %v9188_v44 = vmax.f32 %v9171_v38, %v3426_v33  ;;  %v9196_v33 = vpop.eup %6574 }
 0x828   : > { %10248 = vst [vmem:[#allocation78_spill] sm:$0xff] %v9196_v33  ;;  %v9198_v5 = vpop.eup %6576 }
 0x829   : > { %4780 = vst.msk [vmem:[#allocation2 + $0x1a0] sm:$0xff] %vm747_vm0, %v9188_v44  ;;  %v9200_v58 = vpop.eup %6578 }
 0x82b   : > { %v3626_v51 = vpop.permute.xlu2 %3625 }
 0x82c   : > { %v3762_v61 = vsub.f32 %v8686_v31, %v3626_v51  ;;  %v3763_v16 = vsub.f32 %v8688_v11, %v3626_v51 }
 0x82e   : > { %v3840_v25 = vmul.f32 1.442695, %v3762_v61  ;;  %v3842_v28 = vmul.f32 1.442695, %v3763_v16 }
 0x830   : > { %6580 = vpow2.f32 %v3840_v25  ;;  %v4527_v19 = vpop.f32.mrf.mxu0 }
 0x831   : > { %6582 = vpow2.f32 %v3842_v28  ;;  %v4616_v43 = vpop.f32.mrf.mxu1 }
 0x832   : > { %v9194_v23 = vadd.f32 %v4616_v43, %v4527_v19  ;;  %v9216_v43 = vld [vmem:[#allocation2 + $0x1c8] sm:$0xff] }
 0x834   : > { %10247 = vst [vmem:[#allocation20_spill] sm:$0xff] %v9194_v23 }
 0x835   : > { %4260 = vperm.xlu1 %6267, %v9196_v33  }
 0x836   : > { %v6581_v31 = vpop.eup %6580 }
 0x837   : > { %v6583_v11 = vpop.eup %6582  ;;  %v4396_v50 = vpack.c.bf16 %v6581_v31, %v9198_v5 }
 0x838   : > { %v4397_v16 = vpack.c.bf16 %v6583_v11, %v9200_v58  ;;  %v9205_v25 = vadd.f32 %v6583_v11, %v6581_v31  ;;  %v3503_v31 = vsub.f32 %v8847_v26, %v8855_v29  ;;  %v9229_v29 = vpop.f32.mrf.mxu2  ;;  %v9265_v23 = vpop.f32.mrf.mxu0 }
 0x839   : > { %v9207_v28 = vpop.permute.xlu0 %4225  ;;  %4541 = vmatmul.bf16.gmra.mxu0 %v4396_v50  ;;  %10250 = vst [vmem:[#allocation13_spill] sm:$0xff] %v9229_v29  ;;  %v9267_v33 = vpop.f32.mrf.mxu1 }
 0x83a   : > { %10249 = vst [vmem:[#allocation67_spill] sm:$0xff] %v9207_v28  ;;  %4630 = vmatmul.bf16.gmra.mxu1 %v4397_v16 }
 0x83b   : > { %10258 = vst [vmem:[#allocation14_spill] sm:$0xff] %v9265_v23 }
 0x83c   : > { %10259 = vst [vmem:[#allocation21_spill] sm:$0xff] %v9267_v33  ;;  %v4360_v33 = vmul.f32 0.0, %v9026_v46 }
 0x83d   : > { %3665 = vperm.xlu1 %6267, %v8931_v41  }
 0x83f   : > { %3443 = vmax.xlane.f32.xlu0 %v3442_v34 }
 0x841   : > { %v3631_v51 = vpop.permute.xlu0 %3630 }
 0x842   : > { %v3764_v61 = vsub.f32 %v8692_v49, %v3631_v51  ;;  %v3765_v19 = vsub.f32 %v8694_v56, %v3631_v51  ;;  %3446 = vmax.xlane.f32.xlu2 %v3445_v8  ;;  %v3546_v49 = vmul.f32 1.442695, %v3503_v31  ;;  %v3505_v31 = vsub.f32 %v8863_v24, %v8866_v14  ;;  %v9251_v24 = vpop.permute.xlu2 %4235 }
 0x843   : > { %10257 = vst [vmem:[#allocation42_spill] sm:$0xff] %v9251_v24 }
 0x844   : > { %v3844_v11 = vmul.f32 1.442695, %v3764_v61  ;;  %v3846_v50 = vmul.f32 1.442695, %v3765_v19  ;;  %v3441_v16 = vpop.xlane.xlu1 %3440  ;;  %v9231_v61 = vpop.f32.mrf.mxu3 }
 0x845   : > { %v9221_v28 = vmax.f32 %v9216_v43, %v3441_v16  ;;  %10251 = vst [vmem:[#allocation15_spill] sm:$0xff] %v9231_v61 }
 0x846   : > { %6584 = vpow2.f32 %v3844_v11  ;;  %v3550_v11 = vmul.f32 1.442695, %v3505_v31 }
 0x847   : > { %6586 = vpow2.f32 %v3846_v50  ;;  %4785 = vst.msk [vmem:[#allocation2 + $0x1c8] sm:$0xff] %vm747_vm0, %v9221_v28  ;;  %v9238_v50 = vpop.f32.mrf.mxu2 }
 0x848   : > { %6588 = vpow2.f32 %v3546_v49 }
 0x849   : > { %6590 = vpow2.f32 %v3550_v11 }
 0x84c   : > { %v6585_v34 = vpop.eup %6584 }
 0x84d   : > { %v6587_v56 = vpop.eup %6586  ;;  %v4398_v8 = vpack.c.bf16 %v9166_v36, %v6585_v34  ;;  %v9240_v36 = vpop.f32.mrf.mxu3 }
 0x84e   : > { %v4399_v51 = vpack.c.bf16 %v9173_v54, %v6587_v56  ;;  %v9227_v26 = vadd.f32 %v6587_v56, %v6585_v34  ;;  %v9233_v19 = vpop.eup %6588  ;;  %10253 = vst [vmem:[#allocation24_spill] sm:$0xff] %v9240_v36  ;;  %v9255_v56 = vld [vmem:[#allocation2 + $0x1b8] sm:$0xff] }
 0x84f   : > { %4546 = vmatmul.bf16.gmra.mxu0 %v4398_v8  ;;  %10252 = vst [vmem:[#allocation28_spill] sm:$0xff] %v9233_v19  ;;  %v9244_v54 = vpop.eup %6590  ;;  %v9246_v16 = vpop.f32.mrf.mxu2 }
 0x850   : > { %4635 = vmatmul.bf16.gmra.mxu1 %v4399_v51  ;;  %10254 = vst [vmem:[#allocation25_spill] sm:$0xff] %v9244_v54 }
 0x851   : > { %10255 = vst [vmem:[#allocation22_spill] sm:$0xff] %v9246_v16 }
 0x853   : > { %4255 = vperm.xlu0 %6266, %v9233_v19  }
 0x855   : > { %v9248_v49 = vpop.f32.mrf.mxu3 }
 0x856   : > { %10256 = vst [vmem:[#allocation9_spill] sm:$0xff] %v9248_v49  ;;  %v3457_v34 = vmax.f32 %v9246_v16, %v9248_v49  ;;  %v10260_v16 = vld [vmem:[#allocation49_spill] sm:$0xff] }
 0x85a   : > { %3655 = vperm.xlu2 %6265, %v8866_v14   ;;  %v9257_v14 = vld [vmem:[#allocation2 + $0x1c0] sm:$0xff] }
 0x85b   : > { %3660 = vperm.xlu0 %6266, %v8894_v1  }
 0x862   : > { %4265 = vperm.xlu2 %6265, %v9244_v54  }
 0x867   : > { %3458 = vmax.xlane.f32.xlu1 %v3457_v34  ;;  %v3507_v34 = vsub.f32 %v8928_v59, %v8931_v41  ;;  %v9280_v59 = vpop.permute.xlu1 %4245 }
 0x868   : > { %10262 = vst [vmem:[#allocation30_spill] sm:$0xff] %v9280_v59  ;;  %v10267_v59 = vld [vmem:[#allocation45_spill] sm:$0xff] }
 0x869   : > { %v3554_v24 = vmul.f32 1.442695, %v3507_v34 }
 0x86b   : > { %6592 = vpow2.f32 %v3554_v24  ;;  %v3454_v24 = vmax.f32 %v9238_v50, %v9240_v36 }
 0x86c   : > { %v3435_v8 = vpop.xlane.xlu0 %3434  ;;  %v3438_v51 = vpop.xlane.xlu2 %3437 }
 0x86d   : > { %v9260_v31 = vmax.f32 %v9255_v56, %v3435_v8  ;;  %v9263_v11 = vmax.f32 %v9257_v14, %v3438_v51 }
 0x86f   : > { %4783 = vst.msk [vmem:[#allocation2 + $0x1b8] sm:$0xff] %vm747_vm0, %v9260_v31 }
 0x870   : > { %4784 = vst.msk [vmem:[#allocation2 + $0x1c0] sm:$0xff] %vm747_vm0, %v9263_v11 }
 0x871   : > { %v9282_v34 = vpop.eup %6592 }
 0x872   : > { %10263 = vst [vmem:[#allocation27_spill] sm:$0xff] %v9282_v34 }
 0x874   : > { %v3641_v49 = vpop.permute.xlu2 %3640 }
 0x875   : > { %v3768_v8 = vsub.f32 %v8714_v60, %v3641_v49  ;;  %v3769_v51 = vsub.f32 %v10260_v16, %v3641_v49 }
 0x877   : > { %v3852_v54 = vmul.f32 1.442695, %v3768_v8  ;;  %v3854_v19 = vmul.f32 1.442695, %v3769_v51  ;;  %v4532_v23 = vpop.f32.mrf.mxu0  ;;  %v4621_v2 = vpop.f32.mrf.mxu1 }
 0x878   : > { %v4622_v32 = vadd.f32 %v4621_v2, %v4532_v23  ;;  %v9295_v2 = vpop.permute.xlu1 %3650 }
 0x879   : > { %6594 = vpow2.f32 %v3852_v54 }
 0x87a   : > { %6596 = vpow2.f32 %v3854_v19  ;;  %v9278_v41 = vadd.f32 %v4622_v32, %v4360_v33  ;;  %v3451_v32 = vmax.f32 %v9229_v29, %v9231_v61  ;;  %v4362_v33 = vmul.f32 0.0, %v9162_v30  ;;  %v9306_v30 = vld [vmem:[#allocation2 + $0x1e0] sm:$0xff] }
 0x87c   : > { %10261 = vst [vmem:[#allocation29_spill] sm:$0xff] %v9278_v41  ;;  %v10269_v41 = vld [vmem:[#allocation65_spill] sm:$0xff] }
 0x87f   : > { %v6595_v63 = vpop.eup %6594  ;;  %v9284_v60 = vpop.f32.mrf.mxu0 }
 0x880   : > { %10264 = vst [vmem:[#allocation35_spill] sm:$0xff] %v9284_v60  ;;  %v9286_v16 = vpop.f32.mrf.mxu1  ;;  %v6597_v49 = vpop.eup %6596  ;;  %4275 = vperm.xlu1 %6267, %v9282_v34   ;;  %v3506_v34 = vsub.f32 %v10269_v41, %v8894_v1 }
 0x881   : > { %10265 = vst [vmem:[#allocation26_spill] sm:$0xff] %v9286_v16  ;;  %v9288_v8 = vpop.permute.xlu0 %4240  ;;  %v9291_v46 = vadd.f32 %v6597_v49, %v6595_v63  ;;  %v10268_v16 = vld [vmem:[#allocation44_spill] sm:$0xff] }
 0x882   : > { %10266 = vst [vmem:[#allocation33_spill] sm:$0xff] %v9288_v8  ;;  %v3552_v7 = vmul.f32 1.442695, %v3506_v34  ;;  %v10272_v34 = vld [vmem:[#allocation11_spill] sm:$0xff] }
 0x885   : > { %3452 = vmax.xlane.f32.xlu0 %v3451_v32 }
 0x887   : > { %v4537_v23 = vpop.f32.mrf.mxu0 }
 0x888   : > { %v4626_v19 = vpop.f32.mrf.mxu1 }
 0x889   : > { %v3646_v54 = vpop.permute.xlu0 %3645  ;;  %v4627_v51 = vadd.f32 %v4626_v19, %v4537_v23  ;;  %v9328_v19 = vpop.permute.xlu2 %4250 }
 0x88a   : > { %v3770_v8 = vsub.f32 %v10267_v59, %v3646_v54  ;;  %v3771_v60 = vsub.f32 %v10268_v16, %v3646_v54  ;;  %10276 = vst [vmem:[#allocation40_spill] sm:$0xff] %v9328_v19 }
 0x88b   : > { %3455 = vmax.xlane.f32.xlu2 %v3454_v24  ;;  %v9304_v29 = vadd.f32 %v4627_v51, %v4362_v33  ;;  %v10277_v24 = vld [vmem:[#allocation53_spill] sm:$0xff] }
 0x88c   : > { %v3856_v61 = vmul.f32 1.442695, %v3770_v8  ;;  %v3858_v32 = vmul.f32 1.442695, %v3771_v60  ;;  %v10273_v8 = vld [vmem:[#allocation37_spill] sm:$0xff] }
 0x88d   : > { %10270 = vst [vmem:[#allocation23_spill] sm:$0xff] %v9304_v29  ;;  %v10282_v29 = vld [vmem:[#allocation54_spill] sm:$0xff] }
 0x88e   : > { %6598 = vpow2.f32 %v3856_v61 }
 0x88f   : > { %6600 = vpow2.f32 %v3858_v32  ;;  %v3450_v57 = vpop.xlane.xlu1 %3449  ;;  %v10278_v32 = vld [vmem:[#allocation52_spill] sm:$0xff] }
 0x890   : > { %v9309_v23 = vmax.f32 %v9306_v30, %v3450_v57  ;;  %6602 = vpow2.f32 %v3552_v7  ;;  %v3508_v57 = vsub.f32 %v10273_v8, %v10272_v34 }
 0x892   : > { %4788 = vst.msk [vmem:[#allocation2 + $0x1e0] sm:$0xff] %vm747_vm0, %v9309_v23  ;;  %v3556_v33 = vmul.f32 1.442695, %v3508_v57 }
 0x894   : > { %v6599_v59 = vpop.eup %6598  ;;  %6604 = vpow2.f32 %v3556_v33  ;;  %v10279_v33 = vld [vmem:[#allocation43_spill] sm:$0xff] }
 0x895   : > { %v6601_v1 = vpop.eup %6600  ;;  %v4400_v41 = vpack.c.bf16 %v6599_v59, %v6595_v63  ;;  %v4008_v63 = vadd.f32 %v9028_v47, %v9022_v10  ;;  %v9337_v10 = vld [vmem:[#allocation2 + $0x1d8] sm:$0xff] }
 0x896   : > { %v4401_v60 = vpack.c.bf16 %v6601_v1, %v6597_v49  ;;  %v9313_v16 = vadd.f32 %v6601_v1, %v6599_v59  ;;  %v9315_v61 = vpop.eup %6602  ;;  %v9332_v1 = vld [vmem:[#allocation2 + $0x1d0] sm:$0xff] }
 0x897   : > { %4551 = vmatmul.bf16.gmra.mxu0 %v4400_v41  ;;  %10271 = vst [vmem:[#allocation32_spill] sm:$0xff] %v9315_v61 }
 0x898   : > { %4640 = vmatmul.bf16.gmra.mxu1 %v4401_v60 }
 0x899   : > { %4270 = vperm.xlu0 %6266, %v9315_v61  }
 0x89a   : > { %v9325_v49 = vpop.eup %6604 }
 0x89b   : > { %10275 = vst [vmem:[#allocation39_spill] sm:$0xff] %v9325_v49 }
 0x8a3   : > { %3670 = vperm.xlu2 %6265, %v10272_v34  }
 0x8a7   : > { %v9321_v7 = vpop.permute.xlu1 %4260 }
 0x8a8   : > { %10274 = vst [vmem:[#allocation36_spill] sm:$0xff] %v9321_v7  ;;  %v10281_v7 = vld [vmem:[#allocation46_spill] sm:$0xff] }
 0x8aa   : > { %4009 = vadd.xlane.f32.xlu1 %v4008_v63  ;;  %v3772_v63 = vsub.f32 %v10279_v33, %v9295_v2 }
 0x8ab   : > { %4280 = vperm.xlu2 %6265, %v9325_v49  }
 0x8af   : > { %v3666_v54 = vpop.permute.xlu1 %3665 }
 0x8b0   : > { %v3778_v51 = vsub.f32 %v10277_v24, %v3666_v54  ;;  %v3779_v59 = vsub.f32 %v10278_v32, %v3666_v54  ;;  %v10280_v54 = vld [vmem:[#allocation47_spill] sm:$0xff] }
 0x8b1   : > { %v3773_v24 = vsub.f32 %v10280_v54, %v9295_v2 }
 0x8b2   : > { %v3872_v41 = vmul.f32 1.442695, %v3778_v51  ;;  %v3874_v60 = vmul.f32 1.442695, %v3779_v59  ;;  %v3444_v34 = vpop.xlane.xlu0 %3443  ;;  %v3510_v59 = vsub.f32 %v9080_v39, %v9085_v4 }
 0x8b3   : > { %v9335_v8 = vmax.f32 %v9332_v1, %v3444_v34  ;;  %v3862_v34 = vmul.f32 1.442695, %v3773_v24  ;;  %v10285_v24 = vld [vmem:[#allocation58_spill] sm:$0xff] }
 0x8b4   : > { %6606 = vpow2.f32 %v3872_v41  ;;  %v3860_v41 = vmul.f32 1.442695, %v3772_v63  ;;  %v3560_v49 = vmul.f32 1.442695, %v3510_v59 }
 0x8b5   : > { %6608 = vpow2.f32 %v3874_v60  ;;  %4786 = vst.msk [vmem:[#allocation2 + $0x1d0] sm:$0xff] %vm747_vm0, %v9335_v8  ;;  %v3447_v47 = vpop.xlane.xlu2 %3446 }
 0x8b6   : > { %v9342_v57 = vmax.f32 %v9337_v10, %v3447_v47  ;;  %6610 = vpow2.f32 %v3860_v41  ;;  %v3509_v41 = vsub.f32 %v9065_v55, %v9074_v42 }
 0x8b7   : > { %6612 = vpow2.f32 %v3862_v34 }
 0x8b8   : > { %4787 = vst.msk [vmem:[#allocation2 + $0x1d8] sm:$0xff] %vm747_vm0, %v9342_v57 }
 0x8ba   : > { %v6607_v51 = vpop.eup %6606 }
 0x8bb   : > { %v6609_v32 = vpop.eup %6608 }
 0x8bc   : > { %v9352_v60 = vadd.f32 %v6609_v32, %v6607_v51  ;;  %v9360_v2 = vpop.eup %6610 }
 0x8bd   : > { %v3656_v47 = vpop.permute.xlu2 %3655  ;;  %v9362_v63 = vpop.eup %6612 }
 0x8be   : > { %v3774_v19 = vsub.f32 %v10281_v7, %v3656_v47  ;;  %v3775_v33 = vsub.f32 %v10282_v29, %v3656_v47 }
 0x8c0   : > { %v3864_v61 = vmul.f32 1.442695, %v3774_v19  ;;  %v3866_v36 = vmul.f32 1.442695, %v3775_v33  ;;  %v4011_v33 = vadd.f32 %v9111_v18, %v9109_v48 }
 0x8c2   : > { %6614 = vpow2.f32 %v3864_v61 }
 0x8c3   : > { %6616 = vpow2.f32 %v3866_v36  ;;  %3680 = vperm.xlu1 %6267, %v9085_v4   ;;  %4006 = vadd.xlane.f32.xlu0 %v9034_v40  ;;  %v10284_v4 = vld [vmem:[#allocation57_spill] sm:$0xff] }
 0x8c4   : > { %6618 = vpow2.f32 %v3560_v49 }
 0x8c5   : > { %v9358_v39 = vpop.permute.xlu0 %4255 }
 0x8c6   : > { %10283 = vst [vmem:[#allocation49_spill] sm:$0xff] %v9358_v39 }
 0x8c8   : > { %v6615_v7 = vpop.eup %6614 }
 0x8c9   : > { %v6617_v29 = vpop.eup %6616  ;;  %v4402_v54 = vpack.c.bf16 %v6615_v7, %v9360_v2 }
 0x8ca   : > { %v9365_v19 = vpop.eup %6618  ;;  %v4403_v61 = vpack.c.bf16 %v6617_v29, %v9362_v63  ;;  %v9368_v36 = vadd.f32 %v6617_v29, %v6615_v7  ;;  %v3558_v7 = vmul.f32 1.442695, %v3509_v41 }
 0x8cb   : > { %4290 = vperm.xlu1 %6267, %v9365_v19   ;;  %4556 = vmatmul.bf16.gmra.mxu0 %v4402_v54  ;;  %v9378_v54 = vld [vmem:[#allocation2 + $0x1f8] sm:$0xff] }
 0x8cc   : > { %4645 = vmatmul.bf16.gmra.mxu1 %v4403_v61 }
 0x8cd   : > { %v3661_v40 = vpop.permute.xlu0 %3660 }
 0x8ce   : > { %v3776_v49 = vsub.f32 %v10284_v4, %v3661_v40  ;;  %v3777_v59 = vsub.f32 %v10285_v24, %v3661_v40 }
 0x8d0   : > { %v3868_v34 = vmul.f32 1.442695, %v3776_v49  ;;  %v3870_v47 = vmul.f32 1.442695, %v3777_v59  ;;  %v9399_v59 = vld [vmem:[#allocation2 + $0x1e8] sm:$0xff] }
 0x8d2   : > { %6620 = vpow2.f32 %v3868_v34 }
 0x8d3   : > { %6622 = vpow2.f32 %v3870_v47 }
 0x8d4   : > { %4012 = vadd.xlane.f32.xlu2 %v4011_v33  ;;  %6624 = vpow2.f32 %v3558_v7 }
 0x8d7   : > { %3675 = vperm.xlu0 %6266, %v9074_v42   ;;  %v3511_v42 = vsub.f32 %v9036_v13, %v9039_v12  ;;  %v9406_v13 = vld [vmem:[#allocation2 + $0x1f0] sm:$0xff] }
 0x8d8   : > { %v6621_v29 = vpop.eup %6620 }
 0x8d9   : > { %v6623_v61 = vpop.eup %6622  ;;  %v4404_v40 = vpack.c.bf16 %v6607_v51, %v6621_v29  ;;  %v3562_v18 = vmul.f32 1.442695, %v3511_v42 }
 0x8da   : > { %v3459_v4 = vpop.xlane.xlu1 %3458  ;;  %v4405_v24 = vpack.c.bf16 %v6609_v32, %v6623_v61  ;;  %v9380_v55 = vadd.f32 %v6623_v61, %v6621_v29  ;;  %v9387_v48 = vpop.eup %6624  ;;  %v3512_v61 = vsub.f32 %v9171_v38, %v9188_v44  ;;  %v3514_v38 = vsub.f32 %v9118_v15, %v9124_v0 }
 0x8db   : > { %v9383_v49 = vmax.f32 %v9378_v54, %v3459_v4  ;;  %4561 = vmatmul.bf16.gmra.mxu0 %v4404_v40  ;;  %6626 = vpow2.f32 %v3562_v18  ;;  %v9397_v32 = vpop.permute.xlu2 %4265  ;;  %v3942_v40 = vld [vmem:[#allocation3 + $0x108] sm:$0xff] }
 0x8dc   : > { %4650 = vmatmul.bf16.gmra.mxu1 %v4405_v24  ;;  %10286 = vst [vmem:[#allocation45_spill] sm:$0xff] %v9397_v32  ;;  %v3564_v4 = vmul.f32 1.442695, %v3512_v61  ;;  %v3974_v24 = vmul.f32 %v8959_v53, %v3942_v40  ;;  %v3568_v18 = vmul.f32 1.442695, %v3514_v38  ;;  %v3941_v53 = vld [vmem:[#allocation3 + $0x100] sm:$0xff] }
 0x8dd   : > { %4791 = vst.msk [vmem:[#allocation2 + $0x1f8] sm:$0xff] %vm747_vm0, %v9383_v49  ;;  %v10291_v61 = vld [vmem:[#allocation8_spill] sm:$0xff] }
 0x8df   : > { %4285 = vperm.xlu0 %6266, %v9387_v48  }
 0x8e1   : > { %v9393_v51 = vpop.eup %6626 }
 0x8ec   : > { %3685 = vperm.xlu2 %6265, %v9039_v12  }
 0x8f2   : > { %v9419_v29 = vpop.permute.xlu1 %4275 }
 0x8f3   : > { %10287 = vst [vmem:[#allocation44_spill] sm:$0xff] %v9419_v29 }
 0x8f4   : > { %4295 = vperm.xlu2 %6265, %v9393_v51  }
 0x8f5   : > { %4018 = vadd.xlane.f32.xlu1 %v9102_v21  ;;  %v3513_v21 = vsub.f32 %v9164_v27, %v9169_v17 }
 0x8f7   : > { %v3566_v33 = vmul.f32 1.442695, %v3513_v21  ;;  %v10290_v21 = vld [vmem:[#allocation71_spill] sm:$0xff] }
 0x8f8   : > { %v3453_v41 = vpop.xlane.xlu0 %3452 }
 0x8f9   : > { %v9402_v34 = vmax.f32 %v9399_v59, %v3453_v41  ;;  %6628 = vpow2.f32 %v3566_v33 }
 0x8fa   : > { %6630 = vpow2.f32 %v3564_v4 }
 0x8fb   : > { %4789 = vst.msk [vmem:[#allocation2 + $0x1e8] sm:$0xff] %vm747_vm0, %v9402_v34  ;;  %6632 = vpow2.f32 %v3568_v18 }
 0x8fe   : > { %v3456_v12 = vpop.xlane.xlu2 %3455 }
 0x8ff   : > { %v9409_v47 = vmax.f32 %v9406_v13, %v3456_v12  ;;  %v9417_v7 = vpop.eup %6628 }
 0x901   : > { %4790 = vst.msk [vmem:[#allocation2 + $0x1f0] sm:$0xff] %vm747_vm0, %v9409_v47 }
 0x906   : > { %v3671_v41 = vpop.permute.xlu2 %3670 }
 0x909   : > { %4015 = vadd.xlane.f32.xlu0 %v9121_v52 }
 0x90b   : > { %v9433_v42 = vpop.permute.xlu0 %4270 }
 0x90c   : > { %10288 = vst [vmem:[#allocation65_spill] sm:$0xff] %v9433_v42 }
 0x90e   : > { %3695 = vperm.xlu1 %6267, %v9169_v17   ;;  %v9428_v17 = vpop.eup %6630 }
 0x90f   : > { %v9440_v15 = vpop.eup %6632 }
 0x910   : > { %10292 = vst [vmem:[#allocation11_spill] sm:$0xff] %v9440_v15 }
 0x916   : > { %4305 = vperm.xlu1 %6267, %v9417_v7  }
 0x91d   : > { %3690 = vperm.xlu0 %6266, %v9188_v44   ;;  %4021 = vadd.xlane.f32.xlu2 %v9136_v37  ;;  %v4010_v52 = vpop.xlane.xlu1 %4009  ;;  %v10289_v44 = vld [vmem:[#allocation70_spill] sm:$0xff] }
 0x91e   : > { %v4102_v27 = vadd.f32 %v4010_v52, %v3974_v24  ;;  %v3973_v12 = vmul.f32 %v10289_v44, %v3941_v53  ;;  %v10294_v44 = vld [vmem:[#allocation63_spill] sm:$0xff] }
 0x920   : > { %4134 = vst.msk [vmem:[#allocation3 + $0x108] sm:$0xff] %vm747_vm0, %v4102_v27 }
 0x925   : > { %4300 = vperm.xlu0 %6266, %v9428_v17  }
 0x935   : > { %3700 = vperm.xlu2 %6265, %v9124_v0   ;;  %v3681_v37 = vpop.permute.xlu1 %3680  ;;  %v9443_v0 = vpop.permute.xlu2 %4280 }
 0x936   : > { %v3784_v33 = vsub.f32 %v10290_v21, %v3681_v37  ;;  %v3785_v40 = vsub.f32 %v10291_v61, %v3681_v37  ;;  %v4007_v4 = vpop.xlane.xlu0 %4006  ;;  %10293 = vst [vmem:[#allocation37_spill] sm:$0xff] %v9443_v0  ;;  %v3943_v37 = vld [vmem:[#allocation3 + $0x110] sm:$0xff]  ;;  %v10295_v21 = vld [vmem:[#allocation31_spill] sm:$0xff]  ;;  %v10296_v61 = vld [vmem:[#allocation48_spill] sm:$0xff] }
 0x937   : > { %v4101_v24 = vadd.f32 %v4007_v4, %v3973_v12  ;;  %v3780_v12 = vsub.f32 %v10294_v44, %v3671_v41  ;;  %v10297_v0 = vld [vmem:[#allocation61_spill] sm:$0xff] }
 0x938   : > { %v3884_v52 = vmul.f32 1.442695, %v3784_v33  ;;  %v3886_v27 = vmul.f32 1.442695, %v3785_v40  ;;  %v3781_v33 = vsub.f32 %v10295_v21, %v3671_v41  ;;  %v3975_v40 = vmul.f32 %v10296_v61, %v3943_v37  ;;  %v10299_v44 = vld [vmem:[#allocation69_spill] sm:$0xff]  ;;  %v10300_v21 = vld [vmem:[#allocation64_spill] sm:$0xff] }
 0x939   : > { %4133 = vst.msk [vmem:[#allocation3 + $0x100] sm:$0xff] %vm747_vm0, %v4101_v24  ;;  %v3876_v24 = vmul.f32 1.442695, %v3780_v12  ;;  %v4023_v41 = vadd.f32 %v9200_v58, %v9198_v5 }
 0x93a   : > { %6634 = vpow2.f32 %v3884_v52 }
 0x93b   : > { %6636 = vpow2.f32 %v3886_v27  ;;  %v3878_v27 = vmul.f32 1.442695, %v3781_v33 }
 0x93c   : > { %6638 = vpow2.f32 %v3876_v24 }
 0x93d   : > { %4310 = vperm.xlu2 %6265, %v9440_v15   ;;  %6640 = vpow2.f32 %v3878_v27 }
 0x940   : > { %v6635_v38 = vpop.eup %6634  ;;  %4027 = vadd.xlane.f32.xlu1 %v9205_v25  ;;  %v10298_v25 = vld [vmem:[#allocation62_spill] sm:$0xff] }
 0x941   : > { %v6637_v18 = vpop.eup %6636 }
 0x942   : > { %v9446_v53 = vadd.f32 %v6637_v18, %v6635_v38  ;;  %v9458_v61 = vpop.eup %6638 }
 0x947   : > { %v4013_v4 = vpop.xlane.xlu2 %4012 }
 0x948   : > { %v4103_v52 = vadd.f32 %v4013_v4, %v3975_v40 }
 0x949   : > { %v3676_v29 = vpop.permute.xlu0 %3675 }
 0x94a   : > { %4135 = vst.msk [vmem:[#allocation3 + $0x110] sm:$0xff] %vm747_vm0, %v4103_v52  ;;  %v3782_v42 = vsub.f32 %v10297_v0, %v3676_v29  ;;  %v3783_v32 = vsub.f32 %v10298_v25, %v3676_v29  ;;  %v3516_v29 = vsub.f32 %v9257_v14, %v9263_v11  ;;  %v3515_v52 = vsub.f32 %v9255_v56, %v9260_v31 }
 0x94c   : > { %v3880_v39 = vmul.f32 1.442695, %v3782_v42  ;;  %v3882_v15 = vmul.f32 1.442695, %v3783_v32  ;;  %v9462_v32 = vpop.eup %6640 }
 0x94e   : > { %6642 = vpow2.f32 %v3880_v39  ;;  %v3572_v39 = vmul.f32 1.442695, %v3516_v29 }
 0x94f   : > { %6644 = vpow2.f32 %v3882_v15  ;;  %v3686_v37 = vpop.permute.xlu2 %3685  ;;  %4024 = vadd.xlane.f32.xlu0 %v4023_v41  ;;  %v3570_v41 = vmul.f32 1.442695, %v3515_v52 }
 0x950   : > { %v3786_v12 = vsub.f32 %v10299_v44, %v3686_v37  ;;  %v3787_v33 = vsub.f32 %v10300_v21, %v3686_v37  ;;  %v9475_v37 = vpop.permute.xlu1 %4290  ;;  %v3945_v44 = vld [vmem:[#allocation3 + $0x120] sm:$0xff] }
 0x951   : > { %10301 = vst [vmem:[#allocation53_spill] sm:$0xff] %v9475_v37  ;;  %v10302_v21 = vld [vmem:[#allocation76_spill] sm:$0xff] }
 0x952   : > { %v3888_v0 = vmul.f32 1.442695, %v3786_v12  ;;  %v3890_v42 = vmul.f32 1.442695, %v3787_v33  ;;  %v3977_v56 = vmul.f32 %v10302_v21, %v3945_v44 }
 0x954   : > { %v6643_v40 = vpop.eup %6642  ;;  %6646 = vpow2.f32 %v3888_v0 }
 0x955   : > { %v6645_v5 = vpop.eup %6644  ;;  %6648 = vpow2.f32 %v3890_v42  ;;  %v4406_v58 = vpack.c.bf16 %v6643_v40, %v9458_v61  ;;  %v9485_v42 = vpop.f32.mrf.mxu0 }
 0x956   : > { %v4407_v15 = vpack.c.bf16 %v6645_v5, %v9462_v32  ;;  %v9466_v4 = vadd.f32 %v6645_v5, %v6643_v40  ;;  %6650 = vpow2.f32 %v3572_v39  ;;  %v3944_v40 = vld [vmem:[#allocation3 + $0x118] sm:$0xff]  ;;  %v10303_v39 = vld [vmem:[#allocation38_spill] sm:$0xff] }
 0x957   : > { %4566 = vmatmul.bf16.gmra.mxu0 %v4406_v58  ;;  %6652 = vpow2.f32 %v3570_v41 }
 0x958   : > { %4655 = vmatmul.bf16.gmra.mxu1 %v4407_v15  ;;  %v3976_v15 = vmul.f32 %v10303_v39, %v3944_v40 }
 0x959   : > { %3710 = vperm.xlu1 %6267, %v9263_v11  }
 0x95a   : > { %v6647_v14 = vpop.eup %6646 }
 0x95b   : > { %v6649_v24 = vpop.eup %6648  ;;  %v4408_v11 = vpack.c.bf16 %v6647_v14, %v6635_v38  ;;  %v9489_v38 = vpop.permute.xlu0 %4285 }
 0x95c   : > { %v9471_v27 = vadd.f32 %v6649_v24, %v6647_v14  ;;  %v9473_v25 = vpop.eup %6650  ;;  %v4409_v12 = vpack.c.bf16 %v6649_v24, %v6637_v18 }
 0x95d   : > { %v9481_v0 = vpop.eup %6652  ;;  %v9493_v18 = vpop.f32.mrf.mxu0 }
 0x961   : > { %4320 = vperm.xlu1 %6267, %v9473_v25  }
 0x963   : > { %3705 = vperm.xlu0 %6266, %v9260_v31   ;;  %v9487_v31 = vpop.f32.mrf.mxu1 }
 0x965   : > { %v9502_v44 = vpop.f32.mrf.mxu0 }
 0x966   : > { %4030 = vadd.xlane.f32.xlu2 %v9227_v26  ;;  %v3517_v26 = vsub.f32 %v9216_v43, %v9221_v28 }
 0x967   : > { %4571 = vmatmul.bf16.gmra.mxu0 %v4408_v11 }
 0x968   : > { %4660 = vmatmul.bf16.gmra.mxu1 %v4409_v12  ;;  %v4019_v33 = vpop.xlane.xlu1 %4018  ;;  %v3574_v58 = vmul.f32 1.442695, %v3517_v26  ;;  %v3946_v26 = vld [vmem:[#allocation3 + $0x128] sm:$0xff] }
 0x969   : > { %v4105_v29 = vadd.f32 %v4019_v33, %v3977_v56  ;;  %v3978_v39 = vmul.f32 %v9057_v3, %v3946_v26  ;;  %v10305_v3 = vld [vmem:[#allocation60_spill] sm:$0xff] }
 0x96a   : > { %6654 = vpow2.f32 %v3574_v58 }
 0x96b   : > { %4137 = vst.msk [vmem:[#allocation3 + $0x120] sm:$0xff] %vm747_vm0, %v4105_v29  ;;  %4315 = vperm.xlu0 %6266, %v9481_v0   ;;  %v9495_v5 = vpop.f32.mrf.mxu1 }
 0x96d   : > { %v9511_v33 = vpop.f32.mrf.mxu0 }
 0x970   : > { %v9506_v56 = vpop.eup %6654 }
 0x973   : > { %v9504_v11 = vpop.f32.mrf.mxu1 }
 0x97c   : > { %v4016_v14 = vpop.xlane.xlu0 %4015 }
 0x97d   : > { %v4104_v24 = vadd.f32 %v4016_v14, %v3976_v15 }
 0x97e   : > { %3715 = vperm.xlu2 %6265, %v9221_v28   ;;  %v9509_v28 = vpop.permute.xlu2 %4295 }
 0x97f   : > { %4136 = vst.msk [vmem:[#allocation3 + $0x118] sm:$0xff] %vm747_vm0, %v4104_v24 }
 0x980   : > { %v3696_v52 = vpop.permute.xlu1 %3695  ;;  %10304 = vst [vmem:[#allocation52_spill] sm:$0xff] %v9509_v28 }
 0x981   : > { %v3790_v41 = vsub.f32 %v8964_v45, %v3696_v52  ;;  %v3791_v43 = vsub.f32 %v8966_v62, %v3696_v52  ;;  %v9513_v45 = vpop.f32.mrf.mxu1 }
 0x983   : > { %v3896_v12 = vmul.f32 1.442695, %v3790_v41  ;;  %v3898_v21 = vmul.f32 1.442695, %v3791_v43 }
 0x985   : > { %6656 = vpow2.f32 %v3896_v12  ;;  %v9522_v12 = vpop.f32.mrf.mxu0 }
 0x986   : > { %6658 = vpow2.f32 %v3898_v21  ;;  %4325 = vperm.xlu2 %6265, %v9506_v56  }
 0x98b   : > { %v6657_v29 = vpop.eup %6656  ;;  %4036 = vadd.xlane.f32.xlu1 %v9291_v46  ;;  %v9524_v46 = vpop.f32.mrf.mxu1 }
 0x98c   : > { %v6659_v62 = vpop.eup %6658 }
 0x98d   : > { %v9516_v40 = vadd.f32 %v6659_v62, %v6657_v29 }
 0x98f   : > { %v3691_v58 = vpop.permute.xlu0 %3690 }
 0x990   : > { %v3788_v15 = vsub.f32 %v8948_v20, %v3691_v58  ;;  %v3789_v14 = vsub.f32 %v8950_v35, %v3691_v58  ;;  %v4022_v24 = vpop.xlane.xlu2 %4021  ;;  %v10306_v20 = vld [vmem:[#allocation75_spill] sm:$0xff] }
 0x991   : > { %v4106_v52 = vadd.f32 %v4022_v24, %v3978_v39  ;;  %v9529_v24 = vpop.f32.mrf.mxu0 }
 0x992   : > { %v3892_v41 = vmul.f32 1.442695, %v3788_v15  ;;  %v3894_v43 = vmul.f32 1.442695, %v3789_v14 }
 0x993   : > { %4138 = vst.msk [vmem:[#allocation3 + $0x128] sm:$0xff] %vm747_vm0, %v4106_v52 }
 0x994   : > { %6660 = vpow2.f32 %v3892_v41  ;;  %v3519_v41 = vsub.f32 %v9337_v10, %v9342_v57 }
 0x995   : > { %6662 = vpow2.f32 %v3894_v43  ;;  %4033 = vadd.xlane.f32.xlu0 %v9183_v9  ;;  %v9535_v43 = vpop.f32.mrf.mxu1 }
 0x996   : > { %v3578_v9 = vmul.f32 1.442695, %v3519_v41 }
 0x998   : > { %v3701_v21 = vpop.permute.xlu2 %3700 }
 0x999   : > { %v3792_v26 = vsub.f32 %v10305_v3, %v3701_v21  ;;  %v3793_v28 = vsub.f32 %v10306_v20, %v3701_v21  ;;  %v3518_v21 = vsub.f32 %v9332_v1, %v9335_v8  ;;  %v9548_v3 = vpop.f32.mrf.mxu0  ;;  %v9555_v20 = vpop.permute.xlu1 %4305 }
 0x99a   : > { %v6661_v35 = vpop.eup %6660  ;;  %10308 = vst [vmem:[#allocation47_spill] sm:$0xff] %v9555_v20 }
 0x99b   : > { %v6663_v58 = vpop.eup %6662  ;;  %v3900_v39 = vmul.f32 1.442695, %v3792_v26  ;;  %v3902_v15 = vmul.f32 1.442695, %v3793_v28  ;;  %v4410_v14 = vpack.c.bf16 %v6657_v29, %v6661_v35 }
 0x99c   : > { %v4411_v52 = vpack.c.bf16 %v6659_v62, %v6663_v58  ;;  %v9531_v37 = vadd.f32 %v6663_v58, %v6661_v35  ;;  %v3576_v62 = vmul.f32 1.442695, %v3518_v21  ;;  %v3948_v58 = vld [vmem:[#allocation3 + $0x138] sm:$0xff]  ;;  %v3947_v21 = vld [vmem:[#allocation3 + $0x130] sm:$0xff] }
 0x99d   : > { %6664 = vpow2.f32 %v3900_v39  ;;  %4576 = vmatmul.bf16.gmra.mxu0 %v4410_v14  ;;  %v9550_v26 = vpop.f32.mrf.mxu1 }
 0x99e   : > { %6666 = vpow2.f32 %v3902_v15  ;;  %4665 = vmatmul.bf16.gmra.mxu1 %v4411_v52 }
 0x99f   : > { %6668 = vpow2.f32 %v3578_v9  ;;  %v9572_v9 = vpop.permute.xlu0 %4300 }
 0x9a0   : > { %6670 = vpow2.f32 %v3576_v62  ;;  %v3979_v62 = vmul.f32 %v9012_v22, %v3947_v21 }
 0x9a3   : > { %v9539_v28 = vpop.eup %6664 }
 0x9a4   : > { %v9541_v29 = vpop.eup %6666  ;;  %3725 = vperm.xlu1 %6267, %v9342_v57   ;;  %v9558_v57 = vpop.f32.mrf.mxu0 }
 0x9a5   : > { %v9546_v10 = vadd.f32 %v9541_v29, %v9539_v28  ;;  %v9553_v1 = vpop.eup %6668  ;;  %10309 = vst [vmem:[#allocation46_spill] sm:$0xff] %v9558_v57  ;;  %v9560_v35 = vpop.f32.mrf.mxu1 }
 0x9a6   : > { %10307 = vst [vmem:[#allocation43_spill] sm:$0xff] %v9553_v1  ;;  %v9563_v39 = vpop.eup %6670 }
 0x9a7   : > { %10310 = vst [vmem:[#allocation54_spill] sm:$0xff] %v9560_v35 }
 0x9a8   : > { %10311 = vst [vmem:[#allocation57_spill] sm:$0xff] %v9563_v39 }
 0x9a9   : > { %3720 = vperm.xlu0 %6266, %v9335_v8   ;;  %v3980_v8 = vmul.f32 %v9067_v6, %v3948_v58 }
 0x9ac   : > { %4335 = vperm.xlu1 %6267, %v9553_v1   ;;  %v9568_v52 = vpop.f32.mrf.mxu0 }
 0x9ad   : > { %10312 = vst [vmem:[#allocation58_spill] sm:$0xff] %v9568_v52  ;;  %v9570_v41 = vpop.f32.mrf.mxu1 }
 0x9ae   : > { %10313 = vst [vmem:[#allocation70_spill] sm:$0xff] %v9570_v41  ;;  %v10317_v41 = vld [vmem:[#allocation56_spill] sm:$0xff] }
 0x9af   : > { %4039 = vadd.xlane.f32.xlu2 %v9313_v16  ;;  %v3520_v16 = vsub.f32 %v9306_v30, %v9309_v23  ;;  %v10318_v30 = vld [vmem:[#allocation59_spill] sm:$0xff] }
 0x9b1   : > { %4330 = vperm.xlu0 %6266, %v9563_v39   ;;  %v10327_v39 = vld [vmem:[#allocation34_spill] sm:$0xff] }
 0x9b3   : > { %v4028_v15 = vpop.xlane.xlu1 %4027 }
 0x9b4   : > { %v4108_v14 = vadd.f32 %v4028_v15, %v3980_v8  ;;  %v9577_v20 = vpop.f32.mrf.mxu0  ;;  %v3580_v8 = vmul.f32 1.442695, %v3520_v16 }
 0x9b5   : > { %10314 = vst [vmem:[#allocation71_spill] sm:$0xff] %v9577_v20  ;;  %v9579_v6 = vpop.f32.mrf.mxu1 }
 0x9b6   : > { %4140 = vst.msk [vmem:[#allocation3 + $0x138] sm:$0xff] %vm747_vm0, %v4108_v14  ;;  %6672 = vpow2.f32 %v3580_v8  ;;  %v10324_v8 = vld [vmem:[#allocation77_spill] sm:$0xff] }
 0x9b7   : > { %10315 = vst [vmem:[#allocation8_spill] sm:$0xff] %v9579_v6 }
 0x9bc   : > { %v9583_v14 = vpop.f32.mrf.mxu0  ;;  %v9589_v21 = vpop.eup %6672 }
 0x9bd   : > { %10316 = vst [vmem:[#allocation63_spill] sm:$0xff] %v9583_v14  ;;  %v9587_v22 = vpop.f32.mrf.mxu1 }
 0x9be   : > { %10319 = vst [vmem:[#allocation31_spill] sm:$0xff] %v9587_v22 }
 0x9bf   : > { %10320 = vst [vmem:[#allocation48_spill] sm:$0xff] %v9589_v21 }
 0x9c2   : > { %v4025_v1 = vpop.xlane.xlu0 %4024 }
 0x9c3   : > { %v4107_v58 = vadd.f32 %v4025_v1, %v3979_v62  ;;  %v9592_v1 = vpop.permute.xlu2 %4310 }
 0x9c4   : > { %10321 = vst [vmem:[#allocation61_spill] sm:$0xff] %v9592_v1 }
 0x9c5   : > { %4139 = vst.msk [vmem:[#allocation3 + $0x130] sm:$0xff] %vm747_vm0, %v4107_v58 }
 0x9c7   : > { %3730 = vperm.xlu2 %6265, %v9309_v23  }
 0x9cb   : > { %v3711_v15 = vpop.permute.xlu1 %3710 }
 0x9cc   : > { %v3796_v52 = vsub.f32 %v10317_v41, %v3711_v15  ;;  %v3797_v35 = vsub.f32 %v10318_v30, %v3711_v15  ;;  %v3949_v41 = vld [vmem:[#allocation3 + $0x140] sm:$0xff]  ;;  %v10325_v30 = vld [vmem:[#allocation50_spill] sm:$0xff] }
 0x9ce   : > { %v3908_v20 = vmul.f32 1.442695, %v3796_v52  ;;  %v3910_v6 = vmul.f32 1.442695, %v3797_v35 }
 0x9cf   : > { %4340 = vperm.xlu2 %6265, %v9589_v21  }
 0x9d0   : > { %6674 = vpow2.f32 %v3908_v20  ;;  %v10326_v20 = vld [vmem:[#allocation10_spill] sm:$0xff] }
 0x9d1   : > { %6676 = vpow2.f32 %v3910_v6  ;;  %v3981_v21 = vmul.f32 %v10326_v20, %v3949_v41 }
 0x9d4   : > { %v9594_v23 = vpop.f32.mrf.mxu0 }
 0x9d5   : > { %10322 = vst [vmem:[#allocation62_spill] sm:$0xff] %v9594_v23  ;;  %v9596_v16 = vpop.f32.mrf.mxu1  ;;  %v3706_v62 = vpop.permute.xlu0 %3705 }
 0x9d6   : > { %10323 = vst [vmem:[#allocation69_spill] sm:$0xff] %v9596_v16  ;;  %v6675_v58 = vpop.eup %6674  ;;  %v3794_v15 = vsub.f32 %v10324_v8, %v3706_v62  ;;  %v3795_v22 = vsub.f32 %v10325_v30, %v3706_v62  ;;  %4045 = vadd.xlane.f32.xlu1 %v9368_v36  ;;  %v4041_v16 = vadd.f32 %v9362_v63, %v9360_v2  ;;  %v4375_v36 = vmul.f32 0.0, %v9489_v38  ;;  %v10328_v63 = vld [vmem:[#allocation72_spill] sm:$0xff] }
 0x9d7   : > { %v6677_v35 = vpop.eup %6676  ;;  %v3521_v38 = vsub.f32 %v9399_v59, %v9402_v34 }
 0x9d8   : > { %v3904_v52 = vmul.f32 1.442695, %v3794_v15  ;;  %v3906_v14 = vmul.f32 1.442695, %v3795_v22  ;;  %v9602_v1 = vadd.f32 %v6677_v35, %v6675_v58 }
 0x9d9   : > { %v4031_v6 = vpop.xlane.xlu2 %4030 }
 0x9da   : > { %6678 = vpow2.f32 %v3904_v52  ;;  %v4109_v23 = vadd.f32 %v4031_v6, %v3981_v21  ;;  %v3582_v6 = vmul.f32 1.442695, %v3521_v38 }
 0x9db   : > { %6680 = vpow2.f32 %v3906_v14  ;;  %4042 = vadd.xlane.f32.xlu0 %v4041_v16 }
 0x9dc   : > { %4141 = vst.msk [vmem:[#allocation3 + $0x140] sm:$0xff] %vm747_vm0, %v4109_v23  ;;  %v4569_v62 = vpop.f32.mrf.mxu0 }
 0x9dd   : > { %v4658_v8 = vpop.f32.mrf.mxu1 }
 0x9de   : > { %v4659_v15 = vadd.f32 %v4658_v8, %v4569_v62 }
 0x9e0   : > { %v6679_v22 = vpop.eup %6678  ;;  %v9608_v30 = vadd.f32 %v4659_v15, %v4375_v36 }
 0x9e1   : > { %v6681_v41 = vpop.eup %6680  ;;  %v3716_v20 = vpop.permute.xlu2 %3715  ;;  %v4412_v57 = vpack.c.bf16 %v6679_v22, %v9539_v28  ;;  %v3522_v28 = vsub.f32 %v9406_v13, %v9409_v47 }
 0x9e2   : > { %v3798_v2 = vsub.f32 %v10327_v39, %v3716_v20  ;;  %v3799_v21 = vsub.f32 %v10328_v63, %v3716_v20  ;;  %v4413_v14 = vpack.c.bf16 %v6681_v41, %v9541_v29  ;;  %v9614_v16 = vadd.f32 %v6681_v41, %v6679_v22  ;;  %v9628_v13 = vpop.permute.xlu1 %4320  ;;  %v10329_v22 = vld [vmem:[#allocation19_spill] sm:$0xff]  ;;  %v3950_v20 = vld [vmem:[#allocation3 + $0x148] sm:$0xff] }
 0x9e3   : > { %4581 = vmatmul.bf16.gmra.mxu0 %v4412_v57  ;;  %v3584_v62 = vmul.f32 1.442695, %v3522_v28 }
 0x9e4   : > { %v3912_v23 = vmul.f32 1.442695, %v3798_v2  ;;  %v3914_v52 = vmul.f32 1.442695, %v3799_v21  ;;  %4670 = vmatmul.bf16.gmra.mxu1 %v4413_v14  ;;  %v10331_v2 = vld [vmem:[#allocation12_spill] sm:$0xff]  ;;  %v9638_v21 = vpop.f32.mrf.mxu0 }
 0x9e5   : > { %v3982_v63 = vmul.f32 %v10331_v2, %v3950_v20 }
 0x9e6   : > { %6682 = vpow2.f32 %v3912_v23  ;;  %v3523_v23 = vsub.f32 %v9378_v54, %v9383_v49  ;;  %v10333_v54 = vld [vmem:[#allocation74_spill] sm:$0xff] }
 0x9e7   : > { %6684 = vpow2.f32 %v3914_v52  ;;  %v9642_v52 = vpop.f32.mrf.mxu1 }
 0x9e8   : > { %6686 = vpow2.f32 %v3582_v6  ;;  %v3586_v38 = vmul.f32 1.442695, %v3523_v23 }
 0x9e9   : > { %6688 = vpow2.f32 %v3584_v62  ;;  %v5147_v62 = vld [vmem:[#allocation3 + $0x100] sm:$0xff] }
 0x9ea   : > { %6690 = vpow2.f32 %v3586_v38 }
 0x9eb   : > { %6692 = vrcp.f32 %v5147_v62 }
 0x9ec   : > { %v6683_v39 = vpop.eup %6682  ;;  %v9646_v28 = vpop.f32.mrf.mxu0 }
 0x9ed   : > { %v6685_v8 = vpop.eup %6684  ;;  %v4414_v29 = vpack.c.bf16 %v6683_v39, %v6675_v58 }
 0x9ee   : > { %v9620_v36 = vadd.f32 %v6685_v8, %v6683_v39  ;;  %v4415_v57 = vpack.c.bf16 %v6685_v8, %v6677_v35  ;;  %v9624_v59 = vpop.eup %6686  ;;  %v9634_v35 = vpop.permute.xlu0 %4315 }
 0x9ef   : > { %3740 = vperm.xlu1 %6267, %v9409_v47   ;;  %3735 = vperm.xlu0 %6266, %v9402_v34   ;;  %v9626_v15 = vpop.eup %6688  ;;  %v3951_v47 = vld [vmem:[#allocation3 + $0x150] sm:$0xff]  ;;  %10330 = vst [vmem:[#allocation64_spill] sm:$0xff] %v9634_v35  ;;  %v9648_v6 = vpop.f32.mrf.mxu1 }
 0x9f0   : > { %v3983_v34 = vmul.f32 %v10329_v22, %v3951_v47  ;;  %v9650_v8 = vpop.eup %6690 }
 0x9f1   : > { %v6693_v62 = vpop.eup %6692 }
 0x9f3   : > { %4586 = vmatmul.bf16.gmra.mxu0 %v4414_v29  ;;  %v10332_v29 = vld [vmem:[#allocation18_spill] sm:$0xff] }
 0x9f4   : > { %4675 = vmatmul.bf16.gmra.mxu1 %v4415_v57 }
 0x9f7   : > { %4350 = vperm.xlu1 %6267, %v9626_v15   ;;  %4345 = vperm.xlu0 %6266, %v9624_v59  }
 0x9f8   : > { %4048 = vadd.xlane.f32.xlu2 %v9380_v55 }
 0x9fe   : > { %v4037_v41 = vpop.xlane.xlu1 %4036 }
 0x9ff   : > { %v4111_v58 = vadd.f32 %v4037_v41, %v3983_v34  ;;  %v9655_v41 = vpop.permute.xlu2 %4325 }
 0xa01   : > { %4143 = vst.msk [vmem:[#allocation3 + $0x150] sm:$0xff] %vm747_vm0, %v4111_v58  ;;  %v4378_v58 = vmul.f32 0.0, %v9572_v9 }
 0xa08   : > { %v4034_v14 = vpop.xlane.xlu0 %4033 }
 0xa09   : > { %v4110_v55 = vadd.f32 %v4034_v14, %v3982_v63  ;;  %v10334_v14 = vld [vmem:[#allocation41_spill] sm:$0xff] }
 0xa0b   : > { %4142 = vst.msk [vmem:[#allocation3 + $0x148] sm:$0xff] %vm747_vm0, %v4110_v55  ;;  %v10335_v55 = vld [vmem:[#allocation66_spill] sm:$0xff] }
 0xa10   : > { %3745 = vperm.xlu2 %6265, %v9383_v49  }
 0xa16   : > { %v3726_v39 = vpop.permute.xlu1 %3725 }
 0xa17   : > { %v3802_v57 = vsub.f32 %v10332_v29, %v3726_v39  ;;  %v3803_v47 = vsub.f32 %v10333_v54, %v3726_v39  ;;  %v3952_v54 = vld [vmem:[#allocation3 + $0x158] sm:$0xff] }
 0xa18   : > { %4355 = vperm.xlu2 %6265, %v9650_v8  }
 0xa19   : > { %v3920_v22 = vmul.f32 1.442695, %v3802_v57  ;;  %v3922_v34 = vmul.f32 1.442695, %v3803_v47  ;;  %v4053_v47 = vadd.f32 %v9462_v32, %v9458_v61 }
 0xa1a   : > { %v4577_v49 = vpop.f32.mrf.mxu0 }
 0xa1b   : > { %6694 = vpow2.f32 %v3920_v22  ;;  %v4666_v20 = vpop.f32.mrf.mxu1  ;;  %v3721_v2 = vpop.permute.xlu0 %3720  ;;  %v10336_v22 = vld [vmem:[#allocation28_spill] sm:$0xff] }
 0xa1c   : > { %6696 = vpow2.f32 %v3922_v34  ;;  %v4667_v63 = vadd.f32 %v4666_v20, %v4577_v49  ;;  %v3800_v23 = vsub.f32 %v10334_v14, %v3721_v2  ;;  %v3801_v38 = vsub.f32 %v10335_v55, %v3721_v2 }
 0xa1d   : > { %v3984_v34 = vmul.f32 %v10336_v22, %v3952_v54  ;;  %v5148_v54 = vld [vmem:[#allocation3 + $0x108] sm:$0xff]  ;;  %v5149_v22 = vld [vmem:[#allocation3 + $0x110] sm:$0xff] }
 0xa1e   : > { %v3916_v39 = vmul.f32 1.442695, %v3800_v23  ;;  %v3918_v29 = vmul.f32 1.442695, %v3801_v38  ;;  %v9660_v57 = vadd.f32 %v4667_v63, %v4378_v58  ;;  %v10337_v38 = vld [vmem:[#allocation17_spill] sm:$0xff] }
 0xa20   : > { %6698 = vpow2.f32 %v3916_v39  ;;  %5245 = vperm.xlu2 %6265, %v6693_v62   ;;  %v10338_v39 = vld [vmem:[#allocation51_spill] sm:$0xff] }
 0xa21   : > { %v6695_v9 = vpop.eup %6694  ;;  %6700 = vpow2.f32 %v3918_v29  ;;  %4054 = vadd.xlane.f32.xlu1 %v4053_v47  ;;  %4051 = vadd.xlane.f32.xlu0 %v9352_v60 }
 0xa22   : > { %v6697_v49 = vpop.eup %6696  ;;  %v4040_v20 = vpop.xlane.xlu2 %4039  ;;  %6702 = vrcp.f32 %v5148_v54 }
 0xa23   : > { %v4112_v2 = vadd.f32 %v4040_v20, %v3984_v34  ;;  %v9666_v14 = vadd.f32 %v6697_v49, %v6695_v9 }
 0xa25   : > { %4144 = vst.msk [vmem:[#allocation3 + $0x158] sm:$0xff] %vm747_vm0, %v4112_v2 }
 0xa26   : > { %v6699_v58 = vpop.eup %6698 }
 0xa27   : > { %v6701_v63 = vpop.eup %6700  ;;  %v4416_v23 = vpack.c.bf16 %v6695_v9, %v6699_v58 }
 0xa28   : > { %v4417_v61 = vpack.c.bf16 %v6697_v49, %v6701_v63  ;;  %v9669_v32 = vadd.f32 %v6701_v63, %v6699_v58  ;;  %v6703_v34 = vpop.eup %6702  ;;  %v9675_v58 = vpop.permute.xlu1 %4335  ;;  %v3954_v63 = vld [vmem:[#allocation3 + $0x168] sm:$0xff] }
 0xa29   : > { %4591 = vmatmul.bf16.gmra.mxu0 %v4416_v23  ;;  %v9677_v23 = vpop.permute.xlu0 %4330 }
 0xa2a   : > { %4680 = vmatmul.bf16.gmra.mxu1 %v4417_v61  ;;  %v3731_v55 = vpop.permute.xlu2 %3730  ;;  %10339 = vst [vmem:[#allocation76_spill] sm:$0xff] %v9677_v23  ;;  %v10340_v61 = vld [vmem:[#allocation25_spill] sm:$0xff] }
 0xa2b   : > { %v3804_v60 = vsub.f32 %v10337_v38, %v3731_v55  ;;  %v3805_v29 = vsub.f32 %v10338_v39, %v3731_v55  ;;  %v3986_v55 = vmul.f32 %v10340_v61, %v3954_v63  ;;  %v3953_v39 = vld [vmem:[#allocation3 + $0x160] sm:$0xff]  ;;  %v10342_v63 = vld [vmem:[#allocation13_spill] sm:$0xff]  ;;  %v10343_v61 = vld [vmem:[#allocation15_spill] sm:$0xff] }
 0xa2d   : > { %v3924_v62 = vmul.f32 1.442695, %v3804_v60  ;;  %v3926_v47 = vmul.f32 1.442695, %v3805_v29  ;;  %v10341_v29 = vld [vmem:[#allocation78_spill] sm:$0xff] }
 0xa2e   : > { %v3985_v54 = vmul.f32 %v10341_v29, %v3953_v39  ;;  %v10345_v39 = vld [vmem:[#allocation24_spill] sm:$0xff] }
 0xa2f   : > { %6704 = vpow2.f32 %v3924_v62 }
 0xa30   : > { %6706 = vpow2.f32 %v3926_v47 }
 0xa31   : > { %6708 = vrcp.f32 %v5149_v22  ;;  %v5150_v22 = vld [vmem:[#allocation3 + $0x118] sm:$0xff] }
 0xa32   : > { %6710 = vrcp.f32 %v5150_v22  ;;  %v9687_v23 = vpop.permute.xlu2 %4340  ;;  %v3955_v22 = vld [vmem:[#allocation3 + $0x170] sm:$0xff] }
 0xa33   : > { %10344 = vst [vmem:[#allocation38_spill] sm:$0xff] %v9687_v23 }
 0xa35   : > { %v6705_v9 = vpop.eup %6704  ;;  %5250 = vperm.xlu0 %6266, %v6703_v34  }
 0xa36   : > { %v6707_v49 = vpop.eup %6706 }
 0xa37   : > { %v9673_v20 = vadd.f32 %v6707_v49, %v6705_v9  ;;  %v6709_v2 = vpop.eup %6708 }
 0xa38   : > { %v6711_v34 = vpop.eup %6710 }
 0xa3a   : > { %5255 = vperm.xlu1 %6267, %v6709_v2  }
 0xa49   : > { %4057 = vadd.xlane.f32.xlu2 %v9466_v4  ;;  %v4046_v38 = vpop.xlane.xlu1 %4045 }
 0xa4a   : > { %v4114_v60 = vadd.f32 %v4046_v38, %v3986_v55 }
 0xa4c   : > { %4146 = vst.msk [vmem:[#allocation3 + $0x168] sm:$0xff] %vm747_vm0, %v4114_v60 }
 0xa4e   : > { %v4043_v62 = vpop.xlane.xlu0 %4042 }
 0xa4f   : > { %v4113_v47 = vadd.f32 %v4043_v62, %v3985_v54 }
 0xa51   : > { %4145 = vst.msk [vmem:[#allocation3 + $0x160] sm:$0xff] %vm747_vm0, %v4113_v47 }
 0xa5f   : > { %4060 = vadd.xlane.f32.xlu0 %v9446_v53 }
 0xa61   : > { %v3736_v2 = vpop.permute.xlu0 %3735  ;;  %5260 = vperm.xlu2 %6265, %v6711_v34   ;;  %v3741_v38 = vpop.permute.xlu1 %3740  ;;  %v5151_v34 = vld [vmem:[#allocation3 + $0x120] sm:$0xff] }
 0xa62   : > { %v3806_v4 = vsub.f32 %v10342_v63, %v3736_v2  ;;  %v3807_v55 = vsub.f32 %v10343_v61, %v3736_v2  ;;  %v3808_v60 = vsub.f32 %v9238_v50, %v3741_v38  ;;  %v3809_v29 = vsub.f32 %v10345_v39, %v3741_v38  ;;  %v10346_v2 = vld [vmem:[#allocation32_spill] sm:$0xff] }
 0xa63   : > { %v3987_v63 = vmul.f32 %v10346_v2, %v3955_v22  ;;  %v10348_v22 = vld [vmem:[#allocation9_spill] sm:$0xff] }
 0xa64   : > { %v3928_v54 = vmul.f32 1.442695, %v3806_v4  ;;  %v3930_v62 = vmul.f32 1.442695, %v3807_v55  ;;  %4063 = vadd.xlane.f32.xlu1 %v9471_v27  ;;  %v3932_v47 = vmul.f32 1.442695, %v3808_v60 }
 0xa65   : > { %v3934_v53 = vmul.f32 1.442695, %v3809_v29 }
 0xa66   : > { %6712 = vpow2.f32 %v3928_v54 }
 0xa67   : > { %6714 = vpow2.f32 %v3930_v62  ;;  %v5152_v62 = vld [vmem:[#allocation3 + $0x128] sm:$0xff] }
 0xa68   : > { %6716 = vpow2.f32 %v3932_v47  ;;  %v10347_v47 = vld [vmem:[#allocation22_spill] sm:$0xff] }
 0xa69   : > { %6718 = vpow2.f32 %v3934_v53 }
 0xa6a   : > { %6720 = vrcp.f32 %v5151_v34 }
 0xa6b   : > { %v4049_v61 = vpop.xlane.xlu2 %4048  ;;  %6722 = vrcp.f32 %v5152_v62 }
 0xa6c   : > { %v6713_v23 = vpop.eup %6712  ;;  %v4115_v35 = vadd.f32 %v4049_v61, %v3987_v63 }
 0xa6d   : > { %v6715_v50 = vpop.eup %6714  ;;  %v4418_v38 = vpack.c.bf16 %v6713_v23, %v6705_v9 }
 0xa6e   : > { %v6717_v4 = vpop.eup %6716  ;;  %4147 = vst.msk [vmem:[#allocation3 + $0x170] sm:$0xff] %vm747_vm0, %v4115_v35  ;;  %v4419_v27 = vpack.c.bf16 %v6715_v50, %v6707_v49  ;;  %v9694_v55 = vadd.f32 %v6715_v50, %v6713_v23  ;;  %v10349_v50 = vld [vmem:[#allocation73_spill] sm:$0xff] }
 0xa6f   : > { %v6719_v60 = vpop.eup %6718  ;;  %4596 = vmatmul.bf16.gmra.mxu0 %v4418_v38  ;;  %v4358_v38 = vmul.f32 0.0, %v10349_v50 }
 0xa70   : > { %4685 = vmatmul.bf16.gmra.mxu1 %v4419_v27  ;;  %v9696_v39 = vadd.f32 %v6719_v60, %v6717_v4  ;;  %v6721_v29 = vpop.eup %6720 }
 0xa71   : > { %v6723_v49 = vpop.eup %6722 }
 0xa73   : > { %v3746_v54 = vpop.permute.xlu2 %3745  ;;  %5265 = vperm.xlu0 %6266, %v6721_v29  }
 0xa74   : > { %v3810_v53 = vsub.f32 %v10347_v47, %v3746_v54  ;;  %v3811_v34 = vsub.f32 %v10348_v22, %v3746_v54  ;;  %v10350_v54 = vld [vmem:[#allocation20_spill] sm:$0xff] }
 0xa75   : > { %v4696_v47 = vadd.f32 %v10350_v54, %v4358_v38 }
 0xa76   : > { %v3936_v9 = vmul.f32 1.442695, %v3810_v53  ;;  %v3938_v2 = vmul.f32 1.442695, %v3811_v34  ;;  %v9708_v34 = vpop.permute.xlu0 %4345 }
 0xa78   : > { %6724 = vpow2.f32 %v3936_v9  ;;  %v9710_v9 = vpop.permute.xlu1 %4350 }
 0xa79   : > { %6726 = vpow2.f32 %v3938_v2  ;;  %v3957_v2 = vld [vmem:[#allocation3 + $0x180] sm:$0xff] }
 0xa7b   : > { %v9700_v35 = vpop.permute.xlu2 %4355 }
 0xa7d   : > { %5270 = vperm.xlu1 %6267, %v6723_v49   ;;  %v10351_v49 = vld [vmem:[#allocation27_spill] sm:$0xff] }
 0xa7e   : > { %v6725_v23 = vpop.eup %6724 }
 0xa7f   : > { %v6727_v63 = vpop.eup %6726  ;;  %v4420_v61 = vpack.c.bf16 %v6725_v23, %v6717_v4  ;;  %v3956_v4 = vld [vmem:[#allocation3 + $0x178] sm:$0xff] }
 0xa80   : > { %v4421_v27 = vpack.c.bf16 %v6727_v63, %v6719_v60  ;;  %v9703_v29 = vadd.f32 %v6727_v63, %v6725_v23  ;;  %v3988_v60 = vmul.f32 %v10351_v49, %v3956_v4  ;;  %v10352_v23 = vld [vmem:[#allocation39_spill] sm:$0xff] }
 0xa81   : > { %4601 = vmatmul.bf16.vlgmr.msra.gmra.mxu2 %v4420_v61  ;;  %v3989_v63 = vmul.f32 %v10352_v23, %v3957_v2 }
 0xa82   : > { %4690 = vmatmul.bf16.vlgmr.msra.gmra.mxu3 %v4421_v27 }
 0xa83   : > { %v5246_v62 = vpop.permute.xlu2 %5245 }
 0xa84   : > { %v5403_v53 = vmul.f32 %v5246_v62, %v4696_v47  ;;  %v10353_v47 = vld [vmem:[#allocation14_spill] sm:$0xff]  ;;  %v10354_v62 = vld [vmem:[#allocation21_spill] sm:$0xff] }
 0xa86   : > { %v5435_v22 = vpack.c.bf16 %v5403_v53, %v5403_v53  ;;  %v4619_v53 = vadd.f32 %v10354_v62, %v10353_v47 }
 0xa88   : > { %5467 = vst [vmem:[%s8439_s30 + $0x4] sm:$0xf] %v5435_v22  ;;  %v10355_v22 = vld [vmem:[#allocation55_spill] sm:$0xff] }
 0xa89   : > { %v4359_v4 = vmul.f32 0.0, %v10355_v22  ;;  %v10357_v22 = vld [vmem:[#allocation35_spill] sm:$0xff] }
 0xa8a   : > { %4066 = vadd.xlane.f32.xlu2 %v9531_v37  ;;  %v5153_v37 = vld [vmem:[#allocation3 + $0x130] sm:$0xff] }
 0xa8b   : > { %6728 = vrcp.f32 %v5153_v37  ;;  %v4697_v2 = vadd.f32 %v4619_v53, %v4359_v4  ;;  %v5155_v37 = vld [vmem:[#allocation3 + $0x140] sm:$0xff]  ;;  %v10358_v4 = vld [vmem:[#allocation26_spill] sm:$0xff] }
 0xa91   : > { %v6729_v54 = vpop.eup %6728 }
 0xa94   : > { %v4052_v61 = vpop.xlane.xlu0 %4051  ;;  %v4055_v50 = vpop.xlane.xlu1 %4054 }
 0xa95   : > { %v4116_v27 = vadd.f32 %v4052_v61, %v3988_v60  ;;  %v4117_v38 = vadd.f32 %v4055_v50, %v3989_v63  ;;  %v5154_v60 = vld [vmem:[#allocation3 + $0x138] sm:$0xff]  ;;  %v10356_v50 = vld [vmem:[#allocation29_spill] sm:$0xff] }
 0xa96   : > { %6730 = vrcp.f32 %v5154_v60 }
 0xa97   : > { %4148 = vst.msk [vmem:[#allocation3 + $0x178] sm:$0xff] %vm747_vm0, %v4116_v27  ;;  %6732 = vrcp.f32 %v5155_v37  ;;  %v3960_v37 = vld [vmem:[#allocation3 + $0x198] sm:$0xff] }
 0xa98   : > { %4149 = vst.msk [vmem:[#allocation3 + $0x180] sm:$0xff] %vm747_vm0, %v4117_v38 }
 0xa9c   : > { %v6731_v38 = vpop.eup %6730 }
 0xa9d   : > { %4069 = vadd.xlane.f32.xlu0 %v9516_v40  ;;  %v6733_v53 = vpop.eup %6732 }
 0xaa2   : > { %5275 = vperm.xlu2 %6265, %v6729_v54   ;;  %v3958_v54 = vld [vmem:[#allocation3 + $0x188] sm:$0xff] }
 0xaa3   : > { %v3990_v47 = vmul.f32 %v9387_v48, %v3958_v54  ;;  %v3992_v54 = vmul.f32 %v9393_v51, %v3960_v37  ;;  %v4629_v51 = vadd.f32 %v9487_v31, %v9485_v42  ;;  %v4632_v31 = vadd.f32 %v9495_v5, %v9493_v18  ;;  %v10362_v37 = vld [vmem:[#allocation16_spill] sm:$0xff]  ;;  %v3963_v18 = vld [vmem:[#allocation3 + $0x1b0] sm:$0xff]  ;;  %v10363_v5 = vld [vmem:[#allocation11_spill] sm:$0xff] }
 0xaa7   : > { %4072 = vadd.xlane.f32.xlu1 %v9546_v10  ;;  %v5251_v49 = vpop.permute.xlu0 %5250 }
 0xaa8   : > { %v5404_v23 = vmul.f32 %v5251_v49, %v4697_v2  ;;  %v4624_v2 = vadd.f32 %v10358_v4, %v10357_v22  ;;  %v10359_v49 = vld [vmem:[#allocation68_spill] sm:$0xff]  ;;  %v10360_v22 = vld [vmem:[#allocation23_spill] sm:$0xff] }
 0xaa9   : > { %v4361_v60 = vmul.f32 0.0, %v10359_v49  ;;  %v10361_v49 = vld [vmem:[#allocation67_spill] sm:$0xff] }
 0xaaa   : > { %v5436_v63 = vpack.c.bf16 %v5404_v23, %v5404_v23 }
 0xaab   : > { %v4699_v23 = vadd.f32 %v4624_v2, %v4361_v60  ;;  %v4363_v60 = vmul.f32 0.0, %v10361_v49 }
 0xaac   : > { %5468 = vst [vmem:[%s8439_s30 + $0xc] sm:$0xf] %v5436_v63  ;;  %v5256_v61 = vpop.permute.xlu1 %5255 }
 0xaad   : > { %v5405_v40 = vmul.f32 %v5256_v61, %v10356_v50 }
 0xaaf   : > { %v5437_v27 = vpack.c.bf16 %v5405_v40, %v5405_v40  ;;  %v3959_v40 = vld [vmem:[#allocation3 + $0x190] sm:$0xff] }
 0xab0   : > { %v3991_v48 = vmul.f32 %v9365_v19, %v3959_v40  ;;  %v3961_v40 = vld [vmem:[#allocation3 + $0x1a0] sm:$0xff] }
 0xab1   : > { %5469 = vst [vmem:[%s8439_s30 + $0x14] sm:$0xf] %v5437_v27  ;;  %5280 = vperm.xlu0 %6266, %v6731_v38  }
 0xabc   : > { %v4058_v10 = vpop.xlane.xlu2 %4057 }
 0xabd   : > { %v4118_v62 = vadd.f32 %v4058_v10, %v3990_v47 }
 0xabf   : > { %4150 = vst.msk [vmem:[#allocation3 + $0x188] sm:$0xff] %vm747_vm0, %v4118_v62  ;;  %v5156_v62 = vld [vmem:[#allocation3 + $0x148] sm:$0xff] }
 0xac0   : > { %5285 = vperm.xlu1 %6267, %v6733_v53   ;;  %6734 = vrcp.f32 %v5156_v62  ;;  %v5157_v53 = vld [vmem:[#allocation3 + $0x150] sm:$0xff] }
 0xac1   : > { %6736 = vrcp.f32 %v5157_v53 }
 0xac4   : > { %v5261_v63 = vpop.permute.xlu2 %5260 }
 0xac5   : > { %v5406_v61 = vmul.f32 %v5261_v63, %v4699_v23 }
 0xac7   : > { %v5438_v50 = vpack.c.bf16 %v5406_v61, %v5406_v61 }
 0xac9   : > { %5470 = vst [vmem:[%s8439_s30 + $0x1c] sm:$0xf] %v5438_v50 }
 0xacb   : > { %4075 = vadd.xlane.f32.xlu2 %v9614_v16  ;;  %v6735_v16 = vpop.eup %6734 }
 0xacc   : > { %v6737_v23 = vpop.eup %6736 }
 0xad2   : > { %v4061_v27 = vpop.xlane.xlu0 %4060 }
 0xad3   : > { %v4119_v38 = vadd.f32 %v4061_v27, %v3991_v48  ;;  %v5158_v48 = vld [vmem:[#allocation3 + $0x158] sm:$0xff]  ;;  %v3993_v27 = vmul.f32 %v9428_v17, %v3961_v40  ;;  %v3962_v17 = vld [vmem:[#allocation3 + $0x1a8] sm:$0xff] }
 0xad4   : > { %6738 = vrcp.f32 %v5158_v48  ;;  %v4637_v48 = vadd.f32 %v9513_v45, %v9511_v33  ;;  %v4639_v33 = vadd.f32 %v9524_v46, %v9522_v12  ;;  %v10366_v45 = vld [vmem:[#allocation30_spill] sm:$0xff]  ;;  %v3966_v12 = vld [vmem:[#allocation3 + $0x1c8] sm:$0xff]  ;;  %v5162_v46 = vld [vmem:[#allocation3 + $0x178] sm:$0xff] }
 0xad5   : > { %4151 = vst.msk [vmem:[#allocation3 + $0x190] sm:$0xff] %vm747_vm0, %v4119_v38 }
 0xad7   : > { %v4064_v47 = vpop.xlane.xlu1 %4063 }
 0xad8   : > { %v4120_v10 = vadd.f32 %v4064_v47, %v3992_v54  ;;  %v4364_v54 = vmul.f32 0.0, %v10362_v37  ;;  %v5161_v37 = vld [vmem:[#allocation3 + $0x170] sm:$0xff] }
 0xada   : > { %4152 = vst.msk [vmem:[#allocation3 + $0x198] sm:$0xff] %vm747_vm0, %v4120_v10  ;;  %v4702_v47 = vadd.f32 %v4632_v31, %v4364_v54 }
 0xadb   : > { %4078 = vadd.xlane.f32.xlu0 %v9602_v1  ;;  %v4701_v1 = vadd.f32 %v4629_v51, %v4363_v60  ;;  %v5159_v51 = vld [vmem:[#allocation3 + $0x160] sm:$0xff] }
 0xadc   : > { %6740 = vrcp.f32 %v5159_v51 }
 0xae3   : > { %5290 = vperm.xlu2 %6265, %v6735_v16  }
 0xae5   : > { %v5266_v19 = vpop.permute.xlu0 %5265 }
 0xae6   : > { %v5407_v4 = vmul.f32 %v5266_v19, %v10360_v22  ;;  %v3994_v19 = vmul.f32 %v9417_v7, %v3962_v17  ;;  %v10364_v7 = vld [vmem:[#allocation42_spill] sm:$0xff] }
 0xae7   : > { %v4365_v60 = vmul.f32 0.0, %v10364_v7 }
 0xae8   : > { %v5439_v2 = vpack.c.bf16 %v5407_v4, %v5407_v4  ;;  %v3995_v4 = vmul.f32 %v10363_v5, %v3963_v18 }
 0xaea   : > { %5471 = vst [vmem:[%s8439_s30 + $0x24] sm:$0xf] %v5439_v2  ;;  %4081 = vadd.xlane.f32.xlu1 %v9620_v36  ;;  %v6739_v36 = vpop.eup %6738 }
 0xaef   : > { %5295 = vperm.xlu0 %6266, %v6737_v23   ;;  %v5271_v63 = vpop.permute.xlu1 %5270 }
 0xaf0   : > { %v5408_v61 = vmul.f32 %v5271_v63, %v4701_v1  ;;  %v6741_v1 = vpop.eup %6740 }
 0xaf2   : > { %v5440_v50 = vpack.c.bf16 %v5408_v61, %v5408_v61  ;;  %v5160_v61 = vld [vmem:[#allocation3 + $0x168] sm:$0xff] }
 0xaf3   : > { %6742 = vrcp.f32 %v5160_v61 }
 0xaf4   : > { %5472 = vst [vmem:[%s8439_s30 + $0x2c] sm:$0xf] %v5440_v50  ;;  %6744 = vrcp.f32 %v5161_v37 }
 0xaf5   : > { %6746 = vrcp.f32 %v5162_v46  ;;  %v3968_v46 = vld [vmem:[#allocation3 + $0x1d8] sm:$0xff] }
 0xaf9   : > { %v6743_v40 = vpop.eup %6742 }
 0xafd   : > { %v4067_v38 = vpop.xlane.xlu2 %4066 }
 0xafe   : > { %v4121_v42 = vadd.f32 %v4067_v38, %v3993_v27 }
 0xb00   : > { %4153 = vst.msk [vmem:[#allocation3 + $0x1a0] sm:$0xff] %vm747_vm0, %v4121_v42 }
 0xb03   : > { %5300 = vperm.xlu1 %6267, %v6739_v36   ;;  %v3964_v36 = vld [vmem:[#allocation3 + $0x1b8] sm:$0xff] }
 0xb04   : > { %v3996_v54 = vmul.f32 %v9481_v0, %v3964_v36 }
 0xb05   : > { %v5276_v10 = vpop.permute.xlu2 %5275 }
 0xb06   : > { %v5409_v62 = vmul.f32 %v5276_v10, %v4702_v47 }
 0xb08   : > { %v5441_v16 = vpack.c.bf16 %v5409_v62, %v5409_v62  ;;  %v6745_v62 = vpop.eup %6744 }
 0xb0a   : > { %5473 = vst [vmem:[%s8439_s30 + $0x34] sm:$0xf] %v5441_v16 }
 0xb0c   : > { %4084 = vadd.xlane.f32.xlu2 %v9669_v32  ;;  %v4634_v32 = vadd.f32 %v9504_v11, %v9502_v44  ;;  %v10365_v44 = vld [vmem:[#allocation33_spill] sm:$0xff] }
 0xb0d   : > { %v4366_v11 = vmul.f32 0.0, %v10365_v44 }
 0xb0e   : > { %v4703_v23 = vadd.f32 %v4634_v32, %v4365_v60  ;;  %v5163_v60 = vld [vmem:[#allocation3 + $0x180] sm:$0xff] }
 0xb0f   : > { %v4704_v27 = vadd.f32 %v4637_v48, %v4366_v11  ;;  %6748 = vrcp.f32 %v5163_v60  ;;  %v10368_v48 = vld [vmem:[#allocation49_spill] sm:$0xff] }
 0xb10   : > { %v4070_v53 = vpop.xlane.xlu0 %4069  ;;  %v4369_v44 = vmul.f32 0.0, %v10368_v48 }
 0xb11   : > { %v4122_v22 = vadd.f32 %v4070_v53, %v3994_v19 }
 0xb13   : > { %4154 = vst.msk [vmem:[#allocation3 + $0x1a8] sm:$0xff] %vm747_vm0, %v4122_v22  ;;  %v3965_v22 = vld [vmem:[#allocation3 + $0x1c0] sm:$0xff] }
 0xb14   : > { %v3997_v0 = vmul.f32 %v9473_v25, %v3965_v22 }
 0xb19   : > { %4087 = vadd.xlane.f32.xlu0 %v9666_v14 }
 0xb1a   : > { %v4073_v2 = vpop.xlane.xlu1 %4072 }
 0xb1b   : > { %v4123_v49 = vadd.f32 %v4073_v2, %v3995_v4  ;;  %v4642_v4 = vadd.f32 %v9535_v43, %v9529_v24  ;;  %v3998_v2 = vmul.f32 %v9506_v56, %v3966_v12  ;;  %v5166_v24 = vld [vmem:[#allocation3 + $0x198] sm:$0xff]  ;;  %v5168_v43 = vld [vmem:[#allocation3 + $0x1a8] sm:$0xff] }
 0xb1d   : > { %4155 = vst.msk [vmem:[#allocation3 + $0x1b0] sm:$0xff] %vm747_vm0, %v4123_v49  ;;  %v10367_v49 = vld [vmem:[#allocation40_spill] sm:$0xff] }
 0xb1e   : > { %v4368_v32 = vmul.f32 0.0, %v10367_v49 }
 0xb20   : > { %v4706_v25 = vadd.f32 %v4642_v4, %v4368_v32 }
 0xb23   : > { %v5281_v63 = vpop.permute.xlu0 %5280 }
 0xb24   : > { %v5410_v14 = vmul.f32 %v5281_v63, %v4703_v23  ;;  %5305 = vperm.xlu2 %6265, %v6741_v1   ;;  %v6747_v1 = vpop.eup %6746 }
 0xb25   : > { %v6749_v56 = vpop.eup %6748 }
 0xb26   : > { %v5442_v50 = vpack.c.bf16 %v5410_v14, %v5410_v14  ;;  %v4644_v14 = vadd.f32 %v9550_v26, %v9548_v3  ;;  %v3967_v3 = vld [vmem:[#allocation3 + $0x1d0] sm:$0xff] }
 0xb28   : > { %5474 = vst [vmem:[%s8439_s30 + $0x3c] sm:$0xf] %v5442_v50  ;;  %v5169_v50 = vld [vmem:[#allocation3 + $0x1b0] sm:$0xff] }
 0xb2d   : > { %4090 = vadd.xlane.f32.xlu1 %v9673_v20  ;;  %5310 = vperm.xlu0 %6266, %v6743_v40   ;;  %v4367_v20 = vmul.f32 0.0, %v10366_v45 }
 0xb2f   : > { %v4705_v16 = vadd.f32 %v4639_v33, %v4367_v20  ;;  %v5164_v33 = vld [vmem:[#allocation3 + $0x188] sm:$0xff] }
 0xb32   : > { %v5286_v38 = vpop.permute.xlu1 %5285 }
 0xb33   : > { %v5411_v42 = vmul.f32 %v5286_v38, %v4704_v27  ;;  %v4707_v38 = vadd.f32 %v4644_v14, %v4369_v44 }
 0xb35   : > { %v5443_v31 = vpack.c.bf16 %v5411_v42, %v5411_v42 }
 0xb37   : > { %5475 = vst [vmem:[%s8439_s30 + $0x44] sm:$0xf] %v5443_v31 }
 0xb3e   : > { %v4076_v47 = vpop.xlane.xlu2 %4075 }
 0xb3f   : > { %v4124_v10 = vadd.f32 %v4076_v47, %v3996_v54 }
 0xb41   : > { %4156 = vst.msk [vmem:[#allocation3 + $0x1b8] sm:$0xff] %vm747_vm0, %v4124_v10 }
 0xb46   : > { %5315 = vperm.xlu1 %6267, %v6745_v62   ;;  %v5291_v17 = vpop.permute.xlu2 %5290  ;;  %v10370_v62 = vld [vmem:[#allocation46_spill] sm:$0xff] }
 0xb47   : > { %v5412_v19 = vmul.f32 %v5291_v17, %v4705_v16  ;;  %v10371_v16 = vld [vmem:[#allocation54_spill] sm:$0xff] }
 0xb48   : > { %v4647_v17 = vadd.f32 %v10371_v16, %v10370_v62  ;;  %v3970_v16 = vld [vmem:[#allocation3 + $0x1e8] sm:$0xff] }
 0xb49   : > { %v5444_v53 = vpack.c.bf16 %v5412_v19, %v5412_v19  ;;  %v10372_v19 = vld [vmem:[#allocation36_spill] sm:$0xff] }
 0xb4b   : > { %5476 = vst [vmem:[%s8439_s30 + $0x4c] sm:$0xf] %v5444_v53  ;;  %v4370_v53 = vmul.f32 0.0, %v10372_v19  ;;  %v4002_v19 = vmul.f32 %v9624_v59, %v3970_v16 }
 0xb4d   : > { %4093 = vadd.xlane.f32.xlu2 %v9694_v55  ;;  %v4708_v22 = vadd.f32 %v4647_v17, %v4370_v53 }
 0xb4e   : > { %v4079_v18 = vpop.xlane.xlu0 %4078 }
 0xb4f   : > { %v4125_v5 = vadd.f32 %v4079_v18, %v3997_v0  ;;  %v5167_v18 = vld [vmem:[#allocation3 + $0x1a0] sm:$0xff] }
 0xb51   : > { %4157 = vst.msk [vmem:[#allocation3 + $0x1c0] sm:$0xff] %vm747_vm0, %v4125_v5 }
 0xb57   : > { %4096 = vadd.xlane.f32.xlu0 %v9696_v39  ;;  %v5165_v39 = vld [vmem:[#allocation3 + $0x190] sm:$0xff] }
 0xb58   : > { %6750 = vrcp.f32 %v5165_v39  ;;  %v5171_v11 = vld [vmem:[#allocation3 + $0x1c0] sm:$0xff]  ;;  %v10374_v39 = vld [vmem:[#allocation58_spill] sm:$0xff] }
 0xb59   : > { %6752 = vrcp.f32 %v5166_v24  ;;  %v10376_v24 = vld [vmem:[#allocation45_spill] sm:$0xff] }
 0xb5a   : > { %6754 = vrcp.f32 %v5168_v43  ;;  %v3969_v43 = vld [vmem:[#allocation3 + $0x1e0] sm:$0xff] }
 0xb5b   : > { %6756 = vrcp.f32 %v5169_v50 }
 0xb5c   : > { %6758 = vrcp.f32 %v5171_v11 }
 0xb5d   : > { %v4082_v51 = vpop.xlane.xlu1 %4081 }
 0xb5e   : > { %v4126_v55 = vadd.f32 %v4082_v51, %v3998_v2  ;;  %v6751_v61 = vpop.eup %6750  ;;  %v10373_v2 = vld [vmem:[#allocation43_spill] sm:$0xff] }
 0xb5f   : > { %v6753_v40 = vpop.eup %6752  ;;  %v4000_v51 = vmul.f32 %v10373_v2, %v3968_v46  ;;  %v10383_v46 = vld [vmem:[#allocation44_spill] sm:$0xff]  ;;  %v3971_v2 = vld [vmem:[#allocation3 + $0x1f0] sm:$0xff] }
 0xb60   : > { %4158 = vst.msk [vmem:[#allocation3 + $0x1c8] sm:$0xff] %vm747_vm0, %v4126_v55  ;;  %v6755_v27 = vpop.eup %6754  ;;  %v5170_v55 = vld [vmem:[#allocation3 + $0x1b8] sm:$0xff]  ;;  %v4003_v59 = vmul.f32 %v9626_v15, %v3971_v2 }
 0xb61   : > { %v5296_v7 = vpop.permute.xlu0 %5295  ;;  %v6757_v54 = vpop.eup %6756 }
 0xb62   : > { %v5413_v23 = vmul.f32 %v5296_v7, %v4706_v25  ;;  %v6759_v26 = vpop.eup %6758 }
 0xb64   : > { %v5445_v63 = vpack.c.bf16 %v5413_v23, %v5413_v23 }
 0xb65   : > { %5320 = vperm.xlu2 %6265, %v6747_v1   ;;  %v10375_v1 = vld [vmem:[#allocation70_spill] sm:$0xff] }
 0xb66   : > { %5477 = vst [vmem:[%s8439_s30 + $0x54] sm:$0xf] %v5445_v63  ;;  %v4649_v63 = vadd.f32 %v10375_v1, %v10374_v39 }
 0xb67   : > { %v5172_v37 = vld [vmem:[#allocation3 + $0x1c8] sm:$0xff] }
 0xb68   : > { %6760 = vrcp.f32 %v5172_v37  ;;  %v10378_v37 = vld [vmem:[#allocation71_spill] sm:$0xff] }
 0xb69   : > { %6762 = vrcp.f32 %v5164_v33  ;;  %v4668_v33 = vpop.f32.mrf.mxu1 }
 0xb6a   : > { %6764 = vrcp.f32 %v5167_v18  ;;  %v10381_v18 = vld [vmem:[#allocation63_spill] sm:$0xff] }
 0xb6b   : > { %5325 = vperm.xlu0 %6266, %v6749_v56   ;;  %6766 = vrcp.f32 %v5170_v55  ;;  %v4371_v56 = vmul.f32 0.0, %v10376_v24 }
 0xb6d   : > { %5335 = vperm.xlu2 %6265, %v6751_v61   ;;  %v4709_v14 = vadd.f32 %v4649_v63, %v4371_v56  ;;  %v10384_v63 = vld [vmem:[#allocation53_spill] sm:$0xff] }
 0xb6e   : > { %v6761_v20 = vpop.eup %6760  ;;  %v4376_v24 = vmul.f32 0.0, %v10384_v63 }
 0xb6f   : > { %v6763_v5 = vpop.eup %6762 }
 0xb70   : > { %4099 = vadd.xlane.f32.xlu1 %v9703_v29  ;;  %v10369_v29 = vld [vmem:[#allocation57_spill] sm:$0xff]  ;;  %v6765_v25 = vpop.eup %6764 }
 0xb71   : > { %v3999_v47 = vmul.f32 %v10369_v29, %v3967_v3  ;;  %v6767_v23 = vpop.eup %6766  ;;  %v9806_v53 = vpop.f32.mrf.mxu1 }
 0xb73   : > { %5340 = vperm.xlu0 %6266, %v6753_v40   ;;  %v10377_v40 = vld [vmem:[#allocation48_spill] sm:$0xff] }
 0xb74   : > { %v4001_v48 = vmul.f32 %v10377_v40, %v3969_v43 }
 0xb75   : > { %5350 = vperm.xlu2 %6265, %v6755_v27   ;;  %v5301_v42 = vpop.permute.xlu1 %5300 }
 0xb76   : > { %v5414_v31 = vmul.f32 %v5301_v42, %v4707_v38 }
 0xb78   : > { %v5446_v36 = vpack.c.bf16 %v5414_v31, %v5414_v31 }
 0xb7a   : > { %5478 = vst [vmem:[%s8439_s30 + $0x5c] sm:$0xf] %v5446_v36 }
 0xb7b   : > { %5355 = vperm.xlu0 %6266, %v6757_v54   ;;  %v10379_v54 = vld [vmem:[#allocation8_spill] sm:$0xff] }
 0xb7c   : > { %v4652_v3 = vadd.f32 %v10379_v54, %v10378_v37  ;;  %v10388_v37 = vld [vmem:[#allocation37_spill] sm:$0xff] }
 0xb7d   : > { %5365 = vperm.xlu2 %6265, %v6759_v26   ;;  %v10380_v26 = vld [vmem:[#allocation65_spill] sm:$0xff]  ;;  %v4374_v54 = vmul.f32 0.0, %v10388_v37 }
 0xb7e   : > { %v4372_v29 = vmul.f32 0.0, %v10380_v26 }
 0xb7f   : > { %v4085_v10 = vpop.xlane.xlu2 %4084 }
 0xb80   : > { %v4127_v45 = vadd.f32 %v4085_v10, %v3999_v47  ;;  %v4579_v47 = vpop.f32.mrf.mxu0  ;;  %v4710_v10 = vadd.f32 %v4652_v3, %v4372_v29 }
 0xb82   : > { %4159 = vst.msk [vmem:[#allocation3 + $0x1d0] sm:$0xff] %vm747_vm0, %v4127_v45 }
 0xb83   : > { %5370 = vperm.xlu0 %6266, %v6761_v20  }
 0xb87   : > { %v5306_v0 = vpop.permute.xlu2 %5305 }
 0xb88   : > { %v5415_v12 = vmul.f32 %v5306_v0, %v4708_v22  ;;  %v9803_v17 = vpop.f32.mrf.mxu0 }
 0xb89   : > { %5330 = vperm.xlu1 %6267, %v6763_v5   ;;  %v5173_v60 = vld [vmem:[#allocation3 + $0x1d0] sm:$0xff]  ;;  %v10382_v5 = vld [vmem:[#allocation31_spill] sm:$0xff] }
 0xb8a   : > { %v5447_v4 = vpack.c.bf16 %v5415_v12, %v5415_v12  ;;  %v4654_v12 = vadd.f32 %v10382_v5, %v10381_v18 }
 0xb8c   : > { %5479 = vst [vmem:[%s8439_s30 + $0x64] sm:$0xf] %v5447_v4  ;;  %v4088_v49 = vpop.xlane.xlu0 %4087  ;;  %v4373_v4 = vmul.f32 0.0, %v10383_v46 }
 0xb8d   : > { %v4128_v32 = vadd.f32 %v4088_v49, %v4000_v51 }
 0xb8e   : > { %v4711_v51 = vadd.f32 %v4654_v12, %v4373_v4  ;;  %v10389_v12 = vld [vmem:[#allocation52_spill] sm:$0xff] }
 0xb8f   : > { %4160 = vst.msk [vmem:[#allocation3 + $0x1d8] sm:$0xff] %vm747_vm0, %v4128_v32  ;;  %v4377_v46 = vmul.f32 0.0, %v10389_v12 }
 0xb90   : > { %v9812_v32 = vpop.f32.mrf.mxu0 }
 0xb91   : > { %5345 = vperm.xlu1 %6267, %v6765_v25   ;;  %v9815_v25 = vpop.f32.mrf.mxu1 }
 0xb92   : > { %v4674_v37 = vadd.f32 %v9815_v25, %v9812_v32 }
 0xb96   : > { %v5174_v7 = vld [vmem:[#allocation3 + $0x1d8] sm:$0xff] }
 0xb97   : > { %6768 = vrcp.f32 %v5174_v7 }
 0xb98   : > { %6770 = vrcp.f32 %v5173_v60  ;;  %v4587_v40 = vpop.f32.mrf.mxu0 }
 0xb99   : > { %5360 = vperm.xlu1 %6267, %v6767_v23   ;;  %v4662_v23 = vadd.f32 %v9642_v52, %v9638_v21  ;;  %v10385_v21 = vld [vmem:[#allocation47_spill] sm:$0xff] }
 0xb9a   : > { %v4379_v52 = vmul.f32 0.0, %v10385_v21 }
 0xb9b   : > { %v4714_v56 = vadd.f32 %v4662_v23, %v4376_v24  ;;  %v10390_v23 = vld [vmem:[#allocation61_spill] sm:$0xff] }
 0xb9d   : > { %v6769_v61 = vpop.eup %6768 }
 0xb9e   : > { %5380 = vperm.xlu2 %6265, %v6769_v61   ;;  %v6771_v44 = vpop.eup %6770 }
 0xb9f   : > { %v5311_v50 = vpop.permute.xlu0 %5310 }
 0xba0   : > { %v5416_v11 = vmul.f32 %v5311_v50, %v4709_v14  ;;  %v4091_v27 = vpop.xlane.xlu1 %4090  ;;  %v4669_v14 = vadd.f32 %v4668_v33, %v4579_v47 }
 0xba1   : > { %v4129_v38 = vadd.f32 %v4091_v27, %v4001_v48  ;;  %5375 = vperm.xlu1 %6267, %v6771_v44   ;;  %v4676_v48 = vpop.f32.mrf.mxu1  ;;  %v10386_v27 = vld [vmem:[#allocation62_spill] sm:$0xff] }
 0xba2   : > { %v5448_v42 = vpack.c.bf16 %v5416_v11, %v5416_v11  ;;  %v4717_v11 = vadd.f32 %v4669_v14, %v4379_v52  ;;  %v4677_v3 = vadd.f32 %v4676_v48, %v4587_v40  ;;  %v4383_v14 = vmul.f32 0.0, %v9655_v41 }
 0xba3   : > { %4161 = vst.msk [vmem:[#allocation3 + $0x1e0] sm:$0xff] %vm747_vm0, %v4129_v38  ;;  %v10387_v38 = vld [vmem:[#allocation69_spill] sm:$0xff]  ;;  %v4385_v40 = vmul.f32 0.0, %v9675_v58 }
 0xba4   : > { %5480 = vst [vmem:[%s8439_s30 + $0x6c] sm:$0xf] %v5448_v42  ;;  %v4657_v42 = vadd.f32 %v10387_v38, %v10386_v27 }
 0xba6   : > { %v4712_v47 = vadd.f32 %v4657_v42, %v4374_v54 }
 0xbaa   : > { %v5175_v31 = vld [vmem:[#allocation3 + $0x1e0] sm:$0xff] }
 0xbab   : > { %6772 = vrcp.f32 %v5175_v31 }
 0xbb1   : > { %v6773_v36 = vpop.eup %6772 }
 0xbb2   : > { %5385 = vperm.xlu0 %6266, %v6773_v36  }
 0xbb8   : > { %v5316_v45 = vpop.permute.xlu1 %5315 }
 0xbb9   : > { %v5417_v20 = vmul.f32 %v5316_v45, %v4710_v10  ;;  %v4382_v10 = vmul.f32 0.0, %v9628_v13  ;;  %v4589_v45 = vpop.f32.mrf.mxu0 }
 0xbbb   : > { %v5449_v62 = vpack.c.bf16 %v5417_v20, %v5417_v20  ;;  %v4678_v20 = vpop.f32.mrf.mxu1  ;;  %v4720_v16 = vadd.f32 %v4677_v3, %v4382_v10  ;;  %v10391_v3 = vld [vmem:[#allocation64_spill] sm:$0xff] }
 0xbbd   : > { %5481 = vst [vmem:[%s8439_s30 + $0x74] sm:$0xf] %v5449_v62 }
 0xbc0   : > { %v4094_v22 = vpop.xlane.xlu2 %4093 }
 0xbc1   : > { %v4130_v0 = vadd.f32 %v4094_v22, %v4002_v19  ;;  %v3972_v19 = vld [vmem:[#allocation3 + $0x1f8] sm:$0xff]  ;;  %v4664_v22 = vadd.f32 %v9648_v6, %v9646_v28  ;;  %v4672_v6 = vadd.f32 %v9806_v53, %v9803_v17 }
 0xbc2   : > { %v4004_v13 = vmul.f32 %v9650_v8, %v3972_v19 }
 0xbc3   : > { %4162 = vst.msk [vmem:[#allocation3 + $0x1e8] sm:$0xff] %vm747_vm0, %v4130_v0 }
 0xbc8   : > { %v5321_v49 = vpop.permute.xlu2 %5320 }
 0xbc9   : > { %v5418_v55 = vmul.f32 %v5321_v49, %v4711_v51  ;;  %v4715_v49 = vadd.f32 %v4664_v22, %v4377_v46 }
 0xbca   : > { %v4097_v7 = vpop.xlane.xlu0 %4096  ;;  %v5176_v60 = vld [vmem:[#allocation3 + $0x1e8] sm:$0xff] }
 0xbcb   : > { %v5450_v39 = vpack.c.bf16 %v5418_v55, %v5418_v55  ;;  %v4131_v1 = vadd.f32 %v4097_v7, %v4003_v59  ;;  %6774 = vrcp.f32 %v5176_v60  ;;  %v4592_v59 = vpop.f32.mrf.mxu0  ;;  %v4681_v7 = vpop.f32.mrf.mxu1 }
 0xbcd   : > { %5482 = vst [vmem:[%s8439_s30 + $0x7c] sm:$0xf] %v5450_v39  ;;  %v4380_v39 = vmul.f32 0.0, %v10390_v23 }
 0xbce   : > { %4163 = vst.msk [vmem:[#allocation3 + $0x1f0] sm:$0xff] %vm747_vm0, %v4131_v1 }
 0xbcf   : > { %v4718_v8 = vadd.f32 %v4672_v6, %v4380_v39  ;;  %v4387_v39 = vmul.f32 0.0, %v9708_v34 }
 0xbd0   : > { %v5336_v43 = vpop.permute.xlu2 %5335 }
 0xbd1   : > { %v6775_v61 = vpop.eup %6774  ;;  %v5421_v15 = vmul.f32 %v5336_v43, %v4714_v56  ;;  %v4679_v56 = vadd.f32 %v4678_v20, %v4589_v45  ;;  %v10392_v45 = vld [vmem:[#allocation76_spill] sm:$0xff] }
 0xbd2   : > { %5390 = vperm.xlu1 %6267, %v6775_v61   ;;  %v4384_v20 = vmul.f32 0.0, %v10392_v45 }
 0xbd3   : > { %v5453_v50 = vpack.c.bf16 %v5421_v15, %v5421_v15  ;;  %v4594_v43 = vpop.f32.mrf.mxu0  ;;  %v4683_v61 = vpop.f32.mrf.mxu1  ;;  %v4721_v53 = vadd.f32 %v4679_v56, %v4383_v14 }
 0xbd5   : > { %5485 = vst [vmem:[%s8439_s30 + $0x94] sm:$0xf] %v5453_v50  ;;  %v5177_v44 = vld [vmem:[#allocation3 + $0x1f0] sm:$0xff]  ;;  %v4684_v50 = vadd.f32 %v4683_v61, %v4594_v43 }
 0xbd6   : > { %6776 = vrcp.f32 %v5177_v44 }
 0xbd7   : > { %v4723_v52 = vadd.f32 %v4684_v50, %v4385_v40 }
 0xbd8   : > { %v5351_v31 = vpop.permute.xlu2 %5350 }
 0xbd9   : > { %v5424_v36 = vmul.f32 %v5351_v31, %v4717_v11 }
 0xbdb   : > { %v5456_v26 = vpack.c.bf16 %v5424_v36, %v5424_v36  ;;  %v4597_v22 = vpop.f32.mrf.mxu0  ;;  %v4686_v32 = vpop.f32.mrf.mxu1 }
 0xbdc   : > { %v6777_v29 = vpop.eup %6776  ;;  %v4687_v25 = vadd.f32 %v4686_v32, %v4597_v22 }
 0xbdd   : > { %5488 = vst [vmem:[%s8439_s30 + $0xac] sm:$0xf] %v5456_v26  ;;  %5395 = vperm.xlu2 %6265, %v6777_v29   ;;  %v5326_v33 = vpop.permute.xlu0 %5325  ;;  %v4381_v26 = vmul.f32 0.0, %v10391_v3 }
 0xbde   : > { %v5419_v62 = vmul.f32 %v5326_v33, %v4712_v47  ;;  %v4682_v33 = vadd.f32 %v4681_v7, %v4592_v59 }
 0xbdf   : > { %v4719_v29 = vadd.f32 %v4674_v37, %v4381_v26 }
 0xbe0   : > { %v5451_v0 = vpack.c.bf16 %v5419_v62, %v5419_v62  ;;  %v5366_v18 = vpop.permute.xlu2 %5365  ;;  %v4722_v62 = vadd.f32 %v4682_v33, %v4384_v20 }
 0xbe1   : > { %v5427_v5 = vmul.f32 %v5366_v18, %v4720_v16 }
 0xbe2   : > { %5483 = vst [vmem:[%s8439_s30 + $0x84] sm:$0xf] %v5451_v0  ;;  %v10393_v0 = vld [vmem:[#allocation38_spill] sm:$0xff] }
 0xbe3   : > { %v5459_v4 = vpack.c.bf16 %v5427_v5, %v5427_v5  ;;  %v4100_v2 = vpop.xlane.xlu1 %4099  ;;  %v4386_v18 = vmul.f32 0.0, %v10393_v0  ;;  %v4599_v6 = vpop.f32.mrf.mxu0 }
 0xbe4   : > { %v4132_v51 = vadd.f32 %v4100_v2, %v4004_v13  ;;  %v4691_v2 = vpop.f32.mrf.mxu3 }
 0xbe5   : > { %5491 = vst [vmem:[%s8439_s30 + $0xc4] sm:$0xf] %v5459_v4  ;;  %v5341_v55 = vpop.permute.xlu0 %5340  ;;  %v4724_v5 = vadd.f32 %v4687_v25, %v4386_v18  ;;  %v4602_v4 = vpop.f32.mrf.mxu2 }
 0xbe6   : > { %4164 = vst.msk [vmem:[#allocation3 + $0x1f8] sm:$0xff] %vm747_vm0, %v4132_v51  ;;  %v5422_v28 = vmul.f32 %v5341_v55, %v4715_v49  ;;  %v4692_v51 = vadd.f32 %v4691_v2, %v4602_v4  ;;  %v4388_v49 = vmul.f32 0.0, %v9710_v9  ;;  %v4389_v9 = vmul.f32 0.0, %v9700_v35 }
 0xbe8   : > { %v5454_v60 = vpack.c.bf16 %v5422_v28, %v5422_v28  ;;  %v4726_v55 = vadd.f32 %v4692_v51, %v4388_v49 }
 0xbea   : > { %5486 = vst [vmem:[%s8439_s30 + $0x9c] sm:$0xf] %v5454_v60  ;;  %v4688_v60 = vpop.f32.mrf.mxu1 }
 0xbeb   : > { %v4689_v23 = vadd.f32 %v4688_v60, %v4599_v6 }
 0xbec   : > { %v4693_v43 = vpop.f32.mrf.mxu3 }
 0xbed   : > { %v5356_v1 = vpop.permute.xlu0 %5355  ;;  %v5178_v63 = vld [vmem:[#allocation3 + $0x1f8] sm:$0xff]  ;;  %v4604_v56 = vpop.f32.mrf.mxu2 }
 0xbee   : > { %v5425_v24 = vmul.f32 %v5356_v1, %v4718_v8  ;;  %6778 = vrcp.f32 %v5178_v63  ;;  %v4725_v8 = vadd.f32 %v4689_v23, %v4387_v39  ;;  %v4694_v61 = vadd.f32 %v4693_v43, %v4604_v56 }
 0xbf0   : > { %v5457_v15 = vpack.c.bf16 %v5425_v24, %v5425_v24 }
 0xbf2   : > { %5489 = vst [vmem:[%s8439_s30 + $0xb4] sm:$0xf] %v5457_v15  ;;  %v4727_v15 = vadd.f32 %v4694_v61, %v4389_v9 }
 0xbf4   : > { %v6779_v17 = vpop.eup %6778 }
 0xbf5   : > { %v5371_v48 = vpop.permute.xlu0 %5370  ;;  %5400 = vperm.xlu0 %6266, %v6779_v17  }
 0xbf6   : > { %v5428_v21 = vmul.f32 %v5371_v48, %v4721_v53 }
 0xbf8   : > { %v5460_v44 = vpack.c.bf16 %v5428_v21, %v5428_v21  ;;  %v5381_v11 = vpop.permute.xlu2 %5380 }
 0xbf9   : > { %v5430_v27 = vmul.f32 %v5381_v11, %v4723_v52 }
 0xbfa   : > { %5492 = vst [vmem:[%s8439_s30 + $0xcc] sm:$0xf] %v5460_v44 }
 0xbfb   : > { %v5462_v38 = vpack.c.bf16 %v5430_v27, %v5430_v27  ;;  %v5331_v42 = vpop.permute.xlu1 %5330 }
 0xbfc   : > { %v5420_v41 = vmul.f32 %v5331_v42, %v9608_v30 }
 0xbfd   : > { %5494 = vst [vmem:[%s8439_s30 + $0xdc] sm:$0xf] %v5462_v38 }
 0xbfe   : > { %v5452_v31 = vpack.c.bf16 %v5420_v41, %v5420_v41 }
 0xc00   : > { %5484 = vst [vmem:[%s8439_s30 + $0x8c] sm:$0xf] %v5452_v31 }
 0xc03   : > { %v5346_v36 = vpop.permute.xlu1 %5345 }
 0xc04   : > { %v5423_v58 = vmul.f32 %v5346_v36, %v9660_v57 }
 0xc06   : > { %v5455_v54 = vpack.c.bf16 %v5423_v58, %v5423_v58 }
 0xc08   : > { %5487 = vst [vmem:[%s8439_s30 + $0xa4] sm:$0xf] %v5455_v54 }
 0xc0b   : > { %v5361_v47 = vpop.permute.xlu1 %5360 }
 0xc0c   : > { %v5426_v10 = vmul.f32 %v5361_v47, %v4719_v29 }
 0xc0e   : > { %v5458_v30 = vpack.c.bf16 %v5426_v10, %v5426_v10 }
 0xc10   : > { %5490 = vst [vmem:[%s8439_s30 + $0xbc] sm:$0xf] %v5458_v30 }
 0xc13   : > { %v5376_v16 = vpop.permute.xlu1 %5375 }
 0xc14   : > { %v5429_v57 = vmul.f32 %v5376_v16, %v4722_v62 }
 0xc16   : > { %v5461_v19 = vpack.c.bf16 %v5429_v57, %v5429_v57 }
 0xc18   : > { %5493 = vst [vmem:[%s8439_s30 + $0xd4] sm:$0xf] %v5461_v19 }
 0xc24   : > { %v5386_v12 = vpop.permute.xlu0 %5385 }
 0xc25   : > { %v5431_v46 = vmul.f32 %v5386_v12, %v4724_v5 }
 0xc27   : > { %v5463_v13 = vpack.c.bf16 %v5431_v46, %v5431_v46 }
 0xc29   : > { %5495 = vst [vmem:[%s8439_s30 + $0xe4] sm:$0xf] %v5463_v13 }
 0xc37   : > { %v5396_v59 = vpop.permute.xlu2 %5395 }
 0xc38   : > { %v5433_v7 = vmul.f32 %v5396_v59, %v4726_v55 }
 0xc3a   : > { %v5465_v28 = vpack.c.bf16 %v5433_v7, %v5433_v7 }
 0xc3c   : > { %5497 = vst [vmem:[%s8439_s30 + $0xf4] sm:$0xf] %v5465_v28 }
 0xc44   : > { %v5391_v1 = vpop.permute.xlu1 %5390 }
 0xc45   : > { %v5432_v63 = vmul.f32 %v5391_v1, %v4725_v8 }
 0xc47   : > { %v5464_v24 = vpack.c.bf16 %v5432_v63, %v5432_v63 }
 0xc49   : > { %5496 = vst [vmem:[%s8439_s30 + $0xec] sm:$0xf] %v5464_v24 }
 0xc67   : > { %v5401_v14 = vpop.permute.xlu0 %5400 }
 0xc68   : > { %v5434_v50 = vmul.f32 %v5401_v14, %v4727_v15 }
 0xc6a   : > { %v5466_v17 = vpack.c.bf16 %v5434_v50, %v5434_v50 }
 0xc6c   : > { %5498 = vst [vmem:[%s8439_s30 + $0xfc] sm:$0xf] %v5466_v17 }
 0xc6d PF: > { %s13_s16 = sadd.s32 1, %s6818_s16   ;;  %s10394_s12 = smov %s6806_s13 }
 0xc6e   : > { %p10_p10 = scmp.ge.s32.totalorder %s13_s16, 4   ;;  %s10395_s13 = smov %s6882_s21 }
 0xc6f   : > { %s10396_s14 = smov %s6814_s15  ;;  %s10397_s15 = smov %s10399_s17 }
 0xc70   :  { %12 = sbr.rel (!%p10_p10) target bundleno = 3 (0x3), region = 208 }

</bundles_post_ra>
